<compile_context>
chip_gen: v7x
topology: tpu7x:2x2x1
jax: 0.10.0
libtpu: 0.0.40
codegen_flags: <defaults>
</compile_context>

<pallas_src>
import functools
from typing import NamedTuple

import numpy as np
import jax
import jax.numpy as jnp
from jax.experimental import pallas as pl
from jax.experimental.pallas import tpu as pltpu


MXU_DTYPE = jnp.bfloat16      # operand dtype of the 3x3 tap matmuls (f32 accum)


# ----------------------------------------------------------------------------
# Feature-map container: (N, h*layout_w, C) 2-D layout
# ----------------------------------------------------------------------------
class FMap(NamedTuple):
    """layout_w == w  : compact NHWC flattening.
       layout_w == w+2: padded-flat conv-output layout (cols [w, w+2) garbage)."""
    data: jax.Array
    h: int
    w: int
    layout_w: int


def fmap_from_nhwc(x):
    n, h, w, c = x.shape
    return FMap(x.reshape(n, h * w, c), h, w, w)


def fmap_pad_nhwc(x):
    """NHWC -> padded-flat layout (used as fused-multiply operand)."""
    n, h, w, c = x.shape
    xp = jnp.pad(x, ((0, 0), (0, 0), (0, 2), (0, 0)))
    return FMap(xp.reshape(n, h * (w + 2), c), h, w, w + 2)


# ----------------------------------------------------------------------------
# Host-side (numpy) interpolation / slab matrices
# ----------------------------------------------------------------------------
def _resize_matrix(n_in, n_out, align_corners):
    """1-D bilinear interpolation matrix M (n_out, n_in), PyTorch semantics."""
    m = np.zeros((n_out, n_in), np.float32)
    for i in range(n_out):
        if align_corners:
            src = 0.0 if n_out == 1 else i * (n_in - 1) / (n_out - 1)
        else:
            src = max((i + 0.5) * n_in / n_out - 0.5, 0.0)
        i0 = min(int(np.floor(src)), n_in - 1)
        i1 = min(i0 + 1, n_in - 1)
        f = src - i0
        m[i, i0] += 1.0 - f
        m[i, i1] += f
    return m


def _slab_matrix(src_h, src_w, src_layout_w, dst_h, dst_w, upsample):
    """A: (slab_rows, src_h*src_layout_w) with slab = A @ x_src the zero-padded
    (pad=1) conv input at (dst_h, dst_w), flattened as
    slab[yp*(dst_w+2)+xp, :] = padded(yp, xp), plus one extra all-zero pad row
    so every 3x3 tap reads a single contiguous row slice."""
    wp = dst_w + 2
    hs = dst_h + 3                      # top pad + bottom pad + tap-slice slack
    # source layout -> logical source grid (skips padded-layout garbage cols)
    sel = np.zeros((src_h * src_w, src_h * src_layout_w), np.float32)
    for y in range(src_h):
        for x in range(src_w):
            sel[y * src_w + x, y * src_layout_w + x] = 1.0
    # logical source grid -> logical destination grid (optional 2x bilinear)
    if upsample:
        assert dst_h == 2 * src_h and dst_w == 2 * src_w
        u = np.kron(_resize_matrix(src_h, dst_h, True),
                    _resize_matrix(src_w, dst_w, True))
    else:
        assert dst_h == src_h and dst_w == src_w
        u = np.eye(dst_h * dst_w, dtype=np.float32)
    # logical destination grid -> padded slab rows
    p = np.zeros((hs * wp, dst_h * dst_w), np.float32)
    for y in range(dst_h):
        for x in range(dst_w):
            p[(y + 1) * wp + (x + 1), y * dst_w + x] = 1.0
    return p @ u @ sel


# ----------------------------------------------------------------------------
# Fused ConvBR kernel: (upsample+pad) -> 3x3 conv (split-K) -> BN -> ReLU (*mul)
# ----------------------------------------------------------------------------
def _convbr_kernel(*refs, n_in, relu, fuse_mul, rows_out, wp):
    """refs = x[0..n-1], A[0..n-1], w[0..n-1], scale, bias, [mul], out

      x[i]   : (1, rows_in_i, Cin_i)    input feature map (compact or padded)
      A[i]   : (slab_rows_i, rows_in_i) fused upsample+pad+layout-select matrix
      w[i]   : (9, Cin_i, Cout)         HWIO taps flattened as dy*3+dx
      scale/bias : (1, Cout)            folded BatchNorm affine
      mul    : (1, rows_out, Cout)      optional fused elementwise multiplicand
      out    : (1, rows_out, Cout)      padded-flat layout
    """
    x_refs = refs[:n_in]
    a_refs = refs[n_in:2 * n_in]
    w_refs = refs[2 * n_in:3 * n_in]
    s_ref, b_ref = refs[3 * n_in], refs[3 * n_in + 1]
    m_ref = refs[3 * n_in + 2] if fuse_mul else None
    o_ref = refs[-1]

    acc = None
    for i in range(n_in):
        # upsample + zero-pad + layout-select as one small f32 matmul
        slab = jnp.dot(a_refs[i][...], x_refs[i][0],
                       preferred_element_type=jnp.float32)
        w_i = w_refs[i]
        for dy in range(3):
            for dx in range(3):
                off = dy * wp + dx                                 # static
                lhs = slab[off:off + rows_out, :].astype(MXU_DTYPE)
                p = jnp.dot(lhs, w_i[dy * 3 + dx],
                            preferred_element_type=jnp.float32)
                acc = p if acc is None else acc + p
    out = acc * s_ref[...] + b_ref[...]
    if relu:
        out = jnp.maximum(out, 0.0)
    if fuse_mul:
        out = out * m_ref[0]
    o_ref[0] = out


def conv3x3_bn_relu(layer, inputs, upsample_flags, out_hw, *, mul=None, relu=True):
    """Fused {2x bilinear upsample?} + 3x3 conv (pad=1, no bias) + BN + ReLU {*mul}.

    `inputs`: list of FMap, implicitly channel-concatenated (split-K over the
    weight's Cin axis).  `mul`: optional FMap in padded-flat layout at `out_hw`.
    Returns an FMap in padded-flat layout at `out_hw`.
    """
    w_full, scale, bias = layer
    h, w = out_hw
    wp = w + 2
    rows_out = h * wp
    cout = w_full.shape[-1]
    n = inputs[0].data.shape[0]
    cins = [fm.data.shape[-1] for fm in inputs]
    assert sum(cins) == w_full.shape[2]

    args, in_specs = [], []
    for fm in inputs:
        rows_in, ci = fm.data.shape[1], fm.data.shape[2]
        args.append(fm.data.astype(jnp.float32))
        in_specs.append(pl.BlockSpec((1, rows_in, ci), lambda b: (b, 0, 0)))
    for fm, up in zip(inputs, upsample_flags):
        a = _slab_matrix(fm.h, fm.w, fm.layout_w, h, w, up)
        args.append(jnp.asarray(a))
        in_specs.append(pl.BlockSpec(a.shape, lambda b: (0, 0)))
    c0 = 0
    for ci in cins:
        args.append(w_full[:, :, c0:c0 + ci, :]
                    .reshape(9, ci, cout).astype(MXU_DTYPE))
        in_specs.append(pl.BlockSpec((9, ci, cout), lambda b: (0, 0, 0)))
        c0 += ci
    args += [scale.astype(jnp.float32), bias.astype(jnp.float32)]
    in_specs += [pl.BlockSpec((1, cout), lambda b: (0, 0)),
                 pl.BlockSpec((1, cout), lambda b: (0, 0))]

    fuse_mul = mul is not None
    if fuse_mul:
        assert (mul.h, mul.w, mul.layout_w) == (h, w, wp)
        args.append(mul.data.astype(jnp.float32))
        in_specs.append(pl.BlockSpec((1, rows_out, cout), lambda b: (b, 0, 0)))

    kernel = functools.partial(_convbr_kernel, n_in=len(inputs), relu=relu,
                               fuse_mul=fuse_mul, rows_out=rows_out, wp=wp)
    out = pl.pallas_call(
        kernel,
        out_shape=jax.ShapeDtypeStruct((n, rows_out, cout), jnp.float32),
        grid=(n,),
        in_specs=in_specs,
        out_specs=pl.BlockSpec((1, rows_out, cout), lambda b: (b, 0, 0)),
        compiler_params=pltpu.CompilerParams(
            dimension_semantics=("parallel",)),
    )(*args)
    return FMap(out, h, w, wp)


# ----------------------------------------------------------------------------
# Fused head: conv5 (1x1, bias) + F.interpolate(scale=8, bilinear)
# ----------------------------------------------------------------------------
def _head_kernel(x_ref, kw_ref, mh_ref, b_ref, o_ref):
    # x: (1, H, Wl*C); kw: (Wl*C, 8W) = 1x1 conv folded into the width resize
    # (zero rows on the padded-layout garbage columns); mh: (8H, H) height
    # resize; b: (1,1) conv5 bias (bilinear preserves constants).
    z = jnp.dot(x_ref[0], kw_ref[...], preferred_element_type=jnp.float32)
    o_ref[0] = jnp.dot(mh_ref[...], z, preferred_element_type=jnp.float32) + b_ref[...]


def conv5_upsample8(pc, w5, b5):
    """conv5 (1x1, Cout=1, bias) + 8x bilinear upsample (align_corners=False)."""
    n, _, c = pc.data.shape
    h, w, wl = pc.h, pc.w, pc.layout_w
    hout, wout = 8 * h, 8 * w
    mh = jnp.asarray(_resize_matrix(h, hout, False))
    mw_t = np.zeros((wl, wout), np.float32)
    mw_t[:w, :] = _resize_matrix(w, wout, False).T         # zero on garbage cols
    # kw[x*C + ch, j] = Mw[j, x] * w5[ch]
    kw = (jnp.asarray(mw_t)[:, None, :] * w5.reshape(1, c, 1)).reshape(wl * c, wout)
    x = pc.data.reshape(n, h, wl * c)
    return pl.pallas_call(
        _head_kernel,
        out_shape=jax.ShapeDtypeStruct((n, hout, wout), jnp.float32),
        grid=(n,),
        in_specs=[pl.BlockSpec((1, h, wl * c), lambda b: (b, 0, 0)),
                  pl.BlockSpec((wl * c, wout), lambda b: (0, 0)),
                  pl.BlockSpec((hout, h), lambda b: (0, 0)),
                  pl.BlockSpec((1, 1), lambda b: (0, 0))],
        out_specs=pl.BlockSpec((1, hout, wout), lambda b: (b, 0, 0)),
        compiler_params=pltpu.CompilerParams(
            dimension_semantics=("parallel",)),
    )(x.astype(jnp.float32), kw.astype(jnp.float32), mh,
      b5.reshape(1, 1).astype(jnp.float32))


# ----------------------------------------------------------------------------
# Deterministic parameter init (matches the module's __init__; inference BN)
# ----------------------------------------------------------------------------
def _bn_scale_bias(cout, eps=1e-5):
    gamma = jnp.ones((cout,), jnp.float32)
    beta = jnp.zeros((cout,), jnp.float32)
    mean = jnp.zeros((cout,), jnp.float32)
    var = jnp.ones((cout,), jnp.float32)
    s = gamma / jnp.sqrt(var + eps)
    b = beta - mean * s
    return s.reshape(1, cout), b.reshape(1, cout)


def init_params(key, channel=32):
    specs = {
        "conv_upsample1": (channel, channel),
        "conv_upsample2": (channel, channel),
        "conv_upsample3": (channel, channel),
        "conv_upsample4": (channel, channel),
        "conv_upsample5": (2 * channel, 2 * channel),
        "conv_concat2": (2 * channel, 2 * channel),
        "conv_concat3": (3 * channel, 3 * channel),
        "conv4": (3 * channel, 3 * channel),
    }
    keys = jax.random.split(key, len(specs) + 2)
    params = {}
    for k_i, (name, (cin, cout)) in zip(keys[:len(specs)], specs.items()):
        # kaiming_normal_(a=1): std = sqrt(2 / ((1 + 1) * fan_in)) = 1/sqrt(9*cin)
        std = float(np.sqrt(1.0 / (cin * 3 * 3)))
        w = std * jax.random.normal(k_i, (3, 3, cin, cout), jnp.float32)   # HWIO
        s, b = _bn_scale_bias(cout)
        params[name] = (w, s, b)
    cin5 = 3 * channel                            # conv5 = Conv2d(3c, 1, 1) + bias
    bound = float(1.0 / np.sqrt(cin5))
    w5 = jax.random.uniform(keys[-2], (cin5, 1), jnp.float32, -bound, bound)
    b5 = jax.random.uniform(keys[-1], (1, 1), jnp.float32, -bound, bound)
    params["conv5"] = (w5, b5)
    return params


# ----------------------------------------------------------------------------
# NeighborConnectionDecoder forward
# ----------------------------------------------------------------------------
def ncd_forward(params, zt5, zt4, zt3):
    """Inputs/output are NCHW (PyTorch convention); output (B, 1, 8*H3, 8*W3)."""
    to_nhwc = lambda t: jnp.transpose(t, (0, 2, 3, 1)).astype(jnp.float32)
    zt5 = to_nhwc(zt5)     # deepest / smallest spatial
    zt4 = to_nhwc(zt4)
    zt3 = to_nhwc(zt3)     # shallowest / largest spatial
    h4, w4 = zt4.shape[1:3]
    h3, w3 = zt3.shape[1:3]

    f5 = fmap_from_nhwc(zt5)
    f4 = fmap_from_nhwc(zt4)
    m4 = fmap_pad_nhwc(zt4)          # fused-multiply operands (padded layout)
    m3 = fmap_pad_nhwc(zt3)

    def cbr(name, inputs, ups, out_hw, mul=None):
        return conv3x3_bn_relu(params[name], inputs, ups, out_hw, mul=mul)

    # zt4_1 = conv_upsample1(up(zt5)) * zt4                     (multiply fused)
    zt4_1 = cbr("conv_upsample1", [f5], [True], (h4, w4), mul=m4)
    # zt3_1 = conv_upsample2(up(zt4_1)) * conv_upsample3(up(zt4)) * zt3
    t = cbr("conv_upsample3", [f4], [True], (h3, w3), mul=m3)
    zt3_1 = cbr("conv_upsample2", [zt4_1], [True], (h3, w3), mul=t)
    # zt4_2 = conv_concat2(cat(zt4_1, conv_upsample4(up(zt5))))       (split-K)
    up4 = cbr("conv_upsample4", [f5], [True], (h4, w4))
    zt4_2 = cbr("conv_concat2", [zt4_1, up4], [False, False], (h4, w4))
    # zt3_2 = conv_concat3(cat(zt3_1, conv_upsample5(up(zt4_2))))     (split-K)
    up5 = cbr("conv_upsample5", [zt4_2], [True], (h3, w3))
    zt3_2 = cbr("conv_concat3", [zt3_1, up5], [False, False], (h3, w3))
    pc = cbr("conv4", [zt3_2], [False], (h3, w3))
    # conv5 (1x1 + bias) fused with F.interpolate(scale_factor=8, bilinear)
    w5, b5 = params["conv5"]
    res = conv5_upsample8(pc, w5, b5)             # (B, 8*H3, 8*W3)
    return res[:, None, :, :]                     # NCHW


# ----------------------------------------------------------------------------
if __name__ == "__main__":
    key = jax.random.PRNGKey(0)
    kp, k3, k4, k5 = jax.random.split(key, 4)

    channel = 32
    B = 2
    params = init_params(kp, channel=channel)

    # NCHW decoder inputs (dyadic spatial pyramid; zt5 is the deepest feature).
    zt3 = jax.random.normal(k3, (B, channel, 8, 8), jnp.float32)
    zt4 = jax.random.normal(k4, (B, channel, 4, 4), jnp.float32)
    zt5 = jax.random.normal(k5, (B, channel, 2, 2), jnp.float32)

    fwd = jax.jit(ncd_forward)
    out = fwd(params, zt5, zt4, zt3)
    jax.block_until_ready(out)

    assert out.shape == (B, 1, 64, 64), out.shape
    assert bool(jnp.all(jnp.isfinite(out)))
    print("KERNEL_OK")
</pallas_src>

<mosaic_0001>
module attributes {stable_mosaic.version = 11 : i64} {
  func.func @_convbr_kernel(%arg0: i32, %arg1: memref<1x4x32xf32, #tpu.memory_space<vmem>>, %arg2: memref<42x4xf32, #tpu.memory_space<vmem>>, %arg3: memref<9x32x32xbf16, #tpu.memory_space<vmem>>, %arg4: memref<1x32xf32, #tpu.memory_space<vmem>>, %arg5: memref<1x32xf32, #tpu.memory_space<vmem>>, %arg6: memref<1x24x32xf32, #tpu.memory_space<vmem>>, %arg7: memref<1x24x32xf32, #tpu.memory_space<vmem>>) attributes {dimension_semantics = [#tpu.dimension_semantics<parallel>], iteration_bounds = array<i64: 2>, scalar_prefetch = 0 : i64, scratch_operands = 0 : i64, tpu.core_type = #tpu.core_type<tc>, window_params = [{transform_indices = @transform_0, window_bounds = array<i64: 1, 4, 32>}, {pipeline_mode = #tpu.pipeline_mode<synchronous>, transform_indices = @transform_1, window_bounds = array<i64: 42, 4>}, {pipeline_mode = #tpu.pipeline_mode<synchronous>, transform_indices = @transform_2, window_bounds = array<i64: 9, 32, 32>}, {pipeline_mode = #tpu.pipeline_mode<synchronous>, transform_indices = @transform_3, window_bounds = array<i64: 1, 32>}, {pipeline_mode = #tpu.pipeline_mode<synchronous>, transform_indices = @transform_4, window_bounds = array<i64: 1, 32>}, {transform_indices = @transform_5, window_bounds = array<i64: 1, 24, 32>}, {transform_indices = @transform_6, window_bounds = array<i64: 1, 24, 32>}]} {
    %c0 = arith.constant 0 : index
    %c0_0 = arith.constant 0 : index
    %0 = vector.load %arg2[%c0, %c0_0] : memref<42x4xf32, #tpu.memory_space<vmem>>, vector<42x4xf32>
    %c0_1 = arith.constant 0 : index
    %c0_2 = arith.constant 0 : index
    %c0_3 = arith.constant 0 : index
    %1 = vector.load %arg1[%c0_1, %c0_2, %c0_3] : memref<1x4x32xf32, #tpu.memory_space<vmem>>, vector<1x4x32xf32>
    %2 = vector.shape_cast %1 : vector<1x4x32xf32> to vector<4x32xf32>
    %cst = arith.constant dense<0.000000e+00> : vector<42x32xf32>
    %3 = tpu.matmul %0, %2, %cst {dimension_numbers = #tpu.dot_dimension_numbers<[1], [0], [0], [1], [0, 0, 1, 1], [], []>} : vector<42x4xf32>, vector<4x32xf32>, vector<42x32xf32> -> vector<42x32xf32>
    %4 = vector.extract_strided_slice %3 {offsets = [0, 0], sizes = [24, 32], strides = [1, 1]} : vector<42x32xf32> to vector<24x32xf32>
    %5 = arith.truncf %4 : vector<24x32xf32> to vector<24x32xbf16>
    %c0_4 = arith.constant 0 : index
    %c0_5 = arith.constant 0 : index
    %c0_6 = arith.constant 0 : index
    %6 = vector.load %arg3[%c0_4, %c0_5, %c0_6] : memref<9x32x32xbf16, #tpu.memory_space<vmem>>, vector<1x32x32xbf16>
    %7 = vector.shape_cast %6 : vector<1x32x32xbf16> to vector<32x32xbf16>
    %cst_7 = arith.constant dense<0.000000e+00> : vector<24x32xf32>
    %8 = tpu.matmul %5, %7, %cst_7 {dimension_numbers = #tpu.dot_dimension_numbers<[1], [0], [0], [1], [0, 0, 1, 1], [], []>} : vector<24x32xbf16>, vector<32x32xbf16>, vector<24x32xf32> -> vector<24x32xf32>
    %9 = vector.extract_strided_slice %3 {offsets = [1, 0], sizes = [24, 32], strides = [1, 1]} : vector<42x32xf32> to vector<24x32xf32>
    %10 = arith.truncf %9 : vector<24x32xf32> to vector<24x32xbf16>
    %c1 = arith.constant 1 : index
    %c0_8 = arith.constant 0 : index
    %c0_9 = arith.constant 0 : index
    %11 = vector.load %arg3[%c1, %c0_8, %c0_9] : memref<9x32x32xbf16, #tpu.memory_space<vmem>>, vector<1x32x32xbf16>
    %12 = vector.shape_cast %11 : vector<1x32x32xbf16> to vector<32x32xbf16>
    %cst_10 = arith.constant dense<0.000000e+00> : vector<24x32xf32>
    %13 = tpu.matmul %10, %12, %cst_10 {dimension_numbers = #tpu.dot_dimension_numbers<[1], [0], [0], [1], [0, 0, 1, 1], [], []>} : vector<24x32xbf16>, vector<32x32xbf16>, vector<24x32xf32> -> vector<24x32xf32>
    %14 = arith.addf %8, %13 : vector<24x32xf32>
    %15 = vector.extract_strided_slice %3 {offsets = [2, 0], sizes = [24, 32], strides = [1, 1]} : vector<42x32xf32> to vector<24x32xf32>
    %16 = arith.truncf %15 : vector<24x32xf32> to vector<24x32xbf16>
    %c2 = arith.constant 2 : index
    %c0_11 = arith.constant 0 : index
    %c0_12 = arith.constant 0 : index
    %17 = vector.load %arg3[%c2, %c0_11, %c0_12] : memref<9x32x32xbf16, #tpu.memory_space<vmem>>, vector<1x32x32xbf16>
    %18 = vector.shape_cast %17 : vector<1x32x32xbf16> to vector<32x32xbf16>
    %cst_13 = arith.constant dense<0.000000e+00> : vector<24x32xf32>
    %19 = tpu.matmul %16, %18, %cst_13 {dimension_numbers = #tpu.dot_dimension_numbers<[1], [0], [0], [1], [0, 0, 1, 1], [], []>} : vector<24x32xbf16>, vector<32x32xbf16>, vector<24x32xf32> -> vector<24x32xf32>
    %20 = arith.addf %14, %19 : vector<24x32xf32>
    %21 = vector.extract_strided_slice %3 {offsets = [6, 0], sizes = [24, 32], strides = [1, 1]} : vector<42x32xf32> to vector<24x32xf32>
    %22 = arith.truncf %21 : vector<24x32xf32> to vector<24x32xbf16>
    %c3 = arith.constant 3 : index
    %c0_14 = arith.constant 0 : index
    %c0_15 = arith.constant 0 : index
    %23 = vector.load %arg3[%c3, %c0_14, %c0_15] : memref<9x32x32xbf16, #tpu.memory_space<vmem>>, vector<1x32x32xbf16>
    %24 = vector.shape_cast %23 : vector<1x32x32xbf16> to vector<32x32xbf16>
    %cst_16 = arith.constant dense<0.000000e+00> : vector<24x32xf32>
    %25 = tpu.matmul %22, %24, %cst_16 {dimension_numbers = #tpu.dot_dimension_numbers<[1], [0], [0], [1], [0, 0, 1, 1], [], []>} : vector<24x32xbf16>, vector<32x32xbf16>, vector<24x32xf32> -> vector<24x32xf32>
    %26 = arith.addf %20, %25 : vector<24x32xf32>
    %27 = vector.extract_strided_slice %3 {offsets = [7, 0], sizes = [24, 32], strides = [1, 1]} : vector<42x32xf32> to vector<24x32xf32>
    %28 = arith.truncf %27 : vector<24x32xf32> to vector<24x32xbf16>
    %c4 = arith.constant 4 : index
    %c0_17 = arith.constant 0 : index
    %c0_18 = arith.constant 0 : index
    %29 = vector.load %arg3[%c4, %c0_17, %c0_18] : memref<9x32x32xbf16, #tpu.memory_space<vmem>>, vector<1x32x32xbf16>
    %30 = vector.shape_cast %29 : vector<1x32x32xbf16> to vector<32x32xbf16>
    %cst_19 = arith.constant dense<0.000000e+00> : vector<24x32xf32>
    %31 = tpu.matmul %28, %30, %cst_19 {dimension_numbers = #tpu.dot_dimension_numbers<[1], [0], [0], [1], [0, 0, 1, 1], [], []>} : vector<24x32xbf16>, vector<32x32xbf16>, vector<24x32xf32> -> vector<24x32xf32>
    %32 = arith.addf %26, %31 : vector<24x32xf32>
    %33 = vector.extract_strided_slice %3 {offsets = [8, 0], sizes = [24, 32], strides = [1, 1]} : vector<42x32xf32> to vector<24x32xf32>
    %34 = arith.truncf %33 : vector<24x32xf32> to vector<24x32xbf16>
    %c5 = arith.constant 5 : index
    %c0_20 = arith.constant 0 : index
    %c0_21 = arith.constant 0 : index
    %35 = vector.load %arg3[%c5, %c0_20, %c0_21] : memref<9x32x32xbf16, #tpu.memory_space<vmem>>, vector<1x32x32xbf16>
    %36 = vector.shape_cast %35 : vector<1x32x32xbf16> to vector<32x32xbf16>
    %cst_22 = arith.constant dense<0.000000e+00> : vector<24x32xf32>
    %37 = tpu.matmul %34, %36, %cst_22 {dimension_numbers = #tpu.dot_dimension_numbers<[1], [0], [0], [1], [0, 0, 1, 1], [], []>} : vector<24x32xbf16>, vector<32x32xbf16>, vector<24x32xf32> -> vector<24x32xf32>
    %38 = arith.addf %32, %37 : vector<24x32xf32>
    %39 = vector.extract_strided_slice %3 {offsets = [12, 0], sizes = [24, 32], strides = [1, 1]} : vector<42x32xf32> to vector<24x32xf32>
    %40 = arith.truncf %39 : vector<24x32xf32> to vector<24x32xbf16>
    %c6 = arith.constant 6 : index
    %c0_23 = arith.constant 0 : index
    %c0_24 = arith.constant 0 : index
    %41 = vector.load %arg3[%c6, %c0_23, %c0_24] : memref<9x32x32xbf16, #tpu.memory_space<vmem>>, vector<1x32x32xbf16>
    %42 = vector.shape_cast %41 : vector<1x32x32xbf16> to vector<32x32xbf16>
    %cst_25 = arith.constant dense<0.000000e+00> : vector<24x32xf32>
    %43 = tpu.matmul %40, %42, %cst_25 {dimension_numbers = #tpu.dot_dimension_numbers<[1], [0], [0], [1], [0, 0, 1, 1], [], []>} : vector<24x32xbf16>, vector<32x32xbf16>, vector<24x32xf32> -> vector<24x32xf32>
    %44 = arith.addf %38, %43 : vector<24x32xf32>
    %45 = vector.extract_strided_slice %3 {offsets = [13, 0], sizes = [24, 32], strides = [1, 1]} : vector<42x32xf32> to vector<24x32xf32>
    %46 = arith.truncf %45 : vector<24x32xf32> to vector<24x32xbf16>
    %c7 = arith.constant 7 : index
    %c0_26 = arith.constant 0 : index
    %c0_27 = arith.constant 0 : index
    %47 = vector.load %arg3[%c7, %c0_26, %c0_27] : memref<9x32x32xbf16, #tpu.memory_space<vmem>>, vector<1x32x32xbf16>
    %48 = vector.shape_cast %47 : vector<1x32x32xbf16> to vector<32x32xbf16>
    %cst_28 = arith.constant dense<0.000000e+00> : vector<24x32xf32>
    %49 = tpu.matmul %46, %48, %cst_28 {dimension_numbers = #tpu.dot_dimension_numbers<[1], [0], [0], [1], [0, 0, 1, 1], [], []>} : vector<24x32xbf16>, vector<32x32xbf16>, vector<24x32xf32> -> vector<24x32xf32>
    %50 = arith.addf %44, %49 : vector<24x32xf32>
    %51 = vector.extract_strided_slice %3 {offsets = [14, 0], sizes = [24, 32], strides = [1, 1]} : vector<42x32xf32> to vector<24x32xf32>
    %52 = arith.truncf %51 : vector<24x32xf32> to vector<24x32xbf16>
    %c8 = arith.constant 8 : index
    %c0_29 = arith.constant 0 : index
    %c0_30 = arith.constant 0 : index
    %53 = vector.load %arg3[%c8, %c0_29, %c0_30] : memref<9x32x32xbf16, #tpu.memory_space<vmem>>, vector<1x32x32xbf16>
    %54 = vector.shape_cast %53 : vector<1x32x32xbf16> to vector<32x32xbf16>
    %cst_31 = arith.constant dense<0.000000e+00> : vector<24x32xf32>
    %55 = tpu.matmul %52, %54, %cst_31 {dimension_numbers = #tpu.dot_dimension_numbers<[1], [0], [0], [1], [0, 0, 1, 1], [], []>} : vector<24x32xbf16>, vector<32x32xbf16>, vector<24x32xf32> -> vector<24x32xf32>
    %56 = arith.addf %50, %55 : vector<24x32xf32>
    %c0_32 = arith.constant 0 : index
    %c0_33 = arith.constant 0 : index
    %57 = vector.load %arg4[%c0_32, %c0_33] : memref<1x32xf32, #tpu.memory_space<vmem>>, vector<1x32xf32>
    %58 = vector.broadcast %57 : vector<1x32xf32> to vector<24x32xf32>
    %59 = arith.mulf %56, %58 : vector<24x32xf32>
    %c0_34 = arith.constant 0 : index
    %c0_35 = arith.constant 0 : index
    %60 = vector.load %arg5[%c0_34, %c0_35] : memref<1x32xf32, #tpu.memory_space<vmem>>, vector<1x32xf32>
    %61 = vector.broadcast %60 : vector<1x32xf32> to vector<24x32xf32>
    %62 = arith.addf %59, %61 : vector<24x32xf32>
    %cst_36 = arith.constant 0.000000e+00 : f32
    %63 = vector.broadcast %cst_36 : f32 to vector<24x32xf32>
    %64 = arith.maximumf %62, %63 : vector<24x32xf32>
    %c0_37 = arith.constant 0 : index
    %c0_38 = arith.constant 0 : index
    %c0_39 = arith.constant 0 : index
    %65 = vector.load %arg6[%c0_37, %c0_38, %c0_39] : memref<1x24x32xf32, #tpu.memory_space<vmem>>, vector<1x24x32xf32>
    %66 = vector.shape_cast %65 : vector<1x24x32xf32> to vector<24x32xf32>
    %67 = arith.mulf %64, %66 : vector<24x32xf32>
    %c0_40 = arith.constant 0 : index
    %c0_41 = arith.constant 0 : index
    %c0_42 = arith.constant 0 : index
    %68 = vector.load %arg7[%c0_40, %c0_41, %c0_42] : memref<1x24x32xf32, #tpu.memory_space<vmem>>, vector<1x24x32xf32>
    %69 = vector.shape_cast %68 : vector<1x24x32xf32> to vector<24x32xf32>
    %70 = vector.shape_cast %67 : vector<24x32xf32> to vector<1x24x32xf32>
    tpu.vector_store %arg7[%c0_40, %c0_41, %c0_42], %70 {strides = array<i32>} : memref<1x24x32xf32, #tpu.memory_space<vmem>>, vector<1x24x32xf32>,
    return
  }
  func.func @transform_0(%arg0: i32) -> (i32, i32, i32) {
    %c0_i32 = arith.constant 0 : i32
    %c0_i32_0 = arith.constant 0 : i32
    %c0_i32_1 = arith.constant 0 : i32
    return %arg0, %c0_i32, %c0_i32_0 : i32, i32, i32
  }
  func.func @transform_1(%arg0: i32) -> (i32, i32) {
    %c0_i32 = arith.constant 0 : i32
    %c0_i32_0 = arith.constant 0 : i32
    %c0_i32_1 = arith.constant 0 : i32
    return %c0_i32, %c0_i32_0 : i32, i32
  }
  func.func @transform_2(%arg0: i32) -> (i32, i32, i32) {
    %c0_i32 = arith.constant 0 : i32
    %c0_i32_0 = arith.constant 0 : i32
    %c0_i32_1 = arith.constant 0 : i32
    %c0_i32_2 = arith.constant 0 : i32
    return %c0_i32, %c0_i32_0, %c0_i32_1 : i32, i32, i32
  }
  func.func @transform_3(%arg0: i32) -> (i32, i32) {
    %c0_i32 = arith.constant 0 : i32
    %c0_i32_0 = arith.constant 0 : i32
    %c0_i32_1 = arith.constant 0 : i32
    return %c0_i32, %c0_i32_0 : i32, i32
  }
  func.func @transform_4(%arg0: i32) -> (i32, i32) {
    %c0_i32 = arith.constant 0 : i32
    %c0_i32_0 = arith.constant 0 : i32
    %c0_i32_1 = arith.constant 0 : i32
    return %c0_i32, %c0_i32_0 : i32, i32
  }
  func.func @transform_5(%arg0: i32) -> (i32, i32, i32) {
    %c0_i32 = arith.constant 0 : i32
    %c0_i32_0 = arith.constant 0 : i32
    %c0_i32_1 = arith.constant 0 : i32
    return %arg0, %c0_i32, %c0_i32_0 : i32, i32, i32
  }
  func.func @transform_6(%arg0: i32) -> (i32, i32, i32) {
    %c0_i32 = arith.constant 0 : i32
    %c0_i32_0 = arith.constant 0 : i32
    %c0_i32_1 = arith.constant 0 : i32
    return %arg0, %c0_i32, %c0_i32_0 : i32, i32, i32
  }
}

module attributes {stable_mosaic.version = 11 : i64} {
  func.func @_convbr_kernel(%arg0: i32, %arg1: memref<1x4x32xf32, #tpu.memory_space<vmem>>, %arg2: memref<42x4xf32, #tpu.memory_space<vmem>>, %arg3: memref<9x32x32xbf16, #tpu.memory_space<vmem>>, %arg4: memref<1x32xf32, #tpu.memory_space<vmem>>, %arg5: memref<1x32xf32, #tpu.memory_space<vmem>>, %arg6: memref<1x24x32xf32, #tpu.memory_space<vmem>>) attributes {dimension_semantics = [#tpu.dimension_semantics<parallel>], iteration_bounds = array<i64: 2>, scalar_prefetch = 0 : i64, scratch_operands = 0 : i64, tpu.core_type = #tpu.core_type<tc>, window_params = [{transform_indices = @transform_0, window_bounds = array<i64: 1, 4, 32>}, {pipeline_mode = #tpu.pipeline_mode<synchronous>, transform_indices = @transform_1, window_bounds = array<i64: 42, 4>}, {pipeline_mode = #tpu.pipeline_mode<synchronous>, transform_indices = @transform_2, window_bounds = array<i64: 9, 32, 32>}, {pipeline_mode = #tpu.pipeline_mode<synchronous>, transform_indices = @transform_3, window_bounds = array<i64: 1, 32>}, {pipeline_mode = #tpu.pipeline_mode<synchronous>, transform_indices = @transform_4, window_bounds = array<i64: 1, 32>}, {transform_indices = @transform_5, window_bounds = array<i64: 1, 24, 32>}]} {
    %c0 = arith.constant 0 : index
    %c0_0 = arith.constant 0 : index
    %0 = vector.load %arg2[%c0, %c0_0] : memref<42x4xf32, #tpu.memory_space<vmem>>, vector<42x4xf32>
    %c0_1 = arith.constant 0 : index
    %c0_2 = arith.constant 0 : index
    %c0_3 = arith.constant 0 : index
    %1 = vector.load %arg1[%c0_1, %c0_2, %c0_3] : memref<1x4x32xf32, #tpu.memory_space<vmem>>, vector<1x4x32xf32>
    %2 = vector.shape_cast %1 : vector<1x4x32xf32> to vector<4x32xf32>
    %cst = arith.constant dense<0.000000e+00> : vector<42x32xf32>
    %3 = tpu.matmul %0, %2, %cst {dimension_numbers = #tpu.dot_dimension_numbers<[1], [0], [0], [1], [0, 0, 1, 1], [], []>} : vector<42x4xf32>, vector<4x32xf32>, vector<42x32xf32> -> vector<42x32xf32>
    %4 = vector.extract_strided_slice %3 {offsets = [0, 0], sizes = [24, 32], strides = [1, 1]} : vector<42x32xf32> to vector<24x32xf32>
    %5 = arith.truncf %4 : vector<24x32xf32> to vector<24x32xbf16>
    %c0_4 = arith.constant 0 : index
    %c0_5 = arith.constant 0 : index
    %c0_6 = arith.constant 0 : index
    %6 = vector.load %arg3[%c0_4, %c0_5, %c0_6] : memref<9x32x32xbf16, #tpu.memory_space<vmem>>, vector<1x32x32xbf16>
    %7 = vector.shape_cast %6 : vector<1x32x32xbf16> to vector<32x32xbf16>
    %cst_7 = arith.constant dense<0.000000e+00> : vector<24x32xf32>
    %8 = tpu.matmul %5, %7, %cst_7 {dimension_numbers = #tpu.dot_dimension_numbers<[1], [0], [0], [1], [0, 0, 1, 1], [], []>} : vector<24x32xbf16>, vector<32x32xbf16>, vector<24x32xf32> -> vector<24x32xf32>
    %9 = vector.extract_strided_slice %3 {offsets = [1, 0], sizes = [24, 32], strides = [1, 1]} : vector<42x32xf32> to vector<24x32xf32>
    %10 = arith.truncf %9 : vector<24x32xf32> to vector<24x32xbf16>
    %c1 = arith.constant 1 : index
    %c0_8 = arith.constant 0 : index
    %c0_9 = arith.constant 0 : index
    %11 = vector.load %arg3[%c1, %c0_8, %c0_9] : memref<9x32x32xbf16, #tpu.memory_space<vmem>>, vector<1x32x32xbf16>
    %12 = vector.shape_cast %11 : vector<1x32x32xbf16> to vector<32x32xbf16>
    %cst_10 = arith.constant dense<0.000000e+00> : vector<24x32xf32>
    %13 = tpu.matmul %10, %12, %cst_10 {dimension_numbers = #tpu.dot_dimension_numbers<[1], [0], [0], [1], [0, 0, 1, 1], [], []>} : vector<24x32xbf16>, vector<32x32xbf16>, vector<24x32xf32> -> vector<24x32xf32>
    %14 = arith.addf %8, %13 : vector<24x32xf32>
    %15 = vector.extract_strided_slice %3 {offsets = [2, 0], sizes = [24, 32], strides = [1, 1]} : vector<42x32xf32> to vector<24x32xf32>
    %16 = arith.truncf %15 : vector<24x32xf32> to vector<24x32xbf16>
    %c2 = arith.constant 2 : index
    %c0_11 = arith.constant 0 : index
    %c0_12 = arith.constant 0 : index
    %17 = vector.load %arg3[%c2, %c0_11, %c0_12] : memref<9x32x32xbf16, #tpu.memory_space<vmem>>, vector<1x32x32xbf16>
    %18 = vector.shape_cast %17 : vector<1x32x32xbf16> to vector<32x32xbf16>
    %cst_13 = arith.constant dense<0.000000e+00> : vector<24x32xf32>
    %19 = tpu.matmul %16, %18, %cst_13 {dimension_numbers = #tpu.dot_dimension_numbers<[1], [0], [0], [1], [0, 0, 1, 1], [], []>} : vector<24x32xbf16>, vector<32x32xbf16>, vector<24x32xf32> -> vector<24x32xf32>
    %20 = arith.addf %14, %19 : vector<24x32xf32>
    %21 = vector.extract_strided_slice %3 {offsets = [6, 0], sizes = [24, 32], strides = [1, 1]} : vector<42x32xf32> to vector<24x32xf32>
    %22 = arith.truncf %21 : vector<24x32xf32> to vector<24x32xbf16>
    %c3 = arith.constant 3 : index
    %c0_14 = arith.constant 0 : index
    %c0_15 = arith.constant 0 : index
    %23 = vector.load %arg3[%c3, %c0_14, %c0_15] : memref<9x32x32xbf16, #tpu.memory_space<vmem>>, vector<1x32x32xbf16>
    %24 = vector.shape_cast %23 : vector<1x32x32xbf16> to vector<32x32xbf16>
    %cst_16 = arith.constant dense<0.000000e+00> : vector<24x32xf32>
    %25 = tpu.matmul %22, %24, %cst_16 {dimension_numbers = #tpu.dot_dimension_numbers<[1], [0], [0], [1], [0, 0, 1, 1], [], []>} : vector<24x32xbf16>, vector<32x32xbf16>, vector<24x32xf32> -> vector<24x32xf32>
    %26 = arith.addf %20, %25 : vector<24x32xf32>
    %27 = vector.extract_strided_slice %3 {offsets = [7, 0], sizes = [24, 32], strides = [1, 1]} : vector<42x32xf32> to vector<24x32xf32>
    %28 = arith.truncf %27 : vector<24x32xf32> to vector<24x32xbf16>
    %c4 = arith.constant 4 : index
    %c0_17 = arith.constant 0 : index
    %c0_18 = arith.constant 0 : index
    %29 = vector.load %arg3[%c4, %c0_17, %c0_18] : memref<9x32x32xbf16, #tpu.memory_space<vmem>>, vector<1x32x32xbf16>
    %30 = vector.shape_cast %29 : vector<1x32x32xbf16> to vector<32x32xbf16>
    %cst_19 = arith.constant dense<0.000000e+00> : vector<24x32xf32>
    %31 = tpu.matmul %28, %30, %cst_19 {dimension_numbers = #tpu.dot_dimension_numbers<[1], [0], [0], [1], [0, 0, 1, 1], [], []>} : vector<24x32xbf16>, vector<32x32xbf16>, vector<24x32xf32> -> vector<24x32xf32>
    %32 = arith.addf %26, %31 : vector<24x32xf32>
    %33 = vector.extract_strided_slice %3 {offsets = [8, 0], sizes = [24, 32], strides = [1, 1]} : vector<42x32xf32> to vector<24x32xf32>
    %34 = arith.truncf %33 : vector<24x32xf32> to vector<24x32xbf16>
    %c5 = arith.constant 5 : index
    %c0_20 = arith.constant 0 : index
    %c0_21 = arith.constant 0 : index
    %35 = vector.load %arg3[%c5, %c0_20, %c0_21] : memref<9x32x32xbf16, #tpu.memory_space<vmem>>, vector<1x32x32xbf16>
    %36 = vector.shape_cast %35 : vector<1x32x32xbf16> to vector<32x32xbf16>
    %cst_22 = arith.constant dense<0.000000e+00> : vector<24x32xf32>
    %37 = tpu.matmul %34, %36, %cst_22 {dimension_numbers = #tpu.dot_dimension_numbers<[1], [0], [0], [1], [0, 0, 1, 1], [], []>} : vector<24x32xbf16>, vector<32x32xbf16>, vector<24x32xf32> -> vector<24x32xf32>
    %38 = arith.addf %32, %37 : vector<24x32xf32>
    %39 = vector.extract_strided_slice %3 {offsets = [12, 0], sizes = [24, 32], strides = [1, 1]} : vector<42x32xf32> to vector<24x32xf32>
    %40 = arith.truncf %39 : vector<24x32xf32> to vector<24x32xbf16>
    %c6 = arith.constant 6 : index
    %c0_23 = arith.constant 0 : index
    %c0_24 = arith.constant 0 : index
    %41 = vector.load %arg3[%c6, %c0_23, %c0_24] : memref<9x32x32xbf16, #tpu.memory_space<vmem>>, vector<1x32x32xbf16>
    %42 = vector.shape_cast %41 : vector<1x32x32xbf16> to vector<32x32xbf16>
    %cst_25 = arith.constant dense<0.000000e+00> : vector<24x32xf32>
    %43 = tpu.matmul %40, %42, %cst_25 {dimension_numbers = #tpu.dot_dimension_numbers<[1], [0], [0], [1], [0, 0, 1, 1], [], []>} : vector<24x32xbf16>, vector<32x32xbf16>, vector<24x32xf32> -> vector<24x32xf32>
    %44 = arith.addf %38, %43 : vector<24x32xf32>
    %45 = vector.extract_strided_slice %3 {offsets = [13, 0], sizes = [24, 32], strides = [1, 1]} : vector<42x32xf32> to vector<24x32xf32>
    %46 = arith.truncf %45 : vector<24x32xf32> to vector<24x32xbf16>
    %c7 = arith.constant 7 : index
    %c0_26 = arith.constant 0 : index
    %c0_27 = arith.constant 0 : index
    %47 = vector.load %arg3[%c7, %c0_26, %c0_27] : memref<9x32x32xbf16, #tpu.memory_space<vmem>>, vector<1x32x32xbf16>
    %48 = vector.shape_cast %47 : vector<1x32x32xbf16> to vector<32x32xbf16>
    %cst_28 = arith.constant dense<0.000000e+00> : vector<24x32xf32>
    %49 = tpu.matmul %46, %48, %cst_28 {dimension_numbers = #tpu.dot_dimension_numbers<[1], [0], [0], [1], [0, 0, 1, 1], [], []>} : vector<24x32xbf16>, vector<32x32xbf16>, vector<24x32xf32> -> vector<24x32xf32>
    %50 = arith.addf %44, %49 : vector<24x32xf32>
    %51 = vector.extract_strided_slice %3 {offsets = [14, 0], sizes = [24, 32], strides = [1, 1]} : vector<42x32xf32> to vector<24x32xf32>
    %52 = arith.truncf %51 : vector<24x32xf32> to vector<24x32xbf16>
    %c8 = arith.constant 8 : index
    %c0_29 = arith.constant 0 : index
    %c0_30 = arith.constant 0 : index
    %53 = vector.load %arg3[%c8, %c0_29, %c0_30] : memref<9x32x32xbf16, #tpu.memory_space<vmem>>, vector<1x32x32xbf16>
    %54 = vector.shape_cast %53 : vector<1x32x32xbf16> to vector<32x32xbf16>
    %cst_31 = arith.constant dense<0.000000e+00> : vector<24x32xf32>
    %55 = tpu.matmul %52, %54, %cst_31 {dimension_numbers = #tpu.dot_dimension_numbers<[1], [0], [0], [1], [0, 0, 1, 1], [], []>} : vector<24x32xbf16>, vector<32x32xbf16>, vector<24x32xf32> -> vector<24x32xf32>
    %56 = arith.addf %50, %55 : vector<24x32xf32>
    %c0_32 = arith.constant 0 : index
    %c0_33 = arith.constant 0 : index
    %57 = vector.load %arg4[%c0_32, %c0_33] : memref<1x32xf32, #tpu.memory_space<vmem>>, vector<1x32xf32>
    %58 = vector.broadcast %57 : vector<1x32xf32> to vector<24x32xf32>
    %59 = arith.mulf %56, %58 : vector<24x32xf32>
    %c0_34 = arith.constant 0 : index
    %c0_35 = arith.constant 0 : index
    %60 = vector.load %arg5[%c0_34, %c0_35] : memref<1x32xf32, #tpu.memory_space<vmem>>, vector<1x32xf32>
    %61 = vector.broadcast %60 : vector<1x32xf32> to vector<24x32xf32>
    %62 = arith.addf %59, %61 : vector<24x32xf32>
    %cst_36 = arith.constant 0.000000e+00 : f32
    %63 = vector.broadcast %cst_36 : f32 to vector<24x32xf32>
    %64 = arith.maximumf %62, %63 : vector<24x32xf32>
    %c0_37 = arith.constant 0 : index
    %c0_38 = arith.constant 0 : index
    %c0_39 = arith.constant 0 : index
    %65 = vector.load %arg6[%c0_37, %c0_38, %c0_39] : memref<1x24x32xf32, #tpu.memory_space<vmem>>, vector<1x24x32xf32>
    %66 = vector.shape_cast %65 : vector<1x24x32xf32> to vector<24x32xf32>
    %67 = vector.shape_cast %64 : vector<24x32xf32> to vector<1x24x32xf32>
    tpu.vector_store %arg6[%c0_37, %c0_38, %c0_39], %67 {strides = array<i32>} : memref<1x24x32xf32, #tpu.memory_space<vmem>>, vector<1x24x32xf32>,
    return
  }
  func.func @transform_0(%arg0: i32) -> (i32, i32, i32) {
    %c0_i32 = arith.constant 0 : i32
    %c0_i32_0 = arith.constant 0 : i32
    %c0_i32_1 = arith.constant 0 : i32
    return %arg0, %c0_i32, %c0_i32_0 : i32, i32, i32
  }
  func.func @transform_1(%arg0: i32) -> (i32, i32) {
    %c0_i32 = arith.constant 0 : i32
    %c0_i32_0 = arith.constant 0 : i32
    %c0_i32_1 = arith.constant 0 : i32
    return %c0_i32, %c0_i32_0 : i32, i32
  }
  func.func @transform_2(%arg0: i32) -> (i32, i32, i32) {
    %c0_i32 = arith.constant 0 : i32
    %c0_i32_0 = arith.constant 0 : i32
    %c0_i32_1 = arith.constant 0 : i32
    %c0_i32_2 = arith.constant 0 : i32
    return %c0_i32, %c0_i32_0, %c0_i32_1 : i32, i32, i32
  }
  func.func @transform_3(%arg0: i32) -> (i32, i32) {
    %c0_i32 = arith.constant 0 : i32
    %c0_i32_0 = arith.constant 0 : i32
    %c0_i32_1 = arith.constant 0 : i32
    return %c0_i32, %c0_i32_0 : i32, i32
  }
  func.func @transform_4(%arg0: i32) -> (i32, i32) {
    %c0_i32 = arith.constant 0 : i32
    %c0_i32_0 = arith.constant 0 : i32
    %c0_i32_1 = arith.constant 0 : i32
    return %c0_i32, %c0_i32_0 : i32, i32
  }
  func.func @transform_5(%arg0: i32) -> (i32, i32, i32) {
    %c0_i32 = arith.constant 0 : i32
    %c0_i32_0 = arith.constant 0 : i32
    %c0_i32_1 = arith.constant 0 : i32
    return %arg0, %c0_i32, %c0_i32_0 : i32, i32, i32
  }
}

module attributes {stable_mosaic.version = 11 : i64} {
  func.func @_convbr_kernel(%arg0: i32, %arg1: memref<1x24x64xf32, #tpu.memory_space<vmem>>, %arg2: memref<110x24xf32, #tpu.memory_space<vmem>>, %arg3: memref<9x64x64xbf16, #tpu.memory_space<vmem>>, %arg4: memref<1x64xf32, #tpu.memory_space<vmem>>, %arg5: memref<1x64xf32, #tpu.memory_space<vmem>>, %arg6: memref<1x80x64xf32, #tpu.memory_space<vmem>>) attributes {dimension_semantics = [#tpu.dimension_semantics<parallel>], iteration_bounds = array<i64: 2>, scalar_prefetch = 0 : i64, scratch_operands = 0 : i64, tpu.core_type = #tpu.core_type<tc>, window_params = [{transform_indices = @transform_0, window_bounds = array<i64: 1, 24, 64>}, {pipeline_mode = #tpu.pipeline_mode<synchronous>, transform_indices = @transform_1, window_bounds = array<i64: 110, 24>}, {pipeline_mode = #tpu.pipeline_mode<synchronous>, transform_indices = @transform_2, window_bounds = array<i64: 9, 64, 64>}, {pipeline_mode = #tpu.pipeline_mode<synchronous>, transform_indices = @transform_3, window_bounds = array<i64: 1, 64>}, {pipeline_mode = #tpu.pipeline_mode<synchronous>, transform_indices = @transform_4, window_bounds = array<i64: 1, 64>}, {transform_indices = @transform_5, window_bounds = array<i64: 1, 80, 64>}]} {
    %c0 = arith.constant 0 : index
    %c0_0 = arith.constant 0 : index
    %0 = vector.load %arg2[%c0, %c0_0] : memref<110x24xf32, #tpu.memory_space<vmem>>, vector<110x24xf32>
    %c0_1 = arith.constant 0 : index
    %c0_2 = arith.constant 0 : index
    %c0_3 = arith.constant 0 : index
    %1 = vector.load %arg1[%c0_1, %c0_2, %c0_3] : memref<1x24x64xf32, #tpu.memory_space<vmem>>, vector<1x24x64xf32>
    %2 = vector.shape_cast %1 : vector<1x24x64xf32> to vector<24x64xf32>
    %cst = arith.constant dense<0.000000e+00> : vector<110x64xf32>
    %3 = tpu.matmul %0, %2, %cst {dimension_numbers = #tpu.dot_dimension_numbers<[1], [0], [0], [1], [0, 0, 1, 1], [], []>} : vector<110x24xf32>, vector<24x64xf32>, vector<110x64xf32> -> vector<110x64xf32>
    %4 = vector.extract_strided_slice %3 {offsets = [0, 0], sizes = [80, 64], strides = [1, 1]} : vector<110x64xf32> to vector<80x64xf32>
    %5 = arith.truncf %4 : vector<80x64xf32> to vector<80x64xbf16>
    %c0_4 = arith.constant 0 : index
    %c0_5 = arith.constant 0 : index
    %c0_6 = arith.constant 0 : index
    %6 = vector.load %arg3[%c0_4, %c0_5, %c0_6] : memref<9x64x64xbf16, #tpu.memory_space<vmem>>, vector<1x64x64xbf16>
    %7 = vector.shape_cast %6 : vector<1x64x64xbf16> to vector<64x64xbf16>
    %cst_7 = arith.constant dense<0.000000e+00> : vector<80x64xf32>
    %8 = tpu.matmul %5, %7, %cst_7 {dimension_numbers = #tpu.dot_dimension_numbers<[1], [0], [0], [1], [0, 0, 1, 1], [], []>} : vector<80x64xbf16>, vector<64x64xbf16>, vector<80x64xf32> -> vector<80x64xf32>
    %9 = vector.extract_strided_slice %3 {offsets = [1, 0], sizes = [80, 64], strides = [1, 1]} : vector<110x64xf32> to vector<80x64xf32>
    %10 = arith.truncf %9 : vector<80x64xf32> to vector<80x64xbf16>
    %c1 = arith.constant 1 : index
    %c0_8 = arith.constant 0 : index
    %c0_9 = arith.constant 0 : index
    %11 = vector.load %arg3[%c1, %c0_8, %c0_9] : memref<9x64x64xbf16, #tpu.memory_space<vmem>>, vector<1x64x64xbf16>
    %12 = vector.shape_cast %11 : vector<1x64x64xbf16> to vector<64x64xbf16>
    %cst_10 = arith.constant dense<0.000000e+00> : vector<80x64xf32>
    %13 = tpu.matmul %10, %12, %cst_10 {dimension_numbers = #tpu.dot_dimension_numbers<[1], [0], [0], [1], [0, 0, 1, 1], [], []>} : vector<80x64xbf16>, vector<64x64xbf16>, vector<80x64xf32> -> vector<80x64xf32>
    %14 = arith.addf %8, %13 : vector<80x64xf32>
    %15 = vector.extract_strided_slice %3 {offsets = [2, 0], sizes = [80, 64], strides = [1, 1]} : vector<110x64xf32> to vector<80x64xf32>
    %16 = arith.truncf %15 : vector<80x64xf32> to vector<80x64xbf16>
    %c2 = arith.constant 2 : index
    %c0_11 = arith.constant 0 : index
    %c0_12 = arith.constant 0 : index
    %17 = vector.load %arg3[%c2, %c0_11, %c0_12] : memref<9x64x64xbf16, #tpu.memory_space<vmem>>, vector<1x64x64xbf16>
    %18 = vector.shape_cast %17 : vector<1x64x64xbf16> to vector<64x64xbf16>
    %cst_13 = arith.constant dense<0.000000e+00> : vector<80x64xf32>
    %19 = tpu.matmul %16, %18, %cst_13 {dimension_numbers = #tpu.dot_dimension_numbers<[1], [0], [0], [1], [0, 0, 1, 1], [], []>} : vector<80x64xbf16>, vector<64x64xbf16>, vector<80x64xf32> -> vector<80x64xf32>
    %20 = arith.addf %14, %19 : vector<80x64xf32>
    %21 = vector.extract_strided_slice %3 {offsets = [10, 0], sizes = [80, 64], strides = [1, 1]} : vector<110x64xf32> to vector<80x64xf32>
    %22 = arith.truncf %21 : vector<80x64xf32> to vector<80x64xbf16>
    %c3 = arith.constant 3 : index
    %c0_14 = arith.constant 0 : index
    %c0_15 = arith.constant 0 : index
    %23 = vector.load %arg3[%c3, %c0_14, %c0_15] : memref<9x64x64xbf16, #tpu.memory_space<vmem>>, vector<1x64x64xbf16>
    %24 = vector.shape_cast %23 : vector<1x64x64xbf16> to vector<64x64xbf16>
    %cst_16 = arith.constant dense<0.000000e+00> : vector<80x64xf32>
    %25 = tpu.matmul %22, %24, %cst_16 {dimension_numbers = #tpu.dot_dimension_numbers<[1], [0], [0], [1], [0, 0, 1, 1], [], []>} : vector<80x64xbf16>, vector<64x64xbf16>, vector<80x64xf32> -> vector<80x64xf32>
    %26 = arith.addf %20, %25 : vector<80x64xf32>
    %27 = vector.extract_strided_slice %3 {offsets = [11, 0], sizes = [80, 64], strides = [1, 1]} : vector<110x64xf32> to vector<80x64xf32>
    %28 = arith.truncf %27 : vector<80x64xf32> to vector<80x64xbf16>
    %c4 = arith.constant 4 : index
    %c0_17 = arith.constant 0 : index
    %c0_18 = arith.constant 0 : index
    %29 = vector.load %arg3[%c4, %c0_17, %c0_18] : memref<9x64x64xbf16, #tpu.memory_space<vmem>>, vector<1x64x64xbf16>
    %30 = vector.shape_cast %29 : vector<1x64x64xbf16> to vector<64x64xbf16>
    %cst_19 = arith.constant dense<0.000000e+00> : vector<80x64xf32>
    %31 = tpu.matmul %28, %30, %cst_19 {dimension_numbers = #tpu.dot_dimension_numbers<[1], [0], [0], [1], [0, 0, 1, 1], [], []>} : vector<80x64xbf16>, vector<64x64xbf16>, vector<80x64xf32> -> vector<80x64xf32>
    %32 = arith.addf %26, %31 : vector<80x64xf32>
    %33 = vector.extract_strided_slice %3 {offsets = [12, 0], sizes = [80, 64], strides = [1, 1]} : vector<110x64xf32> to vector<80x64xf32>
    %34 = arith.truncf %33 : vector<80x64xf32> to vector<80x64xbf16>
    %c5 = arith.constant 5 : index
    %c0_20 = arith.constant 0 : index
    %c0_21 = arith.constant 0 : index
    %35 = vector.load %arg3[%c5, %c0_20, %c0_21] : memref<9x64x64xbf16, #tpu.memory_space<vmem>>, vector<1x64x64xbf16>
    %36 = vector.shape_cast %35 : vector<1x64x64xbf16> to vector<64x64xbf16>
    %cst_22 = arith.constant dense<0.000000e+00> : vector<80x64xf32>
    %37 = tpu.matmul %34, %36, %cst_22 {dimension_numbers = #tpu.dot_dimension_numbers<[1], [0], [0], [1], [0, 0, 1, 1], [], []>} : vector<80x64xbf16>, vector<64x64xbf16>, vector<80x64xf32> -> vector<80x64xf32>
    %38 = arith.addf %32, %37 : vector<80x64xf32>
    %39 = vector.extract_strided_slice %3 {offsets = [20, 0], sizes = [80, 64], strides = [1, 1]} : vector<110x64xf32> to vector<80x64xf32>
    %40 = arith.truncf %39 : vector<80x64xf32> to vector<80x64xbf16>
    %c6 = arith.constant 6 : index
    %c0_23 = arith.constant 0 : index
    %c0_24 = arith.constant 0 : index
    %41 = vector.load %arg3[%c6, %c0_23, %c0_24] : memref<9x64x64xbf16, #tpu.memory_space<vmem>>, vector<1x64x64xbf16>
    %42 = vector.shape_cast %41 : vector<1x64x64xbf16> to vector<64x64xbf16>
    %cst_25 = arith.constant dense<0.000000e+00> : vector<80x64xf32>
    %43 = tpu.matmul %40, %42, %cst_25 {dimension_numbers = #tpu.dot_dimension_numbers<[1], [0], [0], [1], [0, 0, 1, 1], [], []>} : vector<80x64xbf16>, vector<64x64xbf16>, vector<80x64xf32> -> vector<80x64xf32>
    %44 = arith.addf %38, %43 : vector<80x64xf32>
    %45 = vector.extract_strided_slice %3 {offsets = [21, 0], sizes = [80, 64], strides = [1, 1]} : vector<110x64xf32> to vector<80x64xf32>
    %46 = arith.truncf %45 : vector<80x64xf32> to vector<80x64xbf16>
    %c7 = arith.constant 7 : index
    %c0_26 = arith.constant 0 : index
    %c0_27 = arith.constant 0 : index
    %47 = vector.load %arg3[%c7, %c0_26, %c0_27] : memref<9x64x64xbf16, #tpu.memory_space<vmem>>, vector<1x64x64xbf16>
    %48 = vector.shape_cast %47 : vector<1x64x64xbf16> to vector<64x64xbf16>
    %cst_28 = arith.constant dense<0.000000e+00> : vector<80x64xf32>
    %49 = tpu.matmul %46, %48, %cst_28 {dimension_numbers = #tpu.dot_dimension_numbers<[1], [0], [0], [1], [0, 0, 1, 1], [], []>} : vector<80x64xbf16>, vector<64x64xbf16>, vector<80x64xf32> -> vector<80x64xf32>
    %50 = arith.addf %44, %49 : vector<80x64xf32>
    %51 = vector.extract_strided_slice %3 {offsets = [22, 0], sizes = [80, 64], strides = [1, 1]} : vector<110x64xf32> to vector<80x64xf32>
    %52 = arith.truncf %51 : vector<80x64xf32> to vector<80x64xbf16>
    %c8 = arith.constant 8 : index
    %c0_29 = arith.constant 0 : index
    %c0_30 = arith.constant 0 : index
    %53 = vector.load %arg3[%c8, %c0_29, %c0_30] : memref<9x64x64xbf16, #tpu.memory_space<vmem>>, vector<1x64x64xbf16>
    %54 = vector.shape_cast %53 : vector<1x64x64xbf16> to vector<64x64xbf16>
    %cst_31 = arith.constant dense<0.000000e+00> : vector<80x64xf32>
    %55 = tpu.matmul %52, %54, %cst_31 {dimension_numbers = #tpu.dot_dimension_numbers<[1], [0], [0], [1], [0, 0, 1, 1], [], []>} : vector<80x64xbf16>, vector<64x64xbf16>, vector<80x64xf32> -> vector<80x64xf32>
    %56 = arith.addf %50, %55 : vector<80x64xf32>
    %c0_32 = arith.constant 0 : index
    %c0_33 = arith.constant 0 : index
    %57 = vector.load %arg4[%c0_32, %c0_33] : memref<1x64xf32, #tpu.memory_space<vmem>>, vector<1x64xf32>
    %58 = vector.broadcast %57 : vector<1x64xf32> to vector<80x64xf32>
    %59 = arith.mulf %56, %58 : vector<80x64xf32>
    %c0_34 = arith.constant 0 : index
    %c0_35 = arith.constant 0 : index
    %60 = vector.load %arg5[%c0_34, %c0_35] : memref<1x64xf32, #tpu.memory_space<vmem>>, vector<1x64xf32>
    %61 = vector.broadcast %60 : vector<1x64xf32> to vector<80x64xf32>
    %62 = arith.addf %59, %61 : vector<80x64xf32>
    %cst_36 = arith.constant 0.000000e+00 : f32
    %63 = vector.broadcast %cst_36 : f32 to vector<80x64xf32>
    %64 = arith.maximumf %62, %63 : vector<80x64xf32>
    %c0_37 = arith.constant 0 : index
    %c0_38 = arith.constant 0 : index
    %c0_39 = arith.constant 0 : index
    %65 = vector.load %arg6[%c0_37, %c0_38, %c0_39] : memref<1x80x64xf32, #tpu.memory_space<vmem>>, vector<1x80x64xf32>
    %66 = vector.shape_cast %65 : vector<1x80x64xf32> to vector<80x64xf32>
    %67 = vector.shape_cast %64 : vector<80x64xf32> to vector<1x80x64xf32>
    tpu.vector_store %arg6[%c0_37, %c0_38, %c0_39], %67 {strides = array<i32>} : memref<1x80x64xf32, #tpu.memory_space<vmem>>, vector<1x80x64xf32>,
    return
  }
  func.func @transform_0(%arg0: i32) -> (i32, i32, i32) {
    %c0_i32 = arith.constant 0 : i32
    %c0_i32_0 = arith.constant 0 : i32
    %c0_i32_1 = arith.constant 0 : i32
    return %arg0, %c0_i32, %c0_i32_0 : i32, i32, i32
  }
  func.func @transform_1(%arg0: i32) -> (i32, i32) {
    %c0_i32 = arith.constant 0 : i32
    %c0_i32_0 = arith.constant 0 : i32
    %c0_i32_1 = arith.constant 0 : i32
    return %c0_i32, %c0_i32_0 : i32, i32
  }
  func.func @transform_2(%arg0: i32) -> (i32, i32, i32) {
    %c0_i32 = arith.constant 0 : i32
    %c0_i32_0 = arith.constant 0 : i32
    %c0_i32_1 = arith.constant 0 : i32
    %c0_i32_2 = arith.constant 0 : i32
    return %c0_i32, %c0_i32_0, %c0_i32_1 : i32, i32, i32
  }
  func.func @transform_3(%arg0: i32) -> (i32, i32) {
    %c0_i32 = arith.constant 0 : i32
    %c0_i32_0 = arith.constant 0 : i32
    %c0_i32_1 = arith.constant 0 : i32
    return %c0_i32, %c0_i32_0 : i32, i32
  }
  func.func @transform_4(%arg0: i32) -> (i32, i32) {
    %c0_i32 = arith.constant 0 : i32
    %c0_i32_0 = arith.constant 0 : i32
    %c0_i32_1 = arith.constant 0 : i32
    return %c0_i32, %c0_i32_0 : i32, i32
  }
  func.func @transform_5(%arg0: i32) -> (i32, i32, i32) {
    %c0_i32 = arith.constant 0 : i32
    %c0_i32_0 = arith.constant 0 : i32
    %c0_i32_1 = arith.constant 0 : i32
    return %arg0, %c0_i32, %c0_i32_0 : i32, i32, i32
  }
}

module attributes {stable_mosaic.version = 11 : i64} {
  func.func @_convbr_kernel(%arg0: i32, %arg1: memref<1x24x32xf32, #tpu.memory_space<vmem>>, %arg2: memref<1x24x32xf32, #tpu.memory_space<vmem>>, %arg3: memref<42x24xf32, #tpu.memory_space<vmem>>, %arg4: memref<42x24xf32, #tpu.memory_space<vmem>>, %arg5: memref<9x32x64xbf16, #tpu.memory_space<vmem>>, %arg6: memref<9x32x64xbf16, #tpu.memory_space<vmem>>, %arg7: memref<1x64xf32, #tpu.memory_space<vmem>>, %arg8: memref<1x64xf32, #tpu.memory_space<vmem>>, %arg9: memref<1x24x64xf32, #tpu.memory_space<vmem>>) attributes {dimension_semantics = [#tpu.dimension_semantics<parallel>], iteration_bounds = array<i64: 2>, scalar_prefetch = 0 : i64, scratch_operands = 0 : i64, tpu.core_type = #tpu.core_type<tc>, window_params = [{transform_indices = @transform_0, window_bounds = array<i64: 1, 24, 32>}, {transform_indices = @transform_1, window_bounds = array<i64: 1, 24, 32>}, {pipeline_mode = #tpu.pipeline_mode<synchronous>, transform_indices = @transform_2, window_bounds = array<i64: 42, 24>}, {pipeline_mode = #tpu.pipeline_mode<synchronous>, transform_indices = @transform_3, window_bounds = array<i64: 42, 24>}, {pipeline_mode = #tpu.pipeline_mode<synchronous>, transform_indices = @transform_4, window_bounds = array<i64: 9, 32, 64>}, {pipeline_mode = #tpu.pipeline_mode<synchronous>, transform_indices = @transform_5, window_bounds = array<i64: 9, 32, 64>}, {pipeline_mode = #tpu.pipeline_mode<synchronous>, transform_indices = @transform_6, window_bounds = array<i64: 1, 64>}, {pipeline_mode = #tpu.pipeline_mode<synchronous>, transform_indices = @transform_7, window_bounds = array<i64: 1, 64>}, {transform_indices = @transform_8, window_bounds = array<i64: 1, 24, 64>}]} {
    %c0 = arith.constant 0 : index
    %c0_0 = arith.constant 0 : index
    %0 = vector.load %arg3[%c0, %c0_0] : memref<42x24xf32, #tpu.memory_space<vmem>>, vector<42x24xf32>
    %c0_1 = arith.constant 0 : index
    %c0_2 = arith.constant 0 : index
    %c0_3 = arith.constant 0 : index
    %1 = vector.load %arg1[%c0_1, %c0_2, %c0_3] : memref<1x24x32xf32, #tpu.memory_space<vmem>>, vector<1x24x32xf32>
    %2 = vector.shape_cast %1 : vector<1x24x32xf32> to vector<24x32xf32>
    %cst = arith.constant dense<0.000000e+00> : vector<42x32xf32>
    %3 = tpu.matmul %0, %2, %cst {dimension_numbers = #tpu.dot_dimension_numbers<[1], [0], [0], [1], [0, 0, 1, 1], [], []>} : vector<42x24xf32>, vector<24x32xf32>, vector<42x32xf32> -> vector<42x32xf32>
    %4 = vector.extract_strided_slice %3 {offsets = [0, 0], sizes = [24, 32], strides = [1, 1]} : vector<42x32xf32> to vector<24x32xf32>
    %5 = arith.truncf %4 : vector<24x32xf32> to vector<24x32xbf16>
    %c0_4 = arith.constant 0 : index
    %c0_5 = arith.constant 0 : index
    %c0_6 = arith.constant 0 : index
    %6 = vector.load %arg5[%c0_4, %c0_5, %c0_6] : memref<9x32x64xbf16, #tpu.memory_space<vmem>>, vector<1x32x64xbf16>
    %7 = vector.shape_cast %6 : vector<1x32x64xbf16> to vector<32x64xbf16>
    %cst_7 = arith.constant dense<0.000000e+00> : vector<24x64xf32>
    %8 = tpu.matmul %5, %7, %cst_7 {dimension_numbers = #tpu.dot_dimension_numbers<[1], [0], [0], [1], [0, 0, 1, 1], [], []>} : vector<24x32xbf16>, vector<32x64xbf16>, vector<24x64xf32> -> vector<24x64xf32>
    %9 = vector.extract_strided_slice %3 {offsets = [1, 0], sizes = [24, 32], strides = [1, 1]} : vector<42x32xf32> to vector<24x32xf32>
    %10 = arith.truncf %9 : vector<24x32xf32> to vector<24x32xbf16>
    %c1 = arith.constant 1 : index
    %c0_8 = arith.constant 0 : index
    %c0_9 = arith.constant 0 : index
    %11 = vector.load %arg5[%c1, %c0_8, %c0_9] : memref<9x32x64xbf16, #tpu.memory_space<vmem>>, vector<1x32x64xbf16>
    %12 = vector.shape_cast %11 : vector<1x32x64xbf16> to vector<32x64xbf16>
    %cst_10 = arith.constant dense<0.000000e+00> : vector<24x64xf32>
    %13 = tpu.matmul %10, %12, %cst_10 {dimension_numbers = #tpu.dot_dimension_numbers<[1], [0], [0], [1], [0, 0, 1, 1], [], []>} : vector<24x32xbf16>, vector<32x64xbf16>, vector<24x64xf32> -> vector<24x64xf32>
    %14 = arith.addf %8, %13 : vector<24x64xf32>
    %15 = vector.extract_strided_slice %3 {offsets = [2, 0], sizes = [24, 32], strides = [1, 1]} : vector<42x32xf32> to vector<24x32xf32>
    %16 = arith.truncf %15 : vector<24x32xf32> to vector<24x32xbf16>
    %c2 = arith.constant 2 : index
    %c0_11 = arith.constant 0 : index
    %c0_12 = arith.constant 0 : index
    %17 = vector.load %arg5[%c2, %c0_11, %c0_12] : memref<9x32x64xbf16, #tpu.memory_space<vmem>>, vector<1x32x64xbf16>
    %18 = vector.shape_cast %17 : vector<1x32x64xbf16> to vector<32x64xbf16>
    %cst_13 = arith.constant dense<0.000000e+00> : vector<24x64xf32>
    %19 = tpu.matmul %16, %18, %cst_13 {dimension_numbers = #tpu.dot_dimension_numbers<[1], [0], [0], [1], [0, 0, 1, 1], [], []>} : vector<24x32xbf16>, vector<32x64xbf16>, vector<24x64xf32> -> vector<24x64xf32>
    %20 = arith.addf %14, %19 : vector<24x64xf32>
    %21 = vector.extract_strided_slice %3 {offsets = [6, 0], sizes = [24, 32], strides = [1, 1]} : vector<42x32xf32> to vector<24x32xf32>
    %22 = arith.truncf %21 : vector<24x32xf32> to vector<24x32xbf16>
    %c3 = arith.constant 3 : index
    %c0_14 = arith.constant 0 : index
    %c0_15 = arith.constant 0 : index
    %23 = vector.load %arg5[%c3, %c0_14, %c0_15] : memref<9x32x64xbf16, #tpu.memory_space<vmem>>, vector<1x32x64xbf16>
    %24 = vector.shape_cast %23 : vector<1x32x64xbf16> to vector<32x64xbf16>
    %cst_16 = arith.constant dense<0.000000e+00> : vector<24x64xf32>
    %25 = tpu.matmul %22, %24, %cst_16 {dimension_numbers = #tpu.dot_dimension_numbers<[1], [0], [0], [1], [0, 0, 1, 1], [], []>} : vector<24x32xbf16>, vector<32x64xbf16>, vector<24x64xf32> -> vector<24x64xf32>
    %26 = arith.addf %20, %25 : vector<24x64xf32>
    %27 = vector.extract_strided_slice %3 {offsets = [7, 0], sizes = [24, 32], strides = [1, 1]} : vector<42x32xf32> to vector<24x32xf32>
    %28 = arith.truncf %27 : vector<24x32xf32> to vector<24x32xbf16>
    %c4 = arith.constant 4 : index
    %c0_17 = arith.constant 0 : index
    %c0_18 = arith.constant 0 : index
    %29 = vector.load %arg5[%c4, %c0_17, %c0_18] : memref<9x32x64xbf16, #tpu.memory_space<vmem>>, vector<1x32x64xbf16>
    %30 = vector.shape_cast %29 : vector<1x32x64xbf16> to vector<32x64xbf16>
    %cst_19 = arith.constant dense<0.000000e+00> : vector<24x64xf32>
    %31 = tpu.matmul %28, %30, %cst_19 {dimension_numbers = #tpu.dot_dimension_numbers<[1], [0], [0], [1], [0, 0, 1, 1], [], []>} : vector<24x32xbf16>, vector<32x64xbf16>, vector<24x64xf32> -> vector<24x64xf32>
    %32 = arith.addf %26, %31 : vector<24x64xf32>
    %33 = vector.extract_strided_slice %3 {offsets = [8, 0], sizes = [24, 32], strides = [1, 1]} : vector<42x32xf32> to vector<24x32xf32>
    %34 = arith.truncf %33 : vector<24x32xf32> to vector<24x32xbf16>
    %c5 = arith.constant 5 : index
    %c0_20 = arith.constant 0 : index
    %c0_21 = arith.constant 0 : index
    %35 = vector.load %arg5[%c5, %c0_20, %c0_21] : memref<9x32x64xbf16, #tpu.memory_space<vmem>>, vector<1x32x64xbf16>
    %36 = vector.shape_cast %35 : vector<1x32x64xbf16> to vector<32x64xbf16>
    %cst_22 = arith.constant dense<0.000000e+00> : vector<24x64xf32>
    %37 = tpu.matmul %34, %36, %cst_22 {dimension_numbers = #tpu.dot_dimension_numbers<[1], [0], [0], [1], [0, 0, 1, 1], [], []>} : vector<24x32xbf16>, vector<32x64xbf16>, vector<24x64xf32> -> vector<24x64xf32>
    %38 = arith.addf %32, %37 : vector<24x64xf32>
    %39 = vector.extract_strided_slice %3 {offsets = [12, 0], sizes = [24, 32], strides = [1, 1]} : vector<42x32xf32> to vector<24x32xf32>
    %40 = arith.truncf %39 : vector<24x32xf32> to vector<24x32xbf16>
    %c6 = arith.constant 6 : index
    %c0_23 = arith.constant 0 : index
    %c0_24 = arith.constant 0 : index
    %41 = vector.load %arg5[%c6, %c0_23, %c0_24] : memref<9x32x64xbf16, #tpu.memory_space<vmem>>, vector<1x32x64xbf16>
    %42 = vector.shape_cast %41 : vector<1x32x64xbf16> to vector<32x64xbf16>
    %cst_25 = arith.constant dense<0.000000e+00> : vector<24x64xf32>
    %43 = tpu.matmul %40, %42, %cst_25 {dimension_numbers = #tpu.dot_dimension_numbers<[1], [0], [0], [1], [0, 0, 1, 1], [], []>} : vector<24x32xbf16>, vector<32x64xbf16>, vector<24x64xf32> -> vector<24x64xf32>
    %44 = arith.addf %38, %43 : vector<24x64xf32>
    %45 = vector.extract_strided_slice %3 {offsets = [13, 0], sizes = [24, 32], strides = [1, 1]} : vector<42x32xf32> to vector<24x32xf32>
    %46 = arith.truncf %45 : vector<24x32xf32> to vector<24x32xbf16>
    %c7 = arith.constant 7 : index
    %c0_26 = arith.constant 0 : index
    %c0_27 = arith.constant 0 : index
    %47 = vector.load %arg5[%c7, %c0_26, %c0_27] : memref<9x32x64xbf16, #tpu.memory_space<vmem>>, vector<1x32x64xbf16>
    %48 = vector.shape_cast %47 : vector<1x32x64xbf16> to vector<32x64xbf16>
    %cst_28 = arith.constant dense<0.000000e+00> : vector<24x64xf32>
    %49 = tpu.matmul %46, %48, %cst_28 {dimension_numbers = #tpu.dot_dimension_numbers<[1], [0], [0], [1], [0, 0, 1, 1], [], []>} : vector<24x32xbf16>, vector<32x64xbf16>, vector<24x64xf32> -> vector<24x64xf32>
    %50 = arith.addf %44, %49 : vector<24x64xf32>
    %51 = vector.extract_strided_slice %3 {offsets = [14, 0], sizes = [24, 32], strides = [1, 1]} : vector<42x32xf32> to vector<24x32xf32>
    %52 = arith.truncf %51 : vector<24x32xf32> to vector<24x32xbf16>
    %c8 = arith.constant 8 : index
    %c0_29 = arith.constant 0 : index
    %c0_30 = arith.constant 0 : index
    %53 = vector.load %arg5[%c8, %c0_29, %c0_30] : memref<9x32x64xbf16, #tpu.memory_space<vmem>>, vector<1x32x64xbf16>
    %54 = vector.shape_cast %53 : vector<1x32x64xbf16> to vector<32x64xbf16>
    %cst_31 = arith.constant dense<0.000000e+00> : vector<24x64xf32>
    %55 = tpu.matmul %52, %54, %cst_31 {dimension_numbers = #tpu.dot_dimension_numbers<[1], [0], [0], [1], [0, 0, 1, 1], [], []>} : vector<24x32xbf16>, vector<32x64xbf16>, vector<24x64xf32> -> vector<24x64xf32>
    %56 = arith.addf %50, %55 : vector<24x64xf32>
    %c0_32 = arith.constant 0 : index
    %c0_33 = arith.constant 0 : index
    %57 = vector.load %arg4[%c0_32, %c0_33] : memref<42x24xf32, #tpu.memory_space<vmem>>, vector<42x24xf32>
    %c0_34 = arith.constant 0 : index
    %c0_35 = arith.constant 0 : index
    %c0_36 = arith.constant 0 : index
    %58 = vector.load %arg2[%c0_34, %c0_35, %c0_36] : memref<1x24x32xf32, #tpu.memory_space<vmem>>, vector<1x24x32xf32>
    %59 = vector.shape_cast %58 : vector<1x24x32xf32> to vector<24x32xf32>
    %cst_37 = arith.constant dense<0.000000e+00> : vector<42x32xf32>
    %60 = tpu.matmul %57, %59, %cst_37 {dimension_numbers = #tpu.dot_dimension_numbers<[1], [0], [0], [1], [0, 0, 1, 1], [], []>} : vector<42x24xf32>, vector<24x32xf32>, vector<42x32xf32> -> vector<42x32xf32>
    %61 = vector.extract_strided_slice %60 {offsets = [0, 0], sizes = [24, 32], strides = [1, 1]} : vector<42x32xf32> to vector<24x32xf32>
    %62 = arith.truncf %61 : vector<24x32xf32> to vector<24x32xbf16>
    %c0_38 = arith.constant 0 : index
    %c0_39 = arith.constant 0 : index
    %c0_40 = arith.constant 0 : index
    %63 = vector.load %arg6[%c0_38, %c0_39, %c0_40] : memref<9x32x64xbf16, #tpu.memory_space<vmem>>, vector<1x32x64xbf16>
    %64 = vector.shape_cast %63 : vector<1x32x64xbf16> to vector<32x64xbf16>
    %cst_41 = arith.constant dense<0.000000e+00> : vector<24x64xf32>
    %65 = tpu.matmul %62, %64, %cst_41 {dimension_numbers = #tpu.dot_dimension_numbers<[1], [0], [0], [1], [0, 0, 1, 1], [], []>} : vector<24x32xbf16>, vector<32x64xbf16>, vector<24x64xf32> -> vector<24x64xf32>
    %66 = arith.addf %56, %65 : vector<24x64xf32>
    %67 = vector.extract_strided_slice %60 {offsets = [1, 0], sizes = [24, 32], strides = [1, 1]} : vector<42x32xf32> to vector<24x32xf32>
    %68 = arith.truncf %67 : vector<24x32xf32> to vector<24x32xbf16>
    %c1_42 = arith.constant 1 : index
    %c0_43 = arith.constant 0 : index
    %c0_44 = arith.constant 0 : index
    %69 = vector.load %arg6[%c1_42, %c0_43, %c0_44] : memref<9x32x64xbf16, #tpu.memory_space<vmem>>, vector<1x32x64xbf16>
    %70 = vector.shape_cast %69 : vector<1x32x64xbf16> to vector<32x64xbf16>
    %cst_45 = arith.constant dense<0.000000e+00> : vector<24x64xf32>
    %71 = tpu.matmul %68, %70, %cst_45 {dimension_numbers = #tpu.dot_dimension_numbers<[1], [0], [0], [1], [0, 0, 1, 1], [], []>} : vector<24x32xbf16>, vector<32x64xbf16>, vector<24x64xf32> -> vector<24x64xf32>
    %72 = arith.addf %66, %71 : vector<24x64xf32>
    %73 = vector.extract_strided_slice %60 {offsets = [2, 0], sizes = [24, 32], strides = [1, 1]} : vector<42x32xf32> to vector<24x32xf32>
    %74 = arith.truncf %73 : vector<24x32xf32> to vector<24x32xbf16>
    %c2_46 = arith.constant 2 : index
    %c0_47 = arith.constant 0 : index
    %c0_48 = arith.constant 0 : index
    %75 = vector.load %arg6[%c2_46, %c0_47, %c0_48] : memref<9x32x64xbf16, #tpu.memory_space<vmem>>, vector<1x32x64xbf16>
    %76 = vector.shape_cast %75 : vector<1x32x64xbf16> to vector<32x64xbf16>
    %cst_49 = arith.constant dense<0.000000e+00> : vector<24x64xf32>
    %77 = tpu.matmul %74, %76, %cst_49 {dimension_numbers = #tpu.dot_dimension_numbers<[1], [0], [0], [1], [0, 0, 1, 1], [], []>} : vector<24x32xbf16>, vector<32x64xbf16>, vector<24x64xf32> -> vector<24x64xf32>
    %78 = arith.addf %72, %77 : vector<24x64xf32>
    %79 = vector.extract_strided_slice %60 {offsets = [6, 0], sizes = [24, 32], strides = [1, 1]} : vector<42x32xf32> to vector<24x32xf32>
    %80 = arith.truncf %79 : vector<24x32xf32> to vector<24x32xbf16>
    %c3_50 = arith.constant 3 : index
    %c0_51 = arith.constant 0 : index
    %c0_52 = arith.constant 0 : index
    %81 = vector.load %arg6[%c3_50, %c0_51, %c0_52] : memref<9x32x64xbf16, #tpu.memory_space<vmem>>, vector<1x32x64xbf16>
    %82 = vector.shape_cast %81 : vector<1x32x64xbf16> to vector<32x64xbf16>
    %cst_53 = arith.constant dense<0.000000e+00> : vector<24x64xf32>
    %83 = tpu.matmul %80, %82, %cst_53 {dimension_numbers = #tpu.dot_dimension_numbers<[1], [0], [0], [1], [0, 0, 1, 1], [], []>} : vector<24x32xbf16>, vector<32x64xbf16>, vector<24x64xf32> -> vector<24x64xf32>
    %84 = arith.addf %78, %83 : vector<24x64xf32>
    %85 = vector.extract_strided_slice %60 {offsets = [7, 0], sizes = [24, 32], strides = [1, 1]} : vector<42x32xf32> to vector<24x32xf32>
    %86 = arith.truncf %85 : vector<24x32xf32> to vector<24x32xbf16>
    %c4_54 = arith.constant 4 : index
    %c0_55 = arith.constant 0 : index
    %c0_56 = arith.constant 0 : index
    %87 = vector.load %arg6[%c4_54, %c0_55, %c0_56] : memref<9x32x64xbf16, #tpu.memory_space<vmem>>, vector<1x32x64xbf16>
    %88 = vector.shape_cast %87 : vector<1x32x64xbf16> to vector<32x64xbf16>
    %cst_57 = arith.constant dense<0.000000e+00> : vector<24x64xf32>
    %89 = tpu.matmul %86, %88, %cst_57 {dimension_numbers = #tpu.dot_dimension_numbers<[1], [0], [0], [1], [0, 0, 1, 1], [], []>} : vector<24x32xbf16>, vector<32x64xbf16>, vector<24x64xf32> -> vector<24x64xf32>
    %90 = arith.addf %84, %89 : vector<24x64xf32>
    %91 = vector.extract_strided_slice %60 {offsets = [8, 0], sizes = [24, 32], strides = [1, 1]} : vector<42x32xf32> to vector<24x32xf32>
    %92 = arith.truncf %91 : vector<24x32xf32> to vector<24x32xbf16>
    %c5_58 = arith.constant 5 : index
    %c0_59 = arith.constant 0 : index
    %c0_60 = arith.constant 0 : index
    %93 = vector.load %arg6[%c5_58, %c0_59, %c0_60] : memref<9x32x64xbf16, #tpu.memory_space<vmem>>, vector<1x32x64xbf16>
    %94 = vector.shape_cast %93 : vector<1x32x64xbf16> to vector<32x64xbf16>
    %cst_61 = arith.constant dense<0.000000e+00> : vector<24x64xf32>
    %95 = tpu.matmul %92, %94, %cst_61 {dimension_numbers = #tpu.dot_dimension_numbers<[1], [0], [0], [1], [0, 0, 1, 1], [], []>} : vector<24x32xbf16>, vector<32x64xbf16>, vector<24x64xf32> -> vector<24x64xf32>
    %96 = arith.addf %90, %95 : vector<24x64xf32>
    %97 = vector.extract_strided_slice %60 {offsets = [12, 0], sizes = [24, 32], strides = [1, 1]} : vector<42x32xf32> to vector<24x32xf32>
    %98 = arith.truncf %97 : vector<24x32xf32> to vector<24x32xbf16>
    %c6_62 = arith.constant 6 : index
    %c0_63 = arith.constant 0 : index
    %c0_64 = arith.constant 0 : index
    %99 = vector.load %arg6[%c6_62, %c0_63, %c0_64] : memref<9x32x64xbf16, #tpu.memory_space<vmem>>, vector<1x32x64xbf16>
    %100 = vector.shape_cast %99 : vector<1x32x64xbf16> to vector<32x64xbf16>
    %cst_65 = arith.constant dense<0.000000e+00> : vector<24x64xf32>
    %101 = tpu.matmul %98, %100, %cst_65 {dimension_numbers = #tpu.dot_dimension_numbers<[1], [0], [0], [1], [0, 0, 1, 1], [], []>} : vector<24x32xbf16>, vector<32x64xbf16>, vector<24x64xf32> -> vector<24x64xf32>
    %102 = arith.addf %96, %101 : vector<24x64xf32>
    %103 = vector.extract_strided_slice %60 {offsets = [13, 0], sizes = [24, 32], strides = [1, 1]} : vector<42x32xf32> to vector<24x32xf32>
    %104 = arith.truncf %103 : vector<24x32xf32> to vector<24x32xbf16>
    %c7_66 = arith.constant 7 : index
    %c0_67 = arith.constant 0 : index
    %c0_68 = arith.constant 0 : index
    %105 = vector.load %arg6[%c7_66, %c0_67, %c0_68] : memref<9x32x64xbf16, #tpu.memory_space<vmem>>, vector<1x32x64xbf16>
    %106 = vector.shape_cast %105 : vector<1x32x64xbf16> to vector<32x64xbf16>
    %cst_69 = arith.constant dense<0.000000e+00> : vector<24x64xf32>
    %107 = tpu.matmul %104, %106, %cst_69 {dimension_numbers = #tpu.dot_dimension_numbers<[1], [0], [0], [1], [0, 0, 1, 1], [], []>} : vector<24x32xbf16>, vector<32x64xbf16>, vector<24x64xf32> -> vector<24x64xf32>
    %108 = arith.addf %102, %107 : vector<24x64xf32>
    %109 = vector.extract_strided_slice %60 {offsets = [14, 0], sizes = [24, 32], strides = [1, 1]} : vector<42x32xf32> to vector<24x32xf32>
    %110 = arith.truncf %109 : vector<24x32xf32> to vector<24x32xbf16>
    %c8_70 = arith.constant 8 : index
    %c0_71 = arith.constant 0 : index
    %c0_72 = arith.constant 0 : index
    %111 = vector.load %arg6[%c8_70, %c0_71, %c0_72] : memref<9x32x64xbf16, #tpu.memory_space<vmem>>, vector<1x32x64xbf16>
    %112 = vector.shape_cast %111 : vector<1x32x64xbf16> to vector<32x64xbf16>
    %cst_73 = arith.constant dense<0.000000e+00> : vector<24x64xf32>
    %113 = tpu.matmul %110, %112, %cst_73 {dimension_numbers = #tpu.dot_dimension_numbers<[1], [0], [0], [1], [0, 0, 1, 1], [], []>} : vector<24x32xbf16>, vector<32x64xbf16>, vector<24x64xf32> -> vector<24x64xf32>
    %114 = arith.addf %108, %113 : vector<24x64xf32>
    %c0_74 = arith.constant 0 : index
    %c0_75 = arith.constant 0 : index
    %115 = vector.load %arg7[%c0_74, %c0_75] : memref<1x64xf32, #tpu.memory_space<vmem>>, vector<1x64xf32>
    %116 = vector.broadcast %115 : vector<1x64xf32> to vector<24x64xf32>
    %117 = arith.mulf %114, %116 : vector<24x64xf32>
    %c0_76 = arith.constant 0 : index
    %c0_77 = arith.constant 0 : index
    %118 = vector.load %arg8[%c0_76, %c0_77] : memref<1x64xf32, #tpu.memory_space<vmem>>, vector<1x64xf32>
    %119 = vector.broadcast %118 : vector<1x64xf32> to vector<24x64xf32>
    %120 = arith.addf %117, %119 : vector<24x64xf32>
    %cst_78 = arith.constant 0.000000e+00 : f32
    %121 = vector.broadcast %cst_78 : f32 to vector<24x64xf32>
    %122 = arith.maximumf %120, %121 : vector<24x64xf32>
    %c0_79 = arith.constant 0 : index
    %c0_80 = arith.constant 0 : index
    %c0_81 = arith.constant 0 : index
    %123 = vector.load %arg9[%c0_79, %c0_80, %c0_81] : memref<1x24x64xf32, #tpu.memory_space<vmem>>, vector<1x24x64xf32>
    %124 = vector.shape_cast %123 : vector<1x24x64xf32> to vector<24x64xf32>
    %125 = vector.shape_cast %122 : vector<24x64xf32> to vector<1x24x64xf32>
    tpu.vector_store %arg9[%c0_79, %c0_80, %c0_81], %125 {strides = array<i32>} : memref<1x24x64xf32, #tpu.memory_space<vmem>>, vector<1x24x64xf32>,
    return
  }
  func.func @transform_0(%arg0: i32) -> (i32, i32, i32) {
    %c0_i32 = arith.constant 0 : i32
    %c0_i32_0 = arith.constant 0 : i32
    %c0_i32_1 = arith.constant 0 : i32
    return %arg0, %c0_i32, %c0_i32_0 : i32, i32, i32
  }
  func.func @transform_1(%arg0: i32) -> (i32, i32, i32) {
    %c0_i32 = arith.constant 0 : i32
    %c0_i32_0 = arith.constant 0 : i32
    %c0_i32_1 = arith.constant 0 : i32
    return %arg0, %c0_i32, %c0_i32_0 : i32, i32, i32
  }
  func.func @transform_2(%arg0: i32) -> (i32, i32) {
    %c0_i32 = arith.constant 0 : i32
    %c0_i32_0 = arith.constant 0 : i32
    %c0_i32_1 = arith.constant 0 : i32
    return %c0_i32, %c0_i32_0 : i32, i32
  }
  func.func @transform_3(%arg0: i32) -> (i32, i32) {
    %c0_i32 = arith.constant 0 : i32
    %c0_i32_0 = arith.constant 0 : i32
    %c0_i32_1 = arith.constant 0 : i32
    return %c0_i32, %c0_i32_0 : i32, i32
  }
  func.func @transform_4(%arg0: i32) -> (i32, i32, i32) {
    %c0_i32 = arith.constant 0 : i32
    %c0_i32_0 = arith.constant 0 : i32
    %c0_i32_1 = arith.constant 0 : i32
    %c0_i32_2 = arith.constant 0 : i32
    return %c0_i32, %c0_i32_0, %c0_i32_1 : i32, i32, i32
  }
  func.func @transform_5(%arg0: i32) -> (i32, i32, i32) {
    %c0_i32 = arith.constant 0 : i32
    %c0_i32_0 = arith.constant 0 : i32
    %c0_i32_1 = arith.constant 0 : i32
    %c0_i32_2 = arith.constant 0 : i32
    return %c0_i32, %c0_i32_0, %c0_i32_1 : i32, i32, i32
  }
  func.func @transform_6(%arg0: i32) -> (i32, i32) {
    %c0_i32 = arith.constant 0 : i32
    %c0_i32_0 = arith.constant 0 : i32
    %c0_i32_1 = arith.constant 0 : i32
    return %c0_i32, %c0_i32_0 : i32, i32
  }
  func.func @transform_7(%arg0: i32) -> (i32, i32) {
    %c0_i32 = arith.constant 0 : i32
    %c0_i32_0 = arith.constant 0 : i32
    %c0_i32_1 = arith.constant 0 : i32
    return %c0_i32, %c0_i32_0 : i32, i32
  }
  func.func @transform_8(%arg0: i32) -> (i32, i32, i32) {
    %c0_i32 = arith.constant 0 : i32
    %c0_i32_0 = arith.constant 0 : i32
    %c0_i32_1 = arith.constant 0 : i32
    return %arg0, %c0_i32, %c0_i32_0 : i32, i32, i32
  }
}

module attributes {stable_mosaic.version = 11 : i64} {
  func.func @_convbr_kernel(%arg0: i32, %arg1: memref<1x24x32xf32, #tpu.memory_space<vmem>>, %arg2: memref<110x24xf32, #tpu.memory_space<vmem>>, %arg3: memref<9x32x32xbf16, #tpu.memory_space<vmem>>, %arg4: memref<1x32xf32, #tpu.memory_space<vmem>>, %arg5: memref<1x32xf32, #tpu.memory_space<vmem>>, %arg6: memref<1x80x32xf32, #tpu.memory_space<vmem>>, %arg7: memref<1x80x32xf32, #tpu.memory_space<vmem>>) attributes {dimension_semantics = [#tpu.dimension_semantics<parallel>], iteration_bounds = array<i64: 2>, scalar_prefetch = 0 : i64, scratch_operands = 0 : i64, tpu.core_type = #tpu.core_type<tc>, window_params = [{transform_indices = @transform_0, window_bounds = array<i64: 1, 24, 32>}, {pipeline_mode = #tpu.pipeline_mode<synchronous>, transform_indices = @transform_1, window_bounds = array<i64: 110, 24>}, {pipeline_mode = #tpu.pipeline_mode<synchronous>, transform_indices = @transform_2, window_bounds = array<i64: 9, 32, 32>}, {pipeline_mode = #tpu.pipeline_mode<synchronous>, transform_indices = @transform_3, window_bounds = array<i64: 1, 32>}, {pipeline_mode = #tpu.pipeline_mode<synchronous>, transform_indices = @transform_4, window_bounds = array<i64: 1, 32>}, {transform_indices = @transform_5, window_bounds = array<i64: 1, 80, 32>}, {transform_indices = @transform_6, window_bounds = array<i64: 1, 80, 32>}]} {
    %c0 = arith.constant 0 : index
    %c0_0 = arith.constant 0 : index
    %0 = vector.load %arg2[%c0, %c0_0] : memref<110x24xf32, #tpu.memory_space<vmem>>, vector<110x24xf32>
    %c0_1 = arith.constant 0 : index
    %c0_2 = arith.constant 0 : index
    %c0_3 = arith.constant 0 : index
    %1 = vector.load %arg1[%c0_1, %c0_2, %c0_3] : memref<1x24x32xf32, #tpu.memory_space<vmem>>, vector<1x24x32xf32>
    %2 = vector.shape_cast %1 : vector<1x24x32xf32> to vector<24x32xf32>
    %cst = arith.constant dense<0.000000e+00> : vector<110x32xf32>
    %3 = tpu.matmul %0, %2, %cst {dimension_numbers = #tpu.dot_dimension_numbers<[1], [0], [0], [1], [0, 0, 1, 1], [], []>} : vector<110x24xf32>, vector<24x32xf32>, vector<110x32xf32> -> vector<110x32xf32>
    %4 = vector.extract_strided_slice %3 {offsets = [0, 0], sizes = [80, 32], strides = [1, 1]} : vector<110x32xf32> to vector<80x32xf32>
    %5 = arith.truncf %4 : vector<80x32xf32> to vector<80x32xbf16>
    %c0_4 = arith.constant 0 : index
    %c0_5 = arith.constant 0 : index
    %c0_6 = arith.constant 0 : index
    %6 = vector.load %arg3[%c0_4, %c0_5, %c0_6] : memref<9x32x32xbf16, #tpu.memory_space<vmem>>, vector<1x32x32xbf16>
    %7 = vector.shape_cast %6 : vector<1x32x32xbf16> to vector<32x32xbf16>
    %cst_7 = arith.constant dense<0.000000e+00> : vector<80x32xf32>
    %8 = tpu.matmul %5, %7, %cst_7 {dimension_numbers = #tpu.dot_dimension_numbers<[1], [0], [0], [1], [0, 0, 1, 1], [], []>} : vector<80x32xbf16>, vector<32x32xbf16>, vector<80x32xf32> -> vector<80x32xf32>
    %9 = vector.extract_strided_slice %3 {offsets = [1, 0], sizes = [80, 32], strides = [1, 1]} : vector<110x32xf32> to vector<80x32xf32>
    %10 = arith.truncf %9 : vector<80x32xf32> to vector<80x32xbf16>
    %c1 = arith.constant 1 : index
    %c0_8 = arith.constant 0 : index
    %c0_9 = arith.constant 0 : index
    %11 = vector.load %arg3[%c1, %c0_8, %c0_9] : memref<9x32x32xbf16, #tpu.memory_space<vmem>>, vector<1x32x32xbf16>
    %12 = vector.shape_cast %11 : vector<1x32x32xbf16> to vector<32x32xbf16>
    %cst_10 = arith.constant dense<0.000000e+00> : vector<80x32xf32>
    %13 = tpu.matmul %10, %12, %cst_10 {dimension_numbers = #tpu.dot_dimension_numbers<[1], [0], [0], [1], [0, 0, 1, 1], [], []>} : vector<80x32xbf16>, vector<32x32xbf16>, vector<80x32xf32> -> vector<80x32xf32>
    %14 = arith.addf %8, %13 : vector<80x32xf32>
    %15 = vector.extract_strided_slice %3 {offsets = [2, 0], sizes = [80, 32], strides = [1, 1]} : vector<110x32xf32> to vector<80x32xf32>
    %16 = arith.truncf %15 : vector<80x32xf32> to vector<80x32xbf16>
    %c2 = arith.constant 2 : index
    %c0_11 = arith.constant 0 : index
    %c0_12 = arith.constant 0 : index
    %17 = vector.load %arg3[%c2, %c0_11, %c0_12] : memref<9x32x32xbf16, #tpu.memory_space<vmem>>, vector<1x32x32xbf16>
    %18 = vector.shape_cast %17 : vector<1x32x32xbf16> to vector<32x32xbf16>
    %cst_13 = arith.constant dense<0.000000e+00> : vector<80x32xf32>
    %19 = tpu.matmul %16, %18, %cst_13 {dimension_numbers = #tpu.dot_dimension_numbers<[1], [0], [0], [1], [0, 0, 1, 1], [], []>} : vector<80x32xbf16>, vector<32x32xbf16>, vector<80x32xf32> -> vector<80x32xf32>
    %20 = arith.addf %14, %19 : vector<80x32xf32>
    %21 = vector.extract_strided_slice %3 {offsets = [10, 0], sizes = [80, 32], strides = [1, 1]} : vector<110x32xf32> to vector<80x32xf32>
    %22 = arith.truncf %21 : vector<80x32xf32> to vector<80x32xbf16>
    %c3 = arith.constant 3 : index
    %c0_14 = arith.constant 0 : index
    %c0_15 = arith.constant 0 : index
    %23 = vector.load %arg3[%c3, %c0_14, %c0_15] : memref<9x32x32xbf16, #tpu.memory_space<vmem>>, vector<1x32x32xbf16>
    %24 = vector.shape_cast %23 : vector<1x32x32xbf16> to vector<32x32xbf16>
    %cst_16 = arith.constant dense<0.000000e+00> : vector<80x32xf32>
    %25 = tpu.matmul %22, %24, %cst_16 {dimension_numbers = #tpu.dot_dimension_numbers<[1], [0], [0], [1], [0, 0, 1, 1], [], []>} : vector<80x32xbf16>, vector<32x32xbf16>, vector<80x32xf32> -> vector<80x32xf32>
    %26 = arith.addf %20, %25 : vector<80x32xf32>
    %27 = vector.extract_strided_slice %3 {offsets = [11, 0], sizes = [80, 32], strides = [1, 1]} : vector<110x32xf32> to vector<80x32xf32>
    %28 = arith.truncf %27 : vector<80x32xf32> to vector<80x32xbf16>
    %c4 = arith.constant 4 : index
    %c0_17 = arith.constant 0 : index
    %c0_18 = arith.constant 0 : index
    %29 = vector.load %arg3[%c4, %c0_17, %c0_18] : memref<9x32x32xbf16, #tpu.memory_space<vmem>>, vector<1x32x32xbf16>
    %30 = vector.shape_cast %29 : vector<1x32x32xbf16> to vector<32x32xbf16>
    %cst_19 = arith.constant dense<0.000000e+00> : vector<80x32xf32>
    %31 = tpu.matmul %28, %30, %cst_19 {dimension_numbers = #tpu.dot_dimension_numbers<[1], [0], [0], [1], [0, 0, 1, 1], [], []>} : vector<80x32xbf16>, vector<32x32xbf16>, vector<80x32xf32> -> vector<80x32xf32>
    %32 = arith.addf %26, %31 : vector<80x32xf32>
    %33 = vector.extract_strided_slice %3 {offsets = [12, 0], sizes = [80, 32], strides = [1, 1]} : vector<110x32xf32> to vector<80x32xf32>
    %34 = arith.truncf %33 : vector<80x32xf32> to vector<80x32xbf16>
    %c5 = arith.constant 5 : index
    %c0_20 = arith.constant 0 : index
    %c0_21 = arith.constant 0 : index
    %35 = vector.load %arg3[%c5, %c0_20, %c0_21] : memref<9x32x32xbf16, #tpu.memory_space<vmem>>, vector<1x32x32xbf16>
    %36 = vector.shape_cast %35 : vector<1x32x32xbf16> to vector<32x32xbf16>
    %cst_22 = arith.constant dense<0.000000e+00> : vector<80x32xf32>
    %37 = tpu.matmul %34, %36, %cst_22 {dimension_numbers = #tpu.dot_dimension_numbers<[1], [0], [0], [1], [0, 0, 1, 1], [], []>} : vector<80x32xbf16>, vector<32x32xbf16>, vector<80x32xf32> -> vector<80x32xf32>
    %38 = arith.addf %32, %37 : vector<80x32xf32>
    %39 = vector.extract_strided_slice %3 {offsets = [20, 0], sizes = [80, 32], strides = [1, 1]} : vector<110x32xf32> to vector<80x32xf32>
    %40 = arith.truncf %39 : vector<80x32xf32> to vector<80x32xbf16>
    %c6 = arith.constant 6 : index
    %c0_23 = arith.constant 0 : index
    %c0_24 = arith.constant 0 : index
    %41 = vector.load %arg3[%c6, %c0_23, %c0_24] : memref<9x32x32xbf16, #tpu.memory_space<vmem>>, vector<1x32x32xbf16>
    %42 = vector.shape_cast %41 : vector<1x32x32xbf16> to vector<32x32xbf16>
    %cst_25 = arith.constant dense<0.000000e+00> : vector<80x32xf32>
    %43 = tpu.matmul %40, %42, %cst_25 {dimension_numbers = #tpu.dot_dimension_numbers<[1], [0], [0], [1], [0, 0, 1, 1], [], []>} : vector<80x32xbf16>, vector<32x32xbf16>, vector<80x32xf32> -> vector<80x32xf32>
    %44 = arith.addf %38, %43 : vector<80x32xf32>
    %45 = vector.extract_strided_slice %3 {offsets = [21, 0], sizes = [80, 32], strides = [1, 1]} : vector<110x32xf32> to vector<80x32xf32>
    %46 = arith.truncf %45 : vector<80x32xf32> to vector<80x32xbf16>
    %c7 = arith.constant 7 : index
    %c0_26 = arith.constant 0 : index
    %c0_27 = arith.constant 0 : index
    %47 = vector.load %arg3[%c7, %c0_26, %c0_27] : memref<9x32x32xbf16, #tpu.memory_space<vmem>>, vector<1x32x32xbf16>
    %48 = vector.shape_cast %47 : vector<1x32x32xbf16> to vector<32x32xbf16>
    %cst_28 = arith.constant dense<0.000000e+00> : vector<80x32xf32>
    %49 = tpu.matmul %46, %48, %cst_28 {dimension_numbers = #tpu.dot_dimension_numbers<[1], [0], [0], [1], [0, 0, 1, 1], [], []>} : vector<80x32xbf16>, vector<32x32xbf16>, vector<80x32xf32> -> vector<80x32xf32>
    %50 = arith.addf %44, %49 : vector<80x32xf32>
    %51 = vector.extract_strided_slice %3 {offsets = [22, 0], sizes = [80, 32], strides = [1, 1]} : vector<110x32xf32> to vector<80x32xf32>
    %52 = arith.truncf %51 : vector<80x32xf32> to vector<80x32xbf16>
    %c8 = arith.constant 8 : index
    %c0_29 = arith.constant 0 : index
    %c0_30 = arith.constant 0 : index
    %53 = vector.load %arg3[%c8, %c0_29, %c0_30] : memref<9x32x32xbf16, #tpu.memory_space<vmem>>, vector<1x32x32xbf16>
    %54 = vector.shape_cast %53 : vector<1x32x32xbf16> to vector<32x32xbf16>
    %cst_31 = arith.constant dense<0.000000e+00> : vector<80x32xf32>
    %55 = tpu.matmul %52, %54, %cst_31 {dimension_numbers = #tpu.dot_dimension_numbers<[1], [0], [0], [1], [0, 0, 1, 1], [], []>} : vector<80x32xbf16>, vector<32x32xbf16>, vector<80x32xf32> -> vector<80x32xf32>
    %56 = arith.addf %50, %55 : vector<80x32xf32>
    %c0_32 = arith.constant 0 : index
    %c0_33 = arith.constant 0 : index
    %57 = vector.load %arg4[%c0_32, %c0_33] : memref<1x32xf32, #tpu.memory_space<vmem>>, vector<1x32xf32>
    %58 = vector.broadcast %57 : vector<1x32xf32> to vector<80x32xf32>
    %59 = arith.mulf %56, %58 : vector<80x32xf32>
    %c0_34 = arith.constant 0 : index
    %c0_35 = arith.constant 0 : index
    %60 = vector.load %arg5[%c0_34, %c0_35] : memref<1x32xf32, #tpu.memory_space<vmem>>, vector<1x32xf32>
    %61 = vector.broadcast %60 : vector<1x32xf32> to vector<80x32xf32>
    %62 = arith.addf %59, %61 : vector<80x32xf32>
    %cst_36 = arith.constant 0.000000e+00 : f32
    %63 = vector.broadcast %cst_36 : f32 to vector<80x32xf32>
    %64 = arith.maximumf %62, %63 : vector<80x32xf32>
    %c0_37 = arith.constant 0 : index
    %c0_38 = arith.constant 0 : index
    %c0_39 = arith.constant 0 : index
    %65 = vector.load %arg6[%c0_37, %c0_38, %c0_39] : memref<1x80x32xf32, #tpu.memory_space<vmem>>, vector<1x80x32xf32>
    %66 = vector.shape_cast %65 : vector<1x80x32xf32> to vector<80x32xf32>
    %67 = arith.mulf %64, %66 : vector<80x32xf32>
    %c0_40 = arith.constant 0 : index
    %c0_41 = arith.constant 0 : index
    %c0_42 = arith.constant 0 : index
    %68 = vector.load %arg7[%c0_40, %c0_41, %c0_42] : memref<1x80x32xf32, #tpu.memory_space<vmem>>, vector<1x80x32xf32>
    %69 = vector.shape_cast %68 : vector<1x80x32xf32> to vector<80x32xf32>
    %70 = vector.shape_cast %67 : vector<80x32xf32> to vector<1x80x32xf32>
    tpu.vector_store %arg7[%c0_40, %c0_41, %c0_42], %70 {strides = array<i32>} : memref<1x80x32xf32, #tpu.memory_space<vmem>>, vector<1x80x32xf32>,
    return
  }
  func.func @transform_0(%arg0: i32) -> (i32, i32, i32) {
    %c0_i32 = arith.constant 0 : i32
    %c0_i32_0 = arith.constant 0 : i32
    %c0_i32_1 = arith.constant 0 : i32
    return %arg0, %c0_i32, %c0_i32_0 : i32, i32, i32
  }
  func.func @transform_1(%arg0: i32) -> (i32, i32) {
    %c0_i32 = arith.constant 0 : i32
    %c0_i32_0 = arith.constant 0 : i32
    %c0_i32_1 = arith.constant 0 : i32
    return %c0_i32, %c0_i32_0 : i32, i32
  }
  func.func @transform_2(%arg0: i32) -> (i32, i32, i32) {
    %c0_i32 = arith.constant 0 : i32
    %c0_i32_0 = arith.constant 0 : i32
    %c0_i32_1 = arith.constant 0 : i32
    %c0_i32_2 = arith.constant 0 : i32
    return %c0_i32, %c0_i32_0, %c0_i32_1 : i32, i32, i32
  }
  func.func @transform_3(%arg0: i32) -> (i32, i32) {
    %c0_i32 = arith.constant 0 : i32
    %c0_i32_0 = arith.constant 0 : i32
    %c0_i32_1 = arith.constant 0 : i32
    return %c0_i32, %c0_i32_0 : i32, i32
  }
  func.func @transform_4(%arg0: i32) -> (i32, i32) {
    %c0_i32 = arith.constant 0 : i32
    %c0_i32_0 = arith.constant 0 : i32
    %c0_i32_1 = arith.constant 0 : i32
    return %c0_i32, %c0_i32_0 : i32, i32
  }
  func.func @transform_5(%arg0: i32) -> (i32, i32, i32) {
    %c0_i32 = arith.constant 0 : i32
    %c0_i32_0 = arith.constant 0 : i32
    %c0_i32_1 = arith.constant 0 : i32
    return %arg0, %c0_i32, %c0_i32_0 : i32, i32, i32
  }
  func.func @transform_6(%arg0: i32) -> (i32, i32, i32) {
    %c0_i32 = arith.constant 0 : i32
    %c0_i32_0 = arith.constant 0 : i32
    %c0_i32_1 = arith.constant 0 : i32
    return %arg0, %c0_i32, %c0_i32_0 : i32, i32, i32
  }
}

module attributes {stable_mosaic.version = 11 : i64} {
  func.func @_convbr_kernel(%arg0: i32, %arg1: memref<1x16x32xf32, #tpu.memory_space<vmem>>, %arg2: memref<110x16xf32, #tpu.memory_space<vmem>>, %arg3: memref<9x32x32xbf16, #tpu.memory_space<vmem>>, %arg4: memref<1x32xf32, #tpu.memory_space<vmem>>, %arg5: memref<1x32xf32, #tpu.memory_space<vmem>>, %arg6: memref<1x80x32xf32, #tpu.memory_space<vmem>>, %arg7: memref<1x80x32xf32, #tpu.memory_space<vmem>>) attributes {dimension_semantics = [#tpu.dimension_semantics<parallel>], iteration_bounds = array<i64: 2>, scalar_prefetch = 0 : i64, scratch_operands = 0 : i64, tpu.core_type = #tpu.core_type<tc>, window_params = [{transform_indices = @transform_0, window_bounds = array<i64: 1, 16, 32>}, {pipeline_mode = #tpu.pipeline_mode<synchronous>, transform_indices = @transform_1, window_bounds = array<i64: 110, 16>}, {pipeline_mode = #tpu.pipeline_mode<synchronous>, transform_indices = @transform_2, window_bounds = array<i64: 9, 32, 32>}, {pipeline_mode = #tpu.pipeline_mode<synchronous>, transform_indices = @transform_3, window_bounds = array<i64: 1, 32>}, {pipeline_mode = #tpu.pipeline_mode<synchronous>, transform_indices = @transform_4, window_bounds = array<i64: 1, 32>}, {transform_indices = @transform_5, window_bounds = array<i64: 1, 80, 32>}, {transform_indices = @transform_6, window_bounds = array<i64: 1, 80, 32>}]} {
    %c0 = arith.constant 0 : index
    %c0_0 = arith.constant 0 : index
    %0 = vector.load %arg2[%c0, %c0_0] : memref<110x16xf32, #tpu.memory_space<vmem>>, vector<110x16xf32>
    %c0_1 = arith.constant 0 : index
    %c0_2 = arith.constant 0 : index
    %c0_3 = arith.constant 0 : index
    %1 = vector.load %arg1[%c0_1, %c0_2, %c0_3] : memref<1x16x32xf32, #tpu.memory_space<vmem>>, vector<1x16x32xf32>
    %2 = vector.shape_cast %1 : vector<1x16x32xf32> to vector<16x32xf32>
    %cst = arith.constant dense<0.000000e+00> : vector<110x32xf32>
    %3 = tpu.matmul %0, %2, %cst {dimension_numbers = #tpu.dot_dimension_numbers<[1], [0], [0], [1], [0, 0, 1, 1], [], []>} : vector<110x16xf32>, vector<16x32xf32>, vector<110x32xf32> -> vector<110x32xf32>
    %4 = vector.extract_strided_slice %3 {offsets = [0, 0], sizes = [80, 32], strides = [1, 1]} : vector<110x32xf32> to vector<80x32xf32>
    %5 = arith.truncf %4 : vector<80x32xf32> to vector<80x32xbf16>
    %c0_4 = arith.constant 0 : index
    %c0_5 = arith.constant 0 : index
    %c0_6 = arith.constant 0 : index
    %6 = vector.load %arg3[%c0_4, %c0_5, %c0_6] : memref<9x32x32xbf16, #tpu.memory_space<vmem>>, vector<1x32x32xbf16>
    %7 = vector.shape_cast %6 : vector<1x32x32xbf16> to vector<32x32xbf16>
    %cst_7 = arith.constant dense<0.000000e+00> : vector<80x32xf32>
    %8 = tpu.matmul %5, %7, %cst_7 {dimension_numbers = #tpu.dot_dimension_numbers<[1], [0], [0], [1], [0, 0, 1, 1], [], []>} : vector<80x32xbf16>, vector<32x32xbf16>, vector<80x32xf32> -> vector<80x32xf32>
    %9 = vector.extract_strided_slice %3 {offsets = [1, 0], sizes = [80, 32], strides = [1, 1]} : vector<110x32xf32> to vector<80x32xf32>
    %10 = arith.truncf %9 : vector<80x32xf32> to vector<80x32xbf16>
    %c1 = arith.constant 1 : index
    %c0_8 = arith.constant 0 : index
    %c0_9 = arith.constant 0 : index
    %11 = vector.load %arg3[%c1, %c0_8, %c0_9] : memref<9x32x32xbf16, #tpu.memory_space<vmem>>, vector<1x32x32xbf16>
    %12 = vector.shape_cast %11 : vector<1x32x32xbf16> to vector<32x32xbf16>
    %cst_10 = arith.constant dense<0.000000e+00> : vector<80x32xf32>
    %13 = tpu.matmul %10, %12, %cst_10 {dimension_numbers = #tpu.dot_dimension_numbers<[1], [0], [0], [1], [0, 0, 1, 1], [], []>} : vector<80x32xbf16>, vector<32x32xbf16>, vector<80x32xf32> -> vector<80x32xf32>
    %14 = arith.addf %8, %13 : vector<80x32xf32>
    %15 = vector.extract_strided_slice %3 {offsets = [2, 0], sizes = [80, 32], strides = [1, 1]} : vector<110x32xf32> to vector<80x32xf32>
    %16 = arith.truncf %15 : vector<80x32xf32> to vector<80x32xbf16>
    %c2 = arith.constant 2 : index
    %c0_11 = arith.constant 0 : index
    %c0_12 = arith.constant 0 : index
    %17 = vector.load %arg3[%c2, %c0_11, %c0_12] : memref<9x32x32xbf16, #tpu.memory_space<vmem>>, vector<1x32x32xbf16>
    %18 = vector.shape_cast %17 : vector<1x32x32xbf16> to vector<32x32xbf16>
    %cst_13 = arith.constant dense<0.000000e+00> : vector<80x32xf32>
    %19 = tpu.matmul %16, %18, %cst_13 {dimension_numbers = #tpu.dot_dimension_numbers<[1], [0], [0], [1], [0, 0, 1, 1], [], []>} : vector<80x32xbf16>, vector<32x32xbf16>, vector<80x32xf32> -> vector<80x32xf32>
    %20 = arith.addf %14, %19 : vector<80x32xf32>
    %21 = vector.extract_strided_slice %3 {offsets = [10, 0], sizes = [80, 32], strides = [1, 1]} : vector<110x32xf32> to vector<80x32xf32>
    %22 = arith.truncf %21 : vector<80x32xf32> to vector<80x32xbf16>
    %c3 = arith.constant 3 : index
    %c0_14 = arith.constant 0 : index
    %c0_15 = arith.constant 0 : index
    %23 = vector.load %arg3[%c3, %c0_14, %c0_15] : memref<9x32x32xbf16, #tpu.memory_space<vmem>>, vector<1x32x32xbf16>
    %24 = vector.shape_cast %23 : vector<1x32x32xbf16> to vector<32x32xbf16>
    %cst_16 = arith.constant dense<0.000000e+00> : vector<80x32xf32>
    %25 = tpu.matmul %22, %24, %cst_16 {dimension_numbers = #tpu.dot_dimension_numbers<[1], [0], [0], [1], [0, 0, 1, 1], [], []>} : vector<80x32xbf16>, vector<32x32xbf16>, vector<80x32xf32> -> vector<80x32xf32>
    %26 = arith.addf %20, %25 : vector<80x32xf32>
    %27 = vector.extract_strided_slice %3 {offsets = [11, 0], sizes = [80, 32], strides = [1, 1]} : vector<110x32xf32> to vector<80x32xf32>
    %28 = arith.truncf %27 : vector<80x32xf32> to vector<80x32xbf16>
    %c4 = arith.constant 4 : index
    %c0_17 = arith.constant 0 : index
    %c0_18 = arith.constant 0 : index
    %29 = vector.load %arg3[%c4, %c0_17, %c0_18] : memref<9x32x32xbf16, #tpu.memory_space<vmem>>, vector<1x32x32xbf16>
    %30 = vector.shape_cast %29 : vector<1x32x32xbf16> to vector<32x32xbf16>
    %cst_19 = arith.constant dense<0.000000e+00> : vector<80x32xf32>
    %31 = tpu.matmul %28, %30, %cst_19 {dimension_numbers = #tpu.dot_dimension_numbers<[1], [0], [0], [1], [0, 0, 1, 1], [], []>} : vector<80x32xbf16>, vector<32x32xbf16>, vector<80x32xf32> -> vector<80x32xf32>
    %32 = arith.addf %26, %31 : vector<80x32xf32>
    %33 = vector.extract_strided_slice %3 {offsets = [12, 0], sizes = [80, 32], strides = [1, 1]} : vector<110x32xf32> to vector<80x32xf32>
    %34 = arith.truncf %33 : vector<80x32xf32> to vector<80x32xbf16>
    %c5 = arith.constant 5 : index
    %c0_20 = arith.constant 0 : index
    %c0_21 = arith.constant 0 : index
    %35 = vector.load %arg3[%c5, %c0_20, %c0_21] : memref<9x32x32xbf16, #tpu.memory_space<vmem>>, vector<1x32x32xbf16>
    %36 = vector.shape_cast %35 : vector<1x32x32xbf16> to vector<32x32xbf16>
    %cst_22 = arith.constant dense<0.000000e+00> : vector<80x32xf32>
    %37 = tpu.matmul %34, %36, %cst_22 {dimension_numbers = #tpu.dot_dimension_numbers<[1], [0], [0], [1], [0, 0, 1, 1], [], []>} : vector<80x32xbf16>, vector<32x32xbf16>, vector<80x32xf32> -> vector<80x32xf32>
    %38 = arith.addf %32, %37 : vector<80x32xf32>
    %39 = vector.extract_strided_slice %3 {offsets = [20, 0], sizes = [80, 32], strides = [1, 1]} : vector<110x32xf32> to vector<80x32xf32>
    %40 = arith.truncf %39 : vector<80x32xf32> to vector<80x32xbf16>
    %c6 = arith.constant 6 : index
    %c0_23 = arith.constant 0 : index
    %c0_24 = arith.constant 0 : index
    %41 = vector.load %arg3[%c6, %c0_23, %c0_24] : memref<9x32x32xbf16, #tpu.memory_space<vmem>>, vector<1x32x32xbf16>
    %42 = vector.shape_cast %41 : vector<1x32x32xbf16> to vector<32x32xbf16>
    %cst_25 = arith.constant dense<0.000000e+00> : vector<80x32xf32>
    %43 = tpu.matmul %40, %42, %cst_25 {dimension_numbers = #tpu.dot_dimension_numbers<[1], [0], [0], [1], [0, 0, 1, 1], [], []>} : vector<80x32xbf16>, vector<32x32xbf16>, vector<80x32xf32> -> vector<80x32xf32>
    %44 = arith.addf %38, %43 : vector<80x32xf32>
    %45 = vector.extract_strided_slice %3 {offsets = [21, 0], sizes = [80, 32], strides = [1, 1]} : vector<110x32xf32> to vector<80x32xf32>
    %46 = arith.truncf %45 : vector<80x32xf32> to vector<80x32xbf16>
    %c7 = arith.constant 7 : index
    %c0_26 = arith.constant 0 : index
    %c0_27 = arith.constant 0 : index
    %47 = vector.load %arg3[%c7, %c0_26, %c0_27] : memref<9x32x32xbf16, #tpu.memory_space<vmem>>, vector<1x32x32xbf16>
    %48 = vector.shape_cast %47 : vector<1x32x32xbf16> to vector<32x32xbf16>
    %cst_28 = arith.constant dense<0.000000e+00> : vector<80x32xf32>
    %49 = tpu.matmul %46, %48, %cst_28 {dimension_numbers = #tpu.dot_dimension_numbers<[1], [0], [0], [1], [0, 0, 1, 1], [], []>} : vector<80x32xbf16>, vector<32x32xbf16>, vector<80x32xf32> -> vector<80x32xf32>
    %50 = arith.addf %44, %49 : vector<80x32xf32>
    %51 = vector.extract_strided_slice %3 {offsets = [22, 0], sizes = [80, 32], strides = [1, 1]} : vector<110x32xf32> to vector<80x32xf32>
    %52 = arith.truncf %51 : vector<80x32xf32> to vector<80x32xbf16>
    %c8 = arith.constant 8 : index
    %c0_29 = arith.constant 0 : index
    %c0_30 = arith.constant 0 : index
    %53 = vector.load %arg3[%c8, %c0_29, %c0_30] : memref<9x32x32xbf16, #tpu.memory_space<vmem>>, vector<1x32x32xbf16>
    %54 = vector.shape_cast %53 : vector<1x32x32xbf16> to vector<32x32xbf16>
    %cst_31 = arith.constant dense<0.000000e+00> : vector<80x32xf32>
    %55 = tpu.matmul %52, %54, %cst_31 {dimension_numbers = #tpu.dot_dimension_numbers<[1], [0], [0], [1], [0, 0, 1, 1], [], []>} : vector<80x32xbf16>, vector<32x32xbf16>, vector<80x32xf32> -> vector<80x32xf32>
    %56 = arith.addf %50, %55 : vector<80x32xf32>
    %c0_32 = arith.constant 0 : index
    %c0_33 = arith.constant 0 : index
    %57 = vector.load %arg4[%c0_32, %c0_33] : memref<1x32xf32, #tpu.memory_space<vmem>>, vector<1x32xf32>
    %58 = vector.broadcast %57 : vector<1x32xf32> to vector<80x32xf32>
    %59 = arith.mulf %56, %58 : vector<80x32xf32>
    %c0_34 = arith.constant 0 : index
    %c0_35 = arith.constant 0 : index
    %60 = vector.load %arg5[%c0_34, %c0_35] : memref<1x32xf32, #tpu.memory_space<vmem>>, vector<1x32xf32>
    %61 = vector.broadcast %60 : vector<1x32xf32> to vector<80x32xf32>
    %62 = arith.addf %59, %61 : vector<80x32xf32>
    %cst_36 = arith.constant 0.000000e+00 : f32
    %63 = vector.broadcast %cst_36 : f32 to vector<80x32xf32>
    %64 = arith.maximumf %62, %63 : vector<80x32xf32>
    %c0_37 = arith.constant 0 : index
    %c0_38 = arith.constant 0 : index
    %c0_39 = arith.constant 0 : index
    %65 = vector.load %arg6[%c0_37, %c0_38, %c0_39] : memref<1x80x32xf32, #tpu.memory_space<vmem>>, vector<1x80x32xf32>
    %66 = vector.shape_cast %65 : vector<1x80x32xf32> to vector<80x32xf32>
    %67 = arith.mulf %64, %66 : vector<80x32xf32>
    %c0_40 = arith.constant 0 : index
    %c0_41 = arith.constant 0 : index
    %c0_42 = arith.constant 0 : index
    %68 = vector.load %arg7[%c0_40, %c0_41, %c0_42] : memref<1x80x32xf32, #tpu.memory_space<vmem>>, vector<1x80x32xf32>
    %69 = vector.shape_cast %68 : vector<1x80x32xf32> to vector<80x32xf32>
    %70 = vector.shape_cast %67 : vector<80x32xf32> to vector<1x80x32xf32>
    tpu.vector_store %arg7[%c0_40, %c0_41, %c0_42], %70 {strides = array<i32>} : memref<1x80x32xf32, #tpu.memory_space<vmem>>, vector<1x80x32xf32>,
    return
  }
  func.func @transform_0(%arg0: i32) -> (i32, i32, i32) {
    %c0_i32 = arith.constant 0 : i32
    %c0_i32_0 = arith.constant 0 : i32
    %c0_i32_1 = arith.constant 0 : i32
    return %arg0, %c0_i32, %c0_i32_0 : i32, i32, i32
  }
  func.func @transform_1(%arg0: i32) -> (i32, i32) {
    %c0_i32 = arith.constant 0 : i32
    %c0_i32_0 = arith.constant 0 : i32
    %c0_i32_1 = arith.constant 0 : i32
    return %c0_i32, %c0_i32_0 : i32, i32
  }
  func.func @transform_2(%arg0: i32) -> (i32, i32, i32) {
    %c0_i32 = arith.constant 0 : i32
    %c0_i32_0 = arith.constant 0 : i32
    %c0_i32_1 = arith.constant 0 : i32
    %c0_i32_2 = arith.constant 0 : i32
    return %c0_i32, %c0_i32_0, %c0_i32_1 : i32, i32, i32
  }
  func.func @transform_3(%arg0: i32) -> (i32, i32) {
    %c0_i32 = arith.constant 0 : i32
    %c0_i32_0 = arith.constant 0 : i32
    %c0_i32_1 = arith.constant 0 : i32
    return %c0_i32, %c0_i32_0 : i32, i32
  }
  func.func @transform_4(%arg0: i32) -> (i32, i32) {
    %c0_i32 = arith.constant 0 : i32
    %c0_i32_0 = arith.constant 0 : i32
    %c0_i32_1 = arith.constant 0 : i32
    return %c0_i32, %c0_i32_0 : i32, i32
  }
  func.func @transform_5(%arg0: i32) -> (i32, i32, i32) {
    %c0_i32 = arith.constant 0 : i32
    %c0_i32_0 = arith.constant 0 : i32
    %c0_i32_1 = arith.constant 0 : i32
    return %arg0, %c0_i32, %c0_i32_0 : i32, i32, i32
  }
  func.func @transform_6(%arg0: i32) -> (i32, i32, i32) {
    %c0_i32 = arith.constant 0 : i32
    %c0_i32_0 = arith.constant 0 : i32
    %c0_i32_1 = arith.constant 0 : i32
    return %arg0, %c0_i32, %c0_i32_0 : i32, i32, i32
  }
}

module attributes {stable_mosaic.version = 11 : i64} {
  func.func @_convbr_kernel(%arg0: i32, %arg1: memref<1x80x96xf32, #tpu.memory_space<vmem>>, %arg2: memref<110x80xf32, #tpu.memory_space<vmem>>, %arg3: memref<9x96x96xbf16, #tpu.memory_space<vmem>>, %arg4: memref<1x96xf32, #tpu.memory_space<vmem>>, %arg5: memref<1x96xf32, #tpu.memory_space<vmem>>, %arg6: memref<1x80x96xf32, #tpu.memory_space<vmem>>) attributes {dimension_semantics = [#tpu.dimension_semantics<parallel>], iteration_bounds = array<i64: 2>, scalar_prefetch = 0 : i64, scratch_operands = 0 : i64, tpu.core_type = #tpu.core_type<tc>, window_params = [{transform_indices = @transform_0, window_bounds = array<i64: 1, 80, 96>}, {pipeline_mode = #tpu.pipeline_mode<synchronous>, transform_indices = @transform_1, window_bounds = array<i64: 110, 80>}, {pipeline_mode = #tpu.pipeline_mode<synchronous>, transform_indices = @transform_2, window_bounds = array<i64: 9, 96, 96>}, {pipeline_mode = #tpu.pipeline_mode<synchronous>, transform_indices = @transform_3, window_bounds = array<i64: 1, 96>}, {pipeline_mode = #tpu.pipeline_mode<synchronous>, transform_indices = @transform_4, window_bounds = array<i64: 1, 96>}, {transform_indices = @transform_5, window_bounds = array<i64: 1, 80, 96>}]} {
    %c0 = arith.constant 0 : index
    %c0_0 = arith.constant 0 : index
    %0 = vector.load %arg2[%c0, %c0_0] : memref<110x80xf32, #tpu.memory_space<vmem>>, vector<110x80xf32>
    %c0_1 = arith.constant 0 : index
    %c0_2 = arith.constant 0 : index
    %c0_3 = arith.constant 0 : index
    %1 = vector.load %arg1[%c0_1, %c0_2, %c0_3] : memref<1x80x96xf32, #tpu.memory_space<vmem>>, vector<1x80x96xf32>
    %2 = vector.shape_cast %1 : vector<1x80x96xf32> to vector<80x96xf32>
    %cst = arith.constant dense<0.000000e+00> : vector<110x96xf32>
    %3 = tpu.matmul %0, %2, %cst {dimension_numbers = #tpu.dot_dimension_numbers<[1], [0], [0], [1], [0, 0, 1, 1], [], []>} : vector<110x80xf32>, vector<80x96xf32>, vector<110x96xf32> -> vector<110x96xf32>
    %4 = vector.extract_strided_slice %3 {offsets = [0, 0], sizes = [80, 96], strides = [1, 1]} : vector<110x96xf32> to vector<80x96xf32>
    %5 = arith.truncf %4 : vector<80x96xf32> to vector<80x96xbf16>
    %c0_4 = arith.constant 0 : index
    %c0_5 = arith.constant 0 : index
    %c0_6 = arith.constant 0 : index
    %6 = vector.load %arg3[%c0_4, %c0_5, %c0_6] : memref<9x96x96xbf16, #tpu.memory_space<vmem>>, vector<1x96x96xbf16>
    %7 = vector.shape_cast %6 : vector<1x96x96xbf16> to vector<96x96xbf16>
    %cst_7 = arith.constant dense<0.000000e+00> : vector<80x96xf32>
    %8 = tpu.matmul %5, %7, %cst_7 {dimension_numbers = #tpu.dot_dimension_numbers<[1], [0], [0], [1], [0, 0, 1, 1], [], []>} : vector<80x96xbf16>, vector<96x96xbf16>, vector<80x96xf32> -> vector<80x96xf32>
    %9 = vector.extract_strided_slice %3 {offsets = [1, 0], sizes = [80, 96], strides = [1, 1]} : vector<110x96xf32> to vector<80x96xf32>
    %10 = arith.truncf %9 : vector<80x96xf32> to vector<80x96xbf16>
    %c1 = arith.constant 1 : index
    %c0_8 = arith.constant 0 : index
    %c0_9 = arith.constant 0 : index
    %11 = vector.load %arg3[%c1, %c0_8, %c0_9] : memref<9x96x96xbf16, #tpu.memory_space<vmem>>, vector<1x96x96xbf16>
    %12 = vector.shape_cast %11 : vector<1x96x96xbf16> to vector<96x96xbf16>
    %cst_10 = arith.constant dense<0.000000e+00> : vector<80x96xf32>
    %13 = tpu.matmul %10, %12, %cst_10 {dimension_numbers = #tpu.dot_dimension_numbers<[1], [0], [0], [1], [0, 0, 1, 1], [], []>} : vector<80x96xbf16>, vector<96x96xbf16>, vector<80x96xf32> -> vector<80x96xf32>
    %14 = arith.addf %8, %13 : vector<80x96xf32>
    %15 = vector.extract_strided_slice %3 {offsets = [2, 0], sizes = [80, 96], strides = [1, 1]} : vector<110x96xf32> to vector<80x96xf32>
    %16 = arith.truncf %15 : vector<80x96xf32> to vector<80x96xbf16>
    %c2 = arith.constant 2 : index
    %c0_11 = arith.constant 0 : index
    %c0_12 = arith.constant 0 : index
    %17 = vector.load %arg3[%c2, %c0_11, %c0_12] : memref<9x96x96xbf16, #tpu.memory_space<vmem>>, vector<1x96x96xbf16>
    %18 = vector.shape_cast %17 : vector<1x96x96xbf16> to vector<96x96xbf16>
    %cst_13 = arith.constant dense<0.000000e+00> : vector<80x96xf32>
    %19 = tpu.matmul %16, %18, %cst_13 {dimension_numbers = #tpu.dot_dimension_numbers<[1], [0], [0], [1], [0, 0, 1, 1], [], []>} : vector<80x96xbf16>, vector<96x96xbf16>, vector<80x96xf32> -> vector<80x96xf32>
    %20 = arith.addf %14, %19 : vector<80x96xf32>
    %21 = vector.extract_strided_slice %3 {offsets = [10, 0], sizes = [80, 96], strides = [1, 1]} : vector<110x96xf32> to vector<80x96xf32>
    %22 = arith.truncf %21 : vector<80x96xf32> to vector<80x96xbf16>
    %c3 = arith.constant 3 : index
    %c0_14 = arith.constant 0 : index
    %c0_15 = arith.constant 0 : index
    %23 = vector.load %arg3[%c3, %c0_14, %c0_15] : memref<9x96x96xbf16, #tpu.memory_space<vmem>>, vector<1x96x96xbf16>
    %24 = vector.shape_cast %23 : vector<1x96x96xbf16> to vector<96x96xbf16>
    %cst_16 = arith.constant dense<0.000000e+00> : vector<80x96xf32>
    %25 = tpu.matmul %22, %24, %cst_16 {dimension_numbers = #tpu.dot_dimension_numbers<[1], [0], [0], [1], [0, 0, 1, 1], [], []>} : vector<80x96xbf16>, vector<96x96xbf16>, vector<80x96xf32> -> vector<80x96xf32>
    %26 = arith.addf %20, %25 : vector<80x96xf32>
    %27 = vector.extract_strided_slice %3 {offsets = [11, 0], sizes = [80, 96], strides = [1, 1]} : vector<110x96xf32> to vector<80x96xf32>
    %28 = arith.truncf %27 : vector<80x96xf32> to vector<80x96xbf16>
    %c4 = arith.constant 4 : index
    %c0_17 = arith.constant 0 : index
    %c0_18 = arith.constant 0 : index
    %29 = vector.load %arg3[%c4, %c0_17, %c0_18] : memref<9x96x96xbf16, #tpu.memory_space<vmem>>, vector<1x96x96xbf16>
    %30 = vector.shape_cast %29 : vector<1x96x96xbf16> to vector<96x96xbf16>
    %cst_19 = arith.constant dense<0.000000e+00> : vector<80x96xf32>
    %31 = tpu.matmul %28, %30, %cst_19 {dimension_numbers = #tpu.dot_dimension_numbers<[1], [0], [0], [1], [0, 0, 1, 1], [], []>} : vector<80x96xbf16>, vector<96x96xbf16>, vector<80x96xf32> -> vector<80x96xf32>
    %32 = arith.addf %26, %31 : vector<80x96xf32>
    %33 = vector.extract_strided_slice %3 {offsets = [12, 0], sizes = [80, 96], strides = [1, 1]} : vector<110x96xf32> to vector<80x96xf32>
    %34 = arith.truncf %33 : vector<80x96xf32> to vector<80x96xbf16>
    %c5 = arith.constant 5 : index
    %c0_20 = arith.constant 0 : index
    %c0_21 = arith.constant 0 : index
    %35 = vector.load %arg3[%c5, %c0_20, %c0_21] : memref<9x96x96xbf16, #tpu.memory_space<vmem>>, vector<1x96x96xbf16>
    %36 = vector.shape_cast %35 : vector<1x96x96xbf16> to vector<96x96xbf16>
    %cst_22 = arith.constant dense<0.000000e+00> : vector<80x96xf32>
    %37 = tpu.matmul %34, %36, %cst_22 {dimension_numbers = #tpu.dot_dimension_numbers<[1], [0], [0], [1], [0, 0, 1, 1], [], []>} : vector<80x96xbf16>, vector<96x96xbf16>, vector<80x96xf32> -> vector<80x96xf32>
    %38 = arith.addf %32, %37 : vector<80x96xf32>
    %39 = vector.extract_strided_slice %3 {offsets = [20, 0], sizes = [80, 96], strides = [1, 1]} : vector<110x96xf32> to vector<80x96xf32>
    %40 = arith.truncf %39 : vector<80x96xf32> to vector<80x96xbf16>
    %c6 = arith.constant 6 : index
    %c0_23 = arith.constant 0 : index
    %c0_24 = arith.constant 0 : index
    %41 = vector.load %arg3[%c6, %c0_23, %c0_24] : memref<9x96x96xbf16, #tpu.memory_space<vmem>>, vector<1x96x96xbf16>
    %42 = vector.shape_cast %41 : vector<1x96x96xbf16> to vector<96x96xbf16>
    %cst_25 = arith.constant dense<0.000000e+00> : vector<80x96xf32>
    %43 = tpu.matmul %40, %42, %cst_25 {dimension_numbers = #tpu.dot_dimension_numbers<[1], [0], [0], [1], [0, 0, 1, 1], [], []>} : vector<80x96xbf16>, vector<96x96xbf16>, vector<80x96xf32> -> vector<80x96xf32>
    %44 = arith.addf %38, %43 : vector<80x96xf32>
    %45 = vector.extract_strided_slice %3 {offsets = [21, 0], sizes = [80, 96], strides = [1, 1]} : vector<110x96xf32> to vector<80x96xf32>
    %46 = arith.truncf %45 : vector<80x96xf32> to vector<80x96xbf16>
    %c7 = arith.constant 7 : index
    %c0_26 = arith.constant 0 : index
    %c0_27 = arith.constant 0 : index
    %47 = vector.load %arg3[%c7, %c0_26, %c0_27] : memref<9x96x96xbf16, #tpu.memory_space<vmem>>, vector<1x96x96xbf16>
    %48 = vector.shape_cast %47 : vector<1x96x96xbf16> to vector<96x96xbf16>
    %cst_28 = arith.constant dense<0.000000e+00> : vector<80x96xf32>
    %49 = tpu.matmul %46, %48, %cst_28 {dimension_numbers = #tpu.dot_dimension_numbers<[1], [0], [0], [1], [0, 0, 1, 1], [], []>} : vector<80x96xbf16>, vector<96x96xbf16>, vector<80x96xf32> -> vector<80x96xf32>
    %50 = arith.addf %44, %49 : vector<80x96xf32>
    %51 = vector.extract_strided_slice %3 {offsets = [22, 0], sizes = [80, 96], strides = [1, 1]} : vector<110x96xf32> to vector<80x96xf32>
    %52 = arith.truncf %51 : vector<80x96xf32> to vector<80x96xbf16>
    %c8 = arith.constant 8 : index
    %c0_29 = arith.constant 0 : index
    %c0_30 = arith.constant 0 : index
    %53 = vector.load %arg3[%c8, %c0_29, %c0_30] : memref<9x96x96xbf16, #tpu.memory_space<vmem>>, vector<1x96x96xbf16>
    %54 = vector.shape_cast %53 : vector<1x96x96xbf16> to vector<96x96xbf16>
    %cst_31 = arith.constant dense<0.000000e+00> : vector<80x96xf32>
    %55 = tpu.matmul %52, %54, %cst_31 {dimension_numbers = #tpu.dot_dimension_numbers<[1], [0], [0], [1], [0, 0, 1, 1], [], []>} : vector<80x96xbf16>, vector<96x96xbf16>, vector<80x96xf32> -> vector<80x96xf32>
    %56 = arith.addf %50, %55 : vector<80x96xf32>
    %c0_32 = arith.constant 0 : index
    %c0_33 = arith.constant 0 : index
    %57 = vector.load %arg4[%c0_32, %c0_33] : memref<1x96xf32, #tpu.memory_space<vmem>>, vector<1x96xf32>
    %58 = vector.broadcast %57 : vector<1x96xf32> to vector<80x96xf32>
    %59 = arith.mulf %56, %58 : vector<80x96xf32>
    %c0_34 = arith.constant 0 : index
    %c0_35 = arith.constant 0 : index
    %60 = vector.load %arg5[%c0_34, %c0_35] : memref<1x96xf32, #tpu.memory_space<vmem>>, vector<1x96xf32>
    %61 = vector.broadcast %60 : vector<1x96xf32> to vector<80x96xf32>
    %62 = arith.addf %59, %61 : vector<80x96xf32>
    %cst_36 = arith.constant 0.000000e+00 : f32
    %63 = vector.broadcast %cst_36 : f32 to vector<80x96xf32>
    %64 = arith.maximumf %62, %63 : vector<80x96xf32>
    %c0_37 = arith.constant 0 : index
    %c0_38 = arith.constant 0 : index
    %c0_39 = arith.constant 0 : index
    %65 = vector.load %arg6[%c0_37, %c0_38, %c0_39] : memref<1x80x96xf32, #tpu.memory_space<vmem>>, vector<1x80x96xf32>
    %66 = vector.shape_cast %65 : vector<1x80x96xf32> to vector<80x96xf32>
    %67 = vector.shape_cast %64 : vector<80x96xf32> to vector<1x80x96xf32>
    tpu.vector_store %arg6[%c0_37, %c0_38, %c0_39], %67 {strides = array<i32>} : memref<1x80x96xf32, #tpu.memory_space<vmem>>, vector<1x80x96xf32>,
    return
  }
  func.func @transform_0(%arg0: i32) -> (i32, i32, i32) {
    %c0_i32 = arith.constant 0 : i32
    %c0_i32_0 = arith.constant 0 : i32
    %c0_i32_1 = arith.constant 0 : i32
    return %arg0, %c0_i32, %c0_i32_0 : i32, i32, i32
  }
  func.func @transform_1(%arg0: i32) -> (i32, i32) {
    %c0_i32 = arith.constant 0 : i32
    %c0_i32_0 = arith.constant 0 : i32
    %c0_i32_1 = arith.constant 0 : i32
    return %c0_i32, %c0_i32_0 : i32, i32
  }
  func.func @transform_2(%arg0: i32) -> (i32, i32, i32) {
    %c0_i32 = arith.constant 0 : i32
    %c0_i32_0 = arith.constant 0 : i32
    %c0_i32_1 = arith.constant 0 : i32
    %c0_i32_2 = arith.constant 0 : i32
    return %c0_i32, %c0_i32_0, %c0_i32_1 : i32, i32, i32
  }
  func.func @transform_3(%arg0: i32) -> (i32, i32) {
    %c0_i32 = arith.constant 0 : i32
    %c0_i32_0 = arith.constant 0 : i32
    %c0_i32_1 = arith.constant 0 : i32
    return %c0_i32, %c0_i32_0 : i32, i32
  }
  func.func @transform_4(%arg0: i32) -> (i32, i32) {
    %c0_i32 = arith.constant 0 : i32
    %c0_i32_0 = arith.constant 0 : i32
    %c0_i32_1 = arith.constant 0 : i32
    return %c0_i32, %c0_i32_0 : i32, i32
  }
  func.func @transform_5(%arg0: i32) -> (i32, i32, i32) {
    %c0_i32 = arith.constant 0 : i32
    %c0_i32_0 = arith.constant 0 : i32
    %c0_i32_1 = arith.constant 0 : i32
    return %arg0, %c0_i32, %c0_i32_0 : i32, i32, i32
  }
}

module attributes {stable_mosaic.version = 11 : i64} {
  func.func @_convbr_kernel(%arg0: i32, %arg1: memref<1x80x32xf32, #tpu.memory_space<vmem>>, %arg2: memref<1x80x64xf32, #tpu.memory_space<vmem>>, %arg3: memref<110x80xf32, #tpu.memory_space<vmem>>, %arg4: memref<110x80xf32, #tpu.memory_space<vmem>>, %arg5: memref<9x32x96xbf16, #tpu.memory_space<vmem>>, %arg6: memref<9x64x96xbf16, #tpu.memory_space<vmem>>, %arg7: memref<1x96xf32, #tpu.memory_space<vmem>>, %arg8: memref<1x96xf32, #tpu.memory_space<vmem>>, %arg9: memref<1x80x96xf32, #tpu.memory_space<vmem>>) attributes {dimension_semantics = [#tpu.dimension_semantics<parallel>], iteration_bounds = array<i64: 2>, scalar_prefetch = 0 : i64, scratch_operands = 0 : i64, tpu.core_type = #tpu.core_type<tc>, window_params = [{transform_indices = @transform_0, window_bounds = array<i64: 1, 80, 32>}, {transform_indices = @transform_1, window_bounds = array<i64: 1, 80, 64>}, {pipeline_mode = #tpu.pipeline_mode<synchronous>, transform_indices = @transform_2, window_bounds = array<i64: 110, 80>}, {pipeline_mode = #tpu.pipeline_mode<synchronous>, transform_indices = @transform_3, window_bounds = array<i64: 110, 80>}, {pipeline_mode = #tpu.pipeline_mode<synchronous>, transform_indices = @transform_4, window_bounds = array<i64: 9, 32, 96>}, {pipeline_mode = #tpu.pipeline_mode<synchronous>, transform_indices = @transform_5, window_bounds = array<i64: 9, 64, 96>}, {pipeline_mode = #tpu.pipeline_mode<synchronous>, transform_indices = @transform_6, window_bounds = array<i64: 1, 96>}, {pipeline_mode = #tpu.pipeline_mode<synchronous>, transform_indices = @transform_7, window_bounds = array<i64: 1, 96>}, {transform_indices = @transform_8, window_bounds = array<i64: 1, 80, 96>}]} {
    %c0 = arith.constant 0 : index
    %c0_0 = arith.constant 0 : index
    %0 = vector.load %arg3[%c0, %c0_0] : memref<110x80xf32, #tpu.memory_space<vmem>>, vector<110x80xf32>
    %c0_1 = arith.constant 0 : index
    %c0_2 = arith.constant 0 : index
    %c0_3 = arith.constant 0 : index
    %1 = vector.load %arg1[%c0_1, %c0_2, %c0_3] : memref<1x80x32xf32, #tpu.memory_space<vmem>>, vector<1x80x32xf32>
    %2 = vector.shape_cast %1 : vector<1x80x32xf32> to vector<80x32xf32>
    %cst = arith.constant dense<0.000000e+00> : vector<110x32xf32>
    %3 = tpu.matmul %0, %2, %cst {dimension_numbers = #tpu.dot_dimension_numbers<[1], [0], [0], [1], [0, 0, 1, 1], [], []>} : vector<110x80xf32>, vector<80x32xf32>, vector<110x32xf32> -> vector<110x32xf32>
    %4 = vector.extract_strided_slice %3 {offsets = [0, 0], sizes = [80, 32], strides = [1, 1]} : vector<110x32xf32> to vector<80x32xf32>
    %5 = arith.truncf %4 : vector<80x32xf32> to vector<80x32xbf16>
    %c0_4 = arith.constant 0 : index
    %c0_5 = arith.constant 0 : index
    %c0_6 = arith.constant 0 : index
    %6 = vector.load %arg5[%c0_4, %c0_5, %c0_6] : memref<9x32x96xbf16, #tpu.memory_space<vmem>>, vector<1x32x96xbf16>
    %7 = vector.shape_cast %6 : vector<1x32x96xbf16> to vector<32x96xbf16>
    %cst_7 = arith.constant dense<0.000000e+00> : vector<80x96xf32>
    %8 = tpu.matmul %5, %7, %cst_7 {dimension_numbers = #tpu.dot_dimension_numbers<[1], [0], [0], [1], [0, 0, 1, 1], [], []>} : vector<80x32xbf16>, vector<32x96xbf16>, vector<80x96xf32> -> vector<80x96xf32>
    %9 = vector.extract_strided_slice %3 {offsets = [1, 0], sizes = [80, 32], strides = [1, 1]} : vector<110x32xf32> to vector<80x32xf32>
    %10 = arith.truncf %9 : vector<80x32xf32> to vector<80x32xbf16>
    %c1 = arith.constant 1 : index
    %c0_8 = arith.constant 0 : index
    %c0_9 = arith.constant 0 : index
    %11 = vector.load %arg5[%c1, %c0_8, %c0_9] : memref<9x32x96xbf16, #tpu.memory_space<vmem>>, vector<1x32x96xbf16>
    %12 = vector.shape_cast %11 : vector<1x32x96xbf16> to vector<32x96xbf16>
    %cst_10 = arith.constant dense<0.000000e+00> : vector<80x96xf32>
    %13 = tpu.matmul %10, %12, %cst_10 {dimension_numbers = #tpu.dot_dimension_numbers<[1], [0], [0], [1], [0, 0, 1, 1], [], []>} : vector<80x32xbf16>, vector<32x96xbf16>, vector<80x96xf32> -> vector<80x96xf32>
    %14 = arith.addf %8, %13 : vector<80x96xf32>
    %15 = vector.extract_strided_slice %3 {offsets = [2, 0], sizes = [80, 32], strides = [1, 1]} : vector<110x32xf32> to vector<80x32xf32>
    %16 = arith.truncf %15 : vector<80x32xf32> to vector<80x32xbf16>
    %c2 = arith.constant 2 : index
    %c0_11 = arith.constant 0 : index
    %c0_12 = arith.constant 0 : index
    %17 = vector.load %arg5[%c2, %c0_11, %c0_12] : memref<9x32x96xbf16, #tpu.memory_space<vmem>>, vector<1x32x96xbf16>
    %18 = vector.shape_cast %17 : vector<1x32x96xbf16> to vector<32x96xbf16>
    %cst_13 = arith.constant dense<0.000000e+00> : vector<80x96xf32>
    %19 = tpu.matmul %16, %18, %cst_13 {dimension_numbers = #tpu.dot_dimension_numbers<[1], [0], [0], [1], [0, 0, 1, 1], [], []>} : vector<80x32xbf16>, vector<32x96xbf16>, vector<80x96xf32> -> vector<80x96xf32>
    %20 = arith.addf %14, %19 : vector<80x96xf32>
    %21 = vector.extract_strided_slice %3 {offsets = [10, 0], sizes = [80, 32], strides = [1, 1]} : vector<110x32xf32> to vector<80x32xf32>
    %22 = arith.truncf %21 : vector<80x32xf32> to vector<80x32xbf16>
    %c3 = arith.constant 3 : index
    %c0_14 = arith.constant 0 : index
    %c0_15 = arith.constant 0 : index
    %23 = vector.load %arg5[%c3, %c0_14, %c0_15] : memref<9x32x96xbf16, #tpu.memory_space<vmem>>, vector<1x32x96xbf16>
    %24 = vector.shape_cast %23 : vector<1x32x96xbf16> to vector<32x96xbf16>
    %cst_16 = arith.constant dense<0.000000e+00> : vector<80x96xf32>
    %25 = tpu.matmul %22, %24, %cst_16 {dimension_numbers = #tpu.dot_dimension_numbers<[1], [0], [0], [1], [0, 0, 1, 1], [], []>} : vector<80x32xbf16>, vector<32x96xbf16>, vector<80x96xf32> -> vector<80x96xf32>
    %26 = arith.addf %20, %25 : vector<80x96xf32>
    %27 = vector.extract_strided_slice %3 {offsets = [11, 0], sizes = [80, 32], strides = [1, 1]} : vector<110x32xf32> to vector<80x32xf32>
    %28 = arith.truncf %27 : vector<80x32xf32> to vector<80x32xbf16>
    %c4 = arith.constant 4 : index
    %c0_17 = arith.constant 0 : index
    %c0_18 = arith.constant 0 : index
    %29 = vector.load %arg5[%c4, %c0_17, %c0_18] : memref<9x32x96xbf16, #tpu.memory_space<vmem>>, vector<1x32x96xbf16>
    %30 = vector.shape_cast %29 : vector<1x32x96xbf16> to vector<32x96xbf16>
    %cst_19 = arith.constant dense<0.000000e+00> : vector<80x96xf32>
    %31 = tpu.matmul %28, %30, %cst_19 {dimension_numbers = #tpu.dot_dimension_numbers<[1], [0], [0], [1], [0, 0, 1, 1], [], []>} : vector<80x32xbf16>, vector<32x96xbf16>, vector<80x96xf32> -> vector<80x96xf32>
    %32 = arith.addf %26, %31 : vector<80x96xf32>
    %33 = vector.extract_strided_slice %3 {offsets = [12, 0], sizes = [80, 32], strides = [1, 1]} : vector<110x32xf32> to vector<80x32xf32>
    %34 = arith.truncf %33 : vector<80x32xf32> to vector<80x32xbf16>
    %c5 = arith.constant 5 : index
    %c0_20 = arith.constant 0 : index
    %c0_21 = arith.constant 0 : index
    %35 = vector.load %arg5[%c5, %c0_20, %c0_21] : memref<9x32x96xbf16, #tpu.memory_space<vmem>>, vector<1x32x96xbf16>
    %36 = vector.shape_cast %35 : vector<1x32x96xbf16> to vector<32x96xbf16>
    %cst_22 = arith.constant dense<0.000000e+00> : vector<80x96xf32>
    %37 = tpu.matmul %34, %36, %cst_22 {dimension_numbers = #tpu.dot_dimension_numbers<[1], [0], [0], [1], [0, 0, 1, 1], [], []>} : vector<80x32xbf16>, vector<32x96xbf16>, vector<80x96xf32> -> vector<80x96xf32>
    %38 = arith.addf %32, %37 : vector<80x96xf32>
    %39 = vector.extract_strided_slice %3 {offsets = [20, 0], sizes = [80, 32], strides = [1, 1]} : vector<110x32xf32> to vector<80x32xf32>
    %40 = arith.truncf %39 : vector<80x32xf32> to vector<80x32xbf16>
    %c6 = arith.constant 6 : index
    %c0_23 = arith.constant 0 : index
    %c0_24 = arith.constant 0 : index
    %41 = vector.load %arg5[%c6, %c0_23, %c0_24] : memref<9x32x96xbf16, #tpu.memory_space<vmem>>, vector<1x32x96xbf16>
    %42 = vector.shape_cast %41 : vector<1x32x96xbf16> to vector<32x96xbf16>
    %cst_25 = arith.constant dense<0.000000e+00> : vector<80x96xf32>
    %43 = tpu.matmul %40, %42, %cst_25 {dimension_numbers = #tpu.dot_dimension_numbers<[1], [0], [0], [1], [0, 0, 1, 1], [], []>} : vector<80x32xbf16>, vector<32x96xbf16>, vector<80x96xf32> -> vector<80x96xf32>
    %44 = arith.addf %38, %43 : vector<80x96xf32>
    %45 = vector.extract_strided_slice %3 {offsets = [21, 0], sizes = [80, 32], strides = [1, 1]} : vector<110x32xf32> to vector<80x32xf32>
    %46 = arith.truncf %45 : vector<80x32xf32> to vector<80x32xbf16>
    %c7 = arith.constant 7 : index
    %c0_26 = arith.constant 0 : index
    %c0_27 = arith.constant 0 : index
    %47 = vector.load %arg5[%c7, %c0_26, %c0_27] : memref<9x32x96xbf16, #tpu.memory_space<vmem>>, vector<1x32x96xbf16>
    %48 = vector.shape_cast %47 : vector<1x32x96xbf16> to vector<32x96xbf16>
    %cst_28 = arith.constant dense<0.000000e+00> : vector<80x96xf32>
    %49 = tpu.matmul %46, %48, %cst_28 {dimension_numbers = #tpu.dot_dimension_numbers<[1], [0], [0], [1], [0, 0, 1, 1], [], []>} : vector<80x32xbf16>, vector<32x96xbf16>, vector<80x96xf32> -> vector<80x96xf32>
    %50 = arith.addf %44, %49 : vector<80x96xf32>
    %51 = vector.extract_strided_slice %3 {offsets = [22, 0], sizes = [80, 32], strides = [1, 1]} : vector<110x32xf32> to vector<80x32xf32>
    %52 = arith.truncf %51 : vector<80x32xf32> to vector<80x32xbf16>
    %c8 = arith.constant 8 : index
    %c0_29 = arith.constant 0 : index
    %c0_30 = arith.constant 0 : index
    %53 = vector.load %arg5[%c8, %c0_29, %c0_30] : memref<9x32x96xbf16, #tpu.memory_space<vmem>>, vector<1x32x96xbf16>
    %54 = vector.shape_cast %53 : vector<1x32x96xbf16> to vector<32x96xbf16>
    %cst_31 = arith.constant dense<0.000000e+00> : vector<80x96xf32>
    %55 = tpu.matmul %52, %54, %cst_31 {dimension_numbers = #tpu.dot_dimension_numbers<[1], [0], [0], [1], [0, 0, 1, 1], [], []>} : vector<80x32xbf16>, vector<32x96xbf16>, vector<80x96xf32> -> vector<80x96xf32>
    %56 = arith.addf %50, %55 : vector<80x96xf32>
    %c0_32 = arith.constant 0 : index
    %c0_33 = arith.constant 0 : index
    %57 = vector.load %arg4[%c0_32, %c0_33] : memref<110x80xf32, #tpu.memory_space<vmem>>, vector<110x80xf32>
    %c0_34 = arith.constant 0 : index
    %c0_35 = arith.constant 0 : index
    %c0_36 = arith.constant 0 : index
    %58 = vector.load %arg2[%c0_34, %c0_35, %c0_36] : memref<1x80x64xf32, #tpu.memory_space<vmem>>, vector<1x80x64xf32>
    %59 = vector.shape_cast %58 : vector<1x80x64xf32> to vector<80x64xf32>
    %cst_37 = arith.constant dense<0.000000e+00> : vector<110x64xf32>
    %60 = tpu.matmul %57, %59, %cst_37 {dimension_numbers = #tpu.dot_dimension_numbers<[1], [0], [0], [1], [0, 0, 1, 1], [], []>} : vector<110x80xf32>, vector<80x64xf32>, vector<110x64xf32> -> vector<110x64xf32>
    %61 = vector.extract_strided_slice %60 {offsets = [0, 0], sizes = [80, 64], strides = [1, 1]} : vector<110x64xf32> to vector<80x64xf32>
    %62 = arith.truncf %61 : vector<80x64xf32> to vector<80x64xbf16>
    %c0_38 = arith.constant 0 : index
    %c0_39 = arith.constant 0 : index
    %c0_40 = arith.constant 0 : index
    %63 = vector.load %arg6[%c0_38, %c0_39, %c0_40] : memref<9x64x96xbf16, #tpu.memory_space<vmem>>, vector<1x64x96xbf16>
    %64 = vector.shape_cast %63 : vector<1x64x96xbf16> to vector<64x96xbf16>
    %cst_41 = arith.constant dense<0.000000e+00> : vector<80x96xf32>
    %65 = tpu.matmul %62, %64, %cst_41 {dimension_numbers = #tpu.dot_dimension_numbers<[1], [0], [0], [1], [0, 0, 1, 1], [], []>} : vector<80x64xbf16>, vector<64x96xbf16>, vector<80x96xf32> -> vector<80x96xf32>
    %66 = arith.addf %56, %65 : vector<80x96xf32>
    %67 = vector.extract_strided_slice %60 {offsets = [1, 0], sizes = [80, 64], strides = [1, 1]} : vector<110x64xf32> to vector<80x64xf32>
    %68 = arith.truncf %67 : vector<80x64xf32> to vector<80x64xbf16>
    %c1_42 = arith.constant 1 : index
    %c0_43 = arith.constant 0 : index
    %c0_44 = arith.constant 0 : index
    %69 = vector.load %arg6[%c1_42, %c0_43, %c0_44] : memref<9x64x96xbf16, #tpu.memory_space<vmem>>, vector<1x64x96xbf16>
    %70 = vector.shape_cast %69 : vector<1x64x96xbf16> to vector<64x96xbf16>
    %cst_45 = arith.constant dense<0.000000e+00> : vector<80x96xf32>
    %71 = tpu.matmul %68, %70, %cst_45 {dimension_numbers = #tpu.dot_dimension_numbers<[1], [0], [0], [1], [0, 0, 1, 1], [], []>} : vector<80x64xbf16>, vector<64x96xbf16>, vector<80x96xf32> -> vector<80x96xf32>
    %72 = arith.addf %66, %71 : vector<80x96xf32>
    %73 = vector.extract_strided_slice %60 {offsets = [2, 0], sizes = [80, 64], strides = [1, 1]} : vector<110x64xf32> to vector<80x64xf32>
    %74 = arith.truncf %73 : vector<80x64xf32> to vector<80x64xbf16>
    %c2_46 = arith.constant 2 : index
    %c0_47 = arith.constant 0 : index
    %c0_48 = arith.constant 0 : index
    %75 = vector.load %arg6[%c2_46, %c0_47, %c0_48] : memref<9x64x96xbf16, #tpu.memory_space<vmem>>, vector<1x64x96xbf16>
    %76 = vector.shape_cast %75 : vector<1x64x96xbf16> to vector<64x96xbf16>
    %cst_49 = arith.constant dense<0.000000e+00> : vector<80x96xf32>
    %77 = tpu.matmul %74, %76, %cst_49 {dimension_numbers = #tpu.dot_dimension_numbers<[1], [0], [0], [1], [0, 0, 1, 1], [], []>} : vector<80x64xbf16>, vector<64x96xbf16>, vector<80x96xf32> -> vector<80x96xf32>
    %78 = arith.addf %72, %77 : vector<80x96xf32>
    %79 = vector.extract_strided_slice %60 {offsets = [10, 0], sizes = [80, 64], strides = [1, 1]} : vector<110x64xf32> to vector<80x64xf32>
    %80 = arith.truncf %79 : vector<80x64xf32> to vector<80x64xbf16>
    %c3_50 = arith.constant 3 : index
    %c0_51 = arith.constant 0 : index
    %c0_52 = arith.constant 0 : index
    %81 = vector.load %arg6[%c3_50, %c0_51, %c0_52] : memref<9x64x96xbf16, #tpu.memory_space<vmem>>, vector<1x64x96xbf16>
    %82 = vector.shape_cast %81 : vector<1x64x96xbf16> to vector<64x96xbf16>
    %cst_53 = arith.constant dense<0.000000e+00> : vector<80x96xf32>
    %83 = tpu.matmul %80, %82, %cst_53 {dimension_numbers = #tpu.dot_dimension_numbers<[1], [0], [0], [1], [0, 0, 1, 1], [], []>} : vector<80x64xbf16>, vector<64x96xbf16>, vector<80x96xf32> -> vector<80x96xf32>
    %84 = arith.addf %78, %83 : vector<80x96xf32>
    %85 = vector.extract_strided_slice %60 {offsets = [11, 0], sizes = [80, 64], strides = [1, 1]} : vector<110x64xf32> to vector<80x64xf32>
    %86 = arith.truncf %85 : vector<80x64xf32> to vector<80x64xbf16>
    %c4_54 = arith.constant 4 : index
    %c0_55 = arith.constant 0 : index
    %c0_56 = arith.constant 0 : index
    %87 = vector.load %arg6[%c4_54, %c0_55, %c0_56] : memref<9x64x96xbf16, #tpu.memory_space<vmem>>, vector<1x64x96xbf16>
    %88 = vector.shape_cast %87 : vector<1x64x96xbf16> to vector<64x96xbf16>
    %cst_57 = arith.constant dense<0.000000e+00> : vector<80x96xf32>
    %89 = tpu.matmul %86, %88, %cst_57 {dimension_numbers = #tpu.dot_dimension_numbers<[1], [0], [0], [1], [0, 0, 1, 1], [], []>} : vector<80x64xbf16>, vector<64x96xbf16>, vector<80x96xf32> -> vector<80x96xf32>
    %90 = arith.addf %84, %89 : vector<80x96xf32>
    %91 = vector.extract_strided_slice %60 {offsets = [12, 0], sizes = [80, 64], strides = [1, 1]} : vector<110x64xf32> to vector<80x64xf32>
    %92 = arith.truncf %91 : vector<80x64xf32> to vector<80x64xbf16>
    %c5_58 = arith.constant 5 : index
    %c0_59 = arith.constant 0 : index
    %c0_60 = arith.constant 0 : index
    %93 = vector.load %arg6[%c5_58, %c0_59, %c0_60] : memref<9x64x96xbf16, #tpu.memory_space<vmem>>, vector<1x64x96xbf16>
    %94 = vector.shape_cast %93 : vector<1x64x96xbf16> to vector<64x96xbf16>
    %cst_61 = arith.constant dense<0.000000e+00> : vector<80x96xf32>
    %95 = tpu.matmul %92, %94, %cst_61 {dimension_numbers = #tpu.dot_dimension_numbers<[1], [0], [0], [1], [0, 0, 1, 1], [], []>} : vector<80x64xbf16>, vector<64x96xbf16>, vector<80x96xf32> -> vector<80x96xf32>
    %96 = arith.addf %90, %95 : vector<80x96xf32>
    %97 = vector.extract_strided_slice %60 {offsets = [20, 0], sizes = [80, 64], strides = [1, 1]} : vector<110x64xf32> to vector<80x64xf32>
    %98 = arith.truncf %97 : vector<80x64xf32> to vector<80x64xbf16>
    %c6_62 = arith.constant 6 : index
    %c0_63 = arith.constant 0 : index
    %c0_64 = arith.constant 0 : index
    %99 = vector.load %arg6[%c6_62, %c0_63, %c0_64] : memref<9x64x96xbf16, #tpu.memory_space<vmem>>, vector<1x64x96xbf16>
    %100 = vector.shape_cast %99 : vector<1x64x96xbf16> to vector<64x96xbf16>
    %cst_65 = arith.constant dense<0.000000e+00> : vector<80x96xf32>
    %101 = tpu.matmul %98, %100, %cst_65 {dimension_numbers = #tpu.dot_dimension_numbers<[1], [0], [0], [1], [0, 0, 1, 1], [], []>} : vector<80x64xbf16>, vector<64x96xbf16>, vector<80x96xf32> -> vector<80x96xf32>
    %102 = arith.addf %96, %101 : vector<80x96xf32>
    %103 = vector.extract_strided_slice %60 {offsets = [21, 0], sizes = [80, 64], strides = [1, 1]} : vector<110x64xf32> to vector<80x64xf32>
    %104 = arith.truncf %103 : vector<80x64xf32> to vector<80x64xbf16>
    %c7_66 = arith.constant 7 : index
    %c0_67 = arith.constant 0 : index
    %c0_68 = arith.constant 0 : index
    %105 = vector.load %arg6[%c7_66, %c0_67, %c0_68] : memref<9x64x96xbf16, #tpu.memory_space<vmem>>, vector<1x64x96xbf16>
    %106 = vector.shape_cast %105 : vector<1x64x96xbf16> to vector<64x96xbf16>
    %cst_69 = arith.constant dense<0.000000e+00> : vector<80x96xf32>
    %107 = tpu.matmul %104, %106, %cst_69 {dimension_numbers = #tpu.dot_dimension_numbers<[1], [0], [0], [1], [0, 0, 1, 1], [], []>} : vector<80x64xbf16>, vector<64x96xbf16>, vector<80x96xf32> -> vector<80x96xf32>
    %108 = arith.addf %102, %107 : vector<80x96xf32>
    %109 = vector.extract_strided_slice %60 {offsets = [22, 0], sizes = [80, 64], strides = [1, 1]} : vector<110x64xf32> to vector<80x64xf32>
    %110 = arith.truncf %109 : vector<80x64xf32> to vector<80x64xbf16>
    %c8_70 = arith.constant 8 : index
    %c0_71 = arith.constant 0 : index
    %c0_72 = arith.constant 0 : index
    %111 = vector.load %arg6[%c8_70, %c0_71, %c0_72] : memref<9x64x96xbf16, #tpu.memory_space<vmem>>, vector<1x64x96xbf16>
    %112 = vector.shape_cast %111 : vector<1x64x96xbf16> to vector<64x96xbf16>
    %cst_73 = arith.constant dense<0.000000e+00> : vector<80x96xf32>
    %113 = tpu.matmul %110, %112, %cst_73 {dimension_numbers = #tpu.dot_dimension_numbers<[1], [0], [0], [1], [0, 0, 1, 1], [], []>} : vector<80x64xbf16>, vector<64x96xbf16>, vector<80x96xf32> -> vector<80x96xf32>
    %114 = arith.addf %108, %113 : vector<80x96xf32>
    %c0_74 = arith.constant 0 : index
    %c0_75 = arith.constant 0 : index
    %115 = vector.load %arg7[%c0_74, %c0_75] : memref<1x96xf32, #tpu.memory_space<vmem>>, vector<1x96xf32>
    %116 = vector.broadcast %115 : vector<1x96xf32> to vector<80x96xf32>
    %117 = arith.mulf %114, %116 : vector<80x96xf32>
    %c0_76 = arith.constant 0 : index
    %c0_77 = arith.constant 0 : index
    %118 = vector.load %arg8[%c0_76, %c0_77] : memref<1x96xf32, #tpu.memory_space<vmem>>, vector<1x96xf32>
    %119 = vector.broadcast %118 : vector<1x96xf32> to vector<80x96xf32>
    %120 = arith.addf %117, %119 : vector<80x96xf32>
    %cst_78 = arith.constant 0.000000e+00 : f32
    %121 = vector.broadcast %cst_78 : f32 to vector<80x96xf32>
    %122 = arith.maximumf %120, %121 : vector<80x96xf32>
    %c0_79 = arith.constant 0 : index
    %c0_80 = arith.constant 0 : index
    %c0_81 = arith.constant 0 : index
    %123 = vector.load %arg9[%c0_79, %c0_80, %c0_81] : memref<1x80x96xf32, #tpu.memory_space<vmem>>, vector<1x80x96xf32>
    %124 = vector.shape_cast %123 : vector<1x80x96xf32> to vector<80x96xf32>
    %125 = vector.shape_cast %122 : vector<80x96xf32> to vector<1x80x96xf32>
    tpu.vector_store %arg9[%c0_79, %c0_80, %c0_81], %125 {strides = array<i32>} : memref<1x80x96xf32, #tpu.memory_space<vmem>>, vector<1x80x96xf32>,
    return
  }
  func.func @transform_0(%arg0: i32) -> (i32, i32, i32) {
    %c0_i32 = arith.constant 0 : i32
    %c0_i32_0 = arith.constant 0 : i32
    %c0_i32_1 = arith.constant 0 : i32
    return %arg0, %c0_i32, %c0_i32_0 : i32, i32, i32
  }
  func.func @transform_1(%arg0: i32) -> (i32, i32, i32) {
    %c0_i32 = arith.constant 0 : i32
    %c0_i32_0 = arith.constant 0 : i32
    %c0_i32_1 = arith.constant 0 : i32
    return %arg0, %c0_i32, %c0_i32_0 : i32, i32, i32
  }
  func.func @transform_2(%arg0: i32) -> (i32, i32) {
    %c0_i32 = arith.constant 0 : i32
    %c0_i32_0 = arith.constant 0 : i32
    %c0_i32_1 = arith.constant 0 : i32
    return %c0_i32, %c0_i32_0 : i32, i32
  }
  func.func @transform_3(%arg0: i32) -> (i32, i32) {
    %c0_i32 = arith.constant 0 : i32
    %c0_i32_0 = arith.constant 0 : i32
    %c0_i32_1 = arith.constant 0 : i32
    return %c0_i32, %c0_i32_0 : i32, i32
  }
  func.func @transform_4(%arg0: i32) -> (i32, i32, i32) {
    %c0_i32 = arith.constant 0 : i32
    %c0_i32_0 = arith.constant 0 : i32
    %c0_i32_1 = arith.constant 0 : i32
    %c0_i32_2 = arith.constant 0 : i32
    return %c0_i32, %c0_i32_0, %c0_i32_1 : i32, i32, i32
  }
  func.func @transform_5(%arg0: i32) -> (i32, i32, i32) {
    %c0_i32 = arith.constant 0 : i32
    %c0_i32_0 = arith.constant 0 : i32
    %c0_i32_1 = arith.constant 0 : i32
    %c0_i32_2 = arith.constant 0 : i32
    return %c0_i32, %c0_i32_0, %c0_i32_1 : i32, i32, i32
  }
  func.func @transform_6(%arg0: i32) -> (i32, i32) {
    %c0_i32 = arith.constant 0 : i32
    %c0_i32_0 = arith.constant 0 : i32
    %c0_i32_1 = arith.constant 0 : i32
    return %c0_i32, %c0_i32_0 : i32, i32
  }
  func.func @transform_7(%arg0: i32) -> (i32, i32) {
    %c0_i32 = arith.constant 0 : i32
    %c0_i32_0 = arith.constant 0 : i32
    %c0_i32_1 = arith.constant 0 : i32
    return %c0_i32, %c0_i32_0 : i32, i32
  }
  func.func @transform_8(%arg0: i32) -> (i32, i32, i32) {
    %c0_i32 = arith.constant 0 : i32
    %c0_i32_0 = arith.constant 0 : i32
    %c0_i32_1 = arith.constant 0 : i32
    return %arg0, %c0_i32, %c0_i32_0 : i32, i32, i32
  }
}

module attributes {stable_mosaic.version = 11 : i64} {
  func.func @_head_kernel(%arg0: i32, %arg1: memref<1x8x960xf32, #tpu.memory_space<vmem>>, %arg2: memref<960x64xf32, #tpu.memory_space<vmem>>, %arg3: memref<64x8xf32, #tpu.memory_space<vmem>>, %arg4: memref<1x1xf32, #tpu.memory_space<vmem>>, %arg5: memref<1x64x64xf32, #tpu.memory_space<vmem>>) attributes {dimension_semantics = [#tpu.dimension_semantics<parallel>], iteration_bounds = array<i64: 2>, scalar_prefetch = 0 : i64, scratch_operands = 0 : i64, tpu.core_type = #tpu.core_type<tc>, window_params = [{transform_indices = @transform_0, window_bounds = array<i64: 1, 8, 960>}, {pipeline_mode = #tpu.pipeline_mode<synchronous>, transform_indices = @transform_1, window_bounds = array<i64: 960, 64>}, {pipeline_mode = #tpu.pipeline_mode<synchronous>, transform_indices = @transform_2, window_bounds = array<i64: 64, 8>}, {pipeline_mode = #tpu.pipeline_mode<synchronous>, transform_indices = @transform_3, window_bounds = array<i64: 1, 1>}, {transform_indices = @transform_4, window_bounds = array<i64: 1, 64, 64>}]} {
    %c0 = arith.constant 0 : index
    %c0_0 = arith.constant 0 : index
    %c0_1 = arith.constant 0 : index
    %0 = vector.load %arg1[%c0, %c0_0, %c0_1] : memref<1x8x960xf32, #tpu.memory_space<vmem>>, vector<1x8x960xf32>
    %1 = vector.shape_cast %0 : vector<1x8x960xf32> to vector<8x960xf32>
    %c0_2 = arith.constant 0 : index
    %c0_3 = arith.constant 0 : index
    %2 = vector.load %arg2[%c0_2, %c0_3] : memref<960x64xf32, #tpu.memory_space<vmem>>, vector<960x64xf32>
    %cst = arith.constant dense<0.000000e+00> : vector<8x64xf32>
    %3 = tpu.matmul %1, %2, %cst {dimension_numbers = #tpu.dot_dimension_numbers<[1], [0], [0], [1], [0, 0, 1, 1], [], []>} : vector<8x960xf32>, vector<960x64xf32>, vector<8x64xf32> -> vector<8x64xf32>
    %c0_4 = arith.constant 0 : index
    %c0_5 = arith.constant 0 : index
    %4 = vector.load %arg3[%c0_4, %c0_5] : memref<64x8xf32, #tpu.memory_space<vmem>>, vector<64x8xf32>
    %cst_6 = arith.constant dense<0.000000e+00> : vector<64x64xf32>
    %5 = tpu.matmul %4, %3, %cst_6 {dimension_numbers = #tpu.dot_dimension_numbers<[1], [0], [0], [1], [0, 0, 1, 1], [], []>} : vector<64x8xf32>, vector<8x64xf32>, vector<64x64xf32> -> vector<64x64xf32>
    %c0_7 = arith.constant 0 : index
    %c0_8 = arith.constant 0 : index
    %6 = vector.load %arg4[%c0_7, %c0_8] : memref<1x1xf32, #tpu.memory_space<vmem>>, vector<1x1xf32>
    %7 = vector.broadcast %6 : vector<1x1xf32> to vector<64x64xf32>
    %8 = arith.addf %5, %7 : vector<64x64xf32>
    %c0_9 = arith.constant 0 : index
    %c0_10 = arith.constant 0 : index
    %c0_11 = arith.constant 0 : index
    %9 = vector.load %arg5[%c0_9, %c0_10, %c0_11] : memref<1x64x64xf32, #tpu.memory_space<vmem>>, vector<1x64x64xf32>
    %10 = vector.shape_cast %9 : vector<1x64x64xf32> to vector<64x64xf32>
    %11 = vector.shape_cast %8 : vector<64x64xf32> to vector<1x64x64xf32>
    tpu.vector_store %arg5[%c0_9, %c0_10, %c0_11], %11 {strides = array<i32>} : memref<1x64x64xf32, #tpu.memory_space<vmem>>, vector<1x64x64xf32>,
    return
  }
  func.func @transform_0(%arg0: i32) -> (i32, i32, i32) {
    %c0_i32 = arith.constant 0 : i32
    %c0_i32_0 = arith.constant 0 : i32
    %c0_i32_1 = arith.constant 0 : i32
    return %arg0, %c0_i32, %c0_i32_0 : i32, i32, i32
  }
  func.func @transform_1(%arg0: i32) -> (i32, i32) {
    %c0_i32 = arith.constant 0 : i32
    %c0_i32_0 = arith.constant 0 : i32
    %c0_i32_1 = arith.constant 0 : i32
    return %c0_i32, %c0_i32_0 : i32, i32
  }
  func.func @transform_2(%arg0: i32) -> (i32, i32) {
    %c0_i32 = arith.constant 0 : i32
    %c0_i32_0 = arith.constant 0 : i32
    %c0_i32_1 = arith.constant 0 : i32
    return %c0_i32, %c0_i32_0 : i32, i32
  }
  func.func @transform_3(%arg0: i32) -> (i32, i32) {
    %c0_i32 = arith.constant 0 : i32
    %c0_i32_0 = arith.constant 0 : i32
    %c0_i32_1 = arith.constant 0 : i32
    return %c0_i32, %c0_i32_0 : i32, i32
  }
  func.func @transform_4(%arg0: i32) -> (i32, i32, i32) {
    %c0_i32 = arith.constant 0 : i32
    %c0_i32_0 = arith.constant 0 : i32
    %c0_i32_1 = arith.constant 0 : i32
    return %arg0, %c0_i32, %c0_i32_0 : i32, i32, i32
  }
}

</mosaic_0001>

<bundles_post_ra>
// kernel: ncd_forward.12
= control target key start
LH: loop header
LB: loop body
LE: loop exit
PB: predicated region body
PF: predicated region fallthrough
CT: control target
= control target key end

     0   :  { %s1461_s18 = smov 0   ;;  %s1629_s0 = inlined_call_operand.vmem [shape: f32[2,4,32], index: 0, kind: input, shape index: {}]   ;;  %s1630_s1 = inlined_call_operand.vmem [shape: f32[42,4], index: 1, kind: input, shape index: {}]   ;;  %s1631_s2 = inlined_call_operand.vmem [shape: bf16[9,32,32], index: 2, kind: input, shape index: {}]   ;;  %s1632_s3 = inlined_call_operand.vmem [shape: f32[1,32], index: 3, kind: input, shape index: {}]   ;;  %s1633_s4 = inlined_call_operand.vmem [shape: f32[1,32], index: 4, kind: input, shape index: {}]   ;;  %s1634_s5 = inlined_call_operand.vmem [shape: f32[2,24,32], index: 5, kind: output, shape index: {}]  }
   0x1 LB: > { %s1153_s19 = sadd.s32 4294967295, %s1429_s18   ;;  %p1157_p0 = scmp.ge.s32.totalorder %s1429_s18, 1  ;;  %s1429_s18 = sphi %s1461_s18, %s15_s18  }
   0x2   : > { %p186_p1 = scmp.lt.s32.totalorder %s1429_s18, 3 }
   0x4   : > { %p187_p2 = pnand %p1157_p0, %p186_p1 }
   0x5   : > { %p213_p3 = scmp.lt.s32.totalorder (!%p187_p2), %s1153_s19, 1  ;;  %v223_v0 = vld [vmem:[%s1630_s1] sm:$0xff] (!%p187_p2)  ;;  %vm230_vm0 = vcmask (!%p187_p2), 31744   ;;  %vm249_vm1 = vcmask (!%p187_p2), 1043456   ;;  %v224_v1 = vld [vmem:[%s1630_s1 + $0x8] sm:$0xff] (!%p187_p2)  ;;  %v225_v2 = vld [vmem:[%s1630_s1 + $0x10] sm:$0xff] (!%p187_p2) }
   0x6   : > { %190 = sbr.rel (%p187_p2) target bundleno = 519 (0x207), region = 40  ;;  %1284 = vmatprep.mubr.msk.f32.mxu0 (!%p187_p2), %vm230_vm0, %v223_v0  ;;  %v226_v4 = vld [vmem:[%s1630_s1 + $0x18] sm:$0xff] (!%p187_p2)  ;;  %v227_v5 = vld [vmem:[%s1630_s1 + $0x20] sm:$0xff] (!%p187_p2)  ;;  %v228_v6 = vld [vmem:[%s1630_s1 + $0x28] sm:$0x3] (!%p187_p2)  ;;  %vm387_vm3 = vcmask (!%p187_p2), 261120  }
   0x7   : > { %v1405_v7 = vld [vmem:[%s1631_s2 + $0x10] sm:$0xff] (!%p187_p2)   ;;  %v1406_v8 = vld [vmem:[%s1631_s2 + $0x40] sm:$0xff] (!%p187_p2)   ;;  %v1407_v9 = vld [vmem:[%s1631_s2 + $0x18] sm:$0xff] (!%p187_p2)   ;;  %vm359_vm2 = vsmask.f32 (!%p187_p2), 7424  ;;  %vm514_vm4 = vcmask (!%p187_p2), 1046528  }
   0x8   : > { %1325 = vmatprep.subr.bf16.mxu1 (!%p187_p2), %v1406_v8  ;;  %v1408_v10 = vld [vmem:[%s1631_s2 + $0x48] sm:$0xff] (!%p187_p2)   ;;  %v1514_v11 = vld [vmem:[%s1631_s2 + $0x50] sm:$0xff] (!%p187_p2)   ;;  %v1410_v12 = vld [vmem:[%s1631_s2] sm:$0xff] (!%p187_p2)   ;;  %vm592_vm5 = vcmask (!%p187_p2), 1044480   ;;  %vm670_vm6 = vsmask.f32 (!%p187_p2), 4352 }
   0x9   : > { %1326 = vmatpush3.bf16.msra.mxu1 (!%p187_p2), %v1406_v8  ;;  %vm831_vm7 = vcmask (!%p187_p2), 1045504   ;;  %v1412_v48 = vld [vmem:[%s1631_s2 + $0x8] sm:$0xff] (!%p187_p2)   ;;  %v1411_v58 = vld [vmem:[%s1631_s2 + $0x58] sm:$0xff] (!%p187_p2)   ;;  %vm909_vm8 = vsmask.f32 (!%p187_p2), 5376  ;;  %v1414_v60 = vld [vmem:[%s1631_s2 + $0x20] sm:$0xff] (!%p187_p2)  }
   0xa   : > { %1327 = vmatprep.subr.bf16.mxu1 (!%p187_p2), %v1408_v10  ;;  %v1420_v8 = vld [vmem:[%s1631_s2 + $0x38] sm:$0xff] (!%p187_p2)  }
   0xd   : > { %s1636_s19 = smov (!%p213_p3, %s1153_s19), 1  ;;  %1328 = vmatpush3.bf16.msra.mxu1 %v1408_v10  ;;  %v1421_v10 = vld [vmem:[%s1631_s2 + $0x80] sm:$0xff]  }
   0xe   : > { %s1158_s22 = sshll.u32 %s1636_s19, 2  ;;  %1333 = vmatprep.subr.bf16.mxu1 %v1514_v11  ;;  %s1396_s28 = smul.u32 24, %s1636_s19 }
   0xf   : > { %s216_s27 = scalar_lea.vmem %s1629_s0, %s1158_s22 }
  0x10   : > { %v229_v3 = vld [vmem:[%s216_s27] sm:$0xf]  ;;  %s221_s8 = scalar_lea.vmem %s1634_s5, %s1396_s28 }
  0x11   : > { %1282 = vmatprep.subr.msk.mxu0 %vm249_vm1, %v229_v3 }
  0x12   : > { %1283 = vmatpush3.msk.msra.mxu0 %vm249_vm1, %v229_v3  ;;  %v1416_v3 = vld [vmem:[%s1631_s2 + $0x28] sm:$0xff]  }
  0x13   : > { %1285 = vmatmul.mubr.msk.f32.vlgmr.msra.gmra.mrb[0].mxu0 %vm230_vm0, %v224_v1  ;;  %1293 = vmatprep.subr.bf16.mxu0 %v1405_v7  ;;  %v1413_v1 = vld [vmem:[%s1631_s2 + $0x60] sm:$0xff]  }
  0x14   : > { %1287 = vmatprep.mubr.msk.f32.mxu0 %vm230_vm0, %v225_v2  ;;  %1294 = vmatpush3.bf16.msra.mxu0 %v1405_v7  ;;  %v1417_v7 = vld [vmem:[%s1631_s2 + $0x70] sm:$0xff]  }
  0x15   : > { %1295 = vmatprep.subr.bf16.mxu0 %v1407_v9 }
  0x17   : > { %1288 = vmatmul.mubr.msk.f32.gmra.mrb[2].mxu0 %vm230_vm0, %v226_v4 }
  0x18   : > { %1290 = vmatprep.mubr.msk.f32.mxu0 %vm230_vm0, %v227_v5  ;;  %1296 = vmatpush3.bf16.msra.mxu0 %v1407_v9  ;;  %v1415_v5 = vld [vmem:[%s1631_s2 + $0x68] sm:$0xff]   ;;  %v1419_v9 = vld [vmem:[%s1631_s2 + $0x78] sm:$0xff]  }
  0x19   : > { %1301 = vmatprep.subr.bf16.mxu0 %v1410_v12 }
  0x1b   : > { %1291 = vmatmul.mubr.msk.f32.gmra.mrb[4].mxu0 %vm230_vm0, %v228_v6  ;;  %v1418_v6 = vld [vmem:[%s1631_s2 + $0x30] sm:$0xff]  }
  0xe6   : > { %v1286_v13 = vpop.f32.mrb[0].mxu0 }
  0xe7   : > { %v319_v14 = vpop.f32.mrb[1].mxu0 }
  0xe8   : > { %v347_v15 = vpack.c.bf16 %v1286_v13, %v319_v14 }
  0xea   : > { %v1520_v16 = vpop.f32.mrb[2].mxu0  ;;  %v361_v17 = vshrl.u32 %v347_v15, 16  ;;  %v363_v18 = vshll.u32 %v347_v15, 16  ;;  %v515_v25 = vrot.slane %v347_v15, 1  ;;  %v593_v30 = vrot.slane %v347_v15, 3 }
  0xeb   : > { %v1522_v19 = vpop.f32.mrb[3].mxu0  ;;  %v748_v4 = vpack.c.bf16 %v1520_v16, %v1520_v16 }
  0xec   : > { %v1526_v20 = vpack.c.bf16 %v1520_v16, %v1522_v19  ;;  %v747_v21 = vpack.c.bf16 %v1522_v19, %v1286_v13  ;;  %v365_v22 = vrot.slane %v363_v18, 1  ;;  %v671_v23 = vrot.slane %v361_v17, 3 }
  0xed   : > { %v672_v24 = vrot.slane %v363_v18, 4  ;;  %v348_v2 = vpack.c.bf16 %v1522_v19, %v1522_v19 }
  0xee   : > { %v372_v26 = vshrl.u32 %v1526_v20, 16  ;;  %v1292_v27 = vpop.f32.mrb[4].mxu0  ;;  %v368_v28 = vshll.u32 %v1526_v20, 16  ;;  %v516_v29 = vrot.slane %v1526_v20, 1  ;;  %v366_v32 = vor.u32 %v365_v22, %v361_v17  ;;  %v1235_v17 = vld [vmem:[%s1632_s3] ss:$0 sm:$0xff] }
  0xef   : > { %v339_v31 = vpop.f32.mrb[5].mxu0  ;;  %v673_v33 = vor.u32 %v672_v24, %v671_v23  ;;  %v594_v34 = vrot.slane %v1526_v20, 3  ;;  %v910_v35 = vshrl.u32 %v747_v21, 16  ;;  %v913_v43 = vshll.u32 %v747_v21, 16  ;;  %v1236_v20 = vld [vmem:[%s1633_s4] ss:$0 sm:$0xff] }
  0xf0   : > { %v1534_v36 = vpack.c.bf16 %v339_v31, %v1520_v16  ;;  %v370_v37 = vrot.slane %v368_v28, 1  ;;  %v674_v38 = vrot.slane %v372_v26, 3  ;;  %v675_v39 = vrot.slane %v368_v28, 4 }
  0xf1   : > { %v517_v40 = vsel %vm514_vm4, %v515_v25, %v516_v29  ;;  %v595_v41 = vsel %vm592_vm5, %v593_v30, %v594_v34  ;;  %v912_v42 = vrot.slane %v910_v35, 2  ;;  %v832_v50 = vrot.slane %v747_v21, 2 }
  0xf2   : > { %v918_v44 = vshrl.u32 %v1534_v36, 16  ;;  %v921_v45 = vshll.u32 %v1534_v36, 16  ;;  %v371_v46 = vsel %vm359_vm2, %v366_v32, %v370_v37  ;;  %v374_v47 = vor.u32 %v372_v26, %v370_v37 }
  0xf3   : > { %1297 = vmatprep.mubr.msk.bf16.mxu0 %vm387_vm3, %v371_v46  ;;  %v676_v49 = vor.u32 %v675_v39, %v674_v38  ;;  %v833_v51 = vrot.slane %v1534_v36, 2  ;;  %v915_v52 = vrot.slane %v913_v43, 3  ;;  %v1000_v55 = vrot.slane %v747_v21, 3 }
  0xf4   : > { %v920_v53 = vrot.slane %v918_v44, 2  ;;  %v923_v54 = vrot.slane %v921_v45, 3  ;;  %1298 = vmatmul.mubr.msk.bf16.vlgmr.msra.gmra.mrb[8].mxu0 %vm387_vm3, %v374_v47  ;;  %v1001_v56 = vrot.slane %v1534_v36, 3 }
  0xf5   : > { %1305 = vmatprep.mubr.msk.bf16.mxu0 %vm387_vm3, %v347_v15  ;;  %v677_v57 = vsel %vm670_vm6, %v673_v33, %v676_v49  ;;  %1302 = vmatpush3.bf16.msra.mxu0 %v1410_v12  ;;  %v834_v59 = vsel %vm831_vm7, %v832_v50, %v833_v51  ;;  %v916_v61 = vor.u32 %v915_v52, %v912_v42 }
  0xf6   : > { %1329 = vmatprep.mubr.msk.bf16.mxu1 %vm387_vm3, %v677_v57  ;;  %1303 = vmatprep.subr.bf16.mxu0 %v1412_v48  ;;  %v924_v62 = vor.u32 %v923_v54, %v920_v53  ;;  %v1002_v63 = vsel %vm592_vm5, %v1000_v55, %v1001_v56 }
  0xf7   : > { %1330 = vmatmul.mubr.msk.bf16.vlgmr.msra.gmra.mrb[0].mxu1 %vm387_vm3, %v676_v49 }
  0xf8   : > { %1334 = vmatpush3.bf16.msra.mxu1 %v1514_v11  ;;  %1337 = vmatprep.mubr.msk.bf16.mxu1 %vm387_vm3, %v747_v21  ;;  %v925_v0 = vsel %vm909_vm8, %v916_v61, %v924_v62  ;;  %v1422_v11 = vld [vmem:[%s1631_s2 + $0x88] sm:$0xff]  }
  0xf9   : > { %1335 = vmatprep.subr.bf16.mxu1 %v1411_v58  ;;  %1304 = vmatpush3.bf16.msra.mxu0 %v1412_v48 }
  0xfa   : > { %1309 = vmatprep.subr.bf16.mxu0 %v1414_v60 }
  0xfc   : > { %1336 = vmatpush3.bf16.msra.mxu1 %v1411_v58 }
  0xfd   : > { %1341 = vmatprep.subr.bf16.mxu1 %v1413_v1 }
 0x100   : > { %1306 = vmatmul.mubr.msk.bf16.vlgmr.msra.gmra.mrb[8].mxu0 %vm387_vm3, %v348_v2 }
 0x101   : > { %1313 = vmatprep.mubr.msk.bf16.mxu0 %vm387_vm3, %v517_v40  ;;  %1310 = vmatpush3.bf16.msra.mxu0 %v1414_v60 }
 0x102   : > { %1311 = vmatprep.subr.bf16.mxu0 %v1416_v3 }
 0x103   : > { %1338 = vmatmul.mubr.msk.bf16.vlgmr.msra.gmra.mrb[0].mxu1 %vm387_vm3, %v748_v4 }
 0x104   : > { %1342 = vmatpush3.bf16.msra.mxu1 %v1413_v1  ;;  %1345 = vmatprep.mubr.msk.bf16.mxu1 %vm387_vm3, %v834_v59 }
 0x105   : > { %1343 = vmatprep.subr.bf16.mxu1 %v1415_v5  ;;  %1312 = vmatpush3.bf16.msra.mxu0 %v1416_v3 }
 0x106   : > { %1317 = vmatprep.subr.bf16.mxu0 %v1418_v6 }
 0x108   : > { %1344 = vmatpush3.bf16.msra.mxu1 %v1415_v5 }
 0x109   : > { %1349 = vmatprep.subr.bf16.mxu1 %v1417_v7 }
 0x10c   : > { %1314 = vmatmul.mubr.msk.bf16.vlgmr.msra.gmra.mrb[8].mxu0 %vm387_vm3, %v516_v29 }
 0x10d   : > { %1321 = vmatprep.mubr.msk.bf16.mxu0 %vm387_vm3, %v595_v41  ;;  %1318 = vmatpush3.bf16.msra.mxu0 %v1418_v6 }
 0x10e   : > { %1319 = vmatprep.subr.bf16.mxu0 %v1420_v8 }
 0x10f   : > { %1346 = vmatmul.mubr.msk.bf16.vlgmr.msra.gmra.mrb[0].mxu1 %vm387_vm3, %v833_v51 }
 0x110   : > { %1350 = vmatpush3.bf16.msra.mxu1 %v1417_v7  ;;  %1353 = vmatprep.mubr.msk.bf16.mxu1 %vm387_vm3, %v925_v0 }
 0x111   : > { %1351 = vmatprep.subr.bf16.mxu1 %v1419_v9  ;;  %1320 = vmatpush3.bf16.msra.mxu0 %v1420_v8 }
 0x114   : > { %1352 = vmatpush3.bf16.msra.mxu1 %v1419_v9 }
 0x115   : > { %1357 = vmatprep.subr.bf16.mxu1 %v1421_v10 }
 0x118   : > { %1322 = vmatmul.mubr.msk.bf16.vlgmr.msra.gmra.mrb[8].mxu0 %vm387_vm3, %v594_v34 }
 0x11b   : > { %1354 = vmatmul.mubr.msk.bf16.vlgmr.msra.gmra.mrb[0].mxu1 %vm387_vm3, %v924_v62 }
 0x11c   : > { %1358 = vmatpush3.bf16.msra.mxu1 %v1421_v10  ;;  %1361 = vmatprep.mubr.msk.bf16.mxu1 %vm387_vm3, %v1002_v63 }
 0x11d   : > { %1359 = vmatprep.subr.bf16.mxu1 %v1422_v11 }
 0x120   : > { %1360 = vmatpush3.bf16.msra.mxu1 %v1422_v11 }
 0x127   : > { %1362 = vmatmul.mubr.msk.bf16.vlgmr.msra.gmra.mrb[0].mxu1 %vm387_vm3, %v1001_v56 }
 0x1eb   : > { %v1323_v12 = vpop.f32.mrb[8].mxu0 }
 0x1ec   : > { %v648_v13 = vpop.f32.mrb[9].mxu0 }
 0x1ed   : > { %v1324_v14 = vpop.f32.mrb[10].mxu0 }
 0x1ee   : > { %v651_v15 = vpop.f32.mrb[11].mxu0 }
 0x1fa   : > { %v1363_v16 = vpop.f32.mrb[0].mxu1 }
 0x1fb   : > { %v1365_v18 = vadd.f32 %v1363_v16, %v1323_v12  ;;  %v1055_v19 = vpop.f32.mrb[1].mxu1 }
 0x1fc   : > { %v1366_v21 = vadd.f32 %v1055_v19, %v648_v13  ;;  %v1364_v22 = vpop.f32.mrb[2].mxu1 }
 0x1fd   : > { %v1081_v23 = vmul.f32 %v1365_v18, %v1235_v17  ;;  %v1058_v24 = vpop.f32.mrb[3].mxu1 }
 0x1fe   : > { %v1079_v25 = vmul.f32 %v1366_v21, %v1235_v17  ;;  %v1367_v26 = vadd.f32 %v1058_v24, %v651_v15 }
 0x1ff   : > { %v1091_v27 = vadd.f32 %v1236_v20, %v1081_v23 }
 0x200   : > { %v1089_v28 = vadd.f32 %v1236_v20, %v1079_v25  ;;  %v1080_v29 = vmul.f32 %v1367_v26, %v1235_v17 }
 0x201   : > { %v1094_v30 = vmax.f32 %v1091_v27, 0.0 }
 0x202   : > { %v1092_v31 = vmax.f32 %v1089_v28, 0.0  ;;  %v1090_v32 = vadd.f32 %v1236_v20, %v1080_v29 }
 0x203   : > { %1097 = vst.msk [vmem:[%s221_s8 + $0x10] sm:$0xff] %vm387_vm3, %v1094_v30 }
 0x204   : > { %1095 = vst.msk [vmem:[%s221_s8] sm:$0xff] %vm387_vm3, %v1092_v31  ;;  %v1093_v33 = vmax.f32 %v1090_v32, 0.0 }
 0x206   : > { %1096 = vst.msk [vmem:[%s221_s8 + $0x8] sm:$0xff] %vm387_vm3, %v1093_v33 }
 0x207 PF: > { %s15_s18 = sadd.s32 1, %s1429_s18  }
 0x208   : > { %p12_p4 = scmp.ge.s32.totalorder %s15_s18, 4  }
 0x20a   :  { %14 = sbr.rel (!%p12_p4) target bundleno = 1 (0x1), region = 78 }

// kernel: ncd_forward.9
= control target key start
LH: loop header
LB: loop body
LE: loop exit
PB: predicated region body
PF: predicated region fallthrough
CT: control target
= control target key end

     0   :  { %s1532_s21 = smov 0   ;;  %s1703_s0 = inlined_call_operand.vmem [shape: f32[2,4,32], index: 0, kind: input, shape index: {}]   ;;  %s1704_s1 = inlined_call_operand.vmem [shape: f32[42,4], index: 1, kind: input, shape index: {}]   ;;  %s1705_s2 = inlined_call_operand.vmem [shape: bf16[9,32,32], index: 2, kind: input, shape index: {}]   ;;  %s1706_s3 = inlined_call_operand.vmem [shape: f32[1,32], index: 3, kind: input, shape index: {}]   ;;  %s1707_s4 = inlined_call_operand.vmem [shape: f32[1,32], index: 4, kind: input, shape index: {}]   ;;  %s1708_s5 = inlined_call_operand.vmem [shape: f32[2,24,32], index: 5, kind: input, shape index: {}]   ;;  %s1709_s6 = inlined_call_operand.vmem [shape: f32[2,24,32], index: 6, kind: output, shape index: {}]  }
   0x1 LB: > { %s1218_s22 = sadd.s32 4294967295, %s1495_s21   ;;  %p1222_p0 = scmp.ge.s32.totalorder %s1495_s21, 1  ;;  %s1495_s21 = sphi %s1532_s21, %s16_s21  }
   0x2   : > { %p221_p1 = scmp.lt.s32.totalorder %s1495_s21, 3 }
   0x4   : > { %p222_p2 = pnand %p1222_p0, %p221_p1 }
   0x5   : > { %p255_p3 = scmp.lt.s32.totalorder (!%p222_p2), %s1218_s22, 1  ;;  %v270_v0 = vld [vmem:[%s1704_s1] sm:$0xff] (!%p222_p2)  ;;  %vm277_vm0 = vcmask (!%p222_p2), 31744   ;;  %vm296_vm1 = vcmask (!%p222_p2), 1043456   ;;  %v271_v1 = vld [vmem:[%s1704_s1 + $0x8] sm:$0xff] (!%p222_p2)  ;;  %v272_v2 = vld [vmem:[%s1704_s1 + $0x10] sm:$0xff] (!%p222_p2) }
   0x6   : > { %225 = sbr.rel (%p222_p2) target bundleno = 521 (0x209), region = 44  ;;  %1350 = vmatprep.mubr.msk.f32.mxu0 (!%p222_p2), %vm277_vm0, %v270_v0  ;;  %v273_v4 = vld [vmem:[%s1704_s1 + $0x18] sm:$0xff] (!%p222_p2)  ;;  %v274_v5 = vld [vmem:[%s1704_s1 + $0x20] sm:$0xff] (!%p222_p2)  ;;  %v275_v6 = vld [vmem:[%s1704_s1 + $0x28] sm:$0x3] (!%p222_p2)  ;;  %vm434_vm3 = vcmask (!%p222_p2), 261120  }
   0x7   : > { %v1471_v7 = vld [vmem:[%s1705_s2 + $0x10] sm:$0xff] (!%p222_p2)   ;;  %v1472_v8 = vld [vmem:[%s1705_s2 + $0x40] sm:$0xff] (!%p222_p2)   ;;  %v1473_v9 = vld [vmem:[%s1705_s2 + $0x18] sm:$0xff] (!%p222_p2)   ;;  %vm406_vm2 = vsmask.f32 (!%p222_p2), 7424  ;;  %vm561_vm4 = vcmask (!%p222_p2), 1046528  }
   0x8   : > { %1391 = vmatprep.subr.bf16.mxu1 (!%p222_p2), %v1472_v8  ;;  %v1474_v10 = vld [vmem:[%s1705_s2 + $0x48] sm:$0xff] (!%p222_p2)   ;;  %v1585_v11 = vld [vmem:[%s1705_s2 + $0x50] sm:$0xff] (!%p222_p2)   ;;  %v1476_v12 = vld [vmem:[%s1705_s2] sm:$0xff] (!%p222_p2)   ;;  %vm639_vm5 = vcmask (!%p222_p2), 1044480   ;;  %vm717_vm6 = vsmask.f32 (!%p222_p2), 4352 }
   0x9   : > { %1392 = vmatpush3.bf16.msra.mxu1 (!%p222_p2), %v1472_v8  ;;  %vm878_vm7 = vcmask (!%p222_p2), 1045504   ;;  %v1478_v48 = vld [vmem:[%s1705_s2 + $0x8] sm:$0xff] (!%p222_p2)   ;;  %v1477_v58 = vld [vmem:[%s1705_s2 + $0x58] sm:$0xff] (!%p222_p2)   ;;  %vm956_vm8 = vsmask.f32 (!%p222_p2), 5376  ;;  %v1480_v60 = vld [vmem:[%s1705_s2 + $0x20] sm:$0xff] (!%p222_p2)  }
   0xa   : > { %1393 = vmatprep.subr.bf16.mxu1 (!%p222_p2), %v1474_v10  ;;  %v1486_v8 = vld [vmem:[%s1705_s2 + $0x38] sm:$0xff] (!%p222_p2)  }
   0xd   : > { %s1711_s22 = smov (!%p255_p3, %s1218_s22), 1  ;;  %1394 = vmatpush3.bf16.msra.mxu1 %v1474_v10  ;;  %v1487_v10 = vld [vmem:[%s1705_s2 + $0x80] sm:$0xff]  }
   0xe   : > { %s1223_s25 = sshll.u32 %s1711_s22, 2  ;;  %1399 = vmatprep.subr.bf16.mxu1 %v1585_v11  ;;  %s1462_s7 = smul.u32 24, %s1711_s22 }
   0xf   : > { %s258_s30 = scalar_lea.vmem %s1703_s0, %s1223_s25 }
  0x10   : > { %v276_v3 = vld [vmem:[%s258_s30] sm:$0xf]  ;;  %s263_s14 = scalar_lea.vmem %s1708_s5, %s1462_s7  ;;  %s268_s16 = scalar_lea.vmem %s1709_s6, %s1462_s7 }
  0x11   : > { %1348 = vmatprep.subr.msk.mxu0 %vm296_vm1, %v276_v3 }
  0x12   : > { %1349 = vmatpush3.msk.msra.mxu0 %vm296_vm1, %v276_v3  ;;  %v1482_v3 = vld [vmem:[%s1705_s2 + $0x28] sm:$0xff]  }
  0x13   : > { %1351 = vmatmul.mubr.msk.f32.vlgmr.msra.gmra.mrb[0].mxu0 %vm277_vm0, %v271_v1  ;;  %1359 = vmatprep.subr.bf16.mxu0 %v1471_v7  ;;  %v1479_v1 = vld [vmem:[%s1705_s2 + $0x60] sm:$0xff]  }
  0x14   : > { %1353 = vmatprep.mubr.msk.f32.mxu0 %vm277_vm0, %v272_v2  ;;  %1360 = vmatpush3.bf16.msra.mxu0 %v1471_v7  ;;  %v1483_v7 = vld [vmem:[%s1705_s2 + $0x70] sm:$0xff]  }
  0x15   : > { %1361 = vmatprep.subr.bf16.mxu0 %v1473_v9 }
  0x17   : > { %1354 = vmatmul.mubr.msk.f32.gmra.mrb[2].mxu0 %vm277_vm0, %v273_v4 }
  0x18   : > { %1356 = vmatprep.mubr.msk.f32.mxu0 %vm277_vm0, %v274_v5  ;;  %1362 = vmatpush3.bf16.msra.mxu0 %v1473_v9  ;;  %v1481_v5 = vld [vmem:[%s1705_s2 + $0x68] sm:$0xff]   ;;  %v1485_v9 = vld [vmem:[%s1705_s2 + $0x78] sm:$0xff]  }
  0x19   : > { %1367 = vmatprep.subr.bf16.mxu0 %v1476_v12 }
  0x1b   : > { %1357 = vmatmul.mubr.msk.f32.gmra.mrb[4].mxu0 %vm277_vm0, %v275_v6  ;;  %v1484_v6 = vld [vmem:[%s1705_s2 + $0x30] sm:$0xff]  }
  0xe6   : > { %v1352_v13 = vpop.f32.mrb[0].mxu0 }
  0xe7   : > { %v366_v14 = vpop.f32.mrb[1].mxu0 }
  0xe8   : > { %v394_v15 = vpack.c.bf16 %v1352_v13, %v366_v14 }
  0xea   : > { %v1591_v16 = vpop.f32.mrb[2].mxu0  ;;  %v408_v17 = vshrl.u32 %v394_v15, 16  ;;  %v410_v18 = vshll.u32 %v394_v15, 16  ;;  %v562_v25 = vrot.slane %v394_v15, 1  ;;  %v640_v30 = vrot.slane %v394_v15, 3 }
  0xeb   : > { %v1593_v19 = vpop.f32.mrb[3].mxu0  ;;  %v795_v4 = vpack.c.bf16 %v1591_v16, %v1591_v16 }
  0xec   : > { %v1597_v20 = vpack.c.bf16 %v1591_v16, %v1593_v19  ;;  %v794_v21 = vpack.c.bf16 %v1593_v19, %v1352_v13  ;;  %v412_v22 = vrot.slane %v410_v18, 1  ;;  %v718_v23 = vrot.slane %v408_v17, 3 }
  0xed   : > { %v719_v24 = vrot.slane %v410_v18, 4  ;;  %v395_v2 = vpack.c.bf16 %v1593_v19, %v1593_v19 }
  0xee   : > { %v419_v26 = vshrl.u32 %v1597_v20, 16  ;;  %v1358_v27 = vpop.f32.mrb[4].mxu0  ;;  %v415_v28 = vshll.u32 %v1597_v20, 16  ;;  %v563_v29 = vrot.slane %v1597_v20, 1  ;;  %v413_v32 = vor.u32 %v412_v22, %v408_v17  ;;  %v1301_v17 = vld [vmem:[%s1706_s3] ss:$0 sm:$0xff] }
  0xef   : > { %v386_v31 = vpop.f32.mrb[5].mxu0  ;;  %v720_v33 = vor.u32 %v719_v24, %v718_v23  ;;  %v641_v34 = vrot.slane %v1597_v20, 3  ;;  %v957_v35 = vshrl.u32 %v794_v21, 16  ;;  %v960_v43 = vshll.u32 %v794_v21, 16  ;;  %v1302_v20 = vld [vmem:[%s1707_s4] ss:$0 sm:$0xff] }
  0xf0   : > { %v1605_v36 = vpack.c.bf16 %v386_v31, %v1591_v16  ;;  %v417_v37 = vrot.slane %v415_v28, 1  ;;  %v721_v38 = vrot.slane %v419_v26, 3  ;;  %v722_v39 = vrot.slane %v415_v28, 4  ;;  %v1144_v28 = vld [vmem:[%s263_s14 + $0x10] sm:$0xff] }
  0xf1   : > { %v564_v40 = vsel %vm561_vm4, %v562_v25, %v563_v29  ;;  %v642_v41 = vsel %vm639_vm5, %v640_v30, %v641_v34  ;;  %v959_v42 = vrot.slane %v957_v35, 2  ;;  %v879_v50 = vrot.slane %v794_v21, 2 }
  0xf2   : > { %v965_v44 = vshrl.u32 %v1605_v36, 16  ;;  %v968_v45 = vshll.u32 %v1605_v36, 16  ;;  %v418_v46 = vsel %vm406_vm2, %v413_v32, %v417_v37  ;;  %v421_v47 = vor.u32 %v419_v26, %v417_v37  ;;  %v1142_v32 = vld [vmem:[%s263_s14] sm:$0xff] }
  0xf3   : > { %1363 = vmatprep.mubr.msk.bf16.mxu0 %vm434_vm3, %v418_v46  ;;  %v723_v49 = vor.u32 %v722_v39, %v721_v38  ;;  %v880_v51 = vrot.slane %v1605_v36, 2  ;;  %v962_v52 = vrot.slane %v960_v43, 3  ;;  %v1047_v55 = vrot.slane %v794_v21, 3 }
  0xf4   : > { %v967_v53 = vrot.slane %v965_v44, 2  ;;  %v970_v54 = vrot.slane %v968_v45, 3  ;;  %1364 = vmatmul.mubr.msk.bf16.vlgmr.msra.gmra.mrb[8].mxu0 %vm434_vm3, %v421_v47  ;;  %v1048_v56 = vrot.slane %v1605_v36, 3  ;;  %v1143_v36 = vld [vmem:[%s263_s14 + $0x8] sm:$0xff] }
  0xf5   : > { %1371 = vmatprep.mubr.msk.bf16.mxu0 %vm434_vm3, %v394_v15  ;;  %v724_v57 = vsel %vm717_vm6, %v720_v33, %v723_v49  ;;  %1368 = vmatpush3.bf16.msra.mxu0 %v1476_v12  ;;  %v881_v59 = vsel %vm878_vm7, %v879_v50, %v880_v51  ;;  %v963_v61 = vor.u32 %v962_v52, %v959_v42 }
  0xf6   : > { %1395 = vmatprep.mubr.msk.bf16.mxu1 %vm434_vm3, %v724_v57  ;;  %1369 = vmatprep.subr.bf16.mxu0 %v1478_v48  ;;  %v971_v62 = vor.u32 %v970_v54, %v967_v53  ;;  %v1049_v63 = vsel %vm639_vm5, %v1047_v55, %v1048_v56 }
  0xf7   : > { %1396 = vmatmul.mubr.msk.bf16.vlgmr.msra.gmra.mrb[0].mxu1 %vm434_vm3, %v723_v49 }
  0xf8   : > { %1400 = vmatpush3.bf16.msra.mxu1 %v1585_v11  ;;  %1403 = vmatprep.mubr.msk.bf16.mxu1 %vm434_vm3, %v794_v21  ;;  %v972_v0 = vsel %vm956_vm8, %v963_v61, %v971_v62  ;;  %v1488_v11 = vld [vmem:[%s1705_s2 + $0x88] sm:$0xff]  }
  0xf9   : > { %1401 = vmatprep.subr.bf16.mxu1 %v1477_v58  ;;  %1370 = vmatpush3.bf16.msra.mxu0 %v1478_v48 }
  0xfa   : > { %1375 = vmatprep.subr.bf16.mxu0 %v1480_v60 }
  0xfc   : > { %1402 = vmatpush3.bf16.msra.mxu1 %v1477_v58 }
  0xfd   : > { %1407 = vmatprep.subr.bf16.mxu1 %v1479_v1 }
 0x100   : > { %1372 = vmatmul.mubr.msk.bf16.vlgmr.msra.gmra.mrb[8].mxu0 %vm434_vm3, %v395_v2 }
 0x101   : > { %1379 = vmatprep.mubr.msk.bf16.mxu0 %vm434_vm3, %v564_v40  ;;  %1376 = vmatpush3.bf16.msra.mxu0 %v1480_v60 }
 0x102   : > { %1377 = vmatprep.subr.bf16.mxu0 %v1482_v3 }
 0x103   : > { %1404 = vmatmul.mubr.msk.bf16.vlgmr.msra.gmra.mrb[0].mxu1 %vm434_vm3, %v795_v4 }
 0x104   : > { %1408 = vmatpush3.bf16.msra.mxu1 %v1479_v1  ;;  %1411 = vmatprep.mubr.msk.bf16.mxu1 %vm434_vm3, %v881_v59 }
 0x105   : > { %1409 = vmatprep.subr.bf16.mxu1 %v1481_v5  ;;  %1378 = vmatpush3.bf16.msra.mxu0 %v1482_v3 }
 0x106   : > { %1383 = vmatprep.subr.bf16.mxu0 %v1484_v6 }
 0x108   : > { %1410 = vmatpush3.bf16.msra.mxu1 %v1481_v5 }
 0x109   : > { %1415 = vmatprep.subr.bf16.mxu1 %v1483_v7 }
 0x10c   : > { %1380 = vmatmul.mubr.msk.bf16.vlgmr.msra.gmra.mrb[8].mxu0 %vm434_vm3, %v563_v29 }
 0x10d   : > { %1387 = vmatprep.mubr.msk.bf16.mxu0 %vm434_vm3, %v642_v41  ;;  %1384 = vmatpush3.bf16.msra.mxu0 %v1484_v6 }
 0x10e   : > { %1385 = vmatprep.subr.bf16.mxu0 %v1486_v8 }
 0x10f   : > { %1412 = vmatmul.mubr.msk.bf16.vlgmr.msra.gmra.mrb[0].mxu1 %vm434_vm3, %v880_v51 }
 0x110   : > { %1416 = vmatpush3.bf16.msra.mxu1 %v1483_v7  ;;  %1419 = vmatprep.mubr.msk.bf16.mxu1 %vm434_vm3, %v972_v0 }
 0x111   : > { %1417 = vmatprep.subr.bf16.mxu1 %v1485_v9  ;;  %1386 = vmatpush3.bf16.msra.mxu0 %v1486_v8 }
 0x114   : > { %1418 = vmatpush3.bf16.msra.mxu1 %v1485_v9 }
 0x115   : > { %1423 = vmatprep.subr.bf16.mxu1 %v1487_v10 }
 0x118   : > { %1388 = vmatmul.mubr.msk.bf16.vlgmr.msra.gmra.mrb[8].mxu0 %vm434_vm3, %v641_v34 }
 0x11b   : > { %1420 = vmatmul.mubr.msk.bf16.vlgmr.msra.gmra.mrb[0].mxu1 %vm434_vm3, %v971_v62 }
 0x11c   : > { %1424 = vmatpush3.bf16.msra.mxu1 %v1487_v10  ;;  %1427 = vmatprep.mubr.msk.bf16.mxu1 %vm434_vm3, %v1049_v63 }
 0x11d   : > { %1425 = vmatprep.subr.bf16.mxu1 %v1488_v11 }
 0x120   : > { %1426 = vmatpush3.bf16.msra.mxu1 %v1488_v11 }
 0x127   : > { %1428 = vmatmul.mubr.msk.bf16.vlgmr.msra.gmra.mrb[0].mxu1 %vm434_vm3, %v1048_v56 }
 0x1eb   : > { %v1389_v12 = vpop.f32.mrb[8].mxu0 }
 0x1ec   : > { %v695_v13 = vpop.f32.mrb[9].mxu0 }
 0x1ed   : > { %v1390_v14 = vpop.f32.mrb[10].mxu0 }
 0x1ee   : > { %v698_v15 = vpop.f32.mrb[11].mxu0 }
 0x1fa   : > { %v1429_v16 = vpop.f32.mrb[0].mxu1 }
 0x1fb   : > { %v1431_v18 = vadd.f32 %v1429_v16, %v1389_v12  ;;  %v1102_v19 = vpop.f32.mrb[1].mxu1 }
 0x1fc   : > { %v1432_v21 = vadd.f32 %v1102_v19, %v695_v13  ;;  %v1430_v22 = vpop.f32.mrb[2].mxu1 }
 0x1fd   : > { %v1128_v23 = vmul.f32 %v1431_v18, %v1301_v17  ;;  %v1105_v24 = vpop.f32.mrb[3].mxu1 }
 0x1fe   : > { %v1126_v25 = vmul.f32 %v1432_v21, %v1301_v17  ;;  %v1433_v26 = vadd.f32 %v1105_v24, %v698_v15 }
 0x1ff   : > { %v1138_v27 = vadd.f32 %v1302_v20, %v1128_v23 }
 0x200   : > { %v1136_v29 = vadd.f32 %v1302_v20, %v1126_v25  ;;  %v1127_v30 = vmul.f32 %v1433_v26, %v1301_v17 }
 0x201   : > { %v1141_v31 = vmax.f32 %v1138_v27, 0.0 }
 0x202   : > { %v1139_v33 = vmax.f32 %v1136_v29, 0.0  ;;  %v1137_v34 = vadd.f32 %v1302_v20, %v1127_v30 }
 0x203   : > { %v1147_v35 = vmul.f32 %v1144_v28, %v1141_v31 }
 0x204   : > { %v1145_v37 = vmul.f32 %v1142_v32, %v1139_v33  ;;  %v1140_v38 = vmax.f32 %v1137_v34, 0.0 }
 0x205   : > { %1150 = vst.msk [vmem:[%s268_s16 + $0x10] sm:$0xff] %vm434_vm3, %v1147_v35 }
 0x206   : > { %1148 = vst.msk [vmem:[%s268_s16] sm:$0xff] %vm434_vm3, %v1145_v37  ;;  %v1146_v39 = vmul.f32 %v1143_v36, %v1140_v38 }
 0x208   : > { %1149 = vst.msk [vmem:[%s268_s16 + $0x8] sm:$0xff] %vm434_vm3, %v1146_v39 }
 0x209 PF: > { %s16_s21 = sadd.s32 1, %s1495_s21  }
 0x20a   : > { %p13_p4 = scmp.ge.s32.totalorder %s16_s21, 4  }
 0x20c   :  { %15 = sbr.rel (!%p13_p4) target bundleno = 1 (0x1), region = 85 }

// kernel: ncd_forward.14
= control target key start
LH: loop header
LB: loop body
LE: loop exit
PB: predicated region body
PF: predicated region fallthrough
CT: control target
= control target key end

     0   :  { %s2699_s18 = smov 0   ;;  %s3421_s0 = inlined_call_operand.vmem [shape: f32[2,24,64], index: 0, kind: input, shape index: {}]   ;;  %s3422_s1 = inlined_call_operand.vmem [shape: f32[110,24], index: 1, kind: input, shape index: {}]   ;;  %s3423_s2 = inlined_call_operand.vmem [shape: bf16[9,64,64], index: 2, kind: input, shape index: {}]   ;;  %s3424_s3 = inlined_call_operand.vmem [shape: f32[1,64], index: 3, kind: input, shape index: {}]   ;;  %s3425_s4 = inlined_call_operand.vmem [shape: f32[1,64], index: 4, kind: input, shape index: {}]   ;;  %s3426_s5 = inlined_call_operand.vmem [shape: f32[2,80,64], index: 5, kind: output, shape index: {}]  }
   0x1 LB: > { %s1902_s19 = sadd.s32 4294967295, %s2665_s18   ;;  %p1906_p0 = scmp.ge.s32.totalorder %s2665_s18, 1  ;;  %s2665_s18 = sphi %s2699_s18, %s15_s18  }
   0x2   : > { %p187_p1 = scmp.lt.s32.totalorder %s2665_s18, 3 }
   0x4   : > { %p188_p2 = pnand %p1906_p0, %p187_p1 }
   0x5   : > { %p215_p3 = scmp.lt.s32.totalorder (!%p188_p2), %s1902_s19, 1  ;;  %v226_v0 = vld [vmem:[%s3422_s1] sm:$0xff] (!%p188_p2)  ;;  %vm243_vm0 = vcmask (!%p188_p2), 195584   ;;  %v2667_v1 = vmov (!%p188_p2), 0.0   ;;  %v227_v6 = vld [vmem:[%s3422_s1 + $0x8] sm:$0xff] (!%p188_p2)  ;;  %v228_v8 = vld [vmem:[%s3422_s1 + $0x10] sm:$0xff] (!%p188_p2) }
   0x6   : > { %191 = sbr.rel (%p188_p2) target bundleno = 667 (0x29b), region = 40  ;;  %2176 = vmatprep.mubr.msk.f32.mxu0 (!%p188_p2), %vm243_vm0, %v226_v0  ;;  %2453 = vmatprep.subr.bf16.mxu1 (!%p188_p2), %v2667_v1  ;;  %v2623_v7 = vld [vmem:[%s3423_s2 + $0x20] sm:$0xff] (!%p188_p2)   ;;  %v229_v9 = vld [vmem:[%s3422_s1 + $0x18] sm:$0xff] (!%p188_p2)  ;;  %v231_v11 = vld [vmem:[%s3422_s1 + $0x28] sm:$0xff] (!%p188_p2)  ;;  %vm2668_vm1 = vmmov (!%p188_p2), 0   ;;  %vm723_vm3 = vcmask (!%p188_p2), 1046528  }
   0x7   : > { %v230_v10 = vld [vmem:[%s3422_s1 + $0x20] sm:$0xff] (!%p188_p2)  ;;  %v232_v12 = vld [vmem:[%s3422_s1 + $0x30] sm:$0xff] (!%p188_p2)  ;;  %v233_v13 = vld [vmem:[%s3422_s1 + $0x38] sm:$0xff] (!%p188_p2)  ;;  %2321 = vmatprep.mubr.msk.bf16.mxu1 (!%p188_p2), %vm2668_vm1, %v2667_v1  ;;  %vm443_vm2 = vsmask.f32 (!%p188_p2), 7424  ;;  %vm512_vm4 = vcmask (!%p188_p2), 523264  }
   0x8   : > { %v234_v14 = vld [vmem:[%s3422_s1 + $0x40] sm:$0xff] (!%p188_p2)  ;;  %v235_v15 = vld [vmem:[%s3422_s1 + $0x48] sm:$0xff] (!%p188_p2)  ;;  %v236_v16 = vld [vmem:[%s3422_s1 + $0x50] sm:$0xff] (!%p188_p2)  ;;  %vm1205_vm5 = vcmask (!%p188_p2), 1045504   ;;  %vm1020_vm6 = vsmask.f32 (!%p188_p2), 6400 }
   0x9   : > { %v237_v17 = vld [vmem:[%s3422_s1 + $0x58] sm:$0xff] (!%p188_p2)  ;;  %v238_v18 = vld [vmem:[%s3422_s1 + $0x60] sm:$0xff] (!%p188_p2)  ;;  %v239_v19 = vld [vmem:[%s3422_s1 + $0x68] sm:$0x3f] (!%p188_p2)  ;;  %vm1494_vm7 = vsmask.f32 (!%p188_p2), 5376 }
   0xa   : > { %v2624_v20 = vld [vmem:[%s3423_s2 + $0x28] sm:$0xff] (!%p188_p2)   ;;  %v2625_v21 = vld [vmem:[%s3423_s2 + $0x30] sm:$0xff] (!%p188_p2)   ;;  %v2785_v22 = vld [vmem:[%s3423_s2 + $0x80] sm:$0xff] (!%p188_p2)   ;;  %vm1659_vm8 = vcmask (!%p188_p2), 1044480  }
   0xb   : > { %2457 = vmatpush3.bf16.msra.mxu1 (!%p188_p2), %v2785_v22  ;;  %v2627_v23 = vld [vmem:[%s3423_s2 + $0x38] sm:$0xff] (!%p188_p2)   ;;  %v2796_v24 = vld [vmem:[%s3423_s2 + $0x88] sm:$0xff] (!%p188_p2)   ;;  %v2808_v25 = vld [vmem:[%s3423_s2 + $0x90] sm:$0xff] (!%p188_p2)  }
   0xc   : > { %2454 = vmatprep.subr.bf16.mxu1 (!%p188_p2), %v2667_v1  ;;  %v2815_v26 = vld [vmem:[%s3423_s2 + $0x98] sm:$0xff] (!%p188_p2)   ;;  %v2633_v49 = vld [vmem:[%s3423_s2] sm:$0xff] (!%p188_p2)  }
   0xd   : > { %s3428_s19 = smov (!%p215_p3, %s1902_s19), 1 }
   0xe   : > { %s2611_s22 = smul.u32 24, %s3428_s19 }
   0xf   : > { %2458 = vmatpush3.bf16.msra.mxu1 %v2796_v24  ;;  %s2612_s9 = smul.u32 80, %s3428_s19 }
  0x10   : > { %s219_s25 = scalar_lea.vmem %s3421_s0, %s2611_s22  ;;  %2455 = vmatprep.subr.bf16.mxu1 %v2667_v1 }
  0x11   : > { %v240_v2 = vld [vmem:[%s219_s25] sm:$0xff]  ;;  %v241_v3 = vld [vmem:[%s219_s25 + $0x8] sm:$0xff]  ;;  %v242_v4 = vld [vmem:[%s219_s25 + $0x10] sm:$0xff]  ;;  %s3377_s14 = scalar_lea.vmem %s3426_s5, %s2612_s9 }
  0x12   : > { %v2449_v5 = vpack.c.bf16 %v241_v3, %v240_v2 }
  0x13   : > { %2459 = vmatpush3.bf16.msra.mxu1 %v2808_v25 }
  0x14   : > { %2450 = vmatprep.subr.bf16.mxu0 %v2449_v5  ;;  %2456 = vmatprep.subr.bf16.mxu1 %v2667_v1 }
  0x15   : > { %2452 = vmatpush3.bf16.msra.mxu0 %v2449_v5  ;;  %v2635_v5 = vld [vmem:[%s3423_s2 + $0x8] sm:$0xff]  }
  0x16   : > { %2174 = vmatprep.subr.mxu0 %v242_v4 }
  0x17   : > { %2460 = vmatpush3.bf16.msra.mxu1 %v2815_v26 }
  0x18   : > { %2337 = vmatprep.subr.bf16.mxu1 %v2667_v1 }
  0x19   : > { %2175 = vmatpush3.msra.mxu0 %v242_v4 }
  0x1a   : > { %2177 = vmatmul.mubr.msk.f32.vlgmr.msra.gmra.mrb[0].mxu0 %vm243_vm0, %v227_v6  ;;  %2197 = vmatprep.subr.bf16.mxu0 %v2667_v1 }
  0x1b   : > { %2179 = vmatprep.mubr.msk.f32.mxu0 %vm243_vm0, %v228_v8  ;;  %2198 = vmatpush3.bf16.msra.mxu0 %v2623_v7 }
  0x1c   : > { %2199 = vmatprep.subr.bf16.mxu0 %v2667_v1 }
  0x1e   : > { %2180 = vmatmul.mubr.msk.f32.gmra.mrb[2].mxu0 %vm243_vm0, %v229_v9 }
  0x1f   : > { %2182 = vmatprep.mubr.msk.f32.mxu0 %vm243_vm0, %v230_v10  ;;  %2200 = vmatpush3.bf16.msra.mxu0 %v2624_v20 }
  0x20   : > { %2201 = vmatprep.subr.bf16.mxu0 %v2667_v1 }
  0x22   : > { %2183 = vmatmul.mubr.msk.f32.gmra.mrb[4].mxu0 %vm243_vm0, %v231_v11 }
  0x23   : > { %2185 = vmatprep.mubr.msk.f32.mxu0 %vm243_vm0, %v232_v12  ;;  %2202 = vmatpush3.bf16.msra.mxu0 %v2625_v21 }
  0x24   : > { %2203 = vmatprep.subr.bf16.mxu0 %v2667_v1 }
  0x26   : > { %2186 = vmatmul.mubr.msk.f32.gmra.mrb[6].mxu0 %vm243_vm0, %v233_v13 }
  0x27   : > { %2188 = vmatprep.mubr.msk.f32.mxu0 %vm243_vm0, %v234_v14  ;;  %2204 = vmatpush3.bf16.msra.mxu0 %v2627_v23 }
  0x28   : > { %2225 = vmatprep.subr.bf16.mxu0 %v2667_v1 }
  0x2a   : > { %2189 = vmatmul.mubr.msk.f32.gmra.mrb[8].mxu0 %vm243_vm0, %v235_v15 }
  0x2b   : > { %2191 = vmatprep.mubr.msk.f32.mxu0 %vm243_vm0, %v236_v16 }
  0x2e   : > { %2192 = vmatmul.mubr.msk.f32.gmra.mrb[10].mxu0 %vm243_vm0, %v237_v17 }
  0x2f   : > { %2194 = vmatprep.mubr.msk.f32.mxu0 %vm243_vm0, %v238_v18 }
  0x32   : > { %2195 = vmatmul.mubr.msk.f32.gmra.mrb[12].mxu0 %vm243_vm0, %v239_v19 }
  0x33   : > { %2205 = vmatprep.mubr.msk.bf16.mxu0 %vm2668_vm1, %v2667_v1 }
  0xed   : > { %v2178_v27 = vpop.f32.mrb[0].mxu0 }
  0xee   : > { %v352_v28 = vpop.f32.mrb[1].mxu0 }
  0xef   : > { %v2819_v29 = vpack.c.bf16 %v2178_v27, %v352_v28 }
  0xf1   : > { %v447_v30 = vshll.u32 %v2819_v29, 16  ;;  %v2181_v31 = vpop.f32.mrb[2].mxu0  ;;  %v445_v36 = vshrl.u32 %v2819_v29, 16  ;;  %v724_v39 = vrot.slane %v2819_v29, 1 }
  0xf2   : > { %v362_v32 = vpop.f32.mrb[3].mxu0 }
  0xf3   : > { %v2822_v33 = vpack.c.bf16 %v2181_v31, %v362_v32  ;;  %v2824_v34 = vpack.c.bf16 %v362_v32, %v2178_v27  ;;  %v449_v35 = vrot.slane %v447_v30, 1 }
  0xf5   : > { %v1022_v37 = vshrl.u32 %v2824_v34, 16  ;;  %v2184_v38 = vpop.f32.mrb[4].mxu0  ;;  %v1025_v40 = vshll.u32 %v2824_v34, 16  ;;  %v452_v42 = vshll.u32 %v2822_v33, 16  ;;  %v725_v43 = vrot.slane %v2822_v33, 1 }
  0xf6   : > { %v372_v41 = vpop.f32.mrb[5].mxu0  ;;  %v456_v46 = vshrl.u32 %v2822_v33, 16  ;;  %v450_v47 = vor.u32 %v449_v35, %v445_v36  ;;  %v1206_v52 = vrot.slane %v2824_v34, 2  ;;  %v878_v61 = vrot.slane %v2824_v34, 1 }
  0xf7   : > { %v2832_v44 = vpack.c.bf16 %v2184_v38, %v372_v41  ;;  %v2834_v45 = vpack.c.bf16 %v372_v41, %v2181_v31  ;;  %v454_v48 = vrot.slane %v452_v42, 1  ;;  %v2845_v50 = vsel %vm723_vm3, %v724_v39, %v725_v43 }
  0xf8   : > { %v2847_v51 = vrot.slane %v1022_v37, 1  ;;  %v2852_v56 = vrot.slane %v1025_v40, 2  ;;  %v2863_v0 = vrot.slane %v456_v46, 2  ;;  %v1352_v16 = vrot.slane %v2822_v33, 2  ;;  %v2631_v37 = vld [vmem:[%s3423_s2 + $0xa0] sm:$0xff]  }
  0xf9   : > { %v1030_v53 = vshrl.u32 %v2834_v45, 16  ;;  %v1033_v54 = vshll.u32 %v2834_v45, 16  ;;  %v2187_v55 = vpop.f32.mrb[6].mxu0  ;;  %v1207_v57 = vrot.slane %v2834_v45, 2  ;;  %v455_v59 = vsel %vm443_vm2, %v450_v47, %v454_v48  ;;  %v2636_v47 = vld [vmem:[%s3423_s2 + $0x10] sm:$0xff]  }
  0xfa   : > { %v382_v58 = vpop.f32.mrb[7].mxu0  ;;  %v460_v60 = vshll.u32 %v2832_v44, 16  ;;  %2206 = vmatmul.mubr.msk.bf16.vlgmr.msra.gmra.mrb[16].mxu0 %vm512_vm4, %v455_v59  ;;  %v458_v2 = vor.u32 %v456_v46, %v454_v48  ;;  %v1028_v12 = vor.u32 %v2852_v56, %v2847_v51  ;;  %v464_v15 = vshrl.u32 %v2832_v44, 16 }
  0xfb   : > { %v2858_v62 = vpack.c.bf16 %v2187_v55, %v382_v58  ;;  %v2860_v63 = vpack.c.bf16 %v382_v58, %v2184_v38  ;;  %2209 = vmatprep.mubr.msk.bf16.mxu0 %vm2668_vm1, %v2667_v1  ;;  %v1032_v4 = vrot.slane %v1030_v53, 1  ;;  %2226 = vmatpush3.bf16.msra.mxu0 %v2633_v49  ;;  %v2873_v6 = vsel %vm1205_vm5, %v1206_v52, %v1207_v57 }
  0xfc   : > { %v462_v3 = vrot.slane %v460_v60, 1  ;;  %v1035_v10 = vrot.slane %v1033_v54, 2  ;;  %2227 = vmatprep.subr.bf16.mxu0 %v2667_v1  ;;  %v879_v21 = vrot.slane %v2834_v45, 1  ;;  %v2889_v23 = vrot.slane %v460_v60, 3 }
  0xfd   : > { %v1039_v7 = vshrl.u32 %v2860_v63, 16  ;;  %v1042_v8 = vshll.u32 %v2860_v63, 16  ;;  %v2190_v9 = vpop.f32.mrb[8].mxu0  ;;  %v468_v11 = vshll.u32 %v2858_v62, 16  ;;  %v2904_v41 = vrot.slane %v464_v15, 2 }
  0xfe   : > { %v392_v13 = vpop.f32.mrb[9].mxu0  ;;  %v463_v14 = vsel %vm443_vm2, %v458_v2, %v462_v3  ;;  %v466_v27 = vor.u32 %v464_v15, %v462_v3  ;;  %v2895_v35 = vor.u32 %v1035_v10, %v1032_v4  ;;  %v472_v46 = vshrl.u32 %v2858_v62, 16  ;;  %v2632_v3 = vld [vmem:[%s3423_s2 + $0xa8] sm:$0xff]   ;;  %v2638_v15 = vld [vmem:[%s3423_s2 + $0x18] sm:$0xff]  }
  0xff   : > { %v2884_v17 = vpack.c.bf16 %v2190_v9, %v392_v13  ;;  %v2886_v18 = vpack.c.bf16 %v392_v13, %v2187_v55  ;;  %v1041_v19 = vrot.slane %v1039_v7, 1  ;;  %v1044_v20 = vrot.slane %v1042_v8, 2  ;;  %2228 = vmatpush3.bf16.msra.mxu0 %v2635_v5 }
 0x100   : > { %v470_v28 = vrot.slane %v468_v11, 1  ;;  %2229 = vmatprep.subr.bf16.mxu0 %v2667_v1  ;;  %v1209_v7 = vrot.slane %v2860_v63, 2  ;;  %v1500_v34 = vor.u32 %v2889_v23, %v2904_v41 }
 0x101   : > { %v1048_v30 = vshrl.u32 %v2886_v18, 16  ;;  %v1051_v31 = vshll.u32 %v2886_v18, 16  ;;  %v2193_v32 = vpop.f32.mrb[10].mxu0  ;;  %v1045_v36 = vor.u32 %v1044_v20, %v1041_v19  ;;  %v476_v4 = vshll.u32 %v2884_v17, 16 }
 0x102   : > { %v2901_v38 = vpack.c.bf16 %v2193_v32, %v2193_v32  ;;  %v402_v39 = vpop.f32.mrb[11].mxu0  ;;  %v471_v40 = vsel %vm443_vm2, %v466_v27, %v470_v28  ;;  %2210 = vmatmul.mubr.msk.bf16.gmra.mrb[20].mxu0 %vm512_vm4, %v463_v14  ;;  %v1353_v27 = vrot.slane %v2832_v44, 2 }
 0x103   : > { %v2910_v48 = vpack.c.bf16 %v402_v39, %v402_v39  ;;  %v2912_v49 = vpack.c.bf16 %v402_v39, %v2190_v9  ;;  %v2914_v52 = vpack.c.bf16 %v2193_v32, %v402_v39  ;;  %v1046_v53 = vsel %vm1020_vm6, %v2895_v35, %v1045_v36  ;;  %2213 = vmatprep.mubr.msk.bf16.mxu0 %vm2668_vm1, %v2667_v1 }
 0x104   : > { %v1066_v54 = vshrl.u32 %v2901_v38, 16  ;;  %v1069_v55 = vshll.u32 %v2901_v38, 16  ;;  %2322 = vmatmul.mubr.msk.bf16.vlgmr.msra.gmra.mrb[0].mxu1 %vm512_vm4, %v1046_v53  ;;  %v1050_v58 = vrot.slane %v1048_v30, 1  ;;  %v1053_v59 = vrot.slane %v1051_v31, 2  ;;  %2230 = vmatpush3.bf16.msra.mxu0 %v2636_v47  ;;  %v2634_v53 = vld [vmem:[%s3423_s2 + $0xb0] sm:$0xff]  }
 0x105   : > { %v484_v60 = vshll.u32 %v2910_v48, 16  ;;  %2338 = vmatpush3.bf16.msra.mxu1 %v2631_v37  ;;  %v2196_v2 = vpop.f32.mrb[12].mxu0  ;;  %2325 = vmatprep.mubr.msk.bf16.mxu1 %vm2668_vm1, %v2667_v1  ;;  %v1057_v5 = vshrl.u32 %v2912_v49, 16  ;;  %v1060_v10 = vshll.u32 %v2912_v49, 16  ;;  %v727_v30 = vrot.slane %v2832_v44, 1 }
 0x106   : > { %v412_v8 = vpop.f32.mrb[13].mxu0  ;;  %2339 = vmatprep.subr.bf16.mxu1 %v2667_v1  ;;  %v1054_v9 = vor.u32 %v1053_v59, %v1050_v58  ;;  %v1068_v13 = vrot.slane %v1066_v54, 1  ;;  %v1071_v14 = vrot.slane %v1069_v55, 2  ;;  %2231 = vmatprep.subr.bf16.mxu0 %v2667_v1  ;;  %v474_v32 = vor.u32 %v472_v46, %v470_v28 }
 0x107   : > { %v2938_v19 = vpack.c.bf16 %v412_v8, %v412_v8  ;;  %v1059_v20 = vrot.slane %v1057_v5, 1  ;;  %v1062_v37 = vrot.slane %v1060_v10, 2  ;;  %v478_v47 = vrot.slane %v476_v4, 1 }
 0x108   : > { %v1055_v31 = vsel %vm1020_vm6, %v1045_v36, %v1054_v9  ;;  %v1072_v39 = vor.u32 %v1071_v14, %v1068_v13  ;;  %v480_v54 = vshrl.u32 %v2884_v17, 16  ;;  %v2955_v36 = vsel %vm1205_vm5, %v1207_v57, %v1209_v7  ;;  %2232 = vmatpush3.bf16.msra.mxu0 %v2638_v15 }
 0x109   : > { %2340 = vmatpush3.bf16.msra.mxu1 %v2632_v3  ;;  %v1211_v28 = vrot.slane %v2886_v18, 2  ;;  %v2958_v55 = vrot.slane %v484_v60, 1  ;;  %v1063_v58 = vor.u32 %v1062_v37, %v1059_v20  ;;  %v1213_v59 = vrot.slane %v2912_v49, 2  ;;  %2253 = vmatprep.subr.bf16.mxu0 %v2667_v1 }
 0x10a   : > { %2341 = vmatprep.subr.bf16.mxu1 %v2667_v1  ;;  %v1215_v2 = vrot.slane %v2901_v38, 2  ;;  %v1520_v3 = vshrl.u32 %v2938_v19, 16  ;;  %v1523_v5 = vshll.u32 %v2938_v19, 16  ;;  %2214 = vmatmul.mubr.msk.bf16.gmra.mrb[24].mxu0 %vm512_vm4, %v471_v40  ;;  %v2973_v60 = vsel %vm1205_vm5, %v1352_v16, %v1353_v27  ;;  %v2637_v16 = vld [vmem:[%s3423_s2 + $0xb8] sm:$0xff]  }
 0x10b   : > { %v2967_v57 = vsel %vm1205_vm5, %v1209_v7, %v1211_v28  ;;  %2217 = vmatprep.mubr.msk.bf16.mxu0 %vm2668_vm1, %v2667_v1  ;;  %v1064_v8 = vsel %vm1020_vm6, %v1054_v9, %v1063_v58  ;;  %v2980_v10 = vsel %vm1020_vm6, %v1063_v58, %v1072_v39  ;;  %v2983_v40 = vsel %vm1205_vm5, %v1211_v28, %v1213_v59 }
 0x10c   : > { %2326 = vmatmul.mubr.msk.bf16.gmra.mrb[4].mxu1 %vm512_vm4, %v1055_v31  ;;  %v1355_v7 = vrot.slane %v2858_v62, 2  ;;  %v479_v13 = vsel %vm443_vm2, %v474_v32, %v478_v47  ;;  %v2993_v9 = vsel %vm1205_vm5, %v1213_v59, %v1215_v2  ;;  %v2998_v14 = vsel %vm723_vm3, %v725_v43, %v727_v30 }
 0x10d   : > { %2329 = vmatprep.mubr.msk.bf16.mxu1 %vm2668_vm1, %v2667_v1  ;;  %2342 = vmatpush3.bf16.msra.mxu1 %v2634_v53  ;;  %v729_v15 = vrot.slane %v2858_v62, 1  ;;  %v1357_v31 = vrot.slane %v2884_v17, 2  ;;  %v1359_v32 = vrot.slane %v2914_v52, 2  ;;  %v1361_v37 = vrot.slane %v2938_v19, 2 }
 0x10e   : > { %2343 = vmatprep.subr.bf16.mxu1 %v2667_v1  ;;  %v3005_v20 = vsel %vm1205_vm5, %v1353_v27, %v1355_v7  ;;  %v482_v39 = vor.u32 %v480_v54, %v478_v47  ;;  %v3020_v27 = vsel %vm723_vm3, %v878_v61, %v879_v21  ;;  %v1496_v53 = vrot.slane %v452_v42, 3 }
 0x10f   : > { %v3013_v43 = vsel %vm723_vm3, %v727_v30, %v729_v15  ;;  %v1522_v28 = vrot.slane %v1520_v3, 2  ;;  %v1525_v58 = vrot.slane %v1523_v5, 3  ;;  %v3027_v47 = vsel %vm1205_vm5, %v1357_v31, %v1359_v32 }
 0x110   : > { %v3030_v30 = vsel %vm1205_vm5, %v1359_v32, %v1361_v37  ;;  %v1497_v59 = vor.u32 %v1496_v53, %v2863_v0  ;;  %v881_v61 = vrot.slane %v2860_v63, 1  ;;  %v1502_v42 = vrot.slane %v472_v46, 2 }
 0x111   : > { %2344 = vmatpush3.bf16.msra.mxu1 %v2637_v16  ;;  %v1503_v2 = vrot.slane %v468_v11, 3  ;;  %v883_v3 = vrot.slane %v2886_v18, 1  ;;  %v1506_v5 = vrot.slane %v480_v54, 2  ;;  %v1507_v16 = vrot.slane %v476_v4, 3 }
 0x112   : > { %2365 = vmatprep.subr.bf16.mxu1 %v2667_v1  ;;  %2218 = vmatmul.mubr.msk.bf16.gmra.mrb[28].mxu0 %vm512_vm4, %v479_v13  ;;  %v3046_v0 = vsel %vm1494_vm7, %v1497_v59, %v1500_v34  ;;  %v3051_v63 = vsel %vm723_vm3, %v879_v21, %v881_v61  ;;  %v885_v23 = vrot.slane %v2912_v49, 1  ;;  %v1511_v11 = vshrl.u32 %v2914_v52, 16 }
 0x113   : > { %2221 = vmatprep.mubr.msk.bf16.mxu0 %vm2668_vm1, %v2667_v1  ;;  %v1504_v18 = vor.u32 %v1503_v2, %v1502_v42  ;;  %v3059_v41 = vsel %vm723_vm3, %v881_v61, %v883_v3  ;;  %v1508_v46 = vor.u32 %v1507_v16, %v1506_v5  ;;  %v1514_v4 = vshll.u32 %v2914_v52, 16  ;;  %v2645_v2 = vld [vmem:[%s3423_s2 + $0x50] sm:$0xff]  }
 0x114   : > { %2330 = vmatmul.mubr.msk.bf16.gmra.mrb[8].mxu1 %vm512_vm4, %v1064_v8  ;;  %v3065_v45 = vsel %vm723_vm3, %v883_v3, %v885_v23  ;;  %v1513_v21 = vrot.slane %v1511_v11, 2  ;;  %v887_v49 = vrot.slane %v2901_v38, 1  ;;  %v1526_v54 = vor.u32 %v1525_v58, %v1522_v28  ;;  %v2644_v3 = vld [vmem:[%s3423_s2 + $0xd8] sm:$0xff]  }
 0x115   : > { %2333 = vmatprep.mubr.msk.bf16.mxu1 %vm2668_vm1, %v2667_v1  ;;  %v3069_v8 = vsel %vm1494_vm7, %v1500_v34, %v1504_v18  ;;  %v3072_v13 = vsel %vm1494_vm7, %v1504_v18, %v1508_v46  ;;  %v1516_v32 = vrot.slane %v1514_v4, 3  ;;  %v3079_v37 = vsel %vm1020_vm6, %v1028_v12, %v2895_v35 }
 0x116   : > { %v3082_v53 = vsel %vm723_vm3, %v885_v23, %v887_v49  ;;  %v1660_v38 = vrot.slane %v2822_v33, 3  ;;  %v1661_v28 = vrot.slane %v2832_v44, 3  ;;  %v1663_v58 = vrot.slane %v2858_v62, 3 }
 0x117   : > { %v1517_v59 = vor.u32 %v1516_v32, %v1513_v21  ;;  %v1669_v34 = vrot.slane %v2938_v19, 3  ;;  %v1667_v56 = vrot.slane %v2914_v52, 3  ;;  %v487_v12 = vsel %vm443_vm2, %v482_v39, %v2958_v55  ;;  %v2639_v55 = vld [vmem:[%s3423_s2 + $0xc0] sm:$0xff]  }
 0x118   : > { %v3089_v61 = vsel %vm1659_vm8, %v1660_v38, %v1661_v28  ;;  %v3094_v51 = vsel %vm1659_vm8, %v1661_v28, %v1663_v58  ;;  %v2642_v39 = vld [vmem:[%s3423_s2 + $0x40] sm:$0xff]   ;;  %v731_v5 = vrot.slane %v2884_v17, 1 }
 0x119   : > { %v3100_v35 = vsel %vm1494_vm7, %v1508_v46, %v1517_v59  ;;  %v3103_v42 = vsel %vm1494_vm7, %v1517_v59, %v1526_v54  ;;  %v3109_v19 = vsel %vm1659_vm8, %v1667_v56, %v1669_v34 }
 0x11a   : > { %2222 = vmatmul.mubr.msk.bf16.gmra.mrb[32].mxu0 %vm512_vm4, %v487_v12 }
 0x11b   : > { %2233 = vmatprep.mubr.msk.bf16.mxu0 %vm2668_vm1, %v2667_v1 }
 0x11c   : > { %2334 = vmatmul.mubr.msk.bf16.gmra.mrb[12].mxu1 %vm512_vm4, %v2980_v10  ;;  %v2640_v10 = vld [vmem:[%s3423_s2 + $0xc8] sm:$0xff]  }
 0x11d   : > { %2345 = vmatprep.mubr.msk.bf16.mxu1 %vm2668_vm1, %v2667_v1 }
 0x122   : > { %2234 = vmatmul.mubr.msk.bf16.vlgmr.msra.gmra.mrb[16].mxu0 %vm512_vm4, %v2819_v29  ;;  %v2643_v29 = vld [vmem:[%s3423_s2 + $0x48] sm:$0xff]  }
 0x123   : > { %2237 = vmatprep.mubr.msk.bf16.mxu0 %vm2668_vm1, %v2667_v1  ;;  %2254 = vmatpush3.bf16.msra.mxu0 %v2642_v39 }
 0x124   : > { %2346 = vmatmul.mubr.msk.bf16.vlgmr.msra.gmra.mrb[16].mxu1 %vm512_vm4, %v2873_v6  ;;  %2255 = vmatprep.subr.bf16.mxu0 %v2667_v1  ;;  %v2641_v6 = vld [vmem:[%s3423_s2 + $0xd0] sm:$0xff]  }
 0x125   : > { %2366 = vmatpush3.bf16.msra.mxu1 %v2639_v55  ;;  %2349 = vmatprep.mubr.msk.bf16.mxu1 %vm2668_vm1, %v2667_v1 }
 0x126   : > { %2367 = vmatprep.subr.bf16.mxu1 %v2667_v1 }
 0x127   : > { %2256 = vmatpush3.bf16.msra.mxu0 %v2643_v29 }
 0x128   : > { %2257 = vmatprep.subr.bf16.mxu0 %v2667_v1 }
 0x129   : > { %2368 = vmatpush3.bf16.msra.mxu1 %v2640_v10 }
 0x12a   : > { %2369 = vmatprep.subr.bf16.mxu1 %v2667_v1  ;;  %2238 = vmatmul.mubr.msk.bf16.gmra.mrb[20].mxu0 %vm512_vm4, %v2822_v33  ;;  %v2646_v33 = vld [vmem:[%s3423_s2 + $0x58] sm:$0xff]  }
 0x12b   : > { %2241 = vmatprep.mubr.msk.bf16.mxu0 %vm2668_vm1, %v2667_v1  ;;  %2258 = vmatpush3.bf16.msra.mxu0 %v2645_v2 }
 0x12c   : > { %2350 = vmatmul.mubr.msk.bf16.gmra.mrb[0].mxu1 %vm512_vm4, %v2955_v36  ;;  %2259 = vmatprep.subr.bf16.mxu0 %v2667_v1  ;;  %v2650_v36 = vld [vmem:[%s3423_s2 + $0x60] sm:$0xff]  }
 0x12d   : > { %2353 = vmatprep.mubr.msk.bf16.mxu1 %vm2668_vm1, %v2667_v1  ;;  %2370 = vmatpush3.bf16.msra.mxu1 %v2641_v6 }
 0x12e   : > { %2371 = vmatprep.subr.bf16.mxu1 %v2667_v1 }
 0x12f   : > { %2260 = vmatpush3.bf16.msra.mxu0 %v2646_v33 }
 0x130   : > { %2281 = vmatprep.subr.bf16.mxu0 %v2667_v1 }
 0x131   : > { %2372 = vmatpush3.bf16.msra.mxu1 %v2644_v3 }
 0x132   : > { %2393 = vmatprep.subr.bf16.mxu1 %v2667_v1  ;;  %2242 = vmatmul.mubr.msk.bf16.gmra.mrb[24].mxu0 %vm512_vm4, %v2832_v44  ;;  %v2647_v44 = vld [vmem:[%s3423_s2 + $0xe0] sm:$0xff]  }
 0x133   : > { %2245 = vmatprep.mubr.msk.bf16.mxu0 %vm2668_vm1, %v2667_v1 }
 0x134   : > { %2354 = vmatmul.mubr.msk.bf16.gmra.mrb[4].mxu1 %vm512_vm4, %v2967_v57  ;;  %v2648_v57 = vld [vmem:[%s3423_s2 + $0xe8] sm:$0xff]  }
 0x135   : > { %2357 = vmatprep.mubr.msk.bf16.mxu1 %vm2668_vm1, %v2667_v1 }
 0x13a   : > { %2246 = vmatmul.mubr.msk.bf16.gmra.mrb[28].mxu0 %vm512_vm4, %v2858_v62 }
 0x13b   : > { %2249 = vmatprep.mubr.msk.bf16.mxu0 %vm2668_vm1, %v2667_v1 }
 0x13c   : > { %2358 = vmatmul.mubr.msk.bf16.gmra.mrb[8].mxu1 %vm512_vm4, %v2983_v40  ;;  %v2653_v40 = vld [vmem:[%s3423_s2 + $0x70] sm:$0xff]  }
 0x13d   : > { %2361 = vmatprep.mubr.msk.bf16.mxu1 %vm2668_vm1, %v2667_v1 }
 0x142   : > { %2250 = vmatmul.mubr.msk.bf16.gmra.mrb[32].mxu0 %vm512_vm4, %v2884_v17 }
 0x143   : > { %2261 = vmatprep.mubr.msk.bf16.mxu0 %vm2668_vm1, %v2667_v1 }
 0x144   : > { %2362 = vmatmul.mubr.msk.bf16.gmra.mrb[12].mxu1 %vm512_vm4, %v2993_v9  ;;  %v2652_v9 = vld [vmem:[%s3423_s2 + $0xf8] sm:$0xff]  }
 0x145   : > { %2373 = vmatprep.mubr.msk.bf16.mxu1 %vm2668_vm1, %v2667_v1 }
 0x14a   : > { %2262 = vmatmul.mubr.msk.bf16.vlgmr.msra.gmra.mrb[16].mxu0 %vm512_vm4, %v2845_v50  ;;  %v2651_v50 = vld [vmem:[%s3423_s2 + $0x68] sm:$0xff]  }
 0x14b   : > { %2265 = vmatprep.mubr.msk.bf16.mxu0 %vm2668_vm1, %v2667_v1  ;;  %2282 = vmatpush3.bf16.msra.mxu0 %v2650_v36 }
 0x14c   : > { %2374 = vmatmul.mubr.msk.bf16.vlgmr.msra.gmra.mrb[16].mxu1 %vm512_vm4, %v2973_v60  ;;  %2283 = vmatprep.subr.bf16.mxu0 %v2667_v1  ;;  %v2649_v60 = vld [vmem:[%s3423_s2 + $0xf0] sm:$0xff]  }
 0x14d   : > { %2394 = vmatpush3.bf16.msra.mxu1 %v2647_v44  ;;  %2377 = vmatprep.mubr.msk.bf16.mxu1 %vm2668_vm1, %v2667_v1 }
 0x14e   : > { %2395 = vmatprep.subr.bf16.mxu1 %v2667_v1 }
 0x14f   : > { %2284 = vmatpush3.bf16.msra.mxu0 %v2651_v50 }
 0x150   : > { %2285 = vmatprep.subr.bf16.mxu0 %v2667_v1 }
 0x151   : > { %2396 = vmatpush3.bf16.msra.mxu1 %v2648_v57 }
 0x152   : > { %2397 = vmatprep.subr.bf16.mxu1 %v2667_v1  ;;  %2266 = vmatmul.mubr.msk.bf16.gmra.mrb[20].mxu0 %vm512_vm4, %v2998_v14  ;;  %v2654_v14 = vld [vmem:[%s3423_s2 + $0x78] sm:$0xff]  }
 0x153   : > { %2269 = vmatprep.mubr.msk.bf16.mxu0 %vm2668_vm1, %v2667_v1  ;;  %2286 = vmatpush3.bf16.msra.mxu0 %v2653_v40 }
 0x154   : > { %2378 = vmatmul.mubr.msk.bf16.gmra.mrb[0].mxu1 %vm512_vm4, %v3005_v20  ;;  %2287 = vmatprep.subr.bf16.mxu0 %v2667_v1  ;;  %v1358_v20 = vsel %vm1205_vm5, %v1355_v7, %v1357_v31  ;;  %v733_v7 = vrot.slane %v2910_v48, 1  ;;  %v2656_v48 = vld [vmem:[%s3423_s2 + $0x108] sm:$0xff]  }
 0x155   : > { %2381 = vmatprep.mubr.msk.bf16.mxu1 %vm2668_vm1, %v2667_v1  ;;  %2398 = vmatpush3.bf16.msra.mxu1 %v2649_v60 }
 0x156   : > { %2399 = vmatprep.subr.bf16.mxu1 %v2667_v1  ;;  %v734_v31 = vsel %vm723_vm3, %v731_v5, %v733_v7 }
 0x157   : > { %2288 = vmatpush3.bf16.msra.mxu0 %v2654_v14 }
 0x158   : > { %2309 = vmatprep.subr.bf16.mxu0 %v2667_v1 }
 0x159   : > { %2400 = vmatpush3.bf16.msra.mxu1 %v2652_v9 }
 0x15a   : > { %2421 = vmatprep.subr.bf16.mxu1 %v2667_v1  ;;  %2270 = vmatmul.mubr.msk.bf16.gmra.mrb[24].mxu0 %vm512_vm4, %v3013_v43  ;;  %v732_v43 = vsel %vm723_vm3, %v729_v15, %v731_v5  ;;  %v2655_v15 = vld [vmem:[%s3423_s2 + $0x100] sm:$0xff]  }
 0x15b   : > { %2273 = vmatprep.mubr.msk.bf16.mxu0 %vm2668_vm1, %v2667_v1 }
 0x15c   : > { %2382 = vmatmul.mubr.msk.bf16.gmra.mrb[4].mxu1 %vm512_vm4, %v1358_v20 }
 0x15d   : > { %2385 = vmatprep.mubr.msk.bf16.mxu1 %vm2668_vm1, %v2667_v1 }
 0x162   : > { %2274 = vmatmul.mubr.msk.bf16.gmra.mrb[28].mxu0 %vm512_vm4, %v732_v43 }
 0x163   : > { %2277 = vmatprep.mubr.msk.bf16.mxu0 %vm2668_vm1, %v2667_v1 }
 0x164   : > { %2386 = vmatmul.mubr.msk.bf16.gmra.mrb[8].mxu1 %vm512_vm4, %v3027_v47 }
 0x165   : > { %2389 = vmatprep.mubr.msk.bf16.mxu1 %vm2668_vm1, %v2667_v1 }
 0x16a   : > { %2278 = vmatmul.mubr.msk.bf16.gmra.mrb[32].mxu0 %vm512_vm4, %v734_v31 }
 0x16b   : > { %2289 = vmatprep.mubr.msk.bf16.mxu0 %vm2668_vm1, %v2667_v1 }
 0x16c   : > { %2390 = vmatmul.mubr.msk.bf16.gmra.mrb[12].mxu1 %vm512_vm4, %v3030_v30 }
 0x16d   : > { %2401 = vmatprep.mubr.msk.bf16.mxu1 %vm2668_vm1, %v2667_v1 }
 0x172   : > { %2290 = vmatmul.mubr.msk.bf16.vlgmr.msra.gmra.mrb[16].mxu0 %vm512_vm4, %v3020_v27  ;;  %v2657_v27 = vld [vmem:[%s3423_s2 + $0x110] sm:$0xff]  }
 0x173   : > { %2293 = vmatprep.mubr.msk.bf16.mxu0 %vm2668_vm1, %v2667_v1  ;;  %2310 = vmatpush3.bf16.msra.mxu0 %v2785_v22  ;;  %v2658_v22 = vld [vmem:[%s3423_s2 + $0x118] sm:$0xff]  }
 0x174   : > { %2402 = vmatmul.mubr.msk.bf16.vlgmr.msra.gmra.mrb[16].mxu1 %vm512_vm4, %v3046_v0  ;;  %2311 = vmatprep.subr.bf16.mxu0 %v2667_v1 }
 0x175   : > { %2422 = vmatpush3.bf16.msra.mxu1 %v2655_v15  ;;  %2405 = vmatprep.mubr.msk.bf16.mxu1 %vm2668_vm1, %v2667_v1 }
 0x176   : > { %2423 = vmatprep.subr.bf16.mxu1 %v2667_v1 }
 0x177   : > { %2312 = vmatpush3.bf16.msra.mxu0 %v2796_v24  ;;  %v1665_v24 = vrot.slane %v2884_v17, 3 }
 0x178   : > { %2313 = vmatprep.subr.bf16.mxu0 %v2667_v1 }
 0x179   : > { %2424 = vmatpush3.bf16.msra.mxu1 %v2656_v48 }
 0x17a   : > { %2425 = vmatprep.subr.bf16.mxu1 %v2667_v1  ;;  %2294 = vmatmul.mubr.msk.bf16.gmra.mrb[20].mxu0 %vm512_vm4, %v3051_v63 }
 0x17b   : > { %2297 = vmatprep.mubr.msk.bf16.mxu0 %vm2668_vm1, %v2667_v1  ;;  %2314 = vmatpush3.bf16.msra.mxu0 %v2808_v25  ;;  %v1666_v25 = vsel %vm1659_vm8, %v1663_v58, %v1665_v24 }
 0x17c   : > { %2406 = vmatmul.mubr.msk.bf16.gmra.mrb[0].mxu1 %vm512_vm4, %v3069_v8  ;;  %2315 = vmatprep.subr.bf16.mxu0 %v2667_v1  ;;  %v3363_v8 = vld [vmem:[%s3424_s3] ss:$0 sm:$0xff] }
 0x17d   : > { %2409 = vmatprep.mubr.msk.bf16.mxu1 %vm2668_vm1, %v2667_v1  ;;  %2426 = vmatpush3.bf16.msra.mxu1 %v2657_v27 }
 0x17e   : > { %2427 = vmatprep.subr.bf16.mxu1 %v2667_v1 }
 0x17f   : > { %2316 = vmatpush3.bf16.msra.mxu0 %v2815_v26  ;;  %v1668_v26 = vsel %vm1659_vm8, %v1665_v24, %v1667_v56 }
 0x181   : > { %2428 = vmatpush3.bf16.msra.mxu1 %v2658_v22 }
 0x182   : > { %2298 = vmatmul.mubr.msk.bf16.gmra.mrb[24].mxu0 %vm512_vm4, %v3059_v41 }
 0x183   : > { %2301 = vmatprep.mubr.msk.bf16.mxu0 %vm2668_vm1, %v2667_v1 }
 0x184   : > { %2410 = vmatmul.mubr.msk.bf16.gmra.mrb[4].mxu1 %vm512_vm4, %v3072_v13 }
 0x185   : > { %2413 = vmatprep.mubr.msk.bf16.mxu1 %vm2668_vm1, %v2667_v1 }
 0x18a   : > { %2302 = vmatmul.mubr.msk.bf16.gmra.mrb[28].mxu0 %vm512_vm4, %v3065_v45 }
 0x18b   : > { %2305 = vmatprep.mubr.msk.bf16.mxu0 %vm2668_vm1, %v2667_v1 }
 0x18c   : > { %2414 = vmatmul.mubr.msk.bf16.gmra.mrb[8].mxu1 %vm512_vm4, %v3100_v35 }
 0x18d   : > { %2417 = vmatprep.mubr.msk.bf16.mxu1 %vm2668_vm1, %v2667_v1 }
 0x192   : > { %2306 = vmatmul.mubr.msk.bf16.gmra.mrb[32].mxu0 %vm512_vm4, %v3082_v53  ;;  %v3369_v53 = vld [vmem:[%s3425_s4] ss:$0 sm:$0xff] }
 0x193   : > { %2317 = vmatprep.mubr.msk.bf16.mxu0 %vm2668_vm1, %v2667_v1 }
 0x194   : > { %2418 = vmatmul.mubr.msk.bf16.gmra.mrb[12].mxu1 %vm512_vm4, %v3103_v42 }
 0x195   : > { %2429 = vmatprep.mubr.msk.bf16.mxu1 %vm2668_vm1, %v2667_v1 }
 0x19a   : > { %2318 = vmatmul.mubr.msk.bf16.vlgmr.msra.gmra.mrb[16].mxu0 %vm512_vm4, %v3079_v37 }
 0x19c   : > { %2430 = vmatmul.mubr.msk.bf16.vlgmr.msra.gmra.mrb[16].mxu1 %vm512_vm4, %v3089_v61 }
 0x19d   : > { %2433 = vmatprep.mubr.msk.bf16.mxu1 %vm2668_vm1, %v2667_v1 }
 0x1a4   : > { %2434 = vmatmul.mubr.msk.bf16.gmra.mrb[0].mxu1 %vm512_vm4, %v3094_v51 }
 0x1a5   : > { %2437 = vmatprep.mubr.msk.bf16.mxu1 %vm2668_vm1, %v2667_v1 }
 0x1ac   : > { %2438 = vmatmul.mubr.msk.bf16.gmra.mrb[4].mxu1 %vm512_vm4, %v1666_v25 }
 0x1ad   : > { %2441 = vmatprep.mubr.msk.bf16.mxu1 %vm2668_vm1, %v2667_v1 }
 0x1b4   : > { %2442 = vmatmul.mubr.msk.bf16.gmra.mrb[8].mxu1 %vm512_vm4, %v1668_v26 }
 0x1b5   : > { %2445 = vmatprep.mubr.msk.bf16.mxu1 %vm2668_vm1, %v2667_v1 }
 0x1bc   : > { %2446 = vmatmul.mubr.msk.bf16.gmra.mrb[12].mxu1 %vm512_vm4, %v3109_v19 }
 0x24d   : > { %v970_v62 = vpop.f32.mrb[20].mxu0 }
 0x24e   : > { %v2295_v17 = vpop.f32.mrb[21].mxu0 }
 0x24f   : > { %v973_v47 = vpop.f32.mrb[22].mxu0 }
 0x250   : > { %v2296_v30 = vpop.f32.mrb[23].mxu0 }
 0x255   : > { %v978_v16 = vpop.f32.mrb[24].mxu0 }
 0x256   : > { %v2299_v0 = vpop.f32.mrb[25].mxu0 }
 0x257   : > { %v981_v63 = vpop.f32.mrb[26].mxu0 }
 0x258   : > { %v2300_v23 = vpop.f32.mrb[27].mxu0 }
 0x25d   : > { %v986_v52 = vpop.f32.mrb[28].mxu0 }
 0x25e   : > { %v2303_v11 = vpop.f32.mrb[29].mxu0 }
 0x25f   : > { %v989_v18 = vpop.f32.mrb[30].mxu0 }
 0x260   : > { %v2304_v41 = vpop.f32.mrb[31].mxu0 }
 0x265   : > { %v3356_v46 = vpop.f32.mrb[32].mxu0 }
 0x266   : > { %v2307_v4 = vpop.f32.mrb[33].mxu0 }
 0x267   : > { %v3358_v1 = vpop.f32.mrb[34].mxu0 }
 0x268   : > { %v2308_v45 = vpop.f32.mrb[35].mxu0 }
 0x26d   : > { %v1147_v21 = vpop.f32.mrb[16].mxu0 }
 0x26e   : > { %v2319_v49 = vpop.f32.mrb[17].mxu0 }
 0x26f   : > { %v1744_v54 = vpop.f32.mrb[16].mxu1  ;;  %v1150_v13 = vpop.f32.mrb[18].mxu0 }
 0x270   : > { %v2461_v32 = vadd.f32 %v1744_v54, %v1147_v21  ;;  %v2431_v37 = vpop.f32.mrb[17].mxu1  ;;  %v2320_v38 = vpop.f32.mrb[19].mxu0 }
 0x271   : > { %v1747_v28 = vpop.f32.mrb[18].mxu1 }
 0x272   : > { %v1800_v58 = vmul.f32 %v2461_v32, %v3363_v8  ;;  %v2462_v59 = vadd.f32 %v1747_v28, %v1150_v13  ;;  %v2432_v34 = vpop.f32.mrb[19].mxu1 }
 0x274   : > { %v1817_v61 = vadd.f32 %v3369_v53, %v1800_v58  ;;  %v1801_v51 = vmul.f32 %v2462_v59, %v3363_v8 }
 0x276   : > { %v1827_v56 = vmax.f32 %v1817_v61, 0.0  ;;  %v1818_v12 = vadd.f32 %v3369_v53, %v1801_v51 }
 0x277   : > { %v1752_v35 = vpop.f32.mrb[0].mxu1 }
 0x278   : > { %1837 = vst.msk [vmem:[%s3377_s14] sm:$0xff] %vm512_vm4, %v1827_v56  ;;  %v1828_v42 = vmax.f32 %v1818_v12, 0.0  ;;  %v2463_v19 = vadd.f32 %v1752_v35, %v970_v62  ;;  %v2435_v55 = vpop.f32.mrb[1].mxu1 }
 0x279   : > { %v1755_v39 = vpop.f32.mrb[2].mxu1 }
 0x27a   : > { %1838 = vst.msk [vmem:[%s3377_s14 + $0x8] sm:$0xff] %vm512_vm4, %v1828_v42  ;;  %v1802_v10 = vmul.f32 %v2463_v19, %v3363_v8  ;;  %v2464_v29 = vadd.f32 %v1755_v39, %v973_v47  ;;  %v2436_v6 = vpop.f32.mrb[3].mxu1 }
 0x27c   : > { %v1819_v2 = vadd.f32 %v3369_v53, %v1802_v10  ;;  %v1803_v3 = vmul.f32 %v2464_v29, %v3363_v8 }
 0x27e   : > { %v1829_v33 = vmax.f32 %v1819_v2, 0.0  ;;  %v1820_v44 = vadd.f32 %v3369_v53, %v1803_v3 }
 0x27f   : > { %v1760_v36 = vpop.f32.mrb[4].mxu1 }
 0x280   : > { %1839 = vst.msk [vmem:[%s3377_s14 + $0x10] sm:$0xff] %vm512_vm4, %v1829_v33  ;;  %v1830_v57 = vmax.f32 %v1820_v44, 0.0  ;;  %v2465_v50 = vadd.f32 %v1760_v36, %v978_v16  ;;  %v2439_v60 = vpop.f32.mrb[5].mxu1 }
 0x281   : > { %v1763_v40 = vpop.f32.mrb[6].mxu1 }
 0x282   : > { %1840 = vst.msk [vmem:[%s3377_s14 + $0x18] sm:$0xff] %vm512_vm4, %v1830_v57  ;;  %v1804_v9 = vmul.f32 %v2465_v50, %v3363_v8  ;;  %v2466_v14 = vadd.f32 %v1763_v40, %v981_v63  ;;  %v2440_v20 = vpop.f32.mrb[7].mxu1 }
 0x284   : > { %v1821_v5 = vadd.f32 %v3369_v53, %v1804_v9  ;;  %v1805_v43 = vmul.f32 %v2466_v14, %v3363_v8 }
 0x286   : > { %v1831_v7 = vmax.f32 %v1821_v5, 0.0  ;;  %v1822_v31 = vadd.f32 %v3369_v53, %v1805_v43 }
 0x287   : > { %v1768_v15 = vpop.f32.mrb[8].mxu1 }
 0x288   : > { %1841 = vst.msk [vmem:[%s3377_s14 + $0x20] sm:$0xff] %vm512_vm4, %v1831_v7  ;;  %v1832_v48 = vmax.f32 %v1822_v31, 0.0  ;;  %v2467_v27 = vadd.f32 %v1768_v15, %v986_v52  ;;  %v2443_v22 = vpop.f32.mrb[9].mxu1 }
 0x289   : > { %v1771_v24 = vpop.f32.mrb[10].mxu1 }
 0x28a   : > { %1842 = vst.msk [vmem:[%s3377_s14 + $0x28] sm:$0xff] %vm512_vm4, %v1832_v48  ;;  %v1806_v25 = vmul.f32 %v2467_v27, %v3363_v8  ;;  %v2468_v26 = vadd.f32 %v1771_v24, %v989_v18  ;;  %v2444_v62 = vpop.f32.mrb[11].mxu1 }
 0x28c   : > { %v1823_v17 = vadd.f32 %v3369_v53, %v1806_v25  ;;  %v1807_v47 = vmul.f32 %v2468_v26, %v3363_v8 }
 0x28e   : > { %v1833_v30 = vmax.f32 %v1823_v17, 0.0  ;;  %v1824_v16 = vadd.f32 %v3369_v53, %v1807_v47 }
 0x28f   : > { %v1776_v0 = vpop.f32.mrb[12].mxu1 }
 0x290   : > { %1843 = vst.msk [vmem:[%s3377_s14 + $0x30] sm:$0xff] %vm512_vm4, %v1833_v30  ;;  %v1834_v63 = vmax.f32 %v1824_v16, 0.0  ;;  %v2469_v23 = vadd.f32 %v1776_v0, %v3356_v46  ;;  %v2447_v52 = vpop.f32.mrb[13].mxu1 }
 0x291   : > { %v1779_v11 = vpop.f32.mrb[14].mxu1 }
 0x292   : > { %1844 = vst.msk [vmem:[%s3377_s14 + $0x38] sm:$0xff] %vm512_vm4, %v1834_v63  ;;  %v1808_v18 = vmul.f32 %v2469_v23, %v3363_v8  ;;  %v2470_v41 = vadd.f32 %v1779_v11, %v3358_v1  ;;  %v2448_v4 = vpop.f32.mrb[15].mxu1 }
 0x294   : > { %v1825_v45 = vadd.f32 %v3369_v53, %v1808_v18  ;;  %v1809_v21 = vmul.f32 %v2470_v41, %v3363_v8 }
 0x296   : > { %v1835_v49 = vmax.f32 %v1825_v45, 0.0  ;;  %v1826_v54 = vadd.f32 %v3369_v53, %v1809_v21 }
 0x298   : > { %1845 = vst.msk [vmem:[%s3377_s14 + $0x40] sm:$0xff] %vm512_vm4, %v1835_v49  ;;  %v1836_v13 = vmax.f32 %v1826_v54, 0.0 }
 0x29a   : > { %1846 = vst.msk [vmem:[%s3377_s14 + $0x48] sm:$0xff] %vm512_vm4, %v1836_v13 }
 0x29b PF: > { %s15_s18 = sadd.s32 1, %s2665_s18  }
 0x29c   : > { %p12_p4 = scmp.ge.s32.totalorder %s15_s18, 4  }
 0x29e   :  { %14 = sbr.rel (!%p12_p4) target bundleno = 1 (0x1), region = 78 }

// kernel: ncd_forward.13
= control target key start
LH: loop header
LB: loop body
LE: loop exit
PB: predicated region body
PF: predicated region fallthrough
CT: control target
= control target key end

     0   :  { %s2710_s27 = smov 0   ;;  %s3014_s0 = inlined_call_operand.vmem [shape: f32[2,24,32], index: 0, kind: input, shape index: {}]   ;;  %s3015_s1 = inlined_call_operand.vmem [shape: f32[2,24,32], index: 1, kind: input, shape index: {}]   ;;  %s3016_s2 = inlined_call_operand.vmem [shape: f32[42,24], index: 2, kind: input, shape index: {}, may-alias: {2,3}]   ;;  %s3017_s3 = inlined_call_operand.vmem [shape: f32[42,24], index: 3, kind: input, shape index: {}, may-alias: {2,3}]   ;;  %s3018_s4 = inlined_call_operand.vmem [shape: bf16[9,32,64], index: 4, kind: input, shape index: {}]   ;;  %s3019_s5 = inlined_call_operand.vmem [shape: bf16[9,32,64], index: 5, kind: input, shape index: {}]   ;;  %s3020_s6 = inlined_call_operand.vmem [shape: f32[1,64], index: 6, kind: input, shape index: {}]   ;;  %s3021_s7 = inlined_call_operand.vmem [shape: f32[1,64], index: 7, kind: input, shape index: {}]   ;;  %s3022_s8 = inlined_call_operand.vmem [shape: f32[2,24,64], index: 8, kind: output, shape index: {}]  }
   0x1 LB: > { %s2113_s28 = sadd.s32 4294967295, %s2663_s27   ;;  %p2117_p0 = scmp.ge.s32.totalorder %s2663_s27, 1  ;;  %s2663_s27 = sphi %s2710_s27, %s18_s27  }
   0x2   : > { %p272_p1 = scmp.lt.s32.totalorder %s2663_s27, 3 }
   0x4   : > { %p273_p2 = pnand %p2117_p0, %p272_p1 }
   0x5   : > { %p311_p3 = scmp.lt.s32.totalorder (!%p273_p2), %s2113_s28, 1  ;;  %v327_v0 = vld [vmem:[%s3016_s2] sm:$0xff] (!%p273_p2)  ;;  %vm336_vm0 = vcmask (!%p273_p2), 195584   ;;  %v328_v5 = vld [vmem:[%s3016_s2 + $0x8] sm:$0xff] (!%p273_p2)  ;;  %v329_v6 = vld [vmem:[%s3016_s2 + $0x10] sm:$0xff] (!%p273_p2)  ;;  %vm694_vm1 = vcmask (!%p273_p2), 1044480  }
   0x6   : > { %276 = sbr.rel (%p273_p2) target bundleno = 882 (0x372), region = 52  ;;  %2369 = vmatprep.mubr.msk.f32.mxu0 (!%p273_p2), %vm336_vm0, %v327_v0  ;;  %v330_v7 = vld [vmem:[%s3016_s2 + $0x18] sm:$0xff] (!%p273_p2)  ;;  %v331_v8 = vld [vmem:[%s3016_s2 + $0x20] sm:$0xff] (!%p273_p2)  ;;  %v332_v9 = vld [vmem:[%s3016_s2 + $0x28] sm:$0x3] (!%p273_p2)  ;;  %vm616_vm2 = vcmask (!%p273_p2), 1046528  }
   0x7   : > { %v2621_v10 = vld [vmem:[%s3018_s4 + $0x10] sm:$0xff] (!%p273_p2)   ;;  %v2623_v11 = vld [vmem:[%s3018_s4 + $0x80] sm:$0xff] (!%p273_p2)   ;;  %v2622_v12 = vld [vmem:[%s3018_s4 + $0x18] sm:$0xff] (!%p273_p2)   ;;  %vm461_vm3 = vsmask.f32 (!%p273_p2), 7424  ;;  %vm489_vm4 = vcmask (!%p273_p2), 261120  }
   0x8   : > { %2442 = vmatprep.subr.bf16.mxu1 (!%p273_p2), %v2623_v11  ;;  %v2624_v13 = vld [vmem:[%s3018_s4 + $0x88] sm:$0xff] (!%p273_p2)   ;;  %v2625_v14 = vld [vmem:[%s3018_s4] sm:$0xff] (!%p273_p2)   ;;  %vm772_vm5 = vsmask.f32 (!%p273_p2), 4352  ;;  %vm933_vm6 = vcmask (!%p273_p2), 1045504   ;;  %vm2042_vm8 = vcmask (!%p273_p2), 523264  }
   0x9   : > { %2443 = vmatpush3.bf16.msra.mxu1 (!%p273_p2), %v2623_v11  ;;  %v2626_v51 = vld [vmem:[%s3018_s4 + $0x8] sm:$0xff] (!%p273_p2)   ;;  %vm1011_vm7 = vsmask.f32 (!%p273_p2), 5376  ;;  %v2627_v62 = vld [vmem:[%s3018_s4 + $0x20] sm:$0xff] (!%p273_p2)  }
   0xa   : > { %2444 = vmatprep.subr.bf16.mxu1 (!%p273_p2), %v2624_v13 }
   0xd   : > { %s3024_s28 = smov (!%p311_p3, %s2113_s28), 1  ;;  %2445 = vmatpush3.bf16.msra.mxu1 %v2624_v13  ;;  %v2637_v13 = vld [vmem:[%s3018_s4 + $0x70] sm:$0xff]  }
   0xe   : > { %s2722_s9 = smul.u32 24, %s3024_s28 }
  0x10   : > { %s315_s12 = scalar_lea.vmem %s3014_s0, %s2722_s9  ;;  %s320_s19 = scalar_lea.vmem %s3015_s1, %s2722_s9 }
  0x11   : > { %v333_v1 = vld [vmem:[%s315_s12] sm:$0xff]  ;;  %v334_v2 = vld [vmem:[%s315_s12 + $0x8] sm:$0xff]  ;;  %v335_v3 = vld [vmem:[%s315_s12 + $0x10] sm:$0xff]  ;;  %s325_s16 = scalar_lea.vmem %s3022_s8, %s2722_s9 }
  0x12   : > { %v2537_v4 = vpack.c.bf16 %v334_v2, %v333_v1 }
  0x14   : > { %2538 = vmatprep.subr.bf16.mxu0 %v2537_v4 }
  0x15   : > { %2540 = vmatpush3.bf16.msra.mxu0 %v2537_v4  ;;  %v2629_v4 = vld [vmem:[%s3018_s4 + $0x30] sm:$0xff]  }
  0x16   : > { %2367 = vmatprep.subr.mxu0 %v335_v3 }
  0x19   : > { %2368 = vmatpush3.msra.mxu0 %v335_v3  ;;  %v2628_v3 = vld [vmem:[%s3018_s4 + $0x28] sm:$0xff]  }
  0x1a   : > { %2370 = vmatmul.mubr.msk.f32.vlgmr.msra.gmra.mrb[0].mxu0 %vm336_vm0, %v328_v5  ;;  %2378 = vmatprep.subr.bf16.mxu0 %v2621_v10  ;;  %v2630_v5 = vld [vmem:[%s3018_s4 + $0x38] sm:$0xff]  }
  0x1b   : > { %2372 = vmatprep.mubr.msk.f32.mxu0 %vm336_vm0, %v329_v6  ;;  %2379 = vmatpush3.bf16.msra.mxu0 %v2621_v10  ;;  %v2631_v6 = vld [vmem:[%s3018_s4 + $0x40] sm:$0xff]  }
  0x1c   : > { %2380 = vmatprep.subr.bf16.mxu0 %v2622_v12  ;;  %v2635_v10 = vld [vmem:[%s3018_s4 + $0x60] sm:$0xff]  }
  0x1e   : > { %2373 = vmatmul.mubr.msk.f32.gmra.mrb[2].mxu0 %vm336_vm0, %v330_v7  ;;  %v2632_v7 = vld [vmem:[%s3018_s4 + $0x48] sm:$0xff]  }
  0x1f   : > { %2375 = vmatprep.mubr.msk.f32.mxu0 %vm336_vm0, %v331_v8  ;;  %2381 = vmatpush3.bf16.msra.mxu0 %v2622_v12  ;;  %v2633_v8 = vld [vmem:[%s3018_s4 + $0x50] sm:$0xff]   ;;  %v2636_v12 = vld [vmem:[%s3018_s4 + $0x68] sm:$0xff]  }
  0x20   : > { %2386 = vmatprep.subr.bf16.mxu0 %v2625_v14 }
  0x22   : > { %2376 = vmatmul.mubr.msk.f32.gmra.mrb[4].mxu0 %vm336_vm0, %v332_v9  ;;  %v2634_v9 = vld [vmem:[%s3018_s4 + $0x58] sm:$0xff]  }
  0xed   : > { %v2371_v15 = vpop.f32.mrb[0].mxu0 }
  0xee   : > { %v421_v16 = vpop.f32.mrb[1].mxu0 }
  0xef   : > { %v449_v17 = vpack.c.bf16 %v2371_v15, %v421_v16  ;;  %v1181_v16 = vld [vmem:[%s320_s19 + $0x8] sm:$0xff] }
  0xf1   : > { %v2763_v18 = vpop.f32.mrb[2].mxu0  ;;  %v463_v19 = vshrl.u32 %v449_v17, 16  ;;  %v465_v20 = vshll.u32 %v449_v17, 16  ;;  %v617_v25 = vrot.slane %v449_v17, 1  ;;  %v695_v26 = vrot.slane %v449_v17, 3 }
  0xf2   : > { %v431_v21 = vpop.f32.mrb[3].mxu0  ;;  %v850_v11 = vpack.c.bf16 %v2763_v18, %v2763_v18 }
  0xf3   : > { %v2766_v22 = vpack.c.bf16 %v2763_v18, %v431_v21  ;;  %v2768_v23 = vpack.c.bf16 %v431_v21, %v2371_v15  ;;  %v467_v24 = vrot.slane %v465_v20, 1  ;;  %v773_v27 = vrot.slane %v463_v19, 3  ;;  %v1180_v15 = vld [vmem:[%s320_s19] sm:$0xff] }
  0xf4   : > { %v774_v28 = vrot.slane %v465_v20, 4  ;;  %v450_v2 = vpack.c.bf16 %v431_v21, %v431_v21  ;;  %v1175_v20 = vld [vmem:[%s3017_s3 + $0x8] sm:$0xff]  ;;  %v1176_v21 = vld [vmem:[%s3017_s3 + $0x10] sm:$0xff] }
  0xf5   : > { %v474_v29 = vshrl.u32 %v2766_v22, 16  ;;  %v2377_v30 = vpop.f32.mrb[4].mxu0  ;;  %v468_v31 = vor.u32 %v467_v24, %v463_v19  ;;  %v470_v32 = vshll.u32 %v2766_v22, 16  ;;  %v1102_v33 = vrot.slane %v2768_v23, 3  ;;  %v1182_v19 = vld [vmem:[%s320_s19 + $0x10] sm:$0xff] }
  0xf6   : > { %v441_v34 = vpop.f32.mrb[5].mxu0  ;;  %v618_v35 = vrot.slane %v2766_v22, 1  ;;  %v696_v36 = vrot.slane %v2766_v22, 3  ;;  %v775_v37 = vor.u32 %v774_v28, %v773_v27  ;;  %v934_v38 = vrot.slane %v2768_v23, 2  ;;  %v1177_v22 = vld [vmem:[%s3017_s3 + $0x18] sm:$0xff]  ;;  %v2641_v27 = vld [vmem:[%s3019_s5 + $0x10] sm:$0xff]  }
  0xf7   : > { %v2777_v39 = vpack.c.bf16 %v441_v34, %v2763_v18  ;;  %v472_v40 = vrot.slane %v470_v32, 1  ;;  %v776_v41 = vrot.slane %v474_v29, 3  ;;  %v777_v42 = vrot.slane %v470_v32, 4  ;;  %v1174_v18 = vld [vmem:[%s3017_s3] sm:$0xff]  ;;  %v1179_v24 = vld [vmem:[%s3017_s3 + $0x28] sm:$0x3] }
  0xf8   : > { %v619_v43 = vsel %vm616_vm2, %v617_v25, %v618_v35  ;;  %v697_v44 = vsel %vm694_vm1, %v695_v26, %v696_v36  ;;  %v1012_v45 = vshrl.u32 %v2768_v23, 16  ;;  %v1015_v46 = vshll.u32 %v2768_v23, 16  ;;  %v2639_v25 = vld [vmem:[%s3019_s5] sm:$0xff]   ;;  %v2640_v26 = vld [vmem:[%s3019_s5 + $0x8] sm:$0xff]  }
  0xf9   : > { %v1020_v47 = vshrl.u32 %v2777_v39, 16  ;;  %v1023_v48 = vshll.u32 %v2777_v39, 16  ;;  %v473_v49 = vsel %vm461_vm3, %v468_v31, %v472_v40  ;;  %v476_v50 = vor.u32 %v474_v29, %v472_v40  ;;  %2465 = vmatprep.subr.bf16.mxu1 %v2639_v25 }
  0xfa   : > { %2382 = vmatprep.mubr.msk.bf16.mxu0 %vm489_vm4, %v473_v49  ;;  %v1103_v52 = vrot.slane %v2777_v39, 3  ;;  %v778_v53 = vor.u32 %v777_v42, %v776_v41  ;;  %v935_v54 = vrot.slane %v2777_v39, 2  ;;  %v1014_v55 = vrot.slane %v1012_v45, 2  ;;  %v2642_v42 = vld [vmem:[%s3019_s5 + $0x18] sm:$0xff]  }
  0xfb   : > { %v1022_v56 = vrot.slane %v1020_v47, 2  ;;  %v1025_v57 = vrot.slane %v1023_v48, 3  ;;  %2383 = vmatmul.mubr.msk.bf16.vlgmr.msra.gmra.mrb[8].mxu0 %vm489_vm4, %v476_v50  ;;  %v1017_v58 = vrot.slane %v1015_v46, 3 }
  0xfc   : > { %2387 = vmatpush3.bf16.msra.mxu0 %v2625_v14  ;;  %2390 = vmatprep.mubr.msk.bf16.mxu0 %vm489_vm4, %v449_v17  ;;  %v1104_v59 = vsel %vm694_vm1, %v1102_v33, %v1103_v52  ;;  %v779_v60 = vsel %vm772_vm5, %v775_v37, %v778_v53  ;;  %v936_v61 = vsel %vm933_vm6, %v934_v38, %v935_v54  ;;  %v2638_v14 = vld [vmem:[%s3018_s4 + $0x78] sm:$0xff]  }
  0xfd   : > { %2446 = vmatprep.mubr.msk.bf16.mxu1 %vm489_vm4, %v1104_v59  ;;  %2388 = vmatprep.subr.bf16.mxu0 %v2626_v51  ;;  %v1018_v63 = vor.u32 %v1017_v58, %v1014_v55  ;;  %v1026_v0 = vor.u32 %v1025_v57, %v1022_v56  ;;  %v2541_v17 = vpack.c.bf16 %v1181_v16, %v1180_v15  ;;  %v2643_v58 = vld [vmem:[%s3019_s5 + $0x20] sm:$0xff]  }
  0xfe   : > { %2447 = vmatmul.mubr.msk.bf16.vlgmr.msra.gmra.mrb[0].mxu1 %vm489_vm4, %v1103_v52 }
  0xff   : > { %v1027_v1 = vsel %vm1011_vm7, %v1018_v63, %v1026_v0  ;;  %2466 = vmatpush3.bf16.msra.mxu1 %v2639_v25  ;;  %v2649_v25 = vld [vmem:[%s3019_s5 + $0x50] sm:$0xff]  }
 0x100   : > { %2389 = vmatpush3.bf16.msra.mxu0 %v2626_v51  ;;  %2467 = vmatprep.subr.bf16.mxu1 %v2640_v26 }
 0x101   : > { %2394 = vmatprep.subr.bf16.mxu0 %v2627_v62 }
 0x103   : > { %2468 = vmatpush3.bf16.msra.mxu1 %v2640_v26  ;;  %v2650_v26 = vld [vmem:[%s3019_s5 + $0x58] sm:$0xff]  }
 0x104   : > { %2473 = vmatprep.subr.bf16.mxu1 %v2641_v27 }
 0x107   : > { %2391 = vmatmul.mubr.msk.bf16.vlgmr.msra.gmra.mrb[8].mxu0 %vm489_vm4, %v450_v2 }
 0x108   : > { %2395 = vmatpush3.bf16.msra.mxu0 %v2627_v62  ;;  %2398 = vmatprep.mubr.msk.bf16.mxu0 %vm489_vm4, %v619_v43 }
 0x109   : > { %2396 = vmatprep.subr.bf16.mxu0 %v2628_v3 }
 0x10c   : > { %2397 = vmatpush3.bf16.msra.mxu0 %v2628_v3 }
 0x10d   : > { %2402 = vmatprep.subr.bf16.mxu0 %v2629_v4 }
 0x113   : > { %2399 = vmatmul.mubr.msk.bf16.vlgmr.msra.gmra.mrb[8].mxu0 %vm489_vm4, %v618_v35 }
 0x114   : > { %2403 = vmatpush3.bf16.msra.mxu0 %v2629_v4  ;;  %2406 = vmatprep.mubr.msk.bf16.mxu0 %vm489_vm4, %v697_v44 }
 0x115   : > { %2404 = vmatprep.subr.bf16.mxu0 %v2630_v5 }
 0x118   : > { %2405 = vmatpush3.bf16.msra.mxu0 %v2630_v5 }
 0x119   : > { %2410 = vmatprep.subr.bf16.mxu0 %v2631_v6 }
 0x11f   : > { %2407 = vmatmul.mubr.msk.bf16.vlgmr.msra.gmra.mrb[8].mxu0 %vm489_vm4, %v696_v36 }
 0x120   : > { %2411 = vmatpush3.bf16.msra.mxu0 %v2631_v6  ;;  %2414 = vmatprep.mubr.msk.bf16.mxu0 %vm489_vm4, %v779_v60 }
 0x121   : > { %2412 = vmatprep.subr.bf16.mxu0 %v2632_v7 }
 0x124   : > { %2413 = vmatpush3.bf16.msra.mxu0 %v2632_v7 }
 0x125   : > { %2418 = vmatprep.subr.bf16.mxu0 %v2633_v8 }
 0x12b   : > { %2415 = vmatmul.mubr.msk.bf16.vlgmr.msra.gmra.mrb[8].mxu0 %vm489_vm4, %v778_v53 }
 0x12c   : > { %2419 = vmatpush3.bf16.msra.mxu0 %v2633_v8  ;;  %2422 = vmatprep.mubr.msk.bf16.mxu0 %vm489_vm4, %v2768_v23  ;;  %v1178_v23 = vld [vmem:[%s3017_s3 + $0x20] sm:$0xff] }
 0x12d   : > { %2420 = vmatprep.subr.bf16.mxu0 %v2634_v9 }
 0x130   : > { %2421 = vmatpush3.bf16.msra.mxu0 %v2634_v9 }
 0x131   : > { %2426 = vmatprep.subr.bf16.mxu0 %v2635_v10 }
 0x137   : > { %2423 = vmatmul.mubr.msk.bf16.vlgmr.msra.gmra.mrb[8].mxu0 %vm489_vm4, %v850_v11 }
 0x138   : > { %2427 = vmatpush3.bf16.msra.mxu0 %v2635_v10  ;;  %2430 = vmatprep.mubr.msk.bf16.mxu0 %vm489_vm4, %v936_v61 }
 0x139   : > { %2428 = vmatprep.subr.bf16.mxu0 %v2636_v12 }
 0x13c   : > { %2429 = vmatpush3.bf16.msra.mxu0 %v2636_v12 }
 0x13d   : > { %2434 = vmatprep.subr.bf16.mxu0 %v2637_v13 }
 0x143   : > { %2431 = vmatmul.mubr.msk.bf16.vlgmr.msra.gmra.mrb[8].mxu0 %vm489_vm4, %v935_v54 }
 0x144   : > { %2435 = vmatpush3.bf16.msra.mxu0 %v2637_v13  ;;  %2438 = vmatprep.mubr.msk.bf16.mxu0 %vm489_vm4, %v1027_v1 }
 0x145   : > { %2436 = vmatprep.subr.bf16.mxu0 %v2638_v14 }
 0x148   : > { %2437 = vmatpush3.bf16.msra.mxu0 %v2638_v14 }
 0x149   : > { %2542 = vmatprep.subr.bf16.mxu0 %v2541_v17 }
 0x14f   : > { %2439 = vmatmul.mubr.msk.bf16.vlgmr.msra.gmra.mrb[8].mxu0 %vm489_vm4, %v1026_v0 }
 0x150   : > { %2544 = vmatpush3.bf16.msra.mxu0 %v2541_v17  ;;  %2456 = vmatprep.mubr.msk.f32.mxu0 %vm336_vm0, %v1174_v18 }
 0x151   : > { %2454 = vmatprep.subr.mxu0 %v1182_v19 }
 0x154   : > { %2455 = vmatpush3.msra.mxu0 %v1182_v19  ;;  %v2644_v19 = vld [vmem:[%s3019_s5 + $0x28] sm:$0xff]  }
 0x157   : > { %2457 = vmatmul.mubr.msk.f32.vlgmr.msra.gmra.mrb[6].mxu0 %vm336_vm0, %v1175_v20 }
 0x158   : > { %2459 = vmatprep.mubr.msk.f32.mxu0 %vm336_vm0, %v1176_v21  ;;  %v2645_v21 = vld [vmem:[%s3019_s5 + $0x30] sm:$0xff]  }
 0x15b   : > { %2460 = vmatmul.mubr.msk.f32.gmra.mrb[12].mxu0 %vm336_vm0, %v1177_v22  ;;  %v2646_v22 = vld [vmem:[%s3019_s5 + $0x38] sm:$0xff]  }
 0x15c   : > { %2462 = vmatprep.mubr.msk.f32.mxu0 %vm336_vm0, %v1178_v23  ;;  %v2647_v23 = vld [vmem:[%s3019_s5 + $0x40] sm:$0xff]  }
 0x15f   : > { %2463 = vmatmul.mubr.msk.f32.gmra.mrb[14].mxu0 %vm336_vm0, %v1179_v24  ;;  %v2648_v24 = vld [vmem:[%s3019_s5 + $0x48] sm:$0xff]  }
 0x222   : > { %v2893_v28 = vpop.f32.mrb[8].mxu0 }
 0x223   : > { %v2895_v29 = vpop.f32.mrb[9].mxu0 }
 0x224   : > { %v2441_v30 = vpop.f32.mrb[10].mxu0 }
 0x225   : > { %v2897_v31 = vpop.f32.mrb[11].mxu0 }
 0x22a   : > { %v2458_v32 = vpop.f32.mrb[6].mxu0 }
 0x22b   : > { %v1267_v33 = vpop.f32.mrb[7].mxu0 }
 0x22c   : > { %v1295_v34 = vpack.c.bf16 %v2458_v32, %v1267_v33  ;;  %v2653_v33 = vld [vmem:[%s3019_s5 + $0x70] sm:$0xff]  }
 0x22e   : > { %v2899_v35 = vpop.f32.mrb[12].mxu0  ;;  %2469 = vmatprep.mubr.msk.bf16.mxu1 %vm489_vm4, %v1295_v34  ;;  %v1376_v36 = vshrl.u32 %v1295_v34, 16  ;;  %v1378_v37 = vshll.u32 %v1295_v34, 16  ;;  %v1466_v49 = vrot.slane %v1295_v34, 1  ;;  %v1543_v53 = vrot.slane %v1295_v34, 3  ;;  %v2654_v34 = vld [vmem:[%s3019_s5 + $0x78] sm:$0xff]  }
 0x22f   : > { %v1277_v38 = vpop.f32.mrb[13].mxu0  ;;  %v1697_v30 = vpack.c.bf16 %v2899_v35, %v2899_v35 }
 0x230   : > { %v1296_v39 = vpack.c.bf16 %v1277_v38, %v1277_v38  ;;  %v2903_v40 = vpack.c.bf16 %v2899_v35, %v1277_v38  ;;  %v2905_v41 = vpack.c.bf16 %v1277_v38, %v2458_v32  ;;  %v1380_v43 = vrot.slane %v1378_v37, 1  ;;  %v2652_v32 = vld [vmem:[%s3019_s5 + $0x68] sm:$0xff]   ;;  %v2269_v38 = vld [vmem:[%s3020_s6] ss:$0 sm:$0xff] }
 0x231   : > { %v1620_v44 = vrot.slane %v1376_v36, 3  ;;  %v1621_v45 = vrot.slane %v1378_v37, 4 }
 0x232   : > { %v1387_v46 = vshrl.u32 %v2903_v40, 16  ;;  %v2464_v47 = vpop.f32.mrb[14].mxu0  ;;  %2470 = vmatmul.mubr.msk.bf16.vlgmr.msra.gmra.mrb[0].mxu1 %vm489_vm4, %v1296_v39  ;;  %v1383_v48 = vshll.u32 %v2903_v40, 16  ;;  %v1467_v50 = vrot.slane %v2903_v40, 1  ;;  %v1381_v52 = vor.u32 %v1380_v43, %v1376_v36  ;;  %v2656_v36 = vld [vmem:[%s3019_s5 + $0x88] sm:$0xff]  }
 0x233   : > { %2474 = vmatpush3.bf16.msra.mxu1 %v2641_v27  ;;  %v1287_v51 = vpop.f32.mrb[15].mxu0  ;;  %v1544_v54 = vrot.slane %v2903_v40, 3  ;;  %v1857_v55 = vshrl.u32 %v2905_v41, 16  ;;  %v1622_v62 = vor.u32 %v1621_v45, %v1620_v44  ;;  %v1860_v0 = vshll.u32 %v2905_v41, 16  ;;  %v2651_v27 = vld [vmem:[%s3019_s5 + $0x60] sm:$0xff]  }
 0x234   : > { %v2917_v56 = vpack.c.bf16 %v1287_v51, %v2899_v35  ;;  %2475 = vmatprep.subr.bf16.mxu1 %v2642_v42  ;;  %v1385_v57 = vrot.slane %v1383_v48, 1  ;;  %v1468_v59 = vsel %vm616_vm2, %v1466_v49, %v1467_v50  ;;  %v1623_v60 = vrot.slane %v1387_v46, 3  ;;  %v2655_v35 = vld [vmem:[%s3019_s5 + $0x80] sm:$0xff]  }
 0x235   : > { %v1545_v61 = vsel %vm694_vm1, %v1543_v53, %v1544_v54  ;;  %v1624_v63 = vrot.slane %v1383_v48, 4  ;;  %v1859_v4 = vrot.slane %v1857_v55, 2  ;;  %v1780_v6 = vrot.slane %v2905_v41, 2 }
 0x236   : > { %v1865_v1 = vshrl.u32 %v2917_v56, 16  ;;  %v1868_v2 = vshll.u32 %v2917_v56, 16  ;;  %v1386_v3 = vsel %vm461_vm3, %v1381_v52, %v1385_v57  ;;  %v1781_v7 = vrot.slane %v2917_v56, 2 }
 0x237   : > { %2477 = vmatprep.mubr.msk.bf16.mxu1 %vm489_vm4, %v1386_v3  ;;  %2476 = vmatpush3.bf16.msra.mxu1 %v2642_v42  ;;  %v1625_v5 = vor.u32 %v1624_v63, %v1623_v60  ;;  %v1862_v8 = vrot.slane %v1860_v0, 3  ;;  %v1947_v11 = vrot.slane %v2905_v41, 3  ;;  %v1948_v12 = vrot.slane %v2917_v56, 3 }
 0x238   : > { %v1867_v9 = vrot.slane %v1865_v1, 2  ;;  %v1870_v10 = vrot.slane %v1868_v2, 3  ;;  %2481 = vmatprep.subr.bf16.mxu1 %v2643_v58  ;;  %v1782_v14 = vsel %vm933_vm6, %v1780_v6, %v1781_v7  ;;  %v1389_v18 = vor.u32 %v1387_v46, %v1385_v57 }
 0x239   : > { %v1626_v13 = vsel %vm772_vm5, %v1622_v62, %v1625_v5  ;;  %v1863_v15 = vor.u32 %v1862_v8, %v1859_v4  ;;  %v1949_v17 = vsel %vm694_vm1, %v1947_v11, %v1948_v12 }
 0x23a   : > { %v1871_v16 = vor.u32 %v1870_v10, %v1867_v9 }
 0x23c   : > { %v1872_v20 = vsel %vm1011_vm7, %v1863_v15, %v1871_v16 }
 0x23e   : > { %2478 = vmatmul.mubr.msk.bf16.vlgmr.msra.gmra.mrb[0].mxu1 %vm489_vm4, %v1389_v18 }
 0x23f   : > { %2482 = vmatpush3.bf16.msra.mxu1 %v2643_v58  ;;  %2485 = vmatprep.mubr.msk.bf16.mxu1 %vm489_vm4, %v1468_v59 }
 0x240   : > { %2483 = vmatprep.subr.bf16.mxu1 %v2644_v19 }
 0x243   : > { %2484 = vmatpush3.bf16.msra.mxu1 %v2644_v19 }
 0x244   : > { %2489 = vmatprep.subr.bf16.mxu1 %v2645_v21 }
 0x24a   : > { %2486 = vmatmul.mubr.msk.bf16.vlgmr.msra.gmra.mrb[0].mxu1 %vm489_vm4, %v1467_v50 }
 0x24b   : > { %2490 = vmatpush3.bf16.msra.mxu1 %v2645_v21  ;;  %2493 = vmatprep.mubr.msk.bf16.mxu1 %vm489_vm4, %v1545_v61 }
 0x24c   : > { %2491 = vmatprep.subr.bf16.mxu1 %v2646_v22 }
 0x24f   : > { %2492 = vmatpush3.bf16.msra.mxu1 %v2646_v22 }
 0x250   : > { %2497 = vmatprep.subr.bf16.mxu1 %v2647_v23 }
 0x256   : > { %2494 = vmatmul.mubr.msk.bf16.vlgmr.msra.gmra.mrb[0].mxu1 %vm489_vm4, %v1544_v54 }
 0x257   : > { %2498 = vmatpush3.bf16.msra.mxu1 %v2647_v23  ;;  %2501 = vmatprep.mubr.msk.bf16.mxu1 %vm489_vm4, %v1626_v13 }
 0x258   : > { %2499 = vmatprep.subr.bf16.mxu1 %v2648_v24 }
 0x25b   : > { %2500 = vmatpush3.bf16.msra.mxu1 %v2648_v24 }
 0x25c   : > { %2505 = vmatprep.subr.bf16.mxu1 %v2649_v25 }
 0x262   : > { %2502 = vmatmul.mubr.msk.bf16.vlgmr.msra.gmra.mrb[0].mxu1 %vm489_vm4, %v1625_v5 }
 0x263   : > { %2506 = vmatpush3.bf16.msra.mxu1 %v2649_v25  ;;  %2509 = vmatprep.mubr.msk.bf16.mxu1 %vm489_vm4, %v2905_v41  ;;  %v2270_v41 = vld [vmem:[%s3021_s7] ss:$0 sm:$0xff] }
 0x264   : > { %2507 = vmatprep.subr.bf16.mxu1 %v2650_v26 }
 0x267   : > { %2508 = vmatpush3.bf16.msra.mxu1 %v2650_v26 }
 0x268   : > { %2513 = vmatprep.subr.bf16.mxu1 %v2651_v27 }
 0x26e   : > { %2510 = vmatmul.mubr.msk.bf16.vlgmr.msra.gmra.mrb[0].mxu1 %vm489_vm4, %v1697_v30 }
 0x26f   : > { %2514 = vmatpush3.bf16.msra.mxu1 %v2651_v27  ;;  %2517 = vmatprep.mubr.msk.bf16.mxu1 %vm489_vm4, %v1782_v14 }
 0x270   : > { %2515 = vmatprep.subr.bf16.mxu1 %v2652_v32 }
 0x273   : > { %2516 = vmatpush3.bf16.msra.mxu1 %v2652_v32 }
 0x274   : > { %2521 = vmatprep.subr.bf16.mxu1 %v2653_v33 }
 0x27a   : > { %2518 = vmatmul.mubr.msk.bf16.vlgmr.msra.gmra.mrb[0].mxu1 %vm489_vm4, %v1781_v7 }
 0x27b   : > { %2522 = vmatpush3.bf16.msra.mxu1 %v2653_v33  ;;  %2525 = vmatprep.mubr.msk.bf16.mxu1 %vm489_vm4, %v1872_v20 }
 0x27c   : > { %2523 = vmatprep.subr.bf16.mxu1 %v2654_v34 }
 0x27f   : > { %2524 = vmatpush3.bf16.msra.mxu1 %v2654_v34 }
 0x280   : > { %2529 = vmatprep.subr.bf16.mxu1 %v2655_v35 }
 0x286   : > { %2526 = vmatmul.mubr.msk.bf16.vlgmr.msra.gmra.mrb[0].mxu1 %vm489_vm4, %v1871_v16 }
 0x287   : > { %2530 = vmatpush3.bf16.msra.mxu1 %v2655_v35  ;;  %2533 = vmatprep.mubr.msk.bf16.mxu1 %vm489_vm4, %v1949_v17 }
 0x288   : > { %2531 = vmatprep.subr.bf16.mxu1 %v2656_v36 }
 0x28b   : > { %2532 = vmatpush3.bf16.msra.mxu1 %v2656_v36 }
 0x292   : > { %2534 = vmatmul.mubr.msk.bf16.vlgmr.msra.gmra.mrb[0].mxu1 %vm489_vm4, %v1948_v12 }
 0x365   : > { %v2535_v37 = vpop.f32.mrb[0].mxu1 }
 0x366   : > { %v2545_v39 = vadd.f32 %v2535_v37, %v2893_v28  ;;  %v2002_v40 = vpop.f32.mrb[1].mxu1 }
 0x367   : > { %v2546_v42 = vadd.f32 %v2002_v40, %v2895_v29  ;;  %v2536_v43 = vpop.f32.mrb[2].mxu1 }
 0x368   : > { %v2028_v44 = vmul.f32 %v2545_v39, %v2269_v38  ;;  %v2005_v45 = vpop.f32.mrb[3].mxu1 }
 0x369   : > { %v2026_v46 = vmul.f32 %v2546_v42, %v2269_v38  ;;  %v2547_v47 = vadd.f32 %v2005_v45, %v2897_v31 }
 0x36a   : > { %v2038_v48 = vadd.f32 %v2270_v41, %v2028_v44 }
 0x36b   : > { %v2036_v28 = vadd.f32 %v2270_v41, %v2026_v46  ;;  %v2027_v49 = vmul.f32 %v2547_v47, %v2269_v38 }
 0x36c   : > { %v2041_v50 = vmax.f32 %v2038_v48, 0.0 }
 0x36d   : > { %v2039_v51 = vmax.f32 %v2036_v28, 0.0  ;;  %v2037_v52 = vadd.f32 %v2270_v41, %v2027_v49 }
 0x36e   : > { %2045 = vst.msk [vmem:[%s325_s16 + $0x10] sm:$0xff] %vm2042_vm8, %v2041_v50 }
 0x36f   : > { %2043 = vst.msk [vmem:[%s325_s16] sm:$0xff] %vm2042_vm8, %v2039_v51  ;;  %v2040_v29 = vmax.f32 %v2037_v52, 0.0 }
 0x371   : > { %2044 = vst.msk [vmem:[%s325_s16 + $0x8] sm:$0xff] %vm2042_vm8, %v2040_v29 }
 0x372 PF: > { %s18_s27 = sadd.s32 1, %s2663_s27  }
 0x373   : > { %p15_p4 = scmp.ge.s32.totalorder %s18_s27, 4  }
 0x375   :  { %17 = sbr.rel (!%p15_p4) target bundleno = 1 (0x1), region = 101 }

// kernel: ncd_forward.11
= control target key start
LH: loop header
LB: loop body
LE: loop exit
PB: predicated region body
PF: predicated region fallthrough
CT: control target
= control target key end

     0   :  { %s2510_s21 = smov 0   ;;  %s3139_s0 = inlined_call_operand.vmem [shape: f32[2,24,32], index: 0, kind: input, shape index: {}]   ;;  %s3140_s1 = inlined_call_operand.vmem [shape: f32[110,24], index: 1, kind: input, shape index: {}]   ;;  %s3141_s2 = inlined_call_operand.vmem [shape: bf16[9,32,32], index: 2, kind: input, shape index: {}]   ;;  %s3142_s3 = inlined_call_operand.vmem [shape: f32[1,32], index: 3, kind: input, shape index: {}]   ;;  %s3143_s4 = inlined_call_operand.vmem [shape: f32[1,32], index: 4, kind: input, shape index: {}]   ;;  %s3144_s5 = inlined_call_operand.vmem [shape: f32[2,80,32], index: 5, kind: input, shape index: {}]   ;;  %s3145_s6 = inlined_call_operand.vmem [shape: f32[2,80,32], index: 6, kind: output, shape index: {}]  }
   0x1 LB: > { %s1837_s22 = sadd.s32 4294967295, %s2471_s21   ;;  %p1841_p0 = scmp.ge.s32.totalorder %s2471_s21, 1  ;;  %s2471_s21 = sphi %s2510_s21, %s16_s21  }
   0x2   : > { %p222_p1 = scmp.lt.s32.totalorder %s2471_s21, 3 }
   0x4   : > { %p223_p2 = pnand %p1841_p0, %p222_p1 }
   0x5   : > { %p257_p3 = scmp.lt.s32.totalorder (!%p223_p2), %s1837_s22, 1  ;;  %v273_v0 = vld [vmem:[%s3140_s1] sm:$0xff] (!%p223_p2)  ;;  %vm290_vm0 = vcmask (!%p223_p2), 195584   ;;  %v274_v5 = vld [vmem:[%s3140_s1 + $0x8] sm:$0xff] (!%p223_p2)  ;;  %v275_v6 = vld [vmem:[%s3140_s1 + $0x10] sm:$0xff] (!%p223_p2)  ;;  %v2473_v19 = vmov (!%p223_p2), 0.0  }
   0x6   : > { %226 = sbr.rel (%p223_p2) target bundleno = 673 (0x2a1), region = 44  ;;  %2044 = vmatprep.mubr.msk.f32.mxu0 (!%p223_p2), %vm290_vm0, %v273_v0  ;;  %v276_v7 = vld [vmem:[%s3140_s1 + $0x18] sm:$0xff] (!%p223_p2)  ;;  %v277_v8 = vld [vmem:[%s3140_s1 + $0x20] sm:$0xff] (!%p223_p2)  ;;  %v278_v9 = vld [vmem:[%s3140_s1 + $0x28] sm:$0xff] (!%p223_p2)  ;;  %2161 = vmatprep.subr.bf16.mxu1 (!%p223_p2), %v2473_v19  ;;  %vm2474_vm1 = vmmov (!%p223_p2), 0   ;;  %vm734_vm3 = vcmask (!%p223_p2), 1046528  }
   0x7   : > { %v279_v10 = vld [vmem:[%s3140_s1 + $0x30] sm:$0xff] (!%p223_p2)  ;;  %v280_v11 = vld [vmem:[%s3140_s1 + $0x38] sm:$0xff] (!%p223_p2)  ;;  %v281_v12 = vld [vmem:[%s3140_s1 + $0x40] sm:$0xff] (!%p223_p2)  ;;  %2165 = vmatprep.mubr.msk.bf16.mxu1 (!%p223_p2), %vm2474_vm1, %v2473_v19  ;;  %vm482_vm2 = vsmask.f32 (!%p223_p2), 7424  ;;  %vm539_vm4 = vcmask (!%p223_p2), 261120  }
   0x8   : > { %v282_v13 = vld [vmem:[%s3140_s1 + $0x48] sm:$0xff] (!%p223_p2)  ;;  %v283_v14 = vld [vmem:[%s3140_s1 + $0x50] sm:$0xff] (!%p223_p2)  ;;  %v284_v15 = vld [vmem:[%s3140_s1 + $0x58] sm:$0xff] (!%p223_p2)  ;;  %vm1168_vm5 = vcmask (!%p223_p2), 1045504   ;;  %vm999_vm6 = vsmask.f32 (!%p223_p2), 6400 }
   0x9   : > { %v285_v16 = vld [vmem:[%s3140_s1 + $0x60] sm:$0xff] (!%p223_p2)  ;;  %v286_v17 = vld [vmem:[%s3140_s1 + $0x68] sm:$0x3f] (!%p223_p2)  ;;  %v2447_v18 = vld [vmem:[%s3141_s2 + $0x10] sm:$0xff] (!%p223_p2)   ;;  %vm1425_vm7 = vsmask.f32 (!%p223_p2), 5376 }
   0xa   : > { %v2448_v20 = vld [vmem:[%s3141_s2 + $0x18] sm:$0xff] (!%p223_p2)   ;;  %v2449_v21 = vld [vmem:[%s3141_s2 + $0x40] sm:$0xff] (!%p223_p2)   ;;  %v2450_v22 = vld [vmem:[%s3141_s2 + $0x48] sm:$0xff] (!%p223_p2)   ;;  %vm1574_vm8 = vcmask (!%p223_p2), 1044480  }
   0xb   : > { %2162 = vmatpush3.bf16.msra.mxu1 (!%p223_p2), %v2449_v21  ;;  %v2453_v46 = vld [vmem:[%s3141_s2] sm:$0xff] (!%p223_p2)   ;;  %v2454_v0 = vld [vmem:[%s3141_s2 + $0x8] sm:$0xff] (!%p223_p2)  }
   0xc   : > { %2163 = vmatprep.subr.bf16.mxu1 (!%p223_p2), %v2473_v19 }
   0xd   : > { %s3147_s22 = smov (!%p257_p3, %s1837_s22), 1 }
   0xe   : > { %s2435_s25 = smul.u32 24, %s3147_s22 }
   0xf   : > { %2164 = vmatpush3.bf16.msra.mxu1 %v2450_v22 }
  0x10   : > { %s261_s28 = scalar_lea.vmem %s3139_s0, %s2435_s25  ;;  %2185 = vmatprep.subr.bf16.mxu1 %v2473_v19  ;;  %s2436_s25 = smul.u32 80, %s3147_s22 }
  0x11   : > { %v287_v1 = vld [vmem:[%s261_s28] sm:$0xff]  ;;  %v288_v2 = vld [vmem:[%s261_s28 + $0x8] sm:$0xff]  ;;  %v289_v3 = vld [vmem:[%s261_s28 + $0x10] sm:$0xff] }
  0x12   : > { %v2281_v4 = vpack.c.bf16 %v288_v2, %v287_v1  ;;  %s3075_s8 = scalar_lea.vmem %s3144_s5, %s2436_s25  ;;  %s3085_s10 = scalar_lea.vmem %s3145_s6, %s2436_s25 }
  0x14   : > { %2282 = vmatprep.subr.bf16.mxu0 %v2281_v4 }
  0x15   : > { %2284 = vmatpush3.bf16.msra.mxu0 %v2281_v4 }
  0x16   : > { %2042 = vmatprep.subr.mxu0 %v289_v3 }
  0x19   : > { %2043 = vmatpush3.msra.mxu0 %v289_v3 }
  0x1a   : > { %2045 = vmatmul.mubr.msk.f32.vlgmr.msra.gmra.mrb[0].mxu0 %vm290_vm0, %v274_v5  ;;  %2065 = vmatprep.subr.bf16.mxu0 %v2473_v19 }
  0x1b   : > { %2047 = vmatprep.mubr.msk.f32.mxu0 %vm290_vm0, %v275_v6  ;;  %2066 = vmatpush3.bf16.msra.mxu0 %v2447_v18  ;;  %v2451_v6 = vld [vmem:[%s3141_s2 + $0x50] sm:$0xff]  }
  0x1c   : > { %2067 = vmatprep.subr.bf16.mxu0 %v2473_v19 }
  0x1e   : > { %2048 = vmatmul.mubr.msk.f32.gmra.mrb[2].mxu0 %vm290_vm0, %v276_v7 }
  0x1f   : > { %2050 = vmatprep.mubr.msk.f32.mxu0 %vm290_vm0, %v277_v8  ;;  %2068 = vmatpush3.bf16.msra.mxu0 %v2448_v20 }
  0x20   : > { %2089 = vmatprep.subr.bf16.mxu0 %v2473_v19 }
  0x22   : > { %2051 = vmatmul.mubr.msk.f32.gmra.mrb[4].mxu0 %vm290_vm0, %v278_v9 }
  0x23   : > { %2053 = vmatprep.mubr.msk.f32.mxu0 %vm290_vm0, %v279_v10 }
  0x26   : > { %2054 = vmatmul.mubr.msk.f32.gmra.mrb[6].mxu0 %vm290_vm0, %v280_v11 }
  0x27   : > { %2056 = vmatprep.mubr.msk.f32.mxu0 %vm290_vm0, %v281_v12 }
  0x2a   : > { %2057 = vmatmul.mubr.msk.f32.gmra.mrb[8].mxu0 %vm290_vm0, %v282_v13 }
  0x2b   : > { %2059 = vmatprep.mubr.msk.f32.mxu0 %vm290_vm0, %v283_v14 }
  0x2e   : > { %2060 = vmatmul.mubr.msk.f32.gmra.mrb[10].mxu0 %vm290_vm0, %v284_v15 }
  0x2f   : > { %2062 = vmatprep.mubr.msk.f32.mxu0 %vm290_vm0, %v285_v16 }
  0x32   : > { %2063 = vmatmul.mubr.msk.f32.gmra.mrb[12].mxu0 %vm290_vm0, %v286_v17 }
  0x33   : > { %2069 = vmatprep.mubr.msk.bf16.mxu0 %vm2474_vm1, %v2473_v19 }
  0xed   : > { %v2046_v23 = vpop.f32.mrb[0].mxu0 }
  0xee   : > { %v399_v24 = vpop.f32.mrb[1].mxu0 }
  0xef   : > { %v2602_v25 = vpack.c.bf16 %v2046_v23, %v399_v24 }
  0xf1   : > { %v486_v26 = vshll.u32 %v2602_v25, 16  ;;  %v2049_v27 = vpop.f32.mrb[2].mxu0  ;;  %v484_v32 = vshrl.u32 %v2602_v25, 16  ;;  %v735_v36 = vrot.slane %v2602_v25, 1 }
  0xf2   : > { %v409_v28 = vpop.f32.mrb[3].mxu0 }
  0xf3   : > { %v488_v29 = vrot.slane %v486_v26, 1  ;;  %v2605_v30 = vpack.c.bf16 %v2049_v27, %v409_v28  ;;  %v2607_v31 = vpack.c.bf16 %v409_v28, %v2046_v23  ;;  %v2452_v28 = vld [vmem:[%s3141_s2 + $0x58] sm:$0xff]  }
  0xf5   : > { %v1001_v33 = vshrl.u32 %v2607_v31, 16  ;;  %v1004_v34 = vshll.u32 %v2607_v31, 16  ;;  %v2052_v35 = vpop.f32.mrb[4].mxu0  ;;  %v491_v38 = vshll.u32 %v2605_v30, 16  ;;  %v736_v39 = vrot.slane %v2605_v30, 1 }
  0xf6   : > { %v419_v37 = vpop.f32.mrb[5].mxu0  ;;  %v489_v40 = vor.u32 %v488_v29, %v484_v32  ;;  %v1169_v52 = vrot.slane %v2607_v31, 2  ;;  %v495_v55 = vshrl.u32 %v2605_v30, 16  ;;  %v873_v8 = vrot.slane %v2607_v31, 1 }
  0xf7   : > { %v2615_v41 = vpack.c.bf16 %v2052_v35, %v419_v37  ;;  %v2617_v42 = vpack.c.bf16 %v419_v37, %v2049_v27  ;;  %v493_v43 = vrot.slane %v491_v38, 1  ;;  %v1003_v44 = vrot.slane %v1001_v33, 1 }
  0xf8   : > { %v1006_v45 = vrot.slane %v1004_v34, 2  ;;  %v2627_v47 = vsel %vm734_vm3, %v735_v36, %v736_v39  ;;  %v2660_v11 = vrot.slane %v495_v55, 2  ;;  %v1299_v21 = vrot.slane %v2605_v30, 2 }
  0xf9   : > { %v1009_v48 = vshrl.u32 %v2617_v42, 16  ;;  %v1012_v49 = vshll.u32 %v2617_v42, 16  ;;  %v1170_v50 = vrot.slane %v2617_v42, 2  ;;  %v2055_v51 = vpop.f32.mrb[6].mxu0  ;;  %v494_v54 = vsel %vm482_vm2, %v489_v40, %v493_v43 }
  0xfa   : > { %v429_v53 = vpop.f32.mrb[7].mxu0  ;;  %v499_v56 = vshll.u32 %v2615_v41, 16  ;;  %2070 = vmatmul.mubr.msk.bf16.vlgmr.msra.gmra.mrb[16].mxu0 %vm539_vm4, %v494_v54  ;;  %v1007_v61 = vor.u32 %v1006_v45, %v1003_v44  ;;  %v497_v62 = vor.u32 %v495_v55, %v493_v43  ;;  %v503_v12 = vshrl.u32 %v2615_v41, 16 }
  0xfb   : > { %v2636_v57 = vpack.c.bf16 %v2055_v51, %v429_v53  ;;  %v2638_v58 = vpack.c.bf16 %v429_v53, %v2052_v35  ;;  %v1011_v59 = vrot.slane %v1009_v48, 1  ;;  %v1014_v60 = vrot.slane %v1012_v49, 2  ;;  %2073 = vmatprep.mubr.msk.bf16.mxu0 %vm2474_vm1, %v2473_v19  ;;  %2090 = vmatpush3.bf16.msra.mxu0 %v2453_v46 }
  0xfc   : > { %v501_v63 = vrot.slane %v499_v56, 1  ;;  %v2649_v1 = vsel %vm1168_vm5, %v1169_v52, %v1170_v50  ;;  %2091 = vmatprep.subr.bf16.mxu0 %v2473_v19  ;;  %v874_v22 = vrot.slane %v2617_v42, 1  ;;  %v2675_v27 = vrot.slane %v499_v56, 3 }
  0xfd   : > { %v1018_v2 = vshrl.u32 %v2638_v58, 16  ;;  %v1021_v3 = vshll.u32 %v2638_v58, 16  ;;  %v2058_v4 = vpop.f32.mrb[8].mxu0  ;;  %v1015_v5 = vor.u32 %v1014_v60, %v1011_v59  ;;  %v507_v7 = vshll.u32 %v2636_v57, 16 }
  0xfe   : > { %v439_v9 = vpop.f32.mrb[9].mxu0  ;;  %v502_v10 = vsel %vm482_vm2, %v497_v62, %v501_v63  ;;  %v505_v18 = vor.u32 %v503_v12, %v501_v63  ;;  %v2685_v35 = vrot.slane %v503_v12, 2  ;;  %v1172_v54 = vrot.slane %v2638_v58, 2 }
  0xff   : > { %v2663_v13 = vpack.c.bf16 %v2058_v4, %v439_v9  ;;  %v2665_v14 = vpack.c.bf16 %v439_v9, %v2055_v51  ;;  %v1016_v15 = vsel %vm999_vm6, %v1007_v61, %v1015_v5  ;;  %v1020_v16 = vrot.slane %v1018_v2, 1  ;;  %2092 = vmatpush3.bf16.msra.mxu0 %v2454_v0 }
 0x100   : > { %2166 = vmatmul.mubr.msk.bf16.vlgmr.msra.gmra.mrb[0].mxu1 %vm539_vm4, %v1016_v15  ;;  %v1023_v17 = vrot.slane %v1021_v3, 2  ;;  %v509_v20 = vrot.slane %v507_v7, 1  ;;  %2113 = vmatprep.subr.bf16.mxu0 %v2473_v19  ;;  %v511_v63 = vshrl.u32 %v2636_v57, 16  ;;  %v1300_v2 = vrot.slane %v2615_v41, 2 }
 0x101   : > { %v1027_v23 = vshrl.u32 %v2665_v14, 16  ;;  %v1030_v24 = vshll.u32 %v2665_v14, 16  ;;  %2186 = vmatpush3.bf16.msra.mxu1 %v2451_v6  ;;  %v2061_v26 = vpop.f32.mrb[10].mxu0  ;;  %2169 = vmatprep.mubr.msk.bf16.mxu1 %vm2474_vm1, %v2473_v19  ;;  %v515_v52 = vshll.u32 %v2663_v13, 16  ;;  %v2721_v12 = vsel %vm1168_vm5, %v1170_v50, %v1172_v54 }
 0x102   : > { %v2682_v29 = vpack.c.bf16 %v2061_v26, %v2061_v26  ;;  %v449_v32 = vpop.f32.mrb[11].mxu0  ;;  %v1024_v33 = vor.u32 %v1023_v17, %v1020_v16  ;;  %v510_v34 = vsel %vm482_vm2, %v505_v18, %v509_v20  ;;  %2187 = vmatprep.subr.bf16.mxu1 %v2473_v19  ;;  %2074 = vmatmul.mubr.msk.bf16.gmra.mrb[20].mxu0 %vm539_vm4, %v502_v10  ;;  %v1174_v15 = vrot.slane %v2665_v14, 2 }
 0x103   : > { %v2688_v36 = vpack.c.bf16 %v449_v32, %v449_v32  ;;  %v2690_v37 = vpack.c.bf16 %v449_v32, %v2058_v4  ;;  %v2692_v40 = vpack.c.bf16 %v2061_v26, %v449_v32  ;;  %v1029_v43 = vrot.slane %v1027_v23, 1  ;;  %2077 = vmatprep.mubr.msk.bf16.mxu0 %vm2474_vm1, %v2473_v19 }
 0x104   : > { %v1045_v44 = vshrl.u32 %v2682_v29, 16  ;;  %v1048_v45 = vshll.u32 %v2682_v29, 16  ;;  %v1025_v46 = vsel %vm999_vm6, %v1015_v5, %v1024_v33  ;;  %v1032_v48 = vrot.slane %v1030_v24, 2 }
 0x105   : > { %v523_v49 = vshll.u32 %v2688_v36, 16  ;;  %v2064_v51 = vpop.f32.mrb[12].mxu0  ;;  %2188 = vmatpush3.bf16.msra.mxu1 %v2452_v28  ;;  %v1036_v53 = vshrl.u32 %v2690_v37, 16  ;;  %v1039_v59 = vshll.u32 %v2690_v37, 16  ;;  %v519_v5 = vshrl.u32 %v2663_v13, 16 }
 0x106   : > { %v459_v55 = vpop.f32.mrb[13].mxu0  ;;  %v1033_v56 = vor.u32 %v1032_v48, %v1029_v43  ;;  %v1047_v60 = vrot.slane %v1045_v44, 1  ;;  %v1050_v61 = vrot.slane %v1048_v45, 2  ;;  %2209 = vmatprep.subr.bf16.mxu1 %v2473_v19  ;;  %v513_v9 = vor.u32 %v511_v63, %v509_v20 }
 0x107   : > { %v2707_v62 = vpack.c.bf16 %v459_v55, %v459_v55  ;;  %v1038_v0 = vrot.slane %v1036_v53, 1  ;;  %v1041_v4 = vrot.slane %v1039_v59, 2  ;;  %v517_v10 = vrot.slane %v515_v52, 1 }
 0x108   : > { %2170 = vmatmul.mubr.msk.bf16.gmra.mrb[4].mxu1 %vm539_vm4, %v1025_v46  ;;  %v1034_v3 = vsel %vm999_vm6, %v1024_v33, %v1033_v56  ;;  %v1051_v6 = vor.u32 %v1050_v61, %v1047_v60  ;;  %v2724_v16 = vrot.slane %v523_v49, 1  ;;  %v1176_v18 = vrot.slane %v2690_v37, 2 }
 0x109   : > { %2173 = vmatprep.mubr.msk.bf16.mxu1 %vm2474_vm1, %v2473_v19  ;;  %v1042_v17 = vor.u32 %v1041_v4, %v1038_v0  ;;  %v1178_v23 = vrot.slane %v2682_v29, 2  ;;  %v1451_v20 = vshrl.u32 %v2707_v62, 16  ;;  %v1454_v24 = vshll.u32 %v2707_v62, 16 }
 0x10a   : > { %2078 = vmatmul.mubr.msk.bf16.gmra.mrb[24].mxu0 %vm539_vm4, %v510_v34  ;;  %v2732_v26 = vsel %vm1168_vm5, %v1172_v54, %v1174_v15  ;;  %v2735_v50 = vsel %vm1168_vm5, %v1299_v21, %v1300_v2  ;;  %v2744_v33 = vsel %vm1168_vm5, %v1174_v15, %v1176_v18  ;;  %v518_v43 = vsel %vm482_vm2, %v513_v9, %v517_v10 }
 0x10b   : > { %2081 = vmatprep.mubr.msk.bf16.mxu0 %vm2474_vm1, %v2473_v19  ;;  %v1043_v28 = vsel %vm999_vm6, %v1033_v56, %v1042_v17  ;;  %v2741_v32 = vsel %vm999_vm6, %v1042_v17, %v1051_v6  ;;  %v2747_v34 = vsel %vm1168_vm5, %v1176_v18, %v1178_v23  ;;  %v738_v44 = vrot.slane %v2615_v41, 1 }
 0x10c   : > { %v1302_v21 = vrot.slane %v2636_v57, 2  ;;  %v740_v45 = vrot.slane %v2636_v57, 1  ;;  %v1304_v46 = vrot.slane %v2663_v13, 2  ;;  %v1306_v48 = vrot.slane %v2692_v40, 2 }
 0x10d   : > { %v1308_v49 = vrot.slane %v2707_v62, 2  ;;  %v2761_v51 = vsel %vm734_vm3, %v873_v8, %v874_v22  ;;  %v521_v53 = vor.u32 %v519_v5, %v517_v10  ;;  %v2766_v54 = vsel %vm734_vm3, %v736_v39, %v738_v44 }
 0x10e   : > { %v2771_v55 = vsel %vm1168_vm5, %v1300_v2, %v1302_v21  ;;  %v2776_v56 = vsel %vm734_vm3, %v738_v44, %v740_v45  ;;  %v1453_v31 = vrot.slane %v1451_v20, 2  ;;  %v1456_v8 = vrot.slane %v1454_v24, 3 }
 0x10f   : > { %v2782_v59 = vsel %vm1168_vm5, %v1304_v46, %v1306_v48  ;;  %v2785_v39 = vsel %vm1168_vm5, %v1306_v48, %v1308_v49  ;;  %v1427_v60 = vrot.slane %v491_v38, 3  ;;  %v1431_v61 = vor.u32 %v2675_v27, %v2685_v35 }
 0x110   : > { %2174 = vmatmul.mubr.msk.bf16.gmra.mrb[8].mxu1 %vm539_vm4, %v1034_v3  ;;  %v876_v0 = vrot.slane %v2638_v58, 1  ;;  %v1433_v2 = vrot.slane %v511_v63, 2  ;;  %v1434_v3 = vrot.slane %v507_v7, 3  ;;  %v878_v4 = vrot.slane %v2665_v14, 1 }
 0x111   : > { %2177 = vmatprep.mubr.msk.bf16.mxu1 %vm2474_vm1, %v2473_v19  ;;  %v1437_v6 = vrot.slane %v519_v5, 2  ;;  %v1438_v9 = vrot.slane %v515_v52, 3  ;;  %v1428_v10 = vor.u32 %v1427_v60, %v2660_v11  ;;  %v880_v58 = vrot.slane %v2690_v37, 1 }
 0x112   : > { %2082 = vmatmul.mubr.msk.bf16.gmra.mrb[28].mxu0 %vm539_vm4, %v518_v43  ;;  %v2804_v38 = vsel %vm734_vm3, %v874_v22, %v876_v0  ;;  %v1442_v27 = vshrl.u32 %v2692_v40, 16  ;;  %v1435_v7 = vor.u32 %v1434_v3, %v1433_v2  ;;  %v2811_v14 = vsel %vm734_vm3, %v876_v0, %v878_v4 }
 0x113   : > { %2085 = vmatprep.mubr.msk.bf16.mxu0 %vm2474_vm1, %v2473_v19  ;;  %v1439_v35 = vor.u32 %v1438_v9, %v1437_v6  ;;  %v1445_v52 = vshll.u32 %v2692_v40, 16  ;;  %v2815_v11 = vsel %vm1425_vm7, %v1428_v10, %v1431_v61  ;;  %v2818_v42 = vsel %vm734_vm3, %v878_v4, %v880_v58 }
 0x114   : > { %v1444_v22 = vrot.slane %v1442_v27, 2  ;;  %v882_v37 = vrot.slane %v2682_v29, 1  ;;  %v2822_v63 = vsel %vm1425_vm7, %v1431_v61, %v1435_v7  ;;  %v1457_v17 = vor.u32 %v1456_v8, %v1453_v31 }
 0x115   : > { %v2825_v5 = vsel %vm1425_vm7, %v1435_v7, %v1439_v35  ;;  %v1447_v15 = vrot.slane %v1445_v52, 3  ;;  %v1575_v23 = vrot.slane %v2605_v30, 3  ;;  %v1576_v20 = vrot.slane %v2615_v41, 3  ;;  %v3065_v7 = vld [vmem:[%s3142_s3] ss:$0 sm:$0xff] }
 0x116   : > { %v2828_v18 = vsel %vm734_vm3, %v880_v58, %v882_v37  ;;  %v1578_v24 = vrot.slane %v2636_v57, 3  ;;  %v1584_v43 = vrot.slane %v2707_v62, 3  ;;  %v1582_v49 = vrot.slane %v2692_v40, 3  ;;  %v3070_v52 = vld [vmem:[%s3143_s4] ss:$0 sm:$0xff] }
 0x117   : > { %v1448_v29 = vor.u32 %v1447_v15, %v1444_v22  ;;  %v2838_v44 = vsel %vm1574_vm8, %v1575_v23, %v1576_v20  ;;  %v526_v31 = vsel %vm482_vm2, %v521_v53, %v2724_v16  ;;  %v2457_v16 = vld [vmem:[%s3141_s2 + $0x20] sm:$0xff]   ;;  %v2458_v53 = vld [vmem:[%s3141_s2 + $0x28] sm:$0xff]  }
 0x118   : > { %2178 = vmatmul.mubr.msk.bf16.gmra.mrb[12].mxu1 %vm539_vm4, %v1043_v28  ;;  %v2843_v48 = vsel %vm1574_vm8, %v1576_v20, %v1578_v24  ;;  %v2858_v8 = vsel %vm1574_vm8, %v1582_v49, %v1584_v43  ;;  %v1740_v15 = vld [vmem:[%s3075_s8] sm:$0xff]  ;;  %v1741_v23 = vld [vmem:[%s3075_s8 + $0x8] sm:$0xff] }
 0x119   : > { %2181 = vmatprep.mubr.msk.bf16.mxu1 %vm2474_vm1, %v2473_v19  ;;  %v2849_v28 = vsel %vm1425_vm7, %v1439_v35, %v1448_v29  ;;  %v2852_v62 = vsel %vm1425_vm7, %v1448_v29, %v1457_v17 }
 0x11a   : > { %2086 = vmatmul.mubr.msk.bf16.gmra.mrb[32].mxu0 %vm539_vm4, %v526_v31 }
 0x11b   : > { %2093 = vmatprep.mubr.msk.bf16.mxu0 %vm2474_vm1, %v2473_v19 }
 0x120   : > { %2182 = vmatmul.mubr.msk.bf16.gmra.mrb[16].mxu1 %vm539_vm4, %v2741_v32  ;;  %v2455_v32 = vld [vmem:[%s3141_s2 + $0x60] sm:$0xff]  }
 0x121   : > { %2189 = vmatprep.mubr.msk.bf16.mxu1 %vm2474_vm1, %v2473_v19 }
 0x122   : > { %2094 = vmatmul.mubr.msk.bf16.vlgmr.msra.gmra.mrb[16].mxu0 %vm539_vm4, %v2602_v25  ;;  %v2456_v25 = vld [vmem:[%s3141_s2 + $0x68] sm:$0xff]  }
 0x123   : > { %2097 = vmatprep.mubr.msk.bf16.mxu0 %vm2474_vm1, %v2473_v19  ;;  %2114 = vmatpush3.bf16.msra.mxu0 %v2457_v16 }
 0x124   : > { %2115 = vmatprep.subr.bf16.mxu0 %v2473_v19 }
 0x127   : > { %2116 = vmatpush3.bf16.msra.mxu0 %v2458_v53  ;;  %v1742_v53 = vld [vmem:[%s3075_s8 + $0x10] sm:$0xff] }
 0x128   : > { %2190 = vmatmul.mubr.msk.bf16.vlgmr.msra.gmra.mrb[0].mxu1 %vm539_vm4, %v2649_v1  ;;  %2137 = vmatprep.subr.bf16.mxu0 %v2473_v19  ;;  %v2459_v1 = vld [vmem:[%s3141_s2 + $0x70] sm:$0xff]  }
 0x129   : > { %2210 = vmatpush3.bf16.msra.mxu1 %v2455_v32  ;;  %2193 = vmatprep.mubr.msk.bf16.mxu1 %vm2474_vm1, %v2473_v19 }
 0x12a   : > { %2211 = vmatprep.subr.bf16.mxu1 %v2473_v19  ;;  %2098 = vmatmul.mubr.msk.bf16.gmra.mrb[20].mxu0 %vm539_vm4, %v2605_v30  ;;  %v2461_v30 = vld [vmem:[%s3141_s2 + $0x30] sm:$0xff]  }
 0x12b   : > { %2101 = vmatprep.mubr.msk.bf16.mxu0 %vm2474_vm1, %v2473_v19 }
 0x12d   : > { %2212 = vmatpush3.bf16.msra.mxu1 %v2456_v25 }
 0x12e   : > { %2233 = vmatprep.subr.bf16.mxu1 %v2473_v19 }
 0x130   : > { %2194 = vmatmul.mubr.msk.bf16.gmra.mrb[4].mxu1 %vm539_vm4, %v2721_v12  ;;  %v742_v12 = vrot.slane %v2663_v13, 1 }
 0x131   : > { %2197 = vmatprep.mubr.msk.bf16.mxu1 %vm2474_vm1, %v2473_v19 }
 0x132   : > { %2102 = vmatmul.mubr.msk.bf16.gmra.mrb[24].mxu0 %vm539_vm4, %v2615_v41  ;;  %v2462_v41 = vld [vmem:[%s3141_s2 + $0x38] sm:$0xff]  }
 0x133   : > { %2105 = vmatprep.mubr.msk.bf16.mxu0 %vm2474_vm1, %v2473_v19 }
 0x138   : > { %2198 = vmatmul.mubr.msk.bf16.gmra.mrb[8].mxu1 %vm539_vm4, %v2732_v26  ;;  %v1305_v26 = vsel %vm1168_vm5, %v1302_v21, %v1304_v46  ;;  %v2464_v21 = vld [vmem:[%s3141_s2 + $0x88] sm:$0xff]  }
 0x139   : > { %2201 = vmatprep.mubr.msk.bf16.mxu1 %vm2474_vm1, %v2473_v19 }
 0x13a   : > { %2106 = vmatmul.mubr.msk.bf16.gmra.mrb[28].mxu0 %vm539_vm4, %v2636_v57 }
 0x13b   : > { %2109 = vmatprep.mubr.msk.bf16.mxu0 %vm2474_vm1, %v2473_v19 }
 0x140   : > { %2202 = vmatmul.mubr.msk.bf16.gmra.mrb[12].mxu1 %vm539_vm4, %v2744_v33  ;;  %v744_v33 = vrot.slane %v2688_v36, 1  ;;  %v2463_v36 = vld [vmem:[%s3141_s2 + $0x80] sm:$0xff]  }
 0x141   : > { %2205 = vmatprep.mubr.msk.bf16.mxu1 %vm2474_vm1, %v2473_v19 }
 0x142   : > { %2110 = vmatmul.mubr.msk.bf16.gmra.mrb[32].mxu0 %vm539_vm4, %v2663_v13 }
 0x143   : > { %2117 = vmatprep.mubr.msk.bf16.mxu0 %vm2474_vm1, %v2473_v19 }
 0x148   : > { %2206 = vmatmul.mubr.msk.bf16.gmra.mrb[16].mxu1 %vm539_vm4, %v2747_v34  ;;  %v745_v34 = vsel %vm734_vm3, %v742_v12, %v744_v33 }
 0x149   : > { %2213 = vmatprep.mubr.msk.bf16.mxu1 %vm2474_vm1, %v2473_v19 }
 0x14a   : > { %2118 = vmatmul.mubr.msk.bf16.vlgmr.msra.gmra.mrb[16].mxu0 %vm539_vm4, %v2627_v47  ;;  %v2460_v47 = vld [vmem:[%s3141_s2 + $0x78] sm:$0xff]  }
 0x14b   : > { %2121 = vmatprep.mubr.msk.bf16.mxu0 %vm2474_vm1, %v2473_v19  ;;  %2138 = vmatpush3.bf16.msra.mxu0 %v2461_v30  ;;  %v1743_v30 = vld [vmem:[%s3075_s8 + $0x18] sm:$0xff] }
 0x14c   : > { %2139 = vmatprep.subr.bf16.mxu0 %v2473_v19 }
 0x14f   : > { %2140 = vmatpush3.bf16.msra.mxu0 %v2462_v41 }
 0x150   : > { %2214 = vmatmul.mubr.msk.bf16.vlgmr.msra.gmra.mrb[0].mxu1 %vm539_vm4, %v2735_v50  ;;  %v743_v50 = vsel %vm734_vm3, %v740_v45, %v742_v12  ;;  %v1580_v45 = vrot.slane %v2663_v13, 3 }
 0x151   : > { %2234 = vmatpush3.bf16.msra.mxu1 %v2459_v1  ;;  %2217 = vmatprep.mubr.msk.bf16.mxu1 %vm2474_vm1, %v2473_v19 }
 0x152   : > { %2235 = vmatprep.subr.bf16.mxu1 %v2473_v19  ;;  %2122 = vmatmul.mubr.msk.bf16.gmra.mrb[20].mxu0 %vm539_vm4, %v2766_v54  ;;  %v1581_v46 = vsel %vm1574_vm8, %v1578_v24, %v1580_v45 }
 0x153   : > { %2125 = vmatprep.mubr.msk.bf16.mxu0 %vm2474_vm1, %v2473_v19 }
 0x155   : > { %2236 = vmatpush3.bf16.msra.mxu1 %v2460_v47 }
 0x156   : > { %2257 = vmatprep.subr.bf16.mxu1 %v2473_v19 }
 0x158   : > { %2218 = vmatmul.mubr.msk.bf16.gmra.mrb[4].mxu1 %vm539_vm4, %v2771_v55 }
 0x159   : > { %2221 = vmatprep.mubr.msk.bf16.mxu1 %vm2474_vm1, %v2473_v19 }
 0x15a   : > { %2126 = vmatmul.mubr.msk.bf16.gmra.mrb[24].mxu0 %vm539_vm4, %v2776_v56 }
 0x15b   : > { %2129 = vmatprep.mubr.msk.bf16.mxu0 %vm2474_vm1, %v2473_v19 }
 0x160   : > { %2222 = vmatmul.mubr.msk.bf16.gmra.mrb[8].mxu1 %vm539_vm4, %v1305_v26 }
 0x161   : > { %2225 = vmatprep.mubr.msk.bf16.mxu1 %vm2474_vm1, %v2473_v19 }
 0x162   : > { %2130 = vmatmul.mubr.msk.bf16.gmra.mrb[28].mxu0 %vm539_vm4, %v743_v50 }
 0x163   : > { %2133 = vmatprep.mubr.msk.bf16.mxu0 %vm2474_vm1, %v2473_v19 }
 0x168   : > { %2226 = vmatmul.mubr.msk.bf16.gmra.mrb[12].mxu1 %vm539_vm4, %v2782_v59 }
 0x169   : > { %2229 = vmatprep.mubr.msk.bf16.mxu1 %vm2474_vm1, %v2473_v19 }
 0x16a   : > { %2134 = vmatmul.mubr.msk.bf16.gmra.mrb[32].mxu0 %vm539_vm4, %v745_v34 }
 0x16b   : > { %2141 = vmatprep.mubr.msk.bf16.mxu0 %vm2474_vm1, %v2473_v19 }
 0x170   : > { %2230 = vmatmul.mubr.msk.bf16.gmra.mrb[16].mxu1 %vm539_vm4, %v2785_v39 }
 0x171   : > { %2237 = vmatprep.mubr.msk.bf16.mxu1 %vm2474_vm1, %v2473_v19 }
 0x172   : > { %2142 = vmatmul.mubr.msk.bf16.vlgmr.msra.gmra.mrb[16].mxu0 %vm539_vm4, %v2761_v51  ;;  %v1583_v51 = vsel %vm1574_vm8, %v1580_v45, %v1582_v49 }
 0x173   : > { %2145 = vmatprep.mubr.msk.bf16.mxu0 %vm2474_vm1, %v2473_v19 }
 0x178   : > { %2238 = vmatmul.mubr.msk.bf16.vlgmr.msra.gmra.mrb[0].mxu1 %vm539_vm4, %v2815_v11 }
 0x179   : > { %2258 = vmatpush3.bf16.msra.mxu1 %v2463_v36  ;;  %2241 = vmatprep.mubr.msk.bf16.mxu1 %vm2474_vm1, %v2473_v19 }
 0x17a   : > { %2259 = vmatprep.subr.bf16.mxu1 %v2473_v19  ;;  %2146 = vmatmul.mubr.msk.bf16.gmra.mrb[20].mxu0 %vm539_vm4, %v2804_v38 }
 0x17b   : > { %2149 = vmatprep.mubr.msk.bf16.mxu0 %vm2474_vm1, %v2473_v19 }
 0x17d   : > { %2260 = vmatpush3.bf16.msra.mxu1 %v2464_v21 }
 0x180   : > { %2242 = vmatmul.mubr.msk.bf16.gmra.mrb[4].mxu1 %vm539_vm4, %v2822_v63 }
 0x181   : > { %2245 = vmatprep.mubr.msk.bf16.mxu1 %vm2474_vm1, %v2473_v19 }
 0x182   : > { %2150 = vmatmul.mubr.msk.bf16.gmra.mrb[24].mxu0 %vm539_vm4, %v2811_v14 }
 0x183   : > { %2153 = vmatprep.mubr.msk.bf16.mxu0 %vm2474_vm1, %v2473_v19 }
 0x188   : > { %2246 = vmatmul.mubr.msk.bf16.gmra.mrb[8].mxu1 %vm539_vm4, %v2825_v5 }
 0x189   : > { %2249 = vmatprep.mubr.msk.bf16.mxu1 %vm2474_vm1, %v2473_v19 }
 0x18a   : > { %2154 = vmatmul.mubr.msk.bf16.gmra.mrb[28].mxu0 %vm539_vm4, %v2818_v42 }
 0x18b   : > { %2157 = vmatprep.mubr.msk.bf16.mxu0 %vm2474_vm1, %v2473_v19 }
 0x190   : > { %2250 = vmatmul.mubr.msk.bf16.gmra.mrb[12].mxu1 %vm539_vm4, %v2849_v28 }
 0x191   : > { %2253 = vmatprep.mubr.msk.bf16.mxu1 %vm2474_vm1, %v2473_v19 }
 0x192   : > { %2158 = vmatmul.mubr.msk.bf16.gmra.mrb[32].mxu0 %vm539_vm4, %v2828_v18 }
 0x198   : > { %2254 = vmatmul.mubr.msk.bf16.gmra.mrb[16].mxu1 %vm539_vm4, %v2852_v62 }
 0x199   : > { %2261 = vmatprep.mubr.msk.bf16.mxu1 %vm2474_vm1, %v2473_v19 }
 0x1a0   : > { %2262 = vmatmul.mubr.msk.bf16.vlgmr.msra.gmra.mrb[0].mxu1 %vm539_vm4, %v2838_v44 }
 0x1a1   : > { %2265 = vmatprep.mubr.msk.bf16.mxu1 %vm2474_vm1, %v2473_v19 }
 0x1a8   : > { %2266 = vmatmul.mubr.msk.bf16.gmra.mrb[4].mxu1 %vm539_vm4, %v2843_v48 }
 0x1a9   : > { %2269 = vmatprep.mubr.msk.bf16.mxu1 %vm2474_vm1, %v2473_v19 }
 0x1b0   : > { %2270 = vmatmul.mubr.msk.bf16.gmra.mrb[8].mxu1 %vm539_vm4, %v1581_v46 }
 0x1b1   : > { %2273 = vmatprep.mubr.msk.bf16.mxu1 %vm2474_vm1, %v2473_v19 }
 0x1b8   : > { %2274 = vmatmul.mubr.msk.bf16.gmra.mrb[12].mxu1 %vm539_vm4, %v1583_v51  ;;  %v1744_v51 = vld [vmem:[%s3075_s8 + $0x20] sm:$0xff] }
 0x1b9   : > { %2277 = vmatprep.mubr.msk.bf16.mxu1 %vm2474_vm1, %v2473_v19 }
 0x1c0   : > { %2278 = vmatmul.mubr.msk.bf16.gmra.mrb[16].mxu1 %vm539_vm4, %v2858_v8 }
 0x245   : > { %v945_v57 = vpop.f32.mrb[16].mxu0 }
 0x246   : > { %v2143_v13 = vpop.f32.mrb[17].mxu0 }
 0x247   : > { %v948_v54 = vpop.f32.mrb[18].mxu0 }
 0x248   : > { %v2144_v55 = vpop.f32.mrb[19].mxu0 }
 0x24d   : > { %v953_v56 = vpop.f32.mrb[20].mxu0 }
 0x24e   : > { %v2147_v59 = vpop.f32.mrb[21].mxu0 }
 0x24f   : > { %v956_v39 = vpop.f32.mrb[22].mxu0 }
 0x250   : > { %v2148_v60 = vpop.f32.mrb[23].mxu0 }
 0x255   : > { %v961_v40 = vpop.f32.mrb[24].mxu0 }
 0x256   : > { %v2151_v61 = vpop.f32.mrb[25].mxu0 }
 0x257   : > { %v964_v0 = vpop.f32.mrb[26].mxu0 }
 0x258   : > { %v2152_v2 = vpop.f32.mrb[27].mxu0 }
 0x25d   : > { %v3053_v3 = vpop.f32.mrb[28].mxu0 }
 0x25e   : > { %v2155_v4 = vpop.f32.mrb[29].mxu0 }
 0x25f   : > { %v3055_v19 = vpop.f32.mrb[30].mxu0 }
 0x260   : > { %v2156_v6 = vpop.f32.mrb[31].mxu0 }
 0x265   : > { %v3057_v9 = vpop.f32.mrb[32].mxu0 }
 0x266   : > { %v2159_v10 = vpop.f32.mrb[33].mxu0 }
 0x267   : > { %v3059_v38 = vpop.f32.mrb[34].mxu0 }
 0x268   : > { %v2160_v58 = vpop.f32.mrb[35].mxu0 }
 0x269   : > { %v1746_v58 = vld [vmem:[%s3075_s8 + $0x30] sm:$0xff] }
 0x273   : > { %v1647_v27 = vpop.f32.mrb[0].mxu1 }
 0x274   : > { %v2285_v14 = vadd.f32 %v1647_v27, %v945_v57  ;;  %v2263_v35 = vpop.f32.mrb[1].mxu1 }
 0x275   : > { %v1650_v11 = vpop.f32.mrb[2].mxu1 }
 0x276   : > { %v1703_v42 = vmul.f32 %v2285_v14, %v3065_v7  ;;  %v2286_v22 = vadd.f32 %v1650_v11, %v948_v54  ;;  %v2264_v37 = vpop.f32.mrb[3].mxu1  ;;  %v1745_v54 = vld [vmem:[%s3075_s8 + $0x28] sm:$0xff]  ;;  %v1747_v14 = vld [vmem:[%s3075_s8 + $0x38] sm:$0xff] }
 0x278   : > { %v1720_v63 = vadd.f32 %v3070_v52, %v1703_v42  ;;  %v1704_v5 = vmul.f32 %v2286_v22, %v3065_v7 }
 0x27a   : > { %v1730_v17 = vmax.f32 %v1720_v63, 0.0  ;;  %v1721_v18 = vadd.f32 %v3070_v52, %v1704_v5 }
 0x27b   : > { %v1655_v20 = vpop.f32.mrb[4].mxu1 }
 0x27c   : > { %v1750_v24 = vmul.f32 %v1740_v15, %v1730_v17  ;;  %v1731_v29 = vmax.f32 %v1721_v18, 0.0  ;;  %v2287_v43 = vadd.f32 %v1655_v20, %v953_v56  ;;  %v2267_v44 = vpop.f32.mrb[5].mxu1  ;;  %v1748_v20 = vld [vmem:[%s3075_s8 + $0x40] sm:$0xff] }
 0x27d   : > { %v1658_v48 = vpop.f32.mrb[6].mxu1 }
 0x27e   : > { %1760 = vst.msk [vmem:[%s3085_s10] sm:$0xff] %vm539_vm4, %v1750_v24  ;;  %v1751_v49 = vmul.f32 %v1741_v23, %v1731_v29  ;;  %v1705_v31 = vmul.f32 %v2287_v43, %v3065_v7  ;;  %v2288_v28 = vadd.f32 %v1658_v48, %v956_v39  ;;  %v2268_v62 = vpop.f32.mrb[7].mxu1  ;;  %v1749_v29 = vld [vmem:[%s3075_s8 + $0x48] sm:$0xff] }
 0x280   : > { %1761 = vst.msk [vmem:[%s3085_s10 + $0x8] sm:$0xff] %vm539_vm4, %v1751_v49  ;;  %v1722_v8 = vadd.f32 %v3070_v52, %v1705_v31  ;;  %v1706_v16 = vmul.f32 %v2288_v28, %v3065_v7 }
 0x282   : > { %v1732_v32 = vmax.f32 %v1722_v8, 0.0  ;;  %v1723_v25 = vadd.f32 %v3070_v52, %v1706_v16 }
 0x283   : > { %v1663_v41 = vpop.f32.mrb[8].mxu1 }
 0x284   : > { %v1752_v1 = vmul.f32 %v1742_v53, %v1732_v32  ;;  %v1733_v47 = vmax.f32 %v1723_v25, 0.0  ;;  %v2289_v12 = vadd.f32 %v1663_v41, %v961_v40  ;;  %v2271_v26 = vpop.f32.mrb[9].mxu1 }
 0x285   : > { %v1666_v50 = vpop.f32.mrb[10].mxu1 }
 0x286   : > { %1762 = vst.msk [vmem:[%s3085_s10 + $0x10] sm:$0xff] %vm539_vm4, %v1752_v1  ;;  %v1753_v33 = vmul.f32 %v1743_v30, %v1733_v47  ;;  %v1707_v34 = vmul.f32 %v2289_v12, %v3065_v7  ;;  %v2290_v36 = vadd.f32 %v1666_v50, %v964_v0  ;;  %v2272_v21 = vpop.f32.mrb[11].mxu1 }
 0x288   : > { %1763 = vst.msk [vmem:[%s3085_s10 + $0x18] sm:$0xff] %vm539_vm4, %v1753_v33  ;;  %v1724_v45 = vadd.f32 %v3070_v52, %v1707_v34  ;;  %v1708_v46 = vmul.f32 %v2290_v36, %v3065_v7 }
 0x28a   : > { %v1734_v57 = vmax.f32 %v1724_v45, 0.0  ;;  %v1725_v13 = vadd.f32 %v3070_v52, %v1708_v46 }
 0x28b   : > { %v1671_v55 = vpop.f32.mrb[12].mxu1 }
 0x28c   : > { %v1754_v56 = vmul.f32 %v1744_v51, %v1734_v57  ;;  %v1735_v59 = vmax.f32 %v1725_v13, 0.0  ;;  %v2291_v39 = vadd.f32 %v1671_v55, %v3053_v3  ;;  %v2275_v60 = vpop.f32.mrb[13].mxu1 }
 0x28d   : > { %v1674_v40 = vpop.f32.mrb[14].mxu1 }
 0x28e   : > { %1764 = vst.msk [vmem:[%s3085_s10 + $0x20] sm:$0xff] %vm539_vm4, %v1754_v56  ;;  %v1755_v61 = vmul.f32 %v1745_v54, %v1735_v59  ;;  %v1709_v0 = vmul.f32 %v2291_v39, %v3065_v7  ;;  %v2292_v2 = vadd.f32 %v1674_v40, %v3055_v19  ;;  %v2276_v4 = vpop.f32.mrb[15].mxu1 }
 0x290   : > { %1765 = vst.msk [vmem:[%s3085_s10 + $0x28] sm:$0xff] %vm539_vm4, %v1755_v61  ;;  %v1726_v6 = vadd.f32 %v3070_v52, %v1709_v0  ;;  %v1710_v10 = vmul.f32 %v2292_v2, %v3065_v7 }
 0x292   : > { %v1736_v3 = vmax.f32 %v1726_v6, 0.0  ;;  %v1727_v27 = vadd.f32 %v3070_v52, %v1710_v10 }
 0x293   : > { %v1679_v35 = vpop.f32.mrb[16].mxu1 }
 0x294   : > { %v1756_v11 = vmul.f32 %v1746_v58, %v1736_v3  ;;  %v1737_v42 = vmax.f32 %v1727_v27, 0.0  ;;  %v2293_v19 = vadd.f32 %v1679_v35, %v3057_v9  ;;  %v2279_v22 = vpop.f32.mrb[17].mxu1 }
 0x295   : > { %v1682_v37 = vpop.f32.mrb[18].mxu1 }
 0x296   : > { %1766 = vst.msk [vmem:[%s3085_s10 + $0x30] sm:$0xff] %vm539_vm4, %v1756_v11  ;;  %v1757_v63 = vmul.f32 %v1747_v14, %v1737_v42  ;;  %v1711_v5 = vmul.f32 %v2293_v19, %v3065_v7  ;;  %v2294_v15 = vadd.f32 %v1682_v37, %v3059_v38  ;;  %v2280_v17 = vpop.f32.mrb[19].mxu1 }
 0x298   : > { %1767 = vst.msk [vmem:[%s3085_s10 + $0x38] sm:$0xff] %vm539_vm4, %v1757_v63  ;;  %v1728_v18 = vadd.f32 %v3070_v52, %v1711_v5  ;;  %v1712_v23 = vmul.f32 %v2294_v15, %v3065_v7 }
 0x29a   : > { %v1738_v9 = vmax.f32 %v1728_v18, 0.0  ;;  %v1729_v24 = vadd.f32 %v3070_v52, %v1712_v23 }
 0x29c   : > { %v1758_v43 = vmul.f32 %v1748_v20, %v1738_v9  ;;  %v1739_v44 = vmax.f32 %v1729_v24, 0.0 }
 0x29e   : > { %1768 = vst.msk [vmem:[%s3085_s10 + $0x40] sm:$0xff] %vm539_vm4, %v1758_v43  ;;  %v1759_v48 = vmul.f32 %v1749_v29, %v1739_v44 }
 0x2a0   : > { %1769 = vst.msk [vmem:[%s3085_s10 + $0x48] sm:$0xff] %vm539_vm4, %v1759_v48 }
 0x2a1 PF: > { %s16_s21 = sadd.s32 1, %s2471_s21  }
 0x2a2   : > { %p13_p4 = scmp.ge.s32.totalorder %s16_s21, 4  }
 0x2a4   :  { %15 = sbr.rel (!%p13_p4) target bundleno = 1 (0x1), region = 85 }

// kernel: ncd_forward.10
= control target key start
LH: loop header
LB: loop body
LE: loop exit
PB: predicated region body
PF: predicated region fallthrough
CT: control target
= control target key end

     0   :  { %s2511_s21 = smov 0   ;;  %s3172_s0 = inlined_call_operand.vmem [shape: f32[2,16,32], index: 0, kind: input, shape index: {}]   ;;  %s3173_s1 = inlined_call_operand.vmem [shape: f32[110,16], index: 1, kind: input, shape index: {}]   ;;  %s3174_s2 = inlined_call_operand.vmem [shape: bf16[9,32,32], index: 2, kind: input, shape index: {}]   ;;  %s3175_s3 = inlined_call_operand.vmem [shape: f32[1,32], index: 3, kind: input, shape index: {}]   ;;  %s3176_s4 = inlined_call_operand.vmem [shape: f32[1,32], index: 4, kind: input, shape index: {}]   ;;  %s3177_s5 = inlined_call_operand.vmem [shape: f32[2,80,32], index: 5, kind: input, shape index: {}]   ;;  %s3178_s6 = inlined_call_operand.vmem [shape: f32[2,80,32], index: 6, kind: output, shape index: {}]  }
   0x1 LB: > { %s1836_s22 = sadd.s32 4294967295, %s2472_s21   ;;  %p1840_p0 = scmp.ge.s32.totalorder %s2472_s21, 1  ;;  %s2472_s21 = sphi %s2511_s21, %s16_s21  }
   0x2   : > { %p222_p1 = scmp.lt.s32.totalorder %s2472_s21, 3 }
   0x4   : > { %p223_p2 = pnand %p1840_p0, %p222_p1 }
   0x5   : > { %p257_p3 = scmp.lt.s32.totalorder (!%p223_p2), %s1836_s22, 1  ;;  %v273_v0 = vld [vmem:[%s3173_s1] sm:$0xff] (!%p223_p2)  ;;  %vm289_vm0 = vcmask (!%p223_p2), 130048   ;;  %v274_v4 = vld [vmem:[%s3173_s1 + $0x8] sm:$0xff] (!%p223_p2)  ;;  %v275_v5 = vld [vmem:[%s3173_s1 + $0x10] sm:$0xff] (!%p223_p2)  ;;  %v2474_v18 = vmov (!%p223_p2), 0.0  }
   0x6   : > { %226 = sbr.rel (%p223_p2) target bundleno = 666 (0x29a), region = 44  ;;  %2042 = vmatprep.mubr.msk.f32.mxu0 (!%p223_p2), %vm289_vm0, %v273_v0  ;;  %v276_v6 = vld [vmem:[%s3173_s1 + $0x18] sm:$0xff] (!%p223_p2)  ;;  %v277_v7 = vld [vmem:[%s3173_s1 + $0x20] sm:$0xff] (!%p223_p2)  ;;  %v278_v8 = vld [vmem:[%s3173_s1 + $0x28] sm:$0xff] (!%p223_p2)  ;;  %2283 = vmatprep.subr.bf16.mxu1 (!%p223_p2), %v2474_v18  ;;  %vm2475_vm1 = vmmov (!%p223_p2), 0   ;;  %vm733_vm3 = vcmask (!%p223_p2), 1046528  }
   0x7   : > { %v279_v9 = vld [vmem:[%s3173_s1 + $0x30] sm:$0xff] (!%p223_p2)  ;;  %v280_v10 = vld [vmem:[%s3173_s1 + $0x38] sm:$0xff] (!%p223_p2)  ;;  %v281_v11 = vld [vmem:[%s3173_s1 + $0x40] sm:$0xff] (!%p223_p2)  ;;  %2167 = vmatprep.mubr.msk.bf16.mxu1 (!%p223_p2), %vm2475_vm1, %v2474_v18  ;;  %vm481_vm2 = vsmask.f32 (!%p223_p2), 7424  ;;  %vm538_vm4 = vcmask (!%p223_p2), 261120  }
   0x8   : > { %v282_v12 = vld [vmem:[%s3173_s1 + $0x48] sm:$0xff] (!%p223_p2)  ;;  %v283_v13 = vld [vmem:[%s3173_s1 + $0x50] sm:$0xff] (!%p223_p2)  ;;  %v284_v14 = vld [vmem:[%s3173_s1 + $0x58] sm:$0xff] (!%p223_p2)  ;;  %vm1167_vm5 = vcmask (!%p223_p2), 1045504   ;;  %vm998_vm6 = vsmask.f32 (!%p223_p2), 6400 }
   0x9   : > { %v285_v15 = vld [vmem:[%s3173_s1 + $0x60] sm:$0xff] (!%p223_p2)  ;;  %v286_v16 = vld [vmem:[%s3173_s1 + $0x68] sm:$0x3f] (!%p223_p2)  ;;  %v2448_v17 = vld [vmem:[%s3174_s2 + $0x10] sm:$0xff] (!%p223_p2)   ;;  %vm1424_vm7 = vsmask.f32 (!%p223_p2), 5376 }
   0xa   : > { %v2449_v19 = vld [vmem:[%s3174_s2 + $0x18] sm:$0xff] (!%p223_p2)   ;;  %v2598_v20 = vld [vmem:[%s3174_s2 + $0x40] sm:$0xff] (!%p223_p2)   ;;  %v2605_v21 = vld [vmem:[%s3174_s2 + $0x48] sm:$0xff] (!%p223_p2)   ;;  %vm1573_vm8 = vcmask (!%p223_p2), 1044480  }
   0xb   : > { %2285 = vmatpush3.bf16.msra.mxu1 (!%p223_p2), %v2598_v20  ;;  %v2454_v44 = vld [vmem:[%s3174_s2] sm:$0xff] (!%p223_p2)   ;;  %v2455_v63 = vld [vmem:[%s3174_s2 + $0x8] sm:$0xff] (!%p223_p2)  }
   0xc   : > { %2284 = vmatprep.subr.bf16.mxu1 (!%p223_p2), %v2474_v18 }
   0xd   : > { %s3180_s22 = smov (!%p257_p3, %s1836_s22), 1 }
   0xe   : > { %s1958_s25 = sshll.u32 %s3180_s22, 4 }
   0xf   : > { %s261_s28 = scalar_lea.vmem %s3172_s0, %s1958_s25  ;;  %2286 = vmatpush3.bf16.msra.mxu1 %v2605_v21  ;;  %s2437_s25 = smul.u32 80, %s3180_s22 }
  0x10   : > { %v287_v1 = vld [vmem:[%s261_s28] sm:$0xff]  ;;  %v288_v2 = vld [vmem:[%s261_s28 + $0x8] sm:$0xff]  ;;  %2183 = vmatprep.subr.bf16.mxu1 %v2474_v18 }
  0x11   : > { %v2279_v3 = vpack.c.bf16 %v288_v2, %v287_v1  ;;  %s3108_s7 = scalar_lea.vmem %s3177_s5, %s2437_s25  ;;  %s3118_s10 = scalar_lea.vmem %s3178_s6, %s2437_s25 }
  0x13   : > { %2280 = vmatprep.subr.bf16.mxu0 %v2279_v3 }
  0x14   : > { %2282 = vmatpush3.bf16.msra.mxu0 %v2279_v3 }
  0x15   : > { %2063 = vmatprep.subr.bf16.mxu0 %v2474_v18 }
  0x17   : > { %2043 = vmatmul.mubr.msk.f32.vlgmr.msra.gmra.mrb[0].mxu0 %vm289_vm0, %v274_v4 }
  0x18   : > { %2045 = vmatprep.mubr.msk.f32.mxu0 %vm289_vm0, %v275_v5  ;;  %2064 = vmatpush3.bf16.msra.mxu0 %v2448_v17 }
  0x19   : > { %2065 = vmatprep.subr.bf16.mxu0 %v2474_v18 }
  0x1b   : > { %2046 = vmatmul.mubr.msk.f32.gmra.mrb[2].mxu0 %vm289_vm0, %v276_v6 }
  0x1c   : > { %2048 = vmatprep.mubr.msk.f32.mxu0 %vm289_vm0, %v277_v7  ;;  %2066 = vmatpush3.bf16.msra.mxu0 %v2449_v19 }
  0x1d   : > { %2087 = vmatprep.subr.bf16.mxu0 %v2474_v18 }
  0x1f   : > { %2049 = vmatmul.mubr.msk.f32.gmra.mrb[4].mxu0 %vm289_vm0, %v278_v8 }
  0x20   : > { %2051 = vmatprep.mubr.msk.f32.mxu0 %vm289_vm0, %v279_v9 }
  0x23   : > { %2052 = vmatmul.mubr.msk.f32.gmra.mrb[6].mxu0 %vm289_vm0, %v280_v10 }
  0x24   : > { %2054 = vmatprep.mubr.msk.f32.mxu0 %vm289_vm0, %v281_v11 }
  0x27   : > { %2055 = vmatmul.mubr.msk.f32.gmra.mrb[8].mxu0 %vm289_vm0, %v282_v12 }
  0x28   : > { %2057 = vmatprep.mubr.msk.f32.mxu0 %vm289_vm0, %v283_v13 }
  0x2b   : > { %2058 = vmatmul.mubr.msk.f32.gmra.mrb[10].mxu0 %vm289_vm0, %v284_v14 }
  0x2c   : > { %2060 = vmatprep.mubr.msk.f32.mxu0 %vm289_vm0, %v285_v15 }
  0x2f   : > { %2061 = vmatmul.mubr.msk.f32.gmra.mrb[12].mxu0 %vm289_vm0, %v286_v16 }
  0x30   : > { %2067 = vmatprep.mubr.msk.bf16.mxu0 %vm2475_vm1, %v2474_v18 }
  0xea   : > { %v2044_v22 = vpop.f32.mrb[0].mxu0 }
  0xeb   : > { %v398_v23 = vpop.f32.mrb[1].mxu0 }
  0xec   : > { %v2609_v24 = vpack.c.bf16 %v2044_v22, %v398_v23 }
  0xee   : > { %v485_v25 = vshll.u32 %v2609_v24, 16  ;;  %v2047_v26 = vpop.f32.mrb[2].mxu0  ;;  %v483_v31 = vshrl.u32 %v2609_v24, 16  ;;  %v734_v34 = vrot.slane %v2609_v24, 1 }
  0xef   : > { %v408_v27 = vpop.f32.mrb[3].mxu0 }
  0xf0   : > { %v2612_v28 = vpack.c.bf16 %v2047_v26, %v408_v27  ;;  %v2614_v29 = vpack.c.bf16 %v408_v27, %v2044_v22  ;;  %v487_v30 = vrot.slane %v485_v25, 1 }
  0xf2   : > { %v1000_v32 = vshrl.u32 %v2614_v29, 16  ;;  %v2050_v33 = vpop.f32.mrb[4].mxu0  ;;  %v1003_v35 = vshll.u32 %v2614_v29, 16  ;;  %v490_v37 = vshll.u32 %v2612_v28, 16  ;;  %v735_v38 = vrot.slane %v2612_v28, 1 }
  0xf3   : > { %v418_v36 = vpop.f32.mrb[5].mxu0  ;;  %v494_v41 = vshrl.u32 %v2612_v28, 16  ;;  %v488_v42 = vor.u32 %v487_v30, %v483_v31  ;;  %v1168_v47 = vrot.slane %v2614_v29, 2  ;;  %v872_v56 = vrot.slane %v2614_v29, 1  ;;  %v2452_v30 = vld [vmem:[%s3174_s2 + $0x50] sm:$0xff]  }
  0xf4   : > { %v2622_v39 = vpack.c.bf16 %v2050_v33, %v418_v36  ;;  %v2624_v40 = vpack.c.bf16 %v418_v36, %v2047_v26  ;;  %v492_v43 = vrot.slane %v490_v37, 1  ;;  %v2635_v45 = vsel %vm733_vm3, %v734_v34, %v735_v38 }
  0xf5   : > { %v2637_v46 = vrot.slane %v1000_v32, 1  ;;  %v2642_v51 = vrot.slane %v1003_v35, 2  ;;  %v2653_v59 = vrot.slane %v494_v41, 2  ;;  %v1298_v10 = vrot.slane %v2612_v28, 2 }
  0xf6   : > { %v1008_v48 = vshrl.u32 %v2624_v40, 16  ;;  %v1011_v49 = vshll.u32 %v2624_v40, 16  ;;  %v2053_v50 = vpop.f32.mrb[6].mxu0  ;;  %v1169_v52 = vrot.slane %v2624_v40, 2  ;;  %v493_v54 = vsel %vm481_vm2, %v488_v42, %v492_v43 }
  0xf7   : > { %v428_v53 = vpop.f32.mrb[7].mxu0  ;;  %v498_v55 = vshll.u32 %v2622_v39, 16  ;;  %2068 = vmatmul.mubr.msk.bf16.vlgmr.msra.gmra.mrb[16].mxu0 %vm538_vm4, %v493_v54  ;;  %v496_v60 = vor.u32 %v494_v41, %v492_v43  ;;  %v1006_v6 = vor.u32 %v2642_v51, %v2637_v46  ;;  %v502_v9 = vshrl.u32 %v2622_v39, 16 }
  0xf8   : > { %v2648_v57 = vpack.c.bf16 %v2053_v50, %v428_v53  ;;  %v2650_v58 = vpack.c.bf16 %v428_v53, %v2050_v33  ;;  %2071 = vmatprep.mubr.msk.bf16.mxu0 %vm2475_vm1, %v2474_v18  ;;  %v1010_v62 = vrot.slane %v1008_v48, 1  ;;  %2088 = vmatpush3.bf16.msra.mxu0 %v2454_v44  ;;  %v2663_v0 = vsel %vm1167_vm5, %v1168_v47, %v1169_v52 }
  0xf9   : > { %v500_v61 = vrot.slane %v498_v55, 1  ;;  %v1013_v4 = vrot.slane %v1011_v49, 2  ;;  %2089 = vmatprep.subr.bf16.mxu0 %v2474_v18  ;;  %v873_v15 = vrot.slane %v2624_v40, 1  ;;  %v2679_v16 = vrot.slane %v498_v55, 3 }
  0xfa   : > { %v1017_v1 = vshrl.u32 %v2650_v58, 16  ;;  %v1020_v2 = vshll.u32 %v2650_v58, 16  ;;  %v2056_v3 = vpop.f32.mrb[8].mxu0  ;;  %v506_v5 = vshll.u32 %v2648_v57, 16  ;;  %v2694_v34 = vrot.slane %v502_v9, 2 }
  0xfb   : > { %v438_v7 = vpop.f32.mrb[9].mxu0  ;;  %v501_v8 = vsel %vm481_vm2, %v496_v60, %v500_v61  ;;  %v504_v17 = vor.u32 %v502_v9, %v500_v61  ;;  %v2685_v26 = vor.u32 %v1013_v4, %v1010_v62  ;;  %v510_v35 = vshrl.u32 %v2648_v57, 16  ;;  %v2453_v60 = vld [vmem:[%s3174_s2 + $0x58] sm:$0xff]  }
  0xfc   : > { %v2674_v11 = vpack.c.bf16 %v2056_v3, %v438_v7  ;;  %v2676_v12 = vpack.c.bf16 %v438_v7, %v2053_v50  ;;  %v1019_v13 = vrot.slane %v1017_v1, 1  ;;  %v1022_v14 = vrot.slane %v1020_v2, 2  ;;  %2090 = vmatpush3.bf16.msra.mxu0 %v2455_v63 }
  0xfd   : > { %v508_v19 = vrot.slane %v506_v5, 1  ;;  %2111 = vmatprep.subr.bf16.mxu0 %v2474_v18  ;;  %v1171_v61 = vrot.slane %v2650_v58, 2  ;;  %v737_v9 = vrot.slane %v2622_v39, 1  ;;  %v1430_v29 = vor.u32 %v2679_v16, %v2694_v34 }
  0xfe   : > { %v1026_v22 = vshrl.u32 %v2676_v12, 16  ;;  %v1029_v23 = vshll.u32 %v2676_v12, 16  ;;  %v2059_v25 = vpop.f32.mrb[10].mxu0  ;;  %v1023_v27 = vor.u32 %v1022_v14, %v1019_v13  ;;  %v514_v54 = vshll.u32 %v2674_v11, 16 }
  0xff   : > { %v2691_v31 = vpack.c.bf16 %v2059_v25, %v2059_v25  ;;  %v448_v32 = vpop.f32.mrb[11].mxu0  ;;  %v509_v33 = vsel %vm481_vm2, %v504_v17, %v508_v19  ;;  %2072 = vmatmul.mubr.msk.bf16.gmra.mrb[20].mxu0 %vm538_vm4, %v501_v8  ;;  %v1299_v8 = vrot.slane %v2622_v39, 2  ;;  %v512_v14 = vor.u32 %v510_v35, %v508_v19 }
 0x100   : > { %v2697_v36 = vpack.c.bf16 %v448_v32, %v448_v32  ;;  %v2699_v41 = vpack.c.bf16 %v448_v32, %v2056_v3  ;;  %v2701_v42 = vpack.c.bf16 %v2059_v25, %v448_v32  ;;  %v1024_v43 = vsel %vm998_vm6, %v2685_v26, %v1023_v27  ;;  %2075 = vmatprep.mubr.msk.bf16.mxu0 %vm2475_vm1, %v2474_v18 }
 0x101   : > { %v1044_v44 = vshrl.u32 %v2691_v31, 16  ;;  %v1047_v47 = vshll.u32 %v2691_v31, 16  ;;  %2168 = vmatmul.mubr.msk.bf16.vlgmr.msra.gmra.mrb[0].mxu1 %vm538_vm4, %v1024_v43  ;;  %v1028_v48 = vrot.slane %v1026_v22, 1  ;;  %v1031_v49 = vrot.slane %v1029_v23, 2 }
 0x102   : > { %v522_v50 = vshll.u32 %v2697_v36, 16  ;;  %2184 = vmatpush3.bf16.msra.mxu1 %v2452_v30  ;;  %v2062_v53 = vpop.f32.mrb[12].mxu0  ;;  %2171 = vmatprep.mubr.msk.bf16.mxu1 %vm2475_vm1, %v2474_v18  ;;  %v1035_v55 = vshrl.u32 %v2699_v41, 16  ;;  %v1038_v1 = vshll.u32 %v2699_v41, 16  ;;  %v516_v23 = vrot.slane %v514_v54, 1 }
 0x103   : > { %v458_v62 = vpop.f32.mrb[13].mxu0  ;;  %v1032_v63 = vor.u32 %v1031_v49, %v1028_v48  ;;  %2185 = vmatprep.subr.bf16.mxu1 %v2474_v18  ;;  %v1046_v2 = vrot.slane %v1044_v44, 1  ;;  %v1049_v3 = vrot.slane %v1047_v47, 2  ;;  %v518_v25 = vshrl.u32 %v2674_v11, 16 }
 0x104   : > { %v2722_v4 = vpack.c.bf16 %v458_v62, %v458_v62  ;;  %v1037_v7 = vrot.slane %v1035_v55, 1  ;;  %v1040_v17 = vrot.slane %v1038_v1, 2  ;;  %v2735_v30 = vsel %vm1167_vm5, %v1169_v52, %v1171_v61 }
 0x105   : > { %v1033_v13 = vsel %vm998_vm6, %v1023_v27, %v1032_v63  ;;  %v1050_v22 = vor.u32 %v1049_v3, %v1046_v2  ;;  %v1173_v32 = vrot.slane %v2676_v12, 2  ;;  %v2738_v27 = vrot.slane %v522_v50, 1 }
 0x106   : > { %2186 = vmatpush3.bf16.msra.mxu1 %v2453_v60  ;;  %v1041_v43 = vor.u32 %v1040_v17, %v1037_v7  ;;  %v1175_v19 = vrot.slane %v2699_v41, 2  ;;  %v1177_v44 = vrot.slane %v2691_v31, 2  ;;  %v1450_v47 = vshrl.u32 %v2722_v4, 16 }
 0x107   : > { %2207 = vmatprep.subr.bf16.mxu1 %v2474_v18  ;;  %v1453_v48 = vshll.u32 %v2722_v4, 16  ;;  %2076 = vmatmul.mubr.msk.bf16.gmra.mrb[24].mxu0 %vm538_vm4, %v509_v33  ;;  %v2747_v52 = vsel %vm1167_vm5, %v1171_v61, %v1173_v32  ;;  %v2752_v49 = vsel %vm1167_vm5, %v1298_v10, %v1299_v8  ;;  %v1301_v55 = vrot.slane %v2648_v57, 2 }
 0x108   : > { %2079 = vmatprep.mubr.msk.bf16.mxu0 %vm2475_vm1, %v2474_v18  ;;  %v1042_v50 = vsel %vm998_vm6, %v1032_v63, %v1041_v43  ;;  %v2759_v53 = vsel %vm998_vm6, %v1041_v43, %v1050_v22  ;;  %v2762_v33 = vsel %vm1167_vm5, %v1173_v32, %v1175_v19  ;;  %v517_v60 = vsel %vm481_vm2, %v512_v14, %v516_v23 }
 0x109   : > { %2172 = vmatmul.mubr.msk.bf16.gmra.mrb[4].mxu1 %vm538_vm4, %v1033_v13  ;;  %v2769_v10 = vsel %vm1167_vm5, %v1175_v19, %v1177_v44  ;;  %v2774_v61 = vsel %vm733_vm3, %v735_v38, %v737_v9  ;;  %v739_v62 = vrot.slane %v2648_v57, 1  ;;  %v2780_v63 = vsel %vm1167_vm5, %v1299_v8, %v1301_v55 }
 0x10a   : > { %2175 = vmatprep.mubr.msk.bf16.mxu1 %vm2475_vm1, %v2474_v18  ;;  %v1303_v1 = vrot.slane %v2674_v11, 2  ;;  %v1305_v2 = vrot.slane %v2701_v42, 2  ;;  %v1307_v3 = vrot.slane %v2722_v4, 2  ;;  %v520_v7 = vor.u32 %v518_v25, %v516_v23 }
 0x10b   : > { %v2788_v38 = vsel %vm733_vm3, %v737_v9, %v739_v62  ;;  %v2795_v8 = vsel %vm733_vm3, %v872_v56, %v873_v15  ;;  %v1426_v13 = vrot.slane %v490_v37, 3  ;;  %v1452_v14 = vrot.slane %v1450_v47, 2 }
 0x10c   : > { %v1455_v17 = vrot.slane %v1453_v48, 3  ;;  %v2802_v22 = vsel %vm1167_vm5, %v1303_v1, %v1305_v2  ;;  %v2805_v9 = vsel %vm1167_vm5, %v1305_v2, %v1307_v3  ;;  %v875_v56 = vrot.slane %v2650_v58, 1 }
 0x10d   : > { %v1427_v23 = vor.u32 %v1426_v13, %v2653_v59  ;;  %v1432_v37 = vrot.slane %v510_v35, 2  ;;  %v1433_v32 = vrot.slane %v506_v5, 3  ;;  %v877_v43 = vrot.slane %v2676_v12, 1 }
 0x10e   : > { %v1436_v19 = vrot.slane %v518_v25, 2  ;;  %v1437_v44 = vrot.slane %v514_v54, 3  ;;  %v2825_v58 = vsel %vm733_vm3, %v873_v15, %v875_v56  ;;  %v879_v16 = vrot.slane %v2699_v41, 1 }
 0x10f   : > { %2080 = vmatmul.mubr.msk.bf16.gmra.mrb[28].mxu0 %vm538_vm4, %v517_v60  ;;  %v2820_v59 = vsel %vm1424_vm7, %v1427_v23, %v1430_v29  ;;  %v1441_v5 = vshrl.u32 %v2701_v42, 16  ;;  %v1434_v12 = vor.u32 %v1433_v32, %v1432_v37  ;;  %v2833_v34 = vsel %vm733_vm3, %v875_v56, %v877_v43 }
 0x110   : > { %2083 = vmatprep.mubr.msk.bf16.mxu0 %vm2475_vm1, %v2474_v18  ;;  %v1438_v35 = vor.u32 %v1437_v44, %v1436_v19  ;;  %v1444_v54 = vshll.u32 %v2701_v42, 16  ;;  %v2839_v40 = vsel %vm733_vm3, %v877_v43, %v879_v16  ;;  %v881_v41 = vrot.slane %v2691_v31, 1 }
 0x111   : > { %2176 = vmatmul.mubr.msk.bf16.gmra.mrb[8].mxu1 %vm538_vm4, %v1042_v50  ;;  %v1443_v15 = vrot.slane %v1441_v5, 2  ;;  %v1456_v25 = vor.u32 %v1455_v17, %v1452_v14  ;;  %v2843_v47 = vsel %vm1424_vm7, %v1430_v29, %v1434_v12  ;;  %v2853_v60 = vsel %vm998_vm6, %v1006_v6, %v2685_v26 }
 0x112   : > { %2179 = vmatprep.mubr.msk.bf16.mxu1 %vm2475_vm1, %v2474_v18  ;;  %v2846_v48 = vsel %vm1424_vm7, %v1434_v12, %v1438_v35  ;;  %v1446_v50 = vrot.slane %v1444_v54, 3  ;;  %v2856_v2 = vsel %vm733_vm3, %v879_v16, %v881_v41  ;;  %v1574_v31 = vrot.slane %v2612_v28, 3  ;;  %v3098_v16 = vld [vmem:[%s3175_s3] ss:$0 sm:$0xff] }
 0x113   : > { %v1575_v3 = vrot.slane %v2622_v39, 3  ;;  %v1577_v13 = vrot.slane %v2648_v57, 3  ;;  %v1583_v17 = vrot.slane %v2722_v4, 3  ;;  %v1581_v51 = vrot.slane %v2701_v42, 3 }
 0x114   : > { %v1447_v14 = vor.u32 %v1446_v50, %v1443_v15  ;;  %v525_v6 = vsel %vm481_vm2, %v520_v7, %v2738_v27  ;;  %v2456_v27 = vld [vmem:[%s3174_s2 + $0x60] sm:$0xff]  }
 0x115   : > { %v2863_v23 = vsel %vm1573_vm8, %v1574_v31, %v1575_v3  ;;  %v2868_v46 = vsel %vm1573_vm8, %v1575_v3, %v1577_v13  ;;  %v2883_v4 = vsel %vm1573_vm8, %v1581_v51, %v1583_v17  ;;  %v2458_v7 = vld [vmem:[%s3174_s2 + $0x20] sm:$0xff]   ;;  %v1740_v31 = vld [vmem:[%s3108_s7 + $0x8] sm:$0xff] }
 0x116   : > { %v2874_v26 = vsel %vm1424_vm7, %v1438_v35, %v1447_v14  ;;  %v2877_v29 = vsel %vm1424_vm7, %v1447_v14, %v1456_v25  ;;  %v3103_v35 = vld [vmem:[%s3176_s4] ss:$0 sm:$0xff] }
 0x117   : > { %2084 = vmatmul.mubr.msk.bf16.gmra.mrb[32].mxu0 %vm538_vm4, %v525_v6  ;;  %v1739_v50 = vld [vmem:[%s3108_s7] sm:$0xff] }
 0x118   : > { %2091 = vmatprep.mubr.msk.bf16.mxu0 %vm2475_vm1, %v2474_v18 }
 0x119   : > { %2180 = vmatmul.mubr.msk.bf16.gmra.mrb[12].mxu1 %vm538_vm4, %v2759_v53  ;;  %v2457_v53 = vld [vmem:[%s3174_s2 + $0x68] sm:$0xff]  }
 0x11a   : > { %2187 = vmatprep.mubr.msk.bf16.mxu1 %vm2475_vm1, %v2474_v18 }
 0x11f   : > { %2092 = vmatmul.mubr.msk.bf16.vlgmr.msra.gmra.mrb[16].mxu0 %vm538_vm4, %v2609_v24  ;;  %v2459_v24 = vld [vmem:[%s3174_s2 + $0x28] sm:$0xff]  }
 0x120   : > { %2095 = vmatprep.mubr.msk.bf16.mxu0 %vm2475_vm1, %v2474_v18  ;;  %2112 = vmatpush3.bf16.msra.mxu0 %v2458_v7  ;;  %v1741_v7 = vld [vmem:[%s3108_s7 + $0x10] sm:$0xff] }
 0x121   : > { %2188 = vmatmul.mubr.msk.bf16.vlgmr.msra.gmra.mrb[16].mxu1 %vm538_vm4, %v2663_v0  ;;  %2113 = vmatprep.subr.bf16.mxu0 %v2474_v18  ;;  %v2461_v0 = vld [vmem:[%s3174_s2 + $0x78] sm:$0xff]  }
 0x122   : > { %2208 = vmatpush3.bf16.msra.mxu1 %v2456_v27  ;;  %2191 = vmatprep.mubr.msk.bf16.mxu1 %vm2475_vm1, %v2474_v18 }
 0x123   : > { %2209 = vmatprep.subr.bf16.mxu1 %v2474_v18 }
 0x124   : > { %2114 = vmatpush3.bf16.msra.mxu0 %v2459_v24 }
 0x125   : > { %2135 = vmatprep.subr.bf16.mxu0 %v2474_v18 }
 0x126   : > { %2210 = vmatpush3.bf16.msra.mxu1 %v2457_v53 }
 0x127   : > { %2231 = vmatprep.subr.bf16.mxu1 %v2474_v18  ;;  %2096 = vmatmul.mubr.msk.bf16.gmra.mrb[20].mxu0 %vm538_vm4, %v2612_v28  ;;  %v2460_v28 = vld [vmem:[%s3174_s2 + $0x70] sm:$0xff]  }
 0x128   : > { %2099 = vmatprep.mubr.msk.bf16.mxu0 %vm2475_vm1, %v2474_v18 }
 0x129   : > { %2192 = vmatmul.mubr.msk.bf16.gmra.mrb[0].mxu1 %vm538_vm4, %v2735_v30  ;;  %v1304_v30 = vsel %vm1167_vm5, %v1301_v55, %v1303_v1 }
 0x12a   : > { %2195 = vmatprep.mubr.msk.bf16.mxu1 %vm2475_vm1, %v2474_v18 }
 0x12f   : > { %2100 = vmatmul.mubr.msk.bf16.gmra.mrb[24].mxu0 %vm538_vm4, %v2622_v39  ;;  %v2462_v39 = vld [vmem:[%s3174_s2 + $0x30] sm:$0xff]  }
 0x130   : > { %2103 = vmatprep.mubr.msk.bf16.mxu0 %vm2475_vm1, %v2474_v18 }
 0x131   : > { %2196 = vmatmul.mubr.msk.bf16.gmra.mrb[4].mxu1 %vm538_vm4, %v2747_v52  ;;  %v741_v52 = vrot.slane %v2674_v11, 1 }
 0x132   : > { %2199 = vmatprep.mubr.msk.bf16.mxu1 %vm2475_vm1, %v2474_v18 }
 0x137   : > { %2104 = vmatmul.mubr.msk.bf16.gmra.mrb[28].mxu0 %vm538_vm4, %v2648_v57 }
 0x138   : > { %2107 = vmatprep.mubr.msk.bf16.mxu0 %vm2475_vm1, %v2474_v18 }
 0x139   : > { %2200 = vmatmul.mubr.msk.bf16.gmra.mrb[8].mxu1 %vm538_vm4, %v2762_v33  ;;  %v743_v33 = vrot.slane %v2697_v36, 1  ;;  %v2465_v36 = vld [vmem:[%s3174_s2 + $0x88] sm:$0xff]  }
 0x13a   : > { %2203 = vmatprep.mubr.msk.bf16.mxu1 %vm2475_vm1, %v2474_v18 }
 0x13b   : > { %v744_v55 = vsel %vm733_vm3, %v741_v52, %v743_v33 }
 0x13f   : > { %2108 = vmatmul.mubr.msk.bf16.gmra.mrb[32].mxu0 %vm538_vm4, %v2674_v11 }
 0x140   : > { %2115 = vmatprep.mubr.msk.bf16.mxu0 %vm2475_vm1, %v2474_v18 }
 0x141   : > { %2204 = vmatmul.mubr.msk.bf16.gmra.mrb[12].mxu1 %vm538_vm4, %v2769_v10  ;;  %v2464_v10 = vld [vmem:[%s3174_s2 + $0x80] sm:$0xff]  }
 0x142   : > { %2211 = vmatprep.mubr.msk.bf16.mxu1 %vm2475_vm1, %v2474_v18 }
 0x147   : > { %2116 = vmatmul.mubr.msk.bf16.vlgmr.msra.gmra.mrb[16].mxu0 %vm538_vm4, %v2635_v45  ;;  %v2463_v45 = vld [vmem:[%s3174_s2 + $0x38] sm:$0xff]  }
 0x148   : > { %2119 = vmatprep.mubr.msk.bf16.mxu0 %vm2475_vm1, %v2474_v18  ;;  %2136 = vmatpush3.bf16.msra.mxu0 %v2462_v39 }
 0x149   : > { %2212 = vmatmul.mubr.msk.bf16.vlgmr.msra.gmra.mrb[16].mxu1 %vm538_vm4, %v2752_v49  ;;  %2137 = vmatprep.subr.bf16.mxu0 %v2474_v18  ;;  %v742_v49 = vsel %vm733_vm3, %v739_v62, %v741_v52 }
 0x14a   : > { %2232 = vmatpush3.bf16.msra.mxu1 %v2460_v28  ;;  %2215 = vmatprep.mubr.msk.bf16.mxu1 %vm2475_vm1, %v2474_v18  ;;  %v1742_v28 = vld [vmem:[%s3108_s7 + $0x18] sm:$0xff] }
 0x14b   : > { %2233 = vmatprep.subr.bf16.mxu1 %v2474_v18 }
 0x14c   : > { %2138 = vmatpush3.bf16.msra.mxu0 %v2463_v45 }
 0x14d   : > { %2159 = vmatprep.subr.bf16.mxu0 %v2474_v18 }
 0x14e   : > { %2234 = vmatpush3.bf16.msra.mxu1 %v2461_v0 }
 0x14f   : > { %2255 = vmatprep.subr.bf16.mxu1 %v2474_v18  ;;  %2120 = vmatmul.mubr.msk.bf16.gmra.mrb[20].mxu0 %vm538_vm4, %v2774_v61 }
 0x150   : > { %2123 = vmatprep.mubr.msk.bf16.mxu0 %vm2475_vm1, %v2474_v18 }
 0x151   : > { %2216 = vmatmul.mubr.msk.bf16.gmra.mrb[0].mxu1 %vm538_vm4, %v2780_v63 }
 0x152   : > { %2219 = vmatprep.mubr.msk.bf16.mxu1 %vm2475_vm1, %v2474_v18 }
 0x157   : > { %2124 = vmatmul.mubr.msk.bf16.gmra.mrb[24].mxu0 %vm538_vm4, %v2788_v38 }
 0x158   : > { %2127 = vmatprep.mubr.msk.bf16.mxu0 %vm2475_vm1, %v2474_v18 }
 0x159   : > { %2220 = vmatmul.mubr.msk.bf16.gmra.mrb[4].mxu1 %vm538_vm4, %v1304_v30 }
 0x15a   : > { %2223 = vmatprep.mubr.msk.bf16.mxu1 %vm2475_vm1, %v2474_v18 }
 0x15f   : > { %2128 = vmatmul.mubr.msk.bf16.gmra.mrb[28].mxu0 %vm538_vm4, %v742_v49 }
 0x160   : > { %2131 = vmatprep.mubr.msk.bf16.mxu0 %vm2475_vm1, %v2474_v18 }
 0x161   : > { %2224 = vmatmul.mubr.msk.bf16.gmra.mrb[8].mxu1 %vm538_vm4, %v2802_v22 }
 0x162   : > { %2227 = vmatprep.mubr.msk.bf16.mxu1 %vm2475_vm1, %v2474_v18 }
 0x167   : > { %2132 = vmatmul.mubr.msk.bf16.gmra.mrb[32].mxu0 %vm538_vm4, %v744_v55 }
 0x168   : > { %2139 = vmatprep.mubr.msk.bf16.mxu0 %vm2475_vm1, %v2474_v18 }
 0x169   : > { %2228 = vmatmul.mubr.msk.bf16.gmra.mrb[12].mxu1 %vm538_vm4, %v2805_v9 }
 0x16a   : > { %2235 = vmatprep.mubr.msk.bf16.mxu1 %vm2475_vm1, %v2474_v18 }
 0x16f   : > { %2140 = vmatmul.mubr.msk.bf16.vlgmr.msra.gmra.mrb[16].mxu0 %vm538_vm4, %v2795_v8 }
 0x170   : > { %2143 = vmatprep.mubr.msk.bf16.mxu0 %vm2475_vm1, %v2474_v18  ;;  %2160 = vmatpush3.bf16.msra.mxu0 %v2598_v20  ;;  %v1579_v20 = vrot.slane %v2674_v11, 3 }
 0x171   : > { %2236 = vmatmul.mubr.msk.bf16.vlgmr.msra.gmra.mrb[16].mxu1 %vm538_vm4, %v2820_v59  ;;  %2161 = vmatprep.subr.bf16.mxu0 %v2474_v18 }
 0x172   : > { %2256 = vmatpush3.bf16.msra.mxu1 %v2464_v10  ;;  %2239 = vmatprep.mubr.msk.bf16.mxu1 %vm2475_vm1, %v2474_v18  ;;  %v1582_v61 = vsel %vm1573_vm8, %v1579_v20, %v1581_v51 }
 0x173   : > { %2257 = vmatprep.subr.bf16.mxu1 %v2474_v18 }
 0x174   : > { %2162 = vmatpush3.bf16.msra.mxu0 %v2605_v21  ;;  %v1580_v21 = vsel %vm1573_vm8, %v1577_v13, %v1579_v20 }
 0x176   : > { %2258 = vmatpush3.bf16.msra.mxu1 %v2465_v36 }
 0x177   : > { %2144 = vmatmul.mubr.msk.bf16.gmra.mrb[20].mxu0 %vm538_vm4, %v2825_v58 }
 0x178   : > { %2147 = vmatprep.mubr.msk.bf16.mxu0 %vm2475_vm1, %v2474_v18 }
 0x179   : > { %2240 = vmatmul.mubr.msk.bf16.gmra.mrb[0].mxu1 %vm538_vm4, %v2843_v47 }
 0x17a   : > { %2243 = vmatprep.mubr.msk.bf16.mxu1 %vm2475_vm1, %v2474_v18 }
 0x17f   : > { %2148 = vmatmul.mubr.msk.bf16.gmra.mrb[24].mxu0 %vm538_vm4, %v2833_v34 }
 0x180   : > { %2151 = vmatprep.mubr.msk.bf16.mxu0 %vm2475_vm1, %v2474_v18 }
 0x181   : > { %2244 = vmatmul.mubr.msk.bf16.gmra.mrb[4].mxu1 %vm538_vm4, %v2846_v48 }
 0x182   : > { %2247 = vmatprep.mubr.msk.bf16.mxu1 %vm2475_vm1, %v2474_v18 }
 0x187   : > { %2152 = vmatmul.mubr.msk.bf16.gmra.mrb[28].mxu0 %vm538_vm4, %v2839_v40 }
 0x188   : > { %2155 = vmatprep.mubr.msk.bf16.mxu0 %vm2475_vm1, %v2474_v18 }
 0x189   : > { %2248 = vmatmul.mubr.msk.bf16.gmra.mrb[8].mxu1 %vm538_vm4, %v2874_v26 }
 0x18a   : > { %2251 = vmatprep.mubr.msk.bf16.mxu1 %vm2475_vm1, %v2474_v18 }
 0x18f   : > { %2156 = vmatmul.mubr.msk.bf16.gmra.mrb[32].mxu0 %vm538_vm4, %v2856_v2 }
 0x190   : > { %2163 = vmatprep.mubr.msk.bf16.mxu0 %vm2475_vm1, %v2474_v18 }
 0x191   : > { %2252 = vmatmul.mubr.msk.bf16.gmra.mrb[12].mxu1 %vm538_vm4, %v2877_v29 }
 0x192   : > { %2259 = vmatprep.mubr.msk.bf16.mxu1 %vm2475_vm1, %v2474_v18 }
 0x197   : > { %2164 = vmatmul.mubr.msk.bf16.vlgmr.msra.gmra.mrb[16].mxu0 %vm538_vm4, %v2853_v60 }
 0x199   : > { %2260 = vmatmul.mubr.msk.bf16.vlgmr.msra.gmra.mrb[16].mxu1 %vm538_vm4, %v2863_v23 }
 0x19a   : > { %2263 = vmatprep.mubr.msk.bf16.mxu1 %vm2475_vm1, %v2474_v18 }
 0x1a1   : > { %2264 = vmatmul.mubr.msk.bf16.gmra.mrb[0].mxu1 %vm538_vm4, %v2868_v46 }
 0x1a2   : > { %2267 = vmatprep.mubr.msk.bf16.mxu1 %vm2475_vm1, %v2474_v18 }
 0x1a9   : > { %2268 = vmatmul.mubr.msk.bf16.gmra.mrb[4].mxu1 %vm538_vm4, %v1580_v21 }
 0x1aa   : > { %2271 = vmatprep.mubr.msk.bf16.mxu1 %vm2475_vm1, %v2474_v18 }
 0x1b1   : > { %2272 = vmatmul.mubr.msk.bf16.gmra.mrb[8].mxu1 %vm538_vm4, %v1582_v61  ;;  %v1743_v61 = vld [vmem:[%s3108_s7 + $0x20] sm:$0xff] }
 0x1b2   : > { %2275 = vmatprep.mubr.msk.bf16.mxu1 %vm2475_vm1, %v2474_v18 }
 0x1b9   : > { %2276 = vmatmul.mubr.msk.bf16.gmra.mrb[12].mxu1 %vm538_vm4, %v2883_v4 }
 0x24a   : > { %v952_v57 = vpop.f32.mrb[20].mxu0 }
 0x24b   : > { %v2145_v11 = vpop.f32.mrb[21].mxu0 }
 0x24c   : > { %v955_v62 = vpop.f32.mrb[22].mxu0 }
 0x24d   : > { %v2146_v63 = vpop.f32.mrb[23].mxu0 }
 0x252   : > { %v960_v1 = vpop.f32.mrb[24].mxu0 }
 0x253   : > { %v2149_v38 = vpop.f32.mrb[25].mxu0 }
 0x254   : > { %v963_v8 = vpop.f32.mrb[26].mxu0 }
 0x255   : > { %v2150_v22 = vpop.f32.mrb[27].mxu0 }
 0x25a   : > { %v3086_v42 = vpop.f32.mrb[28].mxu0 }
 0x25b   : > { %v2153_v9 = vpop.f32.mrb[29].mxu0 }
 0x25c   : > { %v3088_v56 = vpop.f32.mrb[30].mxu0 }
 0x25d   : > { %v2154_v37 = vpop.f32.mrb[31].mxu0 }
 0x262   : > { %v3090_v32 = vpop.f32.mrb[32].mxu0 }
 0x263   : > { %v2157_v18 = vpop.f32.mrb[33].mxu0 }
 0x264   : > { %v3092_v43 = vpop.f32.mrb[34].mxu0 }
 0x265   : > { %v2158_v19 = vpop.f32.mrb[35].mxu0 }
 0x26a   : > { %v1113_v44 = vpop.f32.mrb[16].mxu0 }
 0x26b   : > { %v2165_v59 = vpop.f32.mrb[17].mxu0 }
 0x26c   : > { %v1646_v58 = vpop.f32.mrb[16].mxu1  ;;  %v1116_v5 = vpop.f32.mrb[18].mxu0 }
 0x26d   : > { %v2287_v12 = vadd.f32 %v1646_v58, %v1113_v44  ;;  %v2261_v34 = vpop.f32.mrb[17].mxu1  ;;  %v2166_v54 = vpop.f32.mrb[19].mxu0 }
 0x26e   : > { %v1649_v40 = vpop.f32.mrb[18].mxu1  ;;  %v1746_v34 = vld [vmem:[%s3108_s7 + $0x38] sm:$0xff] }
 0x26f   : > { %v1702_v15 = vmul.f32 %v2287_v12, %v3098_v16  ;;  %v2288_v41 = vadd.f32 %v1649_v40, %v1116_v5  ;;  %v2262_v25 = vpop.f32.mrb[19].mxu1  ;;  %v1745_v5 = vld [vmem:[%s3108_s7 + $0x30] sm:$0xff] }
 0x271   : > { %v1719_v47 = vadd.f32 %v3103_v35, %v1702_v15  ;;  %v1703_v48 = vmul.f32 %v2288_v41, %v3098_v16 }
 0x273   : > { %v1729_v60 = vmax.f32 %v1719_v47, 0.0  ;;  %v1720_v2 = vadd.f32 %v3103_v35, %v1703_v48 }
 0x274   : > { %v1654_v3 = vpop.f32.mrb[0].mxu1 }
 0x275   : > { %v1749_v13 = vmul.f32 %v1739_v50, %v1729_v60  ;;  %v1730_v14 = vmax.f32 %v1720_v2, 0.0  ;;  %v2289_v17 = vadd.f32 %v1654_v3, %v952_v57  ;;  %v2265_v23 = vpop.f32.mrb[1].mxu1  ;;  %v1747_v3 = vld [vmem:[%s3108_s7 + $0x40] sm:$0xff] }
 0x276   : > { %v1657_v46 = vpop.f32.mrb[2].mxu1 }
 0x277   : > { %1759 = vst.msk [vmem:[%s3118_s10] sm:$0xff] %vm538_vm4, %v1749_v13  ;;  %v1750_v51 = vmul.f32 %v1740_v31, %v1730_v14  ;;  %v1704_v6 = vmul.f32 %v2289_v17, %v3098_v16  ;;  %v2290_v26 = vadd.f32 %v1657_v46, %v955_v62  ;;  %v2266_v29 = vpop.f32.mrb[3].mxu1  ;;  %v1744_v62 = vld [vmem:[%s3108_s7 + $0x28] sm:$0xff] }
 0x278   : > { %v1748_v14 = vld [vmem:[%s3108_s7 + $0x48] sm:$0xff] }
 0x279   : > { %1760 = vst.msk [vmem:[%s3118_s10 + $0x8] sm:$0xff] %vm538_vm4, %v1750_v51  ;;  %v1721_v4 = vadd.f32 %v3103_v35, %v1704_v6  ;;  %v1705_v27 = vmul.f32 %v2290_v26, %v3098_v16 }
 0x27b   : > { %v1731_v53 = vmax.f32 %v1721_v4, 0.0  ;;  %v1722_v24 = vadd.f32 %v3103_v35, %v1705_v27 }
 0x27c   : > { %v1662_v39 = vpop.f32.mrb[4].mxu1 }
 0x27d   : > { %v1751_v0 = vmul.f32 %v1741_v7, %v1731_v53  ;;  %v1732_v45 = vmax.f32 %v1722_v24, 0.0  ;;  %v2291_v30 = vadd.f32 %v1662_v39, %v960_v1  ;;  %v2269_v52 = vpop.f32.mrb[5].mxu1 }
 0x27e   : > { %v1665_v49 = vpop.f32.mrb[6].mxu1 }
 0x27f   : > { %1761 = vst.msk [vmem:[%s3118_s10 + $0x10] sm:$0xff] %vm538_vm4, %v1751_v0  ;;  %v1752_v33 = vmul.f32 %v1742_v28, %v1732_v45  ;;  %v1706_v55 = vmul.f32 %v2291_v30, %v3098_v16  ;;  %v2292_v10 = vadd.f32 %v1665_v49, %v963_v8  ;;  %v2270_v36 = vpop.f32.mrb[7].mxu1 }
 0x281   : > { %1762 = vst.msk [vmem:[%s3118_s10 + $0x18] sm:$0xff] %vm538_vm4, %v1752_v33  ;;  %v1723_v20 = vadd.f32 %v3103_v35, %v1706_v55  ;;  %v1707_v21 = vmul.f32 %v2292_v10, %v3098_v16 }
 0x283   : > { %v1733_v57 = vmax.f32 %v1723_v20, 0.0  ;;  %v1724_v11 = vadd.f32 %v3103_v35, %v1707_v21 }
 0x284   : > { %v1670_v63 = vpop.f32.mrb[8].mxu1 }
 0x285   : > { %v1753_v1 = vmul.f32 %v1743_v61, %v1733_v57  ;;  %v1734_v38 = vmax.f32 %v1724_v11, 0.0  ;;  %v2293_v8 = vadd.f32 %v1670_v63, %v3086_v42  ;;  %v2273_v22 = vpop.f32.mrb[9].mxu1 }
 0x286   : > { %v1673_v9 = vpop.f32.mrb[10].mxu1 }
 0x287   : > { %1763 = vst.msk [vmem:[%s3118_s10 + $0x20] sm:$0xff] %vm538_vm4, %v1753_v1  ;;  %v1754_v37 = vmul.f32 %v1744_v62, %v1734_v38  ;;  %v1708_v18 = vmul.f32 %v2293_v8, %v3098_v16  ;;  %v2294_v19 = vadd.f32 %v1673_v9, %v3088_v56  ;;  %v2274_v44 = vpop.f32.mrb[11].mxu1 }
 0x289   : > { %1764 = vst.msk [vmem:[%s3118_s10 + $0x28] sm:$0xff] %vm538_vm4, %v1754_v37  ;;  %v1725_v59 = vadd.f32 %v3103_v35, %v1708_v18  ;;  %v1709_v58 = vmul.f32 %v2294_v19, %v3098_v16 }
 0x28b   : > { %v1735_v42 = vmax.f32 %v1725_v59, 0.0  ;;  %v1726_v12 = vadd.f32 %v3103_v35, %v1709_v58 }
 0x28c   : > { %v1678_v54 = vpop.f32.mrb[12].mxu1 }
 0x28d   : > { %v1755_v40 = vmul.f32 %v1745_v5, %v1735_v42  ;;  %v1736_v15 = vmax.f32 %v1726_v12, 0.0  ;;  %v2295_v56 = vadd.f32 %v1678_v54, %v3090_v32  ;;  %v2277_v41 = vpop.f32.mrb[13].mxu1 }
 0x28e   : > { %v1681_v25 = vpop.f32.mrb[14].mxu1 }
 0x28f   : > { %1765 = vst.msk [vmem:[%s3118_s10 + $0x30] sm:$0xff] %vm538_vm4, %v1755_v40  ;;  %v1756_v47 = vmul.f32 %v1746_v34, %v1736_v15  ;;  %v1710_v48 = vmul.f32 %v2295_v56, %v3098_v16  ;;  %v2296_v50 = vadd.f32 %v1681_v25, %v3092_v43  ;;  %v2278_v60 = vpop.f32.mrb[15].mxu1 }
 0x291   : > { %1766 = vst.msk [vmem:[%s3118_s10 + $0x38] sm:$0xff] %vm538_vm4, %v1756_v47  ;;  %v1727_v2 = vadd.f32 %v3103_v35, %v1710_v48  ;;  %v1711_v31 = vmul.f32 %v2296_v50, %v3098_v16 }
 0x293   : > { %v1737_v32 = vmax.f32 %v1727_v2, 0.0  ;;  %v1728_v13 = vadd.f32 %v3103_v35, %v1711_v31 }
 0x295   : > { %v1757_v17 = vmul.f32 %v1747_v3, %v1737_v32  ;;  %v1738_v23 = vmax.f32 %v1728_v13, 0.0 }
 0x297   : > { %1767 = vst.msk [vmem:[%s3118_s10 + $0x40] sm:$0xff] %vm538_vm4, %v1757_v17  ;;  %v1758_v46 = vmul.f32 %v1748_v14, %v1738_v23 }
 0x299   : > { %1768 = vst.msk [vmem:[%s3118_s10 + $0x48] sm:$0xff] %vm538_vm4, %v1758_v46 }
 0x29a PF: > { %s16_s21 = sadd.s32 1, %s2472_s21  }
 0x29b   : > { %p13_p4 = scmp.ge.s32.totalorder %s16_s21, 4  }
 0x29d   :  { %15 = sbr.rel (!%p13_p4) target bundleno = 1 (0x1), region = 85 }

// kernel: ncd_forward.16
= control target key start
LH: loop header
LB: loop body
LE: loop exit
PB: predicated region body
PF: predicated region fallthrough
CT: control target
= control target key end

     0   :  { %s3013_s18 = smov 0   ;;  %s3819_s0 = inlined_call_operand.vmem [shape: f32[2,80,96], index: 0, kind: input, shape index: {}]   ;;  %s3820_s1 = inlined_call_operand.vmem [shape: f32[110,80], index: 1, kind: input, shape index: {}]   ;;  %s3821_s2 = inlined_call_operand.vmem [shape: bf16[9,96,96], index: 2, kind: input, shape index: {}]   ;;  %s3822_s3 = inlined_call_operand.vmem [shape: f32[1,96], index: 3, kind: input, shape index: {}]   ;;  %s3823_s4 = inlined_call_operand.vmem [shape: f32[1,96], index: 4, kind: input, shape index: {}]   ;;  %s3824_s5 = inlined_call_operand.vmem [shape: f32[2,80,96], index: 5, kind: output, shape index: {}]  }
   0x1 LB: > { %s2053_s19 = sadd.s32 4294967295, %s2979_s18   ;;  %p2057_p0 = scmp.ge.s32.totalorder %s2979_s18, 1  ;;  %s2979_s18 = sphi %s3013_s18, %s15_s18  }
   0x2   : > { %p187_p1 = scmp.lt.s32.totalorder %s2979_s18, 3 }
   0x4   : > { %p188_p2 = pnand %p2057_p0, %p187_p1 }
   0x5   : > { %p215_p3 = scmp.lt.s32.totalorder (!%p188_p2), %s2053_s19, 1  ;;  %v226_v0 = vld [vmem:[%s3820_s1] sm:$0xff] (!%p188_p2)  ;;  %vm250_vm0 = vcmask (!%p188_p2), 654336   ;;  %v2981_v1 = vmov (!%p188_p2), 0.0   ;;  %v227_v18 = vld [vmem:[%s3820_s1 + $0x8] sm:$0xff] (!%p188_p2)  ;;  %v2918_v19 = vld [vmem:[%s3821_s2 + $0x30] sm:$0xff] (!%p188_p2)  }
   0x6   : > { %191 = sbr.rel (%p188_p2) target bundleno = 681 (0x2a9), region = 40  ;;  %2416 = vmatprep.mubr.msk.f32.mxu0 (!%p188_p2), %vm250_vm0, %v226_v0  ;;  %2745 = vmatprep.subr.bf16.mxu1 (!%p188_p2), %v2981_v1  ;;  %v2921_v12 = vld [vmem:[%s3821_s2 + $0xc0] sm:$0xff] (!%p188_p2)   ;;  %v228_v20 = vld [vmem:[%s3820_s1 + $0x10] sm:$0xff] (!%p188_p2)  ;;  %v229_v21 = vld [vmem:[%s3820_s1 + $0x18] sm:$0xff] (!%p188_p2)  ;;  %vm2982_vm1 = vmmov (!%p188_p2), 0   ;;  %vm766_vm3 = vcmask (!%p188_p2), 1046528  }
   0x7   : > { %2751 = vmatpush3.bf16.msra.mxu1 (!%p188_p2), %v2921_v12  ;;  %v2919_v22 = vld [vmem:[%s3821_s2 + $0x38] sm:$0xff] (!%p188_p2)   ;;  %v230_v23 = vld [vmem:[%s3820_s1 + $0x20] sm:$0xff] (!%p188_p2)  ;;  %v231_v24 = vld [vmem:[%s3820_s1 + $0x28] sm:$0xff] (!%p188_p2)  ;;  %2581 = vmatprep.mubr.msk.bf16.mxu1 (!%p188_p2), %vm2982_vm1, %v2981_v1  ;;  %vm458_vm2 = vsmask.f32 (!%p188_p2), 7424  ;;  %vm539_vm4 = vcmask (!%p188_p2), 785408  }
   0x8   : > { %2746 = vmatprep.subr.bf16.mxu1 (!%p188_p2), %v2981_v1  ;;  %v2920_v25 = vld [vmem:[%s3821_s2 + $0x40] sm:$0xff] (!%p188_p2)   ;;  %v232_v26 = vld [vmem:[%s3820_s1 + $0x30] sm:$0xff] (!%p188_p2)  ;;  %v233_v27 = vld [vmem:[%s3820_s1 + $0x38] sm:$0xff] (!%p188_p2)  ;;  %vm1296_vm5 = vcmask (!%p188_p2), 1045504   ;;  %vm1095_vm6 = vsmask.f32 (!%p188_p2), 6400 }
   0x9   : > { %v234_v28 = vld [vmem:[%s3820_s1 + $0x40] sm:$0xff] (!%p188_p2)  ;;  %v235_v29 = vld [vmem:[%s3820_s1 + $0x48] sm:$0xff] (!%p188_p2)  ;;  %v236_v30 = vld [vmem:[%s3820_s1 + $0x50] sm:$0xff] (!%p188_p2)  ;;  %vm1617_vm7 = vsmask.f32 (!%p188_p2), 5376  ;;  %vm1798_vm8 = vcmask (!%p188_p2), 1044480  }
   0xa   : > { %v237_v31 = vld [vmem:[%s3820_s1 + $0x58] sm:$0xff] (!%p188_p2)  ;;  %v238_v32 = vld [vmem:[%s3820_s1 + $0x60] sm:$0xff] (!%p188_p2)  ;;  %v239_v33 = vld [vmem:[%s3820_s1 + $0x68] sm:$0x3f] (!%p188_p2) }
   0xb   : > { %v2922_v34 = vld [vmem:[%s3821_s2 + $0x48] sm:$0xff] (!%p188_p2)   ;;  %v2924_v36 = vld [vmem:[%s3821_s2 + $0x50] sm:$0xff] (!%p188_p2)   ;;  %v2926_v38 = vld [vmem:[%s3821_s2 + $0x58] sm:$0xff] (!%p188_p2)  }
   0xc   : > { %v3109_v35 = vld [vmem:[%s3821_s2 + $0xc8] sm:$0xff] (!%p188_p2)   ;;  %v3120_v37 = vld [vmem:[%s3821_s2 + $0xd0] sm:$0xff] (!%p188_p2)   ;;  %v3131_v39 = vld [vmem:[%s3821_s2 + $0xd8] sm:$0xff] (!%p188_p2)  }
   0xd   : > { %s3826_s19 = smov (!%p215_p3, %s2053_s19), 1  ;;  %2752 = vmatpush3.bf16.msra.mxu1 %v3109_v35  ;;  %v3143_v40 = vld [vmem:[%s3821_s2 + $0xe0] sm:$0xff]   ;;  %v3150_v41 = vld [vmem:[%s3821_s2 + $0xe8] sm:$0xff]  }
   0xe   : > { %s2907_s22 = smul.u32 80, %s3826_s19  ;;  %2747 = vmatprep.subr.bf16.mxu1 %v2981_v1  ;;  %v2932_v0 = vld [vmem:[%s3821_s2] sm:$0xff]  }
  0x10   : > { %s219_s25 = scalar_lea.vmem %s3819_s0, %s2907_s22  ;;  %s3775_s11 = scalar_lea.vmem %s3824_s5, %s2907_s22 }
  0x11   : > { %v240_v2 = vld [vmem:[%s219_s25] sm:$0xff]  ;;  %v241_v3 = vld [vmem:[%s219_s25 + $0x8] sm:$0xff]  ;;  %v242_v4 = vld [vmem:[%s219_s25 + $0x10] sm:$0xff]  ;;  %2753 = vmatpush3.bf16.msra.mxu1 %v3120_v37 }
  0x12   : > { %v2725_v5 = vpack.c.bf16 %v241_v3, %v240_v2  ;;  %v243_v6 = vld [vmem:[%s219_s25 + $0x18] sm:$0xff]  ;;  %v244_v8 = vld [vmem:[%s219_s25 + $0x20] sm:$0xff]  ;;  %v245_v9 = vld [vmem:[%s219_s25 + $0x28] sm:$0xff]  ;;  %2748 = vmatprep.subr.bf16.mxu1 %v2981_v1 }
  0x13   : > { %v2729_v7 = vpack.c.bf16 %v243_v6, %v242_v4  ;;  %v246_v10 = vld [vmem:[%s219_s25 + $0x30] sm:$0xff]  ;;  %v247_v11 = vld [vmem:[%s219_s25 + $0x38] sm:$0xff]  ;;  %v2733_v13 = vpack.c.bf16 %v245_v9, %v244_v8  ;;  %v248_v14 = vld [vmem:[%s219_s25 + $0x40] sm:$0xff] }
  0x14   : > { %2726 = vmatprep.subr.bf16.mxu0 %v2725_v5  ;;  %v249_v15 = vld [vmem:[%s219_s25 + $0x48] sm:$0xff]  ;;  %v2737_v16 = vpack.c.bf16 %v247_v11, %v246_v10 }
  0x15   : > { %2728 = vmatpush3.bf16.msra.mxu0 %v2725_v5  ;;  %v2741_v17 = vpack.c.bf16 %v249_v15, %v248_v14  ;;  %2754 = vmatpush3.bf16.msra.mxu1 %v3131_v39 }
  0x16   : > { %2730 = vmatprep.subr.bf16.mxu0 %v2729_v7  ;;  %2749 = vmatprep.subr.bf16.mxu1 %v2981_v1 }
  0x19   : > { %2732 = vmatpush3.bf16.msra.mxu0 %v2729_v7  ;;  %2755 = vmatpush3.bf16.msra.mxu1 %v3143_v40 }
  0x1a   : > { %2734 = vmatprep.subr.bf16.mxu0 %v2733_v13  ;;  %2750 = vmatprep.subr.bf16.mxu1 %v2981_v1 }
  0x1d   : > { %2736 = vmatpush3.bf16.msra.mxu0 %v2733_v13  ;;  %2756 = vmatpush3.bf16.msra.mxu1 %v3150_v41 }
  0x1e   : > { %2738 = vmatprep.subr.bf16.mxu0 %v2737_v16  ;;  %2597 = vmatprep.subr.bf16.mxu1 %v2981_v1 }
  0x21   : > { %2740 = vmatpush3.bf16.msra.mxu0 %v2737_v16 }
  0x22   : > { %2742 = vmatprep.subr.bf16.mxu0 %v2741_v17 }
  0x25   : > { %2744 = vmatpush3.bf16.msra.mxu0 %v2741_v17 }
  0x26   : > { %2437 = vmatprep.subr.bf16.mxu0 %v2981_v1 }
  0x28   : > { %2417 = vmatmul.mubr.msk.f32.vlgmr.msra.gmra.mrb[0].mxu0 %vm250_vm0, %v227_v18 }
  0x29   : > { %2419 = vmatprep.mubr.msk.f32.mxu0 %vm250_vm0, %v228_v20  ;;  %2438 = vmatpush3.bf16.msra.mxu0 %v2918_v19  ;;  %v2933_v20 = vld [vmem:[%s3821_s2 + $0x8] sm:$0xff]  }
  0x2a   : > { %2439 = vmatprep.subr.bf16.mxu0 %v2981_v1 }
  0x2c   : > { %2420 = vmatmul.mubr.msk.f32.gmra.mrb[2].mxu0 %vm250_vm0, %v229_v21 }
  0x2d   : > { %2422 = vmatprep.mubr.msk.f32.mxu0 %vm250_vm0, %v230_v23  ;;  %2440 = vmatpush3.bf16.msra.mxu0 %v2919_v22 }
  0x2e   : > { %2441 = vmatprep.subr.bf16.mxu0 %v2981_v1 }
  0x30   : > { %2423 = vmatmul.mubr.msk.f32.gmra.mrb[4].mxu0 %vm250_vm0, %v231_v24 }
  0x31   : > { %2425 = vmatprep.mubr.msk.f32.mxu0 %vm250_vm0, %v232_v26  ;;  %2442 = vmatpush3.bf16.msra.mxu0 %v2920_v25 }
  0x32   : > { %2443 = vmatprep.subr.bf16.mxu0 %v2981_v1 }
  0x34   : > { %2426 = vmatmul.mubr.msk.f32.gmra.mrb[6].mxu0 %vm250_vm0, %v233_v27 }
  0x35   : > { %2428 = vmatprep.mubr.msk.f32.mxu0 %vm250_vm0, %v234_v28  ;;  %2444 = vmatpush3.bf16.msra.mxu0 %v2922_v34 }
  0x36   : > { %2445 = vmatprep.subr.bf16.mxu0 %v2981_v1 }
  0x38   : > { %2429 = vmatmul.mubr.msk.f32.gmra.mrb[8].mxu0 %vm250_vm0, %v235_v29 }
  0x39   : > { %2431 = vmatprep.mubr.msk.f32.mxu0 %vm250_vm0, %v236_v30  ;;  %2446 = vmatpush3.bf16.msra.mxu0 %v2924_v36 }
  0x3a   : > { %2447 = vmatprep.subr.bf16.mxu0 %v2981_v1 }
  0x3c   : > { %2432 = vmatmul.mubr.msk.f32.gmra.mrb[10].mxu0 %vm250_vm0, %v237_v31 }
  0x3d   : > { %2434 = vmatprep.mubr.msk.f32.mxu0 %vm250_vm0, %v238_v32  ;;  %2448 = vmatpush3.bf16.msra.mxu0 %v2926_v38 }
  0x3e   : > { %2469 = vmatprep.subr.bf16.mxu0 %v2981_v1 }
  0x40   : > { %2435 = vmatmul.mubr.msk.f32.gmra.mrb[12].mxu0 %vm250_vm0, %v239_v33 }
  0x41   : > { %2449 = vmatprep.mubr.msk.bf16.mxu0 %vm2982_vm1, %v2981_v1 }
  0xfb   : > { %v2418_v42 = vpop.f32.mrb[0].mxu0 }
  0xfc   : > { %v359_v43 = vpop.f32.mrb[1].mxu0 }
  0xfd   : > { %v3154_v44 = vpack.c.bf16 %v2418_v42, %v359_v43 }
  0xff   : > { %v462_v45 = vshll.u32 %v3154_v44, 16  ;;  %v2421_v46 = vpop.f32.mrb[2].mxu0  ;;  %v460_v51 = vshrl.u32 %v3154_v44, 16  ;;  %v767_v54 = vrot.slane %v3154_v44, 1 }
 0x100   : > { %v369_v47 = vpop.f32.mrb[3].mxu0 }
 0x101   : > { %v3157_v48 = vpack.c.bf16 %v2421_v46, %v369_v47  ;;  %v3159_v49 = vpack.c.bf16 %v369_v47, %v2418_v42  ;;  %v464_v50 = vrot.slane %v462_v45, 1 }
 0x103   : > { %v1097_v52 = vshrl.u32 %v3159_v49, 16  ;;  %v2424_v53 = vpop.f32.mrb[4].mxu0  ;;  %v1100_v55 = vshll.u32 %v3159_v49, 16  ;;  %v467_v57 = vshll.u32 %v3157_v48, 16  ;;  %v768_v58 = vrot.slane %v3157_v48, 1 }
 0x104   : > { %v379_v56 = vpop.f32.mrb[5].mxu0  ;;  %v471_v61 = vshrl.u32 %v3157_v48, 16  ;;  %v465_v62 = vor.u32 %v464_v50, %v460_v51  ;;  %v1297_v4 = vrot.slane %v3159_v49, 2  ;;  %v937_v13 = vrot.slane %v3159_v49, 1  ;;  %v2938_v49 = vld [vmem:[%s3821_s2 + $0x110] sm:$0xff]  }
 0x105   : > { %v3167_v59 = vpack.c.bf16 %v2424_v53, %v379_v56  ;;  %v3169_v60 = vpack.c.bf16 %v379_v56, %v2421_v46  ;;  %v469_v63 = vrot.slane %v467_v57, 1  ;;  %v3180_v2 = vsel %vm766_vm3, %v767_v54, %v768_v58 }
 0x106   : > { %v3182_v3 = vrot.slane %v1097_v52, 1  ;;  %v3187_v8 = vrot.slane %v1100_v55, 2  ;;  %v3198_v16 = vrot.slane %v471_v61, 2  ;;  %v1459_v31 = vrot.slane %v3157_v48, 2 }
 0x107   : > { %v1105_v5 = vshrl.u32 %v3169_v60, 16  ;;  %v1108_v6 = vshll.u32 %v3169_v60, 16  ;;  %v2427_v7 = vpop.f32.mrb[6].mxu0  ;;  %v1298_v9 = vrot.slane %v3169_v60, 2  ;;  %v470_v11 = vsel %vm458_vm2, %v465_v62, %v469_v63 }
 0x108   : > { %v389_v10 = vpop.f32.mrb[7].mxu0  ;;  %v475_v12 = vshll.u32 %v3167_v59, 16  ;;  %2450 = vmatmul.mubr.msk.bf16.vlgmr.msra.gmra.mrb[16].mxu0 %vm539_vm4, %v470_v11  ;;  %v473_v17 = vor.u32 %v471_v61, %v469_v63  ;;  %v1103_v27 = vor.u32 %v3187_v8, %v3182_v3  ;;  %v479_v30 = vshrl.u32 %v3167_v59, 16  ;;  %v2935_v63 = vld [vmem:[%s3821_s2 + $0x10] sm:$0xff]  }
 0x109   : > { %v3193_v14 = vpack.c.bf16 %v2427_v7, %v389_v10  ;;  %v3195_v15 = vpack.c.bf16 %v389_v10, %v2424_v53  ;;  %2453 = vmatprep.mubr.msk.bf16.mxu0 %vm2982_vm1, %v2981_v1  ;;  %v1107_v19 = vrot.slane %v1105_v5, 1  ;;  %2470 = vmatpush3.bf16.msra.mxu0 %v2932_v0  ;;  %v3208_v21 = vsel %vm1296_vm5, %v1297_v4, %v1298_v9  ;;  %v2930_v53 = vld [vmem:[%s3821_s2 + $0xf0] sm:$0xff]  }
 0x10a   : > { %v477_v18 = vrot.slane %v475_v12, 1  ;;  %v1110_v25 = vrot.slane %v1108_v6, 2  ;;  %2471 = vmatprep.subr.bf16.mxu0 %v2981_v1  ;;  %v938_v38 = vrot.slane %v3169_v60, 1  ;;  %v3224_v42 = vrot.slane %v475_v12, 3  ;;  %v2941_v60 = vld [vmem:[%s3821_s2 + $0x118] sm:$0xff]  }
 0x10b   : > { %v1114_v22 = vshrl.u32 %v3195_v15, 16  ;;  %v1117_v23 = vshll.u32 %v3195_v15, 16  ;;  %v2430_v24 = vpop.f32.mrb[8].mxu0  ;;  %v483_v26 = vshll.u32 %v3193_v14, 16  ;;  %v3239_v61 = vrot.slane %v479_v30, 2 }
 0x10c   : > { %v399_v28 = vpop.f32.mrb[9].mxu0  ;;  %v478_v29 = vsel %vm458_vm2, %v473_v17, %v477_v18  ;;  %v481_v43 = vor.u32 %v479_v30, %v477_v18  ;;  %v3230_v51 = vor.u32 %v1110_v25, %v1107_v19  ;;  %v487_v62 = vshrl.u32 %v3193_v14, 16  ;;  %v2931_v19 = vld [vmem:[%s3821_s2 + $0xf8] sm:$0xff]  }
 0x10d   : > { %v3219_v32 = vpack.c.bf16 %v2430_v24, %v399_v28  ;;  %v3221_v33 = vpack.c.bf16 %v399_v28, %v2427_v7  ;;  %v1116_v34 = vrot.slane %v1114_v22, 1  ;;  %v1119_v36 = vrot.slane %v1117_v23, 2  ;;  %2472 = vmatpush3.bf16.msra.mxu0 %v2933_v20 }
 0x10e   : > { %v485_v45 = vrot.slane %v483_v26, 1  ;;  %2473 = vmatprep.subr.bf16.mxu0 %v2981_v1  ;;  %v1300_v23 = vrot.slane %v3195_v15, 2 }
 0x10f   : > { %v1123_v46 = vshrl.u32 %v3221_v33, 16  ;;  %v1126_v47 = vshll.u32 %v3221_v33, 16  ;;  %v2433_v50 = vpop.f32.mrb[10].mxu0  ;;  %v1120_v52 = vor.u32 %v1119_v36, %v1116_v34  ;;  %v491_v20 = vshll.u32 %v3219_v32, 16 }
 0x110   : > { %v3236_v54 = vpack.c.bf16 %v2433_v50, %v2433_v50  ;;  %v409_v55 = vpop.f32.mrb[11].mxu0  ;;  %v486_v56 = vsel %vm458_vm2, %v481_v43, %v485_v45  ;;  %2454 = vmatmul.mubr.msk.bf16.gmra.mrb[20].mxu0 %vm539_vm4, %v478_v29  ;;  %v2937_v29 = vld [vmem:[%s3821_s2 + $0x18] sm:$0xff]  }
 0x111   : > { %v3245_v0 = vpack.c.bf16 %v409_v55, %v409_v55  ;;  %v3247_v4 = vpack.c.bf16 %v409_v55, %v2430_v24  ;;  %v3249_v5 = vpack.c.bf16 %v2433_v50, %v409_v55  ;;  %v1121_v6 = vsel %vm1095_vm6, %v3230_v51, %v1120_v52  ;;  %2457 = vmatprep.mubr.msk.bf16.mxu0 %vm2982_vm1, %v2981_v1 }
 0x112   : > { %v1141_v7 = vshrl.u32 %v3236_v54, 16  ;;  %v1144_v10 = vshll.u32 %v3236_v54, 16  ;;  %2582 = vmatmul.mubr.msk.bf16.vlgmr.msra.gmra.mrb[0].mxu1 %vm539_vm4, %v1121_v6  ;;  %v1125_v11 = vrot.slane %v1123_v46, 1  ;;  %v1128_v12 = vrot.slane %v1126_v47, 2  ;;  %2474 = vmatpush3.bf16.msra.mxu0 %v2935_v63  ;;  %v2934_v6 = vld [vmem:[%s3821_s2 + $0x100] sm:$0xff]  }
 0x113   : > { %v499_v17 = vshll.u32 %v3245_v0, 16  ;;  %2598 = vmatpush3.bf16.msra.mxu1 %v2930_v53  ;;  %v2436_v18 = vpop.f32.mrb[12].mxu0  ;;  %2585 = vmatprep.mubr.msk.bf16.mxu1 %vm2982_vm1, %v2981_v1  ;;  %v1132_v22 = vshrl.u32 %v3247_v4, 16  ;;  %v1135_v28 = vshll.u32 %v3247_v4, 16  ;;  %v1460_v46 = vrot.slane %v3167_v59, 2 }
 0x114   : > { %v419_v24 = vpop.f32.mrb[13].mxu0  ;;  %2599 = vmatprep.subr.bf16.mxu1 %v2981_v1  ;;  %v1129_v25 = vor.u32 %v1128_v12, %v1125_v11  ;;  %v1143_v30 = vrot.slane %v1141_v7, 1  ;;  %v1146_v34 = vrot.slane %v1144_v10, 2  ;;  %2475 = vmatprep.subr.bf16.mxu0 %v2981_v1  ;;  %v770_v47 = vrot.slane %v3167_v59, 1  ;;  %v2939_v18 = vld [vmem:[%s3821_s2 + $0x20] sm:$0xff]  }
 0x115   : > { %v3273_v36 = vpack.c.bf16 %v419_v24, %v419_v24  ;;  %v1134_v43 = vrot.slane %v1132_v22, 1  ;;  %v489_v53 = vor.u32 %v487_v62, %v485_v45  ;;  %v1137_v55 = vrot.slane %v1135_v28, 2 }
 0x116   : > { %v1130_v50 = vsel %vm1095_vm6, %v1120_v52, %v1129_v25  ;;  %v1147_v63 = vor.u32 %v1146_v34, %v1143_v30  ;;  %v493_v7 = vrot.slane %v491_v20, 1  ;;  %v495_v10 = vshrl.u32 %v3219_v32, 16  ;;  %2476 = vmatpush3.bf16.msra.mxu0 %v2937_v29 }
 0x117   : > { %2600 = vmatpush3.bf16.msra.mxu1 %v2931_v19  ;;  %v3290_v52 = vsel %vm1296_vm5, %v1298_v9, %v1300_v23  ;;  %v1302_v45 = vrot.slane %v3221_v33, 2  ;;  %v3293_v11 = vrot.slane %v499_v17, 1  ;;  %v1138_v12 = vor.u32 %v1137_v55, %v1134_v43  ;;  %2477 = vmatprep.subr.bf16.mxu0 %v2981_v1 }
 0x118   : > { %2601 = vmatprep.subr.bf16.mxu1 %v2981_v1  ;;  %v1304_v19 = vrot.slane %v3247_v4, 2  ;;  %v1306_v22 = vrot.slane %v3236_v54, 2  ;;  %v1643_v24 = vshrl.u32 %v3273_v36, 16  ;;  %v1646_v9 = vshll.u32 %v3273_v36, 16  ;;  %2458 = vmatmul.mubr.msk.bf16.gmra.mrb[24].mxu0 %vm539_vm4, %v486_v56 }
 0x119   : > { %v3306_v17 = vsel %vm1296_vm5, %v1300_v23, %v1302_v45  ;;  %v3311_v28 = vsel %vm1296_vm5, %v1459_v31, %v1460_v46  ;;  %2461 = vmatprep.mubr.msk.bf16.mxu0 %vm2982_vm1, %v2981_v1  ;;  %v1139_v29 = vsel %vm1095_vm6, %v1129_v25, %v1138_v12  ;;  %v3318_v30 = vsel %vm1095_vm6, %v1138_v12, %v1147_v63  ;;  %v2936_v31 = vld [vmem:[%s3821_s2 + $0x108] sm:$0xff]  }
 0x11a   : > { %2586 = vmatmul.mubr.msk.bf16.gmra.mrb[4].mxu1 %vm539_vm4, %v1130_v50  ;;  %v3321_v56 = vsel %vm1296_vm5, %v1302_v45, %v1304_v19  ;;  %v1462_v23 = vrot.slane %v3193_v14, 2  ;;  %v494_v34 = vsel %vm458_vm2, %v489_v53, %v493_v7  ;;  %v3331_v25 = vsel %vm1296_vm5, %v1304_v19, %v1306_v22  ;;  %2478 = vmatpush3.bf16.msra.mxu0 %v2939_v18  ;;  %v2940_v53 = vld [vmem:[%s3821_s2 + $0x28] sm:$0xff]  }
 0x11b   : > { %2602 = vmatpush3.bf16.msra.mxu1 %v2934_v6  ;;  %2589 = vmatprep.mubr.msk.bf16.mxu1 %vm2982_vm1, %v2981_v1  ;;  %v3336_v43 = vsel %vm766_vm3, %v768_v58, %v770_v47  ;;  %v772_v50 = vrot.slane %v3193_v14, 1  ;;  %v1464_v63 = vrot.slane %v3219_v32, 2  ;;  %v1466_v6 = vrot.slane %v3249_v5, 2 }
 0x11c   : > { %2603 = vmatprep.subr.bf16.mxu1 %v2981_v1  ;;  %v3346_v55 = vsel %vm1296_vm5, %v1460_v46, %v1462_v23  ;;  %v1468_v58 = vrot.slane %v3273_v36, 2  ;;  %v497_v45 = vor.u32 %v495_v10, %v493_v7  ;;  %2479 = vmatprep.subr.bf16.mxu0 %v2981_v1  ;;  %v3362_v46 = vsel %vm766_vm3, %v937_v13, %v938_v38 }
 0x11d   : > { %v3355_v12 = vsel %vm766_vm3, %v770_v47, %v772_v50  ;;  %v1619_v18 = vrot.slane %v467_v57, 3  ;;  %v1645_v19 = vrot.slane %v1643_v24, 2  ;;  %v1648_v22 = vrot.slane %v1646_v9, 3 }
 0x11e   : > { %v3369_v7 = vsel %vm1296_vm5, %v1464_v63, %v1466_v6  ;;  %v3372_v47 = vsel %vm1296_vm5, %v1466_v6, %v1468_v58  ;;  %v1623_v57 = vor.u32 %v3224_v42, %v3239_v61  ;;  %v940_v24 = vrot.slane %v3195_v15, 1  ;;  %2480 = vmatpush3.bf16.msra.mxu0 %v2940_v53 }
 0x11f   : > { %2604 = vmatpush3.bf16.msra.mxu1 %v2936_v31  ;;  %v1620_v13 = vor.u32 %v1619_v18, %v3198_v16  ;;  %v1625_v9 = vrot.slane %v487_v62, 2  ;;  %v1626_v31 = vrot.slane %v483_v26, 3  ;;  %v942_v6 = vrot.slane %v3221_v33, 1  ;;  %2501 = vmatprep.subr.bf16.mxu0 %v2981_v1 }
 0x120   : > { %2605 = vmatprep.subr.bf16.mxu1 %v2981_v1  ;;  %v1629_v58 = vrot.slane %v495_v10, 2  ;;  %v1630_v16 = vrot.slane %v491_v20, 3  ;;  %2462 = vmatmul.mubr.msk.bf16.gmra.mrb[28].mxu0 %vm539_vm4, %v494_v34  ;;  %v3397_v42 = vsel %vm766_vm3, %v938_v38, %v940_v24  ;;  %v944_v26 = vrot.slane %v3247_v4, 1 }
 0x121   : > { %v3392_v15 = vsel %vm1617_vm7, %v1620_v13, %v1623_v57  ;;  %v1634_v33 = vshrl.u32 %v3249_v5, 16  ;;  %2465 = vmatprep.mubr.msk.bf16.mxu0 %vm2982_vm1, %v2981_v1  ;;  %v1627_v61 = vor.u32 %v1626_v31, %v1625_v9  ;;  %v3405_v62 = vsel %vm766_vm3, %v940_v24, %v942_v6 }
 0x122   : > { %2590 = vmatmul.mubr.msk.bf16.gmra.mrb[8].mxu1 %vm539_vm4, %v1139_v29  ;;  %v1631_v20 = vor.u32 %v1630_v16, %v1629_v58  ;;  %v1637_v10 = vshll.u32 %v3249_v5, 16  ;;  %v3414_v38 = vsel %vm766_vm3, %v942_v6, %v944_v26  ;;  %v946_v29 = vrot.slane %v3236_v54, 1  ;;  %v2948_v58 = vld [vmem:[%s3821_s2 + $0x70] sm:$0xff]   ;;  %v2947_v16 = vld [vmem:[%s3821_s2 + $0x138] sm:$0xff]  }
 0x123   : > { %2606 = vmatpush3.bf16.msra.mxu1 %v2938_v49  ;;  %2593 = vmatprep.mubr.msk.bf16.mxu1 %vm2982_vm1, %v2981_v1  ;;  %v1636_v4 = vrot.slane %v1634_v33, 2  ;;  %v1649_v34 = vor.u32 %v1648_v22, %v1645_v19  ;;  %v3419_v53 = vsel %vm1617_vm7, %v1623_v57, %v1627_v61  ;;  %v3429_v13 = vsel %vm1095_vm6, %v1103_v27, %v3230_v51  ;;  %v2952_v33 = vld [vmem:[%s3821_s2 + $0x148] sm:$0xff]  }
 0x124   : > { %2607 = vmatprep.subr.bf16.mxu1 %v2981_v1  ;;  %v3422_v18 = vsel %vm1617_vm7, %v1627_v61, %v1631_v20  ;;  %v1639_v49 = vrot.slane %v1637_v10, 3  ;;  %v3432_v24 = vsel %vm766_vm3, %v944_v26, %v946_v29  ;;  %v1799_v54 = vrot.slane %v3157_v48, 3  ;;  %v2951_v26 = vld [vmem:[%s3821_s2 + $0x80] sm:$0xff]   ;;  %v2963_v10 = vld [vmem:[%s3821_s2 + $0xb0] sm:$0xff]  }
 0x125   : > { %v1800_v19 = vrot.slane %v3167_v59, 3  ;;  %v1802_v22 = vrot.slane %v3193_v14, 3  ;;  %v1808_v9 = vrot.slane %v3273_v36, 3  ;;  %v1806_v8 = vrot.slane %v3249_v5, 3  ;;  %v2960_v61 = vld [vmem:[%s3821_s2 + $0xa0] sm:$0xff]  }
 0x126   : > { %v1640_v57 = vor.u32 %v1639_v49, %v1636_v4  ;;  %v502_v27 = vsel %vm458_vm2, %v497_v45, %v3293_v11  ;;  %v2942_v11 = vld [vmem:[%s3821_s2 + $0x120] sm:$0xff]   ;;  %v774_v4 = vrot.slane %v3219_v32, 1  ;;  %v776_v29 = vrot.slane %v3245_v0, 1  ;;  %v2967_v0 = vld [vmem:[%s3821_s2 + $0x188] sm:$0xff]  }
 0x127   : > { %2608 = vmatpush3.bf16.msra.mxu1 %v2941_v60  ;;  %v3439_v31 = vsel %vm1798_vm8, %v1799_v54, %v1800_v19  ;;  %v3444_v3 = vsel %vm1798_vm8, %v1800_v19, %v1802_v22  ;;  %v3460_v6 = vsel %vm1798_vm8, %v1806_v8, %v1808_v9  ;;  %v2945_v45 = vld [vmem:[%s3821_s2 + $0x60] sm:$0xff]   ;;  %v1465_v60 = vsel %vm1296_vm5, %v1462_v23, %v1464_v63  ;;  %v2965_v23 = vld [vmem:[%s3821_s2 + $0xb8] sm:$0xff]  }
 0x128   : > { %2629 = vmatprep.subr.bf16.mxu1 %v2981_v1  ;;  %v3451_v51 = vsel %vm1617_vm7, %v1631_v20, %v1640_v57  ;;  %v3454_v36 = vsel %vm1617_vm7, %v1640_v57, %v1649_v34  ;;  %2466 = vmatmul.mubr.msk.bf16.gmra.mrb[32].mxu0 %vm539_vm4, %v502_v27  ;;  %v2959_v20 = vld [vmem:[%s3821_s2 + $0x168] sm:$0xff]   ;;  %v775_v63 = vsel %vm766_vm3, %v772_v50, %v774_v4 }
 0x129   : > { %2481 = vmatprep.mubr.msk.bf16.mxu0 %vm2982_vm1, %v2981_v1  ;;  %v777_v50 = vsel %vm766_vm3, %v774_v4, %v776_v29 }
 0x12a   : > { %2594 = vmatmul.mubr.msk.bf16.gmra.mrb[12].mxu1 %vm539_vm4, %v3318_v30  ;;  %v2943_v30 = vld [vmem:[%s3821_s2 + $0x128] sm:$0xff]  }
 0x12b   : > { %2609 = vmatprep.mubr.msk.bf16.mxu1 %vm2982_vm1, %v2981_v1 }
 0x130   : > { %2482 = vmatmul.mubr.msk.bf16.vlgmr.msra.gmra.mrb[16].mxu0 %vm539_vm4, %v3154_v44  ;;  %v2946_v44 = vld [vmem:[%s3821_s2 + $0x68] sm:$0xff]  }
 0x131   : > { %2485 = vmatprep.mubr.msk.bf16.mxu0 %vm2982_vm1, %v2981_v1  ;;  %2502 = vmatpush3.bf16.msra.mxu0 %v2945_v45 }
 0x132   : > { %2610 = vmatmul.mubr.msk.bf16.vlgmr.msra.gmra.mrb[16].mxu1 %vm539_vm4, %v3208_v21  ;;  %2503 = vmatprep.subr.bf16.mxu0 %v2981_v1  ;;  %v2944_v21 = vld [vmem:[%s3821_s2 + $0x130] sm:$0xff]  }
 0x133   : > { %2630 = vmatpush3.bf16.msra.mxu1 %v2942_v11  ;;  %2613 = vmatprep.mubr.msk.bf16.mxu1 %vm2982_vm1, %v2981_v1 }
 0x134   : > { %2631 = vmatprep.subr.bf16.mxu1 %v2981_v1 }
 0x135   : > { %2504 = vmatpush3.bf16.msra.mxu0 %v2946_v44 }
 0x136   : > { %2505 = vmatprep.subr.bf16.mxu0 %v2981_v1 }
 0x137   : > { %2632 = vmatpush3.bf16.msra.mxu1 %v2943_v30 }
 0x138   : > { %2633 = vmatprep.subr.bf16.mxu1 %v2981_v1  ;;  %2486 = vmatmul.mubr.msk.bf16.gmra.mrb[20].mxu0 %vm539_vm4, %v3157_v48  ;;  %v2949_v48 = vld [vmem:[%s3821_s2 + $0x78] sm:$0xff]  }
 0x139   : > { %2489 = vmatprep.mubr.msk.bf16.mxu0 %vm2982_vm1, %v2981_v1  ;;  %2506 = vmatpush3.bf16.msra.mxu0 %v2948_v58 }
 0x13a   : > { %2614 = vmatmul.mubr.msk.bf16.gmra.mrb[0].mxu1 %vm539_vm4, %v3290_v52  ;;  %2507 = vmatprep.subr.bf16.mxu0 %v2981_v1  ;;  %v2950_v52 = vld [vmem:[%s3821_s2 + $0x140] sm:$0xff]  }
 0x13b   : > { %2634 = vmatpush3.bf16.msra.mxu1 %v2944_v21  ;;  %2617 = vmatprep.mubr.msk.bf16.mxu1 %vm2982_vm1, %v2981_v1 }
 0x13c   : > { %2635 = vmatprep.subr.bf16.mxu1 %v2981_v1 }
 0x13d   : > { %2508 = vmatpush3.bf16.msra.mxu0 %v2949_v48 }
 0x13e   : > { %2509 = vmatprep.subr.bf16.mxu0 %v2981_v1 }
 0x13f   : > { %2636 = vmatpush3.bf16.msra.mxu1 %v2947_v16 }
 0x140   : > { %2637 = vmatprep.subr.bf16.mxu1 %v2981_v1  ;;  %2490 = vmatmul.mubr.msk.bf16.gmra.mrb[24].mxu0 %vm539_vm4, %v3167_v59  ;;  %v2953_v59 = vld [vmem:[%s3821_s2 + $0x88] sm:$0xff]  }
 0x141   : > { %2493 = vmatprep.mubr.msk.bf16.mxu0 %vm2982_vm1, %v2981_v1  ;;  %2510 = vmatpush3.bf16.msra.mxu0 %v2951_v26 }
 0x142   : > { %2618 = vmatmul.mubr.msk.bf16.gmra.mrb[4].mxu1 %vm539_vm4, %v3306_v17  ;;  %2511 = vmatprep.subr.bf16.mxu0 %v2981_v1  ;;  %v2954_v17 = vld [vmem:[%s3821_s2 + $0x150] sm:$0xff]  }
 0x143   : > { %2621 = vmatprep.mubr.msk.bf16.mxu1 %vm2982_vm1, %v2981_v1  ;;  %2638 = vmatpush3.bf16.msra.mxu1 %v2950_v52 }
 0x144   : > { %2639 = vmatprep.subr.bf16.mxu1 %v2981_v1 }
 0x145   : > { %2512 = vmatpush3.bf16.msra.mxu0 %v2953_v59 }
 0x146   : > { %2533 = vmatprep.subr.bf16.mxu0 %v2981_v1 }
 0x147   : > { %2640 = vmatpush3.bf16.msra.mxu1 %v2952_v33 }
 0x148   : > { %2661 = vmatprep.subr.bf16.mxu1 %v2981_v1  ;;  %2494 = vmatmul.mubr.msk.bf16.gmra.mrb[28].mxu0 %vm539_vm4, %v3193_v14 }
 0x149   : > { %2497 = vmatprep.mubr.msk.bf16.mxu0 %vm2982_vm1, %v2981_v1 }
 0x14a   : > { %2622 = vmatmul.mubr.msk.bf16.gmra.mrb[8].mxu1 %vm539_vm4, %v3321_v56  ;;  %v2957_v56 = vld [vmem:[%s3821_s2 + $0x90] sm:$0xff]  }
 0x14b   : > { %2625 = vmatprep.mubr.msk.bf16.mxu1 %vm2982_vm1, %v2981_v1 }
 0x150   : > { %2498 = vmatmul.mubr.msk.bf16.gmra.mrb[32].mxu0 %vm539_vm4, %v3219_v32 }
 0x151   : > { %2513 = vmatprep.mubr.msk.bf16.mxu0 %vm2982_vm1, %v2981_v1 }
 0x152   : > { %2626 = vmatmul.mubr.msk.bf16.gmra.mrb[12].mxu1 %vm539_vm4, %v3331_v25  ;;  %v2955_v25 = vld [vmem:[%s3821_s2 + $0x158] sm:$0xff]  }
 0x153   : > { %2641 = vmatprep.mubr.msk.bf16.mxu1 %vm2982_vm1, %v2981_v1 }
 0x158   : > { %2514 = vmatmul.mubr.msk.bf16.vlgmr.msra.gmra.mrb[16].mxu0 %vm539_vm4, %v3180_v2  ;;  %v2958_v2 = vld [vmem:[%s3821_s2 + $0x98] sm:$0xff]  }
 0x159   : > { %2517 = vmatprep.mubr.msk.bf16.mxu0 %vm2982_vm1, %v2981_v1  ;;  %2534 = vmatpush3.bf16.msra.mxu0 %v2957_v56 }
 0x15a   : > { %2642 = vmatmul.mubr.msk.bf16.vlgmr.msra.gmra.mrb[16].mxu1 %vm539_vm4, %v3311_v28  ;;  %2535 = vmatprep.subr.bf16.mxu0 %v2981_v1  ;;  %v2956_v28 = vld [vmem:[%s3821_s2 + $0x160] sm:$0xff]  }
 0x15b   : > { %2662 = vmatpush3.bf16.msra.mxu1 %v2954_v17  ;;  %2645 = vmatprep.mubr.msk.bf16.mxu1 %vm2982_vm1, %v2981_v1 }
 0x15c   : > { %2663 = vmatprep.subr.bf16.mxu1 %v2981_v1 }
 0x15d   : > { %2536 = vmatpush3.bf16.msra.mxu0 %v2958_v2 }
 0x15e   : > { %2537 = vmatprep.subr.bf16.mxu0 %v2981_v1 }
 0x15f   : > { %2664 = vmatpush3.bf16.msra.mxu1 %v2955_v25 }
 0x160   : > { %2665 = vmatprep.subr.bf16.mxu1 %v2981_v1  ;;  %2518 = vmatmul.mubr.msk.bf16.gmra.mrb[20].mxu0 %vm539_vm4, %v3336_v43  ;;  %v2961_v43 = vld [vmem:[%s3821_s2 + $0xa8] sm:$0xff]  }
 0x161   : > { %2521 = vmatprep.mubr.msk.bf16.mxu0 %vm2982_vm1, %v2981_v1  ;;  %2538 = vmatpush3.bf16.msra.mxu0 %v2960_v61 }
 0x162   : > { %2646 = vmatmul.mubr.msk.bf16.gmra.mrb[0].mxu1 %vm539_vm4, %v3346_v55  ;;  %2539 = vmatprep.subr.bf16.mxu0 %v2981_v1  ;;  %v2962_v55 = vld [vmem:[%s3821_s2 + $0x170] sm:$0xff]  }
 0x163   : > { %2666 = vmatpush3.bf16.msra.mxu1 %v2956_v28  ;;  %2649 = vmatprep.mubr.msk.bf16.mxu1 %vm2982_vm1, %v2981_v1 }
 0x164   : > { %2667 = vmatprep.subr.bf16.mxu1 %v2981_v1 }
 0x165   : > { %2540 = vmatpush3.bf16.msra.mxu0 %v2961_v43 }
 0x166   : > { %2541 = vmatprep.subr.bf16.mxu0 %v2981_v1 }
 0x167   : > { %2668 = vmatpush3.bf16.msra.mxu1 %v2959_v20 }
 0x168   : > { %2669 = vmatprep.subr.bf16.mxu1 %v2981_v1  ;;  %2522 = vmatmul.mubr.msk.bf16.gmra.mrb[24].mxu0 %vm539_vm4, %v3355_v12  ;;  %v2964_v12 = vld [vmem:[%s3821_s2 + $0x178] sm:$0xff]  }
 0x169   : > { %2525 = vmatprep.mubr.msk.bf16.mxu0 %vm2982_vm1, %v2981_v1  ;;  %2542 = vmatpush3.bf16.msra.mxu0 %v2963_v10 }
 0x16a   : > { %2650 = vmatmul.mubr.msk.bf16.gmra.mrb[4].mxu1 %vm539_vm4, %v1465_v60  ;;  %2543 = vmatprep.subr.bf16.mxu0 %v2981_v1 }
 0x16b   : > { %2653 = vmatprep.mubr.msk.bf16.mxu1 %vm2982_vm1, %v2981_v1  ;;  %2670 = vmatpush3.bf16.msra.mxu1 %v2962_v55 }
 0x16c   : > { %2671 = vmatprep.subr.bf16.mxu1 %v2981_v1 }
 0x16d   : > { %2544 = vmatpush3.bf16.msra.mxu0 %v2965_v23 }
 0x16e   : > { %2565 = vmatprep.subr.bf16.mxu0 %v2981_v1 }
 0x16f   : > { %2672 = vmatpush3.bf16.msra.mxu1 %v2964_v12 }
 0x170   : > { %2693 = vmatprep.subr.bf16.mxu1 %v2981_v1  ;;  %2526 = vmatmul.mubr.msk.bf16.gmra.mrb[28].mxu0 %vm539_vm4, %v775_v63 }
 0x171   : > { %2529 = vmatprep.mubr.msk.bf16.mxu0 %vm2982_vm1, %v2981_v1 }
 0x172   : > { %2654 = vmatmul.mubr.msk.bf16.gmra.mrb[8].mxu1 %vm539_vm4, %v3369_v7  ;;  %v2966_v7 = vld [vmem:[%s3821_s2 + $0x180] sm:$0xff]  }
 0x173   : > { %2657 = vmatprep.mubr.msk.bf16.mxu1 %vm2982_vm1, %v2981_v1 }
 0x178   : > { %2530 = vmatmul.mubr.msk.bf16.gmra.mrb[32].mxu0 %vm539_vm4, %v777_v50 }
 0x179   : > { %2545 = vmatprep.mubr.msk.bf16.mxu0 %vm2982_vm1, %v2981_v1 }
 0x17a   : > { %2658 = vmatmul.mubr.msk.bf16.gmra.mrb[12].mxu1 %vm539_vm4, %v3372_v47  ;;  %v2968_v47 = vld [vmem:[%s3821_s2 + $0x190] sm:$0xff]  }
 0x17b   : > { %2673 = vmatprep.mubr.msk.bf16.mxu1 %vm2982_vm1, %v2981_v1 }
 0x180   : > { %2546 = vmatmul.mubr.msk.bf16.vlgmr.msra.gmra.mrb[16].mxu0 %vm539_vm4, %v3362_v46  ;;  %v2972_v46 = vld [vmem:[%s3821_s2 + $0xc0] sm:$0xff]  }
 0x181   : > { %2549 = vmatprep.mubr.msk.bf16.mxu0 %vm2982_vm1, %v2981_v1  ;;  %2566 = vmatpush3.bf16.msra.mxu0 %v2972_v46 }
 0x182   : > { %2674 = vmatmul.mubr.msk.bf16.vlgmr.msra.gmra.mrb[16].mxu1 %vm539_vm4, %v3392_v15  ;;  %2567 = vmatprep.subr.bf16.mxu0 %v2981_v1  ;;  %v2969_v15 = vld [vmem:[%s3821_s2 + $0x198] sm:$0xff]  }
 0x183   : > { %2694 = vmatpush3.bf16.msra.mxu1 %v2966_v7  ;;  %2677 = vmatprep.mubr.msk.bf16.mxu1 %vm2982_vm1, %v2981_v1 }
 0x184   : > { %2695 = vmatprep.subr.bf16.mxu1 %v2981_v1 }
 0x185   : > { %2568 = vmatpush3.bf16.msra.mxu0 %v3109_v35  ;;  %v2970_v35 = vld [vmem:[%s3821_s2 + $0x1a0] sm:$0xff]  }
 0x186   : > { %2569 = vmatprep.subr.bf16.mxu0 %v2981_v1 }
 0x187   : > { %2696 = vmatpush3.bf16.msra.mxu1 %v2967_v0 }
 0x188   : > { %2697 = vmatprep.subr.bf16.mxu1 %v2981_v1  ;;  %2550 = vmatmul.mubr.msk.bf16.gmra.mrb[20].mxu0 %vm539_vm4, %v3397_v42 }
 0x189   : > { %2553 = vmatprep.mubr.msk.bf16.mxu0 %vm2982_vm1, %v2981_v1  ;;  %2570 = vmatpush3.bf16.msra.mxu0 %v3120_v37  ;;  %v2971_v37 = vld [vmem:[%s3821_s2 + $0x1a8] sm:$0xff]  }
 0x18a   : > { %2678 = vmatmul.mubr.msk.bf16.gmra.mrb[0].mxu1 %vm539_vm4, %v3419_v53  ;;  %2571 = vmatprep.subr.bf16.mxu0 %v2981_v1 }
 0x18b   : > { %2698 = vmatpush3.bf16.msra.mxu1 %v2968_v47  ;;  %2681 = vmatprep.mubr.msk.bf16.mxu1 %vm2982_vm1, %v2981_v1 }
 0x18c   : > { %2699 = vmatprep.subr.bf16.mxu1 %v2981_v1 }
 0x18d   : > { %2572 = vmatpush3.bf16.msra.mxu0 %v3131_v39  ;;  %v1804_v39 = vrot.slane %v3219_v32, 3 }
 0x18e   : > { %2573 = vmatprep.subr.bf16.mxu0 %v2981_v1 }
 0x18f   : > { %2700 = vmatpush3.bf16.msra.mxu1 %v2969_v15 }
 0x190   : > { %2701 = vmatprep.subr.bf16.mxu1 %v2981_v1  ;;  %2554 = vmatmul.mubr.msk.bf16.gmra.mrb[24].mxu0 %vm539_vm4, %v3405_v62 }
 0x191   : > { %2557 = vmatprep.mubr.msk.bf16.mxu0 %vm2982_vm1, %v2981_v1  ;;  %2574 = vmatpush3.bf16.msra.mxu0 %v3143_v40  ;;  %v1805_v40 = vsel %vm1798_vm8, %v1802_v22, %v1804_v39 }
 0x192   : > { %2682 = vmatmul.mubr.msk.bf16.gmra.mrb[4].mxu1 %vm539_vm4, %v3422_v18  ;;  %2575 = vmatprep.subr.bf16.mxu0 %v2981_v1 }
 0x193   : > { %2685 = vmatprep.mubr.msk.bf16.mxu1 %vm2982_vm1, %v2981_v1  ;;  %2702 = vmatpush3.bf16.msra.mxu1 %v2970_v35 }
 0x194   : > { %2703 = vmatprep.subr.bf16.mxu1 %v2981_v1 }
 0x195   : > { %2576 = vmatpush3.bf16.msra.mxu0 %v3150_v41  ;;  %v1807_v41 = vsel %vm1798_vm8, %v1804_v39, %v1806_v8 }
 0x197   : > { %2704 = vmatpush3.bf16.msra.mxu1 %v2971_v37 }
 0x198   : > { %2558 = vmatmul.mubr.msk.bf16.gmra.mrb[28].mxu0 %vm539_vm4, %v3414_v38 }
 0x199   : > { %2561 = vmatprep.mubr.msk.bf16.mxu0 %vm2982_vm1, %v2981_v1 }
 0x19a   : > { %2686 = vmatmul.mubr.msk.bf16.gmra.mrb[8].mxu1 %vm539_vm4, %v3451_v51 }
 0x19b   : > { %2689 = vmatprep.mubr.msk.bf16.mxu1 %vm2982_vm1, %v2981_v1 }
 0x1a0   : > { %2562 = vmatmul.mubr.msk.bf16.gmra.mrb[32].mxu0 %vm539_vm4, %v3432_v24 }
 0x1a1   : > { %2577 = vmatprep.mubr.msk.bf16.mxu0 %vm2982_vm1, %v2981_v1 }
 0x1a2   : > { %2690 = vmatmul.mubr.msk.bf16.gmra.mrb[12].mxu1 %vm539_vm4, %v3454_v36  ;;  %v3765_v36 = vld [vmem:[%s3823_s4] ss:$0 sm:$0xff] }
 0x1a3   : > { %2705 = vmatprep.mubr.msk.bf16.mxu1 %vm2982_vm1, %v2981_v1 }
 0x1a8   : > { %2578 = vmatmul.mubr.msk.bf16.vlgmr.msra.gmra.mrb[16].mxu0 %vm539_vm4, %v3429_v13 }
 0x1aa   : > { %2706 = vmatmul.mubr.msk.bf16.vlgmr.msra.gmra.mrb[16].mxu1 %vm539_vm4, %v3439_v31 }
 0x1ab   : > { %2709 = vmatprep.mubr.msk.bf16.mxu1 %vm2982_vm1, %v2981_v1 }
 0x1b2   : > { %2710 = vmatmul.mubr.msk.bf16.gmra.mrb[0].mxu1 %vm539_vm4, %v3444_v3  ;;  %v3760_v3 = vld [vmem:[%s3822_s3] ss:$0 sm:$0xff] }
 0x1b3   : > { %2713 = vmatprep.mubr.msk.bf16.mxu1 %vm2982_vm1, %v2981_v1 }
 0x1ba   : > { %2714 = vmatmul.mubr.msk.bf16.gmra.mrb[4].mxu1 %vm539_vm4, %v1805_v40 }
 0x1bb   : > { %2717 = vmatprep.mubr.msk.bf16.mxu1 %vm2982_vm1, %v2981_v1 }
 0x1c2   : > { %2718 = vmatmul.mubr.msk.bf16.gmra.mrb[8].mxu1 %vm539_vm4, %v1807_v41 }
 0x1c3   : > { %2721 = vmatprep.mubr.msk.bf16.mxu1 %vm2982_vm1, %v2981_v1 }
 0x1ca   : > { %2722 = vmatmul.mubr.msk.bf16.gmra.mrb[12].mxu1 %vm539_vm4, %v3460_v6 }
 0x25b   : > { %v1041_v14 = vpop.f32.mrb[20].mxu0 }
 0x25c   : > { %v2551_v32 = vpop.f32.mrb[21].mxu0 }
 0x25d   : > { %v1044_v42 = vpop.f32.mrb[22].mxu0 }
 0x25e   : > { %v2552_v62 = vpop.f32.mrb[23].mxu0 }
 0x263   : > { %v1049_v38 = vpop.f32.mrb[24].mxu0 }
 0x264   : > { %v2555_v34 = vpop.f32.mrb[25].mxu0 }
 0x265   : > { %v1052_v53 = vpop.f32.mrb[26].mxu0 }
 0x266   : > { %v2556_v18 = vpop.f32.mrb[27].mxu0 }
 0x26b   : > { %v1057_v49 = vpop.f32.mrb[28].mxu0 }
 0x26c   : > { %v2559_v5 = vpop.f32.mrb[29].mxu0 }
 0x26d   : > { %v1060_v13 = vpop.f32.mrb[30].mxu0 }
 0x26e   : > { %v2560_v24 = vpop.f32.mrb[31].mxu0 }
 0x273   : > { %v3753_v54 = vpop.f32.mrb[32].mxu0 }
 0x274   : > { %v2563_v19 = vpop.f32.mrb[33].mxu0 }
 0x275   : > { %v3755_v22 = vpop.f32.mrb[34].mxu0 }
 0x276   : > { %v2564_v1 = vpop.f32.mrb[35].mxu0 }
 0x27b   : > { %v1234_v57 = vpop.f32.mrb[16].mxu0 }
 0x27c   : > { %v2579_v9 = vpop.f32.mrb[17].mxu0 }
 0x27d   : > { %v1895_v31 = vpop.f32.mrb[16].mxu1  ;;  %v1237_v8 = vpop.f32.mrb[18].mxu0 }
 0x27e   : > { %v2757_v27 = vadd.f32 %v1895_v31, %v1234_v57  ;;  %v2707_v51 = vpop.f32.mrb[17].mxu1  ;;  %v2580_v6 = vpop.f32.mrb[19].mxu0 }
 0x27f   : > { %v1898_v11 = vpop.f32.mrb[18].mxu1 }
 0x280   : > { %v1951_v45 = vmul.f32 %v2757_v27, %v3760_v3  ;;  %v2758_v30 = vadd.f32 %v1898_v11, %v1237_v8  ;;  %v2708_v44 = vpop.f32.mrb[19].mxu1 }
 0x282   : > { %v1968_v21 = vadd.f32 %v3765_v36, %v1951_v45  ;;  %v1952_v58 = vmul.f32 %v2758_v30, %v3760_v3 }
 0x284   : > { %v1978_v16 = vmax.f32 %v1968_v21, 0.0  ;;  %v1969_v48 = vadd.f32 %v3765_v36, %v1952_v58 }
 0x285   : > { %v1903_v52 = vpop.f32.mrb[0].mxu1 }
 0x286   : > { %1988 = vst.msk [vmem:[%s3775_s11] sm:$0xff] %vm539_vm4, %v1978_v16  ;;  %v1979_v26 = vmax.f32 %v1969_v48, 0.0  ;;  %v2759_v33 = vadd.f32 %v1903_v52, %v1041_v14  ;;  %v2711_v59 = vpop.f32.mrb[1].mxu1 }
 0x287   : > { %v1906_v17 = vpop.f32.mrb[2].mxu1 }
 0x288   : > { %1989 = vst.msk [vmem:[%s3775_s11 + $0x8] sm:$0xff] %vm539_vm4, %v1979_v26  ;;  %v1953_v56 = vmul.f32 %v2759_v33, %v3760_v3  ;;  %v2760_v25 = vadd.f32 %v1906_v17, %v1044_v42  ;;  %v2712_v2 = vpop.f32.mrb[3].mxu1 }
 0x28a   : > { %v1970_v28 = vadd.f32 %v3765_v36, %v1953_v56  ;;  %v1954_v61 = vmul.f32 %v2760_v25, %v3760_v3 }
 0x28c   : > { %v1980_v20 = vmax.f32 %v1970_v28, 0.0  ;;  %v1971_v43 = vadd.f32 %v3765_v36, %v1954_v61 }
 0x28d   : > { %v1911_v55 = vpop.f32.mrb[4].mxu1 }
 0x28e   : > { %1990 = vst.msk [vmem:[%s3775_s11 + $0x10] sm:$0xff] %vm539_vm4, %v1980_v20  ;;  %v1981_v10 = vmax.f32 %v1971_v43, 0.0  ;;  %v2761_v60 = vadd.f32 %v1911_v55, %v1049_v38  ;;  %v2715_v12 = vpop.f32.mrb[5].mxu1 }
 0x28f   : > { %v1914_v4 = vpop.f32.mrb[6].mxu1 }
 0x290   : > { %1991 = vst.msk [vmem:[%s3775_s11 + $0x18] sm:$0xff] %vm539_vm4, %v1981_v10  ;;  %v1955_v23 = vmul.f32 %v2761_v60, %v3760_v3  ;;  %v2762_v63 = vadd.f32 %v1914_v4, %v1052_v53  ;;  %v2716_v29 = vpop.f32.mrb[7].mxu1 }
 0x292   : > { %v1972_v50 = vadd.f32 %v3765_v36, %v1955_v23  ;;  %v1956_v7 = vmul.f32 %v2762_v63, %v3760_v3 }
 0x294   : > { %v1982_v0 = vmax.f32 %v1972_v50, 0.0  ;;  %v1973_v46 = vadd.f32 %v3765_v36, %v1956_v7 }
 0x295   : > { %v1919_v47 = vpop.f32.mrb[8].mxu1 }
 0x296   : > { %1992 = vst.msk [vmem:[%s3775_s11 + $0x20] sm:$0xff] %vm539_vm4, %v1982_v0  ;;  %v1983_v15 = vmax.f32 %v1973_v46, 0.0  ;;  %v2763_v35 = vadd.f32 %v1919_v47, %v1057_v49  ;;  %v2719_v37 = vpop.f32.mrb[9].mxu1 }
 0x297   : > { %v1922_v39 = vpop.f32.mrb[10].mxu1 }
 0x298   : > { %1993 = vst.msk [vmem:[%s3775_s11 + $0x28] sm:$0xff] %vm539_vm4, %v1983_v15  ;;  %v1957_v40 = vmul.f32 %v2763_v35, %v3760_v3  ;;  %v2764_v41 = vadd.f32 %v1922_v39, %v1060_v13  ;;  %v2720_v14 = vpop.f32.mrb[11].mxu1 }
 0x29a   : > { %v1974_v32 = vadd.f32 %v3765_v36, %v1957_v40  ;;  %v1958_v42 = vmul.f32 %v2764_v41, %v3760_v3 }
 0x29c   : > { %v1984_v62 = vmax.f32 %v1974_v32, 0.0  ;;  %v1975_v38 = vadd.f32 %v3765_v36, %v1958_v42 }
 0x29d   : > { %v1927_v34 = vpop.f32.mrb[12].mxu1 }
 0x29e   : > { %1994 = vst.msk [vmem:[%s3775_s11 + $0x30] sm:$0xff] %vm539_vm4, %v1984_v62  ;;  %v1985_v53 = vmax.f32 %v1975_v38, 0.0  ;;  %v2765_v18 = vadd.f32 %v1927_v34, %v3753_v54  ;;  %v2723_v49 = vpop.f32.mrb[13].mxu1 }
 0x29f   : > { %v1930_v5 = vpop.f32.mrb[14].mxu1 }
 0x2a0   : > { %1995 = vst.msk [vmem:[%s3775_s11 + $0x38] sm:$0xff] %vm539_vm4, %v1985_v53  ;;  %v1959_v13 = vmul.f32 %v2765_v18, %v3760_v3  ;;  %v2766_v24 = vadd.f32 %v1930_v5, %v3755_v22  ;;  %v2724_v19 = vpop.f32.mrb[15].mxu1 }
 0x2a2   : > { %v1976_v1 = vadd.f32 %v3765_v36, %v1959_v13  ;;  %v1960_v57 = vmul.f32 %v2766_v24, %v3760_v3 }
 0x2a4   : > { %v1986_v9 = vmax.f32 %v1976_v1, 0.0  ;;  %v1977_v31 = vadd.f32 %v3765_v36, %v1960_v57 }
 0x2a6   : > { %1996 = vst.msk [vmem:[%s3775_s11 + $0x40] sm:$0xff] %vm539_vm4, %v1986_v9  ;;  %v1987_v8 = vmax.f32 %v1977_v31, 0.0 }
 0x2a8   : > { %1997 = vst.msk [vmem:[%s3775_s11 + $0x48] sm:$0xff] %vm539_vm4, %v1987_v8 }
 0x2a9 PF: > { %s15_s18 = sadd.s32 1, %s2979_s18  }
 0x2aa   : > { %p12_p4 = scmp.ge.s32.totalorder %s15_s18, 4  }
 0x2ac   :  { %14 = sbr.rel (!%p12_p4) target bundleno = 1 (0x1), region = 78 }

// kernel: ncd_forward.15
= control target key start
LH: loop header
LB: loop body
LE: loop exit
PB: predicated region body
PF: predicated region fallthrough
CT: control target
= control target key end

     0   :  { %s4978_s27 = smov 0   ;;  %s6270_s0 = inlined_call_operand.vmem [shape: f32[2,80,32], index: 0, kind: input, shape index: {}]   ;;  %s6271_s1 = inlined_call_operand.vmem [shape: f32[2,80,64], index: 1, kind: input, shape index: {}]   ;;  %s6272_s2 = inlined_call_operand.vmem [shape: f32[110,80], index: 2, kind: input, shape index: {}, may-alias: {2,3}]   ;;  %s6273_s3 = inlined_call_operand.vmem [shape: f32[110,80], index: 3, kind: input, shape index: {}, may-alias: {2,3}]   ;;  %s6274_s4 = inlined_call_operand.vmem [shape: bf16[9,32,96], index: 4, kind: input, shape index: {}]   ;;  %s6275_s5 = inlined_call_operand.vmem [shape: bf16[9,64,96], index: 5, kind: input, shape index: {}]   ;;  %s6276_s6 = inlined_call_operand.vmem [shape: f32[1,96], index: 6, kind: input, shape index: {}]   ;;  %s6277_s7 = inlined_call_operand.vmem [shape: f32[1,96], index: 7, kind: input, shape index: {}]   ;;  %s6278_s8 = inlined_call_operand.vmem [shape: f32[2,80,96], index: 8, kind: output, shape index: {}]  }
   0x1 LB: > { %s3466_s28 = sadd.s32 4294967295, %s4929_s27   ;;  %p3470_p0 = scmp.ge.s32.totalorder %s4929_s27, 1  ;;  %s4929_s27 = sphi %s4978_s27, %s18_s27  }
   0x2   : > { %p272_p1 = scmp.lt.s32.totalorder %s4929_s27, 3 }
   0x4   : > { %p273_p2 = pnand %p3470_p0, %p272_p1 }
   0x6   : > { %276 = sbr.rel (%p273_p2) target bundleno = 1376 (0x560), region = 52 }
   0xd   : > { %p311_p3 = scmp.lt.s32.totalorder %s3466_s28, 1  ;;  %v327_v0 = vld [vmem:[%s6272_s2] sm:$0xff]  ;;  %vm351_vm0 = vcmask 654336   ;;  %v6284_v1 = vmov 0.0   ;;  %v328_v17 = vld [vmem:[%s6272_s2 + $0x8] sm:$0xff]  ;;  %v4869_v18 = vld [vmem:[%s6274_s4 + $0x10] sm:$0xff]  }
   0xe   : > { %3958 = vmatprep.mubr.msk.f32.mxu0 %vm351_vm0, %v327_v0  ;;  %4171 = vmatprep.subr.bf16.mxu1 %v6284_v1  ;;  %v329_v19 = vld [vmem:[%s6272_s2 + $0x10] sm:$0xff]  ;;  %v330_v20 = vld [vmem:[%s6272_s2 + $0x18] sm:$0xff]  ;;  %v331_v22 = vld [vmem:[%s6272_s2 + $0x20] sm:$0xff]  ;;  %vm4932_vm1 = vmmov 0   ;;  %vm543_vm2 = vsmask.f32 7424 }
   0xf   : > { %s6302_s28 = smov (!%p311_p3, %s3466_s28), 1  ;;  %v4870_v21 = vld [vmem:[%s6274_s4 + $0x18] sm:$0xff]   ;;  %v332_v23 = vld [vmem:[%s6272_s2 + $0x28] sm:$0xff]  ;;  %v333_v24 = vld [vmem:[%s6272_s2 + $0x30] sm:$0xff]  ;;  %4175 = vmatprep.mubr.msk.bf16.mxu1 %vm4932_vm1, %v6284_v1  ;;  %vm795_vm3 = vcmask 1046528   ;;  %vm600_vm4 = vcmask 261120  }
  0x10   : > { %s4991_s9 = smul.u32 80, %s6302_s28  ;;  %v334_v25 = vld [vmem:[%s6272_s2 + $0x38] sm:$0xff]  ;;  %v335_v26 = vld [vmem:[%s6272_s2 + $0x40] sm:$0xff]  ;;  %v336_v27 = vld [vmem:[%s6272_s2 + $0x48] sm:$0xff]  ;;  %vm1635_vm5 = vcmask 1044480   ;;  %vm1229_vm7 = vcmask 1045504  }
  0x11   : > { %v337_v28 = vld [vmem:[%s6272_s2 + $0x50] sm:$0xff]  ;;  %v338_v29 = vld [vmem:[%s6272_s2 + $0x58] sm:$0xff]  ;;  %v339_v30 = vld [vmem:[%s6272_s2 + $0x60] sm:$0xff]  ;;  %vm1060_vm6 = vsmask.f32 6400  ;;  %vm1994_vm9 = vcmask 523264  }
  0x12   : > { %s315_s12 = scalar_lea.vmem %s6270_s0, %s4991_s9  ;;  %v340_v31 = vld [vmem:[%s6272_s2 + $0x68] sm:$0x3f]  ;;  %v4871_v32 = vld [vmem:[%s6274_s4 + $0x80] sm:$0xff]   ;;  %vm1486_vm8 = vsmask.f32 5376  ;;  %s5498_s13 = scalar_lea.vmem %s6271_s1, %s4991_s9  ;;  %vm3388_vm10 = vcmask 785408  }
  0x13   : > { %v341_v2 = vld [vmem:[%s315_s12] sm:$0xff]  ;;  %v342_v3 = vld [vmem:[%s315_s12 + $0x8] sm:$0xff]  ;;  %v343_v4 = vld [vmem:[%s315_s12 + $0x10] sm:$0xff]  ;;  %4172 = vmatpush3.bf16.msra.mxu1 %v4871_v32  ;;  %s6220_s24 = scalar_lea.vmem %s6278_s8, %s4991_s9 }
  0x14   : > { %v4488_v5 = vpack.c.bf16 %v342_v3, %v341_v2  ;;  %v344_v6 = vld [vmem:[%s315_s12 + $0x18] sm:$0xff]  ;;  %v345_v8 = vld [vmem:[%s315_s12 + $0x20] sm:$0xff]  ;;  %v346_v9 = vld [vmem:[%s315_s12 + $0x28] sm:$0xff]  ;;  %4173 = vmatprep.subr.bf16.mxu1 %v6284_v1 }
  0x15   : > { %v4492_v7 = vpack.c.bf16 %v344_v6, %v343_v4  ;;  %v347_v10 = vld [vmem:[%s315_s12 + $0x30] sm:$0xff]  ;;  %v348_v11 = vld [vmem:[%s315_s12 + $0x38] sm:$0xff]  ;;  %v4496_v12 = vpack.c.bf16 %v346_v9, %v345_v8  ;;  %v349_v13 = vld [vmem:[%s315_s12 + $0x40] sm:$0xff] }
  0x16   : > { %4489 = vmatprep.subr.bf16.mxu0 %v4488_v5  ;;  %v350_v14 = vld [vmem:[%s315_s12 + $0x48] sm:$0xff]  ;;  %v4500_v15 = vpack.c.bf16 %v348_v11, %v347_v10  ;;  %v4873_v53 = vld [vmem:[%s6274_s4] sm:$0xff]  }
  0x17   : > { %4491 = vmatpush3.bf16.msra.mxu0 %v4488_v5  ;;  %v4504_v16 = vpack.c.bf16 %v350_v14, %v349_v13  ;;  %v4872_v33 = vld [vmem:[%s6274_s4 + $0x88] sm:$0xff]  }
  0x18   : > { %4493 = vmatprep.subr.bf16.mxu0 %v4492_v7  ;;  %4174 = vmatpush3.bf16.msra.mxu1 %v4872_v33  ;;  %v4874_v10 = vld [vmem:[%s6274_s4 + $0x8] sm:$0xff]  }
  0x19   : > { %4236 = vmatprep.subr.bf16.mxu1 %v6284_v1 }
  0x1b   : > { %4495 = vmatpush3.bf16.msra.mxu0 %v4492_v7 }
  0x1c   : > { %4497 = vmatprep.subr.bf16.mxu0 %v4496_v12 }
  0x1f   : > { %4499 = vmatpush3.bf16.msra.mxu0 %v4496_v12 }
  0x20   : > { %4501 = vmatprep.subr.bf16.mxu0 %v4500_v15 }
  0x23   : > { %4503 = vmatpush3.bf16.msra.mxu0 %v4500_v15 }
  0x24   : > { %4505 = vmatprep.subr.bf16.mxu0 %v4504_v16 }
  0x27   : > { %4507 = vmatpush3.bf16.msra.mxu0 %v4504_v16 }
  0x28   : > { %3979 = vmatprep.subr.bf16.mxu0 %v6284_v1 }
  0x2a   : > { %3959 = vmatmul.mubr.msk.f32.vlgmr.msra.gmra.mrb[0].mxu0 %vm351_vm0, %v328_v17 }
  0x2b   : > { %3961 = vmatprep.mubr.msk.f32.mxu0 %vm351_vm0, %v329_v19  ;;  %3980 = vmatpush3.bf16.msra.mxu0 %v4869_v18 }
  0x2c   : > { %3981 = vmatprep.subr.bf16.mxu0 %v6284_v1 }
  0x2e   : > { %3962 = vmatmul.mubr.msk.f32.gmra.mrb[2].mxu0 %vm351_vm0, %v330_v20 }
  0x2f   : > { %3964 = vmatprep.mubr.msk.f32.mxu0 %vm351_vm0, %v331_v22  ;;  %3982 = vmatpush3.bf16.msra.mxu0 %v4870_v21 }
  0x30   : > { %4003 = vmatprep.subr.bf16.mxu0 %v6284_v1 }
  0x32   : > { %3965 = vmatmul.mubr.msk.f32.gmra.mrb[4].mxu0 %vm351_vm0, %v332_v23 }
  0x33   : > { %3967 = vmatprep.mubr.msk.f32.mxu0 %vm351_vm0, %v333_v24 }
  0x36   : > { %3968 = vmatmul.mubr.msk.f32.gmra.mrb[6].mxu0 %vm351_vm0, %v334_v25 }
  0x37   : > { %3970 = vmatprep.mubr.msk.f32.mxu0 %vm351_vm0, %v335_v26 }
  0x3a   : > { %3971 = vmatmul.mubr.msk.f32.gmra.mrb[8].mxu0 %vm351_vm0, %v336_v27 }
  0x3b   : > { %3973 = vmatprep.mubr.msk.f32.mxu0 %vm351_vm0, %v337_v28 }
  0x3e   : > { %3974 = vmatmul.mubr.msk.f32.gmra.mrb[10].mxu0 %vm351_vm0, %v338_v29 }
  0x3f   : > { %3976 = vmatprep.mubr.msk.f32.mxu0 %vm351_vm0, %v339_v30 }
  0x42   : > { %3977 = vmatmul.mubr.msk.f32.gmra.mrb[12].mxu0 %vm351_vm0, %v340_v31 }
  0x43   : > { %3983 = vmatprep.mubr.msk.bf16.mxu0 %vm4932_vm1, %v6284_v1 }
  0xfd   : > { %v3960_v34 = vpop.f32.mrb[0].mxu0 }
  0xfe   : > { %v460_v35 = vpop.f32.mrb[1].mxu0 }
  0xff   : > { %v5070_v36 = vpack.c.bf16 %v3960_v34, %v460_v35 }
 0x101   : > { %v547_v37 = vshll.u32 %v5070_v36, 16  ;;  %v3963_v38 = vpop.f32.mrb[2].mxu0  ;;  %v545_v44 = vshrl.u32 %v5070_v36, 16  ;;  %v796_v56 = vrot.slane %v5070_v36, 1 }
 0x102   : > { %v470_v39 = vpop.f32.mrb[3].mxu0 }
 0x103   : > { %v5073_v40 = vpack.c.bf16 %v3963_v38, %v470_v39  ;;  %v5075_v41 = vpack.c.bf16 %v470_v39, %v3960_v34  ;;  %v549_v42 = vrot.slane %v547_v37, 1 }
 0x105   : > { %v3966_v43 = vpop.f32.mrb[4].mxu0  ;;  %v552_v46 = vshll.u32 %v5073_v40, 16  ;;  %v1062_v47 = vshrl.u32 %v5075_v41, 16  ;;  %v1065_v48 = vshll.u32 %v5075_v41, 16  ;;  %v550_v51 = vor.u32 %v549_v42, %v545_v44 }
 0x106   : > { %v480_v45 = vpop.f32.mrb[5].mxu0  ;;  %v556_v54 = vshrl.u32 %v5073_v40, 16  ;;  %v797_v55 = vrot.slane %v5073_v40, 1  ;;  %v934_v57 = vrot.slane %v5075_v41, 1  ;;  %v1230_v61 = vrot.slane %v5075_v41, 2 }
 0x107   : > { %v5081_v49 = vpack.c.bf16 %v3966_v43, %v480_v45  ;;  %v5083_v50 = vpack.c.bf16 %v480_v45, %v3963_v38  ;;  %v554_v52 = vrot.slane %v552_v46, 1  ;;  %v1636_v0 = vrot.slane %v5073_v40, 3 }
 0x108   : > { %v5100_v3 = vrot.slane %v1062_v47, 1  ;;  %v5102_v4 = vrot.slane %v1065_v48, 2  ;;  %v5113_v9 = vrot.slane %v556_v54, 2  ;;  %v5121_v11 = vsel %vm795_vm3, %v796_v56, %v797_v55 }
 0x109   : > { %v1070_v58 = vshrl.u32 %v5083_v50, 16  ;;  %v1073_v59 = vshll.u32 %v5083_v50, 16  ;;  %v3969_v60 = vpop.f32.mrb[6].mxu0  ;;  %v555_v63 = vsel %vm543_vm2, %v550_v51, %v554_v52  ;;  %v1637_v2 = vrot.slane %v5081_v49, 3 }
 0x10a   : > { %v490_v62 = vpop.f32.mrb[7].mxu0  ;;  %3984 = vmatmul.mubr.msk.bf16.vlgmr.msra.gmra.mrb[16].mxu0 %vm600_vm4, %v555_v63  ;;  %v560_v8 = vshll.u32 %v5081_v49, 16  ;;  %v1360_v16 = vrot.slane %v5073_v40, 2  ;;  %v558_v18 = vor.u32 %v556_v54, %v554_v52  ;;  %v564_v20 = vshrl.u32 %v5081_v49, 16 }
 0x10b   : > { %v5104_v5 = vpack.c.bf16 %v3969_v60, %v490_v62  ;;  %v5106_v6 = vpack.c.bf16 %v490_v62, %v3966_v43  ;;  %4004 = vmatpush3.bf16.msra.mxu0 %v4873_v53  ;;  %v1638_v7 = vsel %vm1635_vm5, %v1636_v0, %v1637_v2  ;;  %3987 = vmatprep.mubr.msk.bf16.mxu0 %vm4932_vm1, %v6284_v1  ;;  %v1072_v12 = vrot.slane %v1070_v58, 1 }
 0x10c   : > { %v1075_v13 = vrot.slane %v1073_v59, 2  ;;  %4176 = vmatmul.mubr.msk.bf16.vlgmr.msra.gmra.mrb[0].mxu1 %vm600_vm4, %v1638_v7  ;;  %4005 = vmatprep.subr.bf16.mxu0 %v6284_v1  ;;  %v562_v19 = vrot.slane %v560_v8, 1  ;;  %v1068_v22 = vor.u32 %v5102_v4, %v5100_v3  ;;  %v799_v29 = vrot.slane %v5081_v49, 1 }
 0x10d   : > { %v3972_v14 = vpop.f32.mrb[8].mxu0  ;;  %v1639_v15 = vrot.slane %v5104_v5, 3  ;;  %4179 = vmatprep.mubr.msk.bf16.mxu1 %vm4932_vm1, %v6284_v1  ;;  %v568_v21 = vshll.u32 %v5104_v5, 16  ;;  %v935_v30 = vrot.slane %v5083_v50, 1  ;;  %v1231_v32 = vrot.slane %v5083_v50, 2 }
 0x10e   : > { %v500_v17 = vpop.f32.mrb[9].mxu0  ;;  %v563_v26 = vsel %vm543_vm2, %v558_v18, %v562_v19  ;;  %v566_v27 = vor.u32 %v564_v20, %v562_v19  ;;  %v5143_v31 = vor.u32 %v1075_v13, %v1072_v12  ;;  %v1079_v35 = vshrl.u32 %v5106_v6, 16 }
 0x10f   : > { %v5133_v23 = vpack.c.bf16 %v3972_v14, %v500_v17  ;;  %v5135_v24 = vpack.c.bf16 %v500_v17, %v3969_v60  ;;  %v1640_v25 = vsel %vm1635_vm5, %v1637_v2, %v1639_v15  ;;  %v570_v28 = vrot.slane %v568_v21, 1  ;;  %4006 = vmatpush3.bf16.msra.mxu0 %v4874_v10 }
 0x110   : > { %4027 = vmatprep.subr.bf16.mxu0 %v6284_v1  ;;  %v1082_v37 = vshll.u32 %v5106_v6, 16  ;;  %v572_v42 = vshrl.u32 %v5104_v5, 16  ;;  %v5162_v51 = vrot.slane %v560_v8, 3  ;;  %v5166_v52 = vrot.slane %v564_v20, 2 }
 0x111   : > { %v3975_v33 = vpop.f32.mrb[10].mxu0  ;;  %v576_v34 = vshll.u32 %v5133_v23, 16  ;;  %v571_v39 = vsel %vm543_vm2, %v566_v27, %v570_v28  ;;  %v1641_v47 = vrot.slane %v5133_v23, 3  ;;  %v5171_v53 = vsel %vm795_vm3, %v797_v55, %v799_v29 }
 0x112   : > { %v510_v38 = vpop.f32.mrb[11].mxu0  ;;  %v5152_v43 = vpack.c.bf16 %v3975_v33, %v3975_v33  ;;  %3988 = vmatmul.mubr.msk.bf16.gmra.mrb[20].mxu0 %vm600_vm4, %v563_v26  ;;  %v574_v56 = vor.u32 %v572_v42, %v570_v28  ;;  %v801_v60 = vrot.slane %v5104_v5, 1  ;;  %v1088_v62 = vshrl.u32 %v5135_v24, 16 }
 0x113   : > { %v5154_v44 = vpack.c.bf16 %v510_v38, %v3972_v14  ;;  %v5156_v45 = vpack.c.bf16 %v3975_v33, %v510_v38  ;;  %v5160_v48 = vpack.c.bf16 %v510_v38, %v510_v38  ;;  %3991 = vmatprep.mubr.msk.bf16.mxu0 %vm4932_vm1, %v6284_v1  ;;  %v5178_v58 = vrot.slane %v576_v34, 1 }
 0x114   : > { %4180 = vmatmul.mubr.msk.bf16.gmra.mrb[4].mxu1 %vm600_vm4, %v1640_v25  ;;  %v1091_v63 = vshll.u32 %v5135_v24, 16  ;;  %v580_v0 = vshrl.u32 %v5133_v23, 16  ;;  %v5190_v2 = vsel %vm795_vm3, %v934_v57, %v935_v30  ;;  %v1106_v7 = vshrl.u32 %v5152_v43, 16 }
 0x115   : > { %v3978_v54 = vpop.f32.mrb[12].mxu0  ;;  %v1643_v59 = vrot.slane %v5156_v45, 3  ;;  %4183 = vmatprep.mubr.msk.bf16.mxu1 %vm4932_vm1, %v6284_v1  ;;  %v1642_v8 = vsel %vm1635_vm5, %v1639_v15, %v1641_v47  ;;  %v5199_v12 = vsel %vm795_vm3, %v799_v29, %v801_v60  ;;  %v1109_v13 = vshll.u32 %v5152_v43, 16 }
 0x116   : > { %v520_v55 = vpop.f32.mrb[13].mxu0  ;;  %v584_v14 = vshll.u32 %v5160_v48, 16  ;;  %v937_v17 = vrot.slane %v5106_v6, 1  ;;  %v939_v57 = vrot.slane %v5135_v24, 1  ;;  %v579_v15 = vsel %vm543_vm2, %v574_v56, %v5178_v58 }
 0x117   : > { %v5194_v10 = vpack.c.bf16 %v520_v55, %v520_v55  ;;  %v1644_v19 = vsel %vm1635_vm5, %v1641_v47, %v1643_v59  ;;  %v941_v27 = vrot.slane %v5154_v44, 1  ;;  %v943_v28 = vrot.slane %v5152_v43, 1 }
 0x118   : > { %v5211_v25 = vsel %vm795_vm3, %v935_v30, %v937_v17  ;;  %v5214_v26 = vsel %vm795_vm3, %v937_v17, %v939_v57  ;;  %v5230_v30 = vsel %vm1060_vm6, %v1068_v22, %v5143_v31  ;;  %v1081_v54 = vrot.slane %v1079_v35, 1 }
 0x119   : > { %v1512_v18 = vshrl.u32 %v5194_v10, 16  ;;  %v1645_v20 = vrot.slane %v5194_v10, 3  ;;  %v1515_v33 = vshll.u32 %v5194_v10, 16  ;;  %v5235_v47 = vsel %vm795_vm3, %v939_v57, %v941_v27 }
 0x11a   : > { %3992 = vmatmul.mubr.msk.bf16.gmra.mrb[24].mxu0 %vm600_vm4, %v571_v39  ;;  %v5238_v39 = vsel %vm795_vm3, %v941_v27, %v943_v28  ;;  %v1084_v56 = vrot.slane %v1082_v37, 2  ;;  %v1093_v55 = vrot.slane %v1091_v63, 2  ;;  %v1097_v3 = vshrl.u32 %v5154_v44, 16 }
 0x11b   : > { %v5219_v29 = vrot.slane %v1512_v18, 2  ;;  %v5223_v38 = vsel %vm1635_vm5, %v1643_v59, %v1645_v20  ;;  %3995 = vmatprep.mubr.msk.bf16.mxu0 %vm4932_vm1, %v6284_v1  ;;  %v1090_v59 = vrot.slane %v1088_v62, 1  ;;  %v1100_v4 = vshll.u32 %v5154_v44, 16 }
 0x11c   : > { %4184 = vmatmul.mubr.msk.bf16.gmra.mrb[8].mxu1 %vm600_vm4, %v1642_v8  ;;  %v1085_v22 = vor.u32 %v1084_v56, %v1081_v54  ;;  %v1108_v17 = vrot.slane %v1106_v7, 1  ;;  %v1111_v57 = vrot.slane %v1109_v13, 2  ;;  %v5250_v35 = vsel %vm1229_vm7, %v1230_v61, %v1231_v32 }
 0x11d   : > { %4187 = vmatprep.mubr.msk.bf16.mxu1 %vm4932_vm1, %v6284_v1  ;;  %v1094_v37 = vor.u32 %v1093_v55, %v1090_v59  ;;  %v1099_v62 = vrot.slane %v1097_v3, 1  ;;  %v1102_v63 = vrot.slane %v1100_v4, 2  ;;  %v1233_v8 = vrot.slane %v5106_v6, 2 }
 0x11e   : > { %v5255_v18 = vsel %vm1060_vm6, %v5143_v31, %v1085_v22  ;;  %v1112_v20 = vor.u32 %v1111_v57, %v1108_v17  ;;  %v1235_v7 = vrot.slane %v5135_v24, 2  ;;  %v1237_v13 = vrot.slane %v5154_v44, 2 }
 0x11f   : > { %v5260_v41 = vsel %vm1060_vm6, %v1085_v22, %v1094_v37  ;;  %v1103_v61 = vor.u32 %v1102_v63, %v1099_v62  ;;  %v5265_v27 = vsel %vm1229_vm7, %v1231_v32, %v1233_v8  ;;  %v1239_v6 = vrot.slane %v5152_v43, 2 }
 0x120   : > { %v5269_v28 = vsel %vm1229_vm7, %v1233_v8, %v1235_v7  ;;  %v5272_v31 = vsel %vm1229_vm7, %v1235_v7, %v1237_v13  ;;  %v1361_v24 = vrot.slane %v5081_v49, 2  ;;  %v1363_v44 = vrot.slane %v5104_v5, 2 }
 0x121   : > { %v1517_v54 = vrot.slane %v1515_v33, 3  ;;  %v5278_v50 = vsel %vm1060_vm6, %v1094_v37, %v1103_v61  ;;  %v5281_v32 = vsel %vm1060_vm6, %v1103_v61, %v1112_v20  ;;  %v5284_v43 = vsel %vm1229_vm7, %v1237_v13, %v1239_v6  ;;  %v4875_v20 = vld [vmem:[%s6274_s4 + $0x20] sm:$0xff]   ;;  %v1776_v6 = vld [vmem:[%s5498_s13 + $0x28] sm:$0xff] }
 0x122   : > { %3996 = vmatmul.mubr.msk.bf16.gmra.mrb[28].mxu0 %vm600_vm4, %v579_v15  ;;  %v5291_v56 = vsel %vm1229_vm7, %v1360_v16, %v1361_v24  ;;  %v5296_v15 = vsel %vm1229_vm7, %v1361_v24, %v1363_v44  ;;  %v1367_v33 = vrot.slane %v5156_v45, 2  ;;  %v1369_v59 = vrot.slane %v5194_v10, 2  ;;  %v1778_v24 = vld [vmem:[%s5498_s13 + $0x38] sm:$0xff] }
 0x123   : > { %3999 = vmatprep.mubr.msk.bf16.mxu0 %vm4932_vm1, %v6284_v1  ;;  %v582_v55 = vor.u32 %v580_v0, %v5178_v58  ;;  %v1488_v3 = vrot.slane %v552_v46, 3  ;;  %v1492_v16 = vor.u32 %v5162_v51, %v5166_v52  ;;  %v1494_v4 = vrot.slane %v572_v42, 2 }
 0x124   : > { %4188 = vmatmul.mubr.msk.bf16.gmra.mrb[12].mxu1 %vm600_vm4, %v1644_v19  ;;  %v586_v22 = vrot.slane %v584_v14, 1  ;;  %v5315_v10 = vsel %vm1229_vm7, %v1367_v33, %v1369_v59  ;;  %v1495_v58 = vrot.slane %v568_v21, 3  ;;  %v1498_v46 = vrot.slane %v580_v0, 2  ;;  %v1761_v59 = vld [vmem:[%s6273_s3 + $0x20] sm:$0xff] }
 0x125   : > { %4191 = vmatprep.mubr.msk.bf16.mxu1 %vm4932_vm1, %v6284_v1  ;;  %v1489_v51 = vor.u32 %v1488_v3, %v5113_v9  ;;  %v1499_v42 = vrot.slane %v576_v34, 3  ;;  %v1503_v52 = vshrl.u32 %v5156_v45, 16  ;;  %v1506_v14 = vshll.u32 %v5156_v45, 16  ;;  %v1763_v3 = vld [vmem:[%s6273_s3 + $0x30] sm:$0xff] }
 0x126   : > { %v1496_v19 = vor.u32 %v1495_v58, %v1494_v4  ;;  %v1518_v17 = vor.u32 %v1517_v54, %v5219_v29  ;;  %v587_v0 = vsel %vm543_vm2, %v582_v55, %v586_v22  ;;  %v1365_v13 = vrot.slane %v5133_v23, 2  ;;  %v1779_v54 = vld [vmem:[%s5498_s13 + $0x40] sm:$0xff]  ;;  %v1762_v55 = vld [vmem:[%s6273_s3 + $0x28] sm:$0xff]  ;;  %v1768_v58 = vld [vmem:[%s6273_s3 + $0x58] sm:$0xff] }
 0x127   : > { %v5328_v57 = vsel %vm1486_vm8, %v1489_v51, %v1492_v16  ;;  %v1500_v37 = vor.u32 %v1499_v42, %v1498_v46  ;;  %v1505_v21 = vrot.slane %v1503_v52, 2  ;;  %v1508_v62 = vrot.slane %v1506_v14, 3  ;;  %v1765_v4 = vld [vmem:[%s6273_s3 + $0x40] sm:$0xff]  ;;  %v1766_v22 = vld [vmem:[%s6273_s3 + $0x48] sm:$0xff]  ;;  %v4889_v14 = vld [vmem:[%s6275_s5 + $0x10] sm:$0xff]  }
 0x128   : > { %v5332_v9 = vsel %vm1486_vm8, %v1492_v16, %v1496_v19  ;;  %v1368_v61 = vsel %vm1229_vm7, %v1365_v13, %v1367_v33  ;;  %v1760_v33 = vld [vmem:[%s6273_s3 + $0x18] sm:$0xff]  ;;  %v1769_v46 = vld [vmem:[%s6273_s3 + $0x60] sm:$0xff]  ;;  %v1770_v51 = vld [vmem:[%s6273_s3 + $0x68] sm:$0x3f] }
 0x129   : > { %v5336_v34 = vsel %vm1486_vm8, %v1496_v19, %v1500_v37  ;;  %v1509_v63 = vor.u32 %v1508_v62, %v1505_v21  ;;  %v1764_v16 = vld [vmem:[%s6273_s3 + $0x38] sm:$0xff]  ;;  %v4887_v42 = vld [vmem:[%s6275_s5] sm:$0xff]   ;;  %v4888_v52 = vld [vmem:[%s6275_s5 + $0x8] sm:$0xff]  }
 0x12a   : > { %4000 = vmatmul.mubr.msk.bf16.gmra.mrb[32].mxu0 %vm600_vm4, %v587_v0  ;;  %4237 = vmatpush3.bf16.msra.mxu1 %v4887_v42  ;;  %v4890_v19 = vld [vmem:[%s6275_s5 + $0x18] sm:$0xff]  }
 0x12b   : > { %4007 = vmatprep.mubr.msk.bf16.mxu0 %vm4932_vm1, %v6284_v1  ;;  %v5343_v29 = vsel %vm1486_vm8, %v1500_v37, %v1509_v63  ;;  %v5346_v8 = vsel %vm1486_vm8, %v1509_v63, %v1518_v17  ;;  %4238 = vmatprep.subr.bf16.mxu1 %v6284_v1  ;;  %v4894_v42 = vld [vmem:[%s6275_s5 + $0x38] sm:$0xff]  }
 0x12c   : > { %4192 = vmatmul.mubr.msk.bf16.gmra.mrb[16].mxu1 %vm600_vm4, %v5223_v38  ;;  %v4876_v38 = vld [vmem:[%s6274_s4 + $0x28] sm:$0xff]  }
 0x12d   : > { %4244 = vmatprep.mubr.msk.bf16.mxu1 %vm4932_vm1, %v6284_v1 }
 0x12e   : > { %4239 = vmatpush3.bf16.msra.mxu1 %v4888_v52 }
 0x12f   : > { %4240 = vmatprep.subr.bf16.mxu1 %v6284_v1 }
 0x132   : > { %4008 = vmatmul.mubr.msk.bf16.vlgmr.msra.gmra.mrb[16].mxu0 %vm600_vm4, %v5070_v36  ;;  %v4877_v36 = vld [vmem:[%s6274_s4 + $0x30] sm:$0xff]   ;;  %4241 = vmatpush3.bf16.msra.mxu1 %v4889_v14 }
 0x133   : > { %4028 = vmatpush3.bf16.msra.mxu0 %v4875_v20  ;;  %4011 = vmatprep.mubr.msk.bf16.mxu0 %vm4932_vm1, %v6284_v1 }
 0x134   : > { %4029 = vmatprep.subr.bf16.mxu0 %v6284_v1  ;;  %4242 = vmatprep.subr.bf16.mxu1 %v6284_v1 }
 0x136   : > { %4243 = vmatpush3.bf16.msra.mxu1 %v4890_v19 }
 0x137   : > { %4030 = vmatpush3.bf16.msra.mxu0 %v4876_v38  ;;  %4264 = vmatprep.subr.bf16.mxu1 %v6284_v1 }
 0x138   : > { %4051 = vmatprep.subr.bf16.mxu0 %v6284_v1 }
 0x13a   : > { %4012 = vmatmul.mubr.msk.bf16.gmra.mrb[20].mxu0 %vm600_vm4, %v5073_v40  ;;  %v4878_v40 = vld [vmem:[%s6274_s4 + $0x38] sm:$0xff]  }
 0x13b   : > { %4015 = vmatprep.mubr.msk.bf16.mxu0 %vm4932_vm1, %v6284_v1 }
 0x142   : > { %4016 = vmatmul.mubr.msk.bf16.gmra.mrb[24].mxu0 %vm600_vm4, %v5081_v49  ;;  %v803_v49 = vrot.slane %v5133_v23, 1 }
 0x143   : > { %4019 = vmatprep.mubr.msk.bf16.mxu0 %vm4932_vm1, %v6284_v1 }
 0x14a   : > { %4020 = vmatmul.mubr.msk.bf16.gmra.mrb[28].mxu0 %vm600_vm4, %v5104_v5  ;;  %v1773_v5 = vld [vmem:[%s5498_s13 + $0x10] sm:$0xff] }
 0x14b   : > { %4023 = vmatprep.mubr.msk.bf16.mxu0 %vm4932_vm1, %v6284_v1 }
 0x152   : > { %4024 = vmatmul.mubr.msk.bf16.gmra.mrb[32].mxu0 %vm600_vm4, %v5133_v23  ;;  %v1774_v23 = vld [vmem:[%s5498_s13 + $0x18] sm:$0xff] }
 0x153   : > { %4031 = vmatprep.mubr.msk.bf16.mxu0 %vm4932_vm1, %v6284_v1  ;;  %v4512_v45 = vpack.c.bf16 %v1774_v23, %v1773_v5 }
 0x15a   : > { %4032 = vmatmul.mubr.msk.bf16.vlgmr.msra.gmra.mrb[16].mxu0 %vm600_vm4, %v5121_v11  ;;  %v804_v11 = vsel %vm795_vm3, %v801_v60, %v803_v49  ;;  %v4881_v60 = vld [vmem:[%s6274_s4 + $0x50] sm:$0xff]  }
 0x15b   : > { %4052 = vmatpush3.bf16.msra.mxu0 %v4877_v36  ;;  %4035 = vmatprep.mubr.msk.bf16.mxu0 %vm4932_vm1, %v6284_v1 }
 0x15c   : > { %4053 = vmatprep.subr.bf16.mxu0 %v6284_v1 }
 0x15f   : > { %4054 = vmatpush3.bf16.msra.mxu0 %v4878_v40 }
 0x160   : > { %4075 = vmatprep.subr.bf16.mxu0 %v6284_v1 }
 0x162   : > { %4036 = vmatmul.mubr.msk.bf16.gmra.mrb[20].mxu0 %vm600_vm4, %v5171_v53  ;;  %v805_v53 = vrot.slane %v5160_v48, 1  ;;  %v4880_v48 = vld [vmem:[%s6274_s4 + $0x48] sm:$0xff]  }
 0x163   : > { %4039 = vmatprep.mubr.msk.bf16.mxu0 %vm4932_vm1, %v6284_v1 }
 0x164   : > { %v806_v7 = vsel %vm795_vm3, %v803_v49, %v805_v53 }
 0x16a   : > { %4040 = vmatmul.mubr.msk.bf16.gmra.mrb[24].mxu0 %vm600_vm4, %v5199_v12  ;;  %v4879_v12 = vld [vmem:[%s6274_s4 + $0x40] sm:$0xff]  }
 0x16b   : > { %4043 = vmatprep.mubr.msk.bf16.mxu0 %vm4932_vm1, %v6284_v1 }
 0x172   : > { %4044 = vmatmul.mubr.msk.bf16.gmra.mrb[28].mxu0 %vm600_vm4, %v804_v11 }
 0x173   : > { %4047 = vmatprep.mubr.msk.bf16.mxu0 %vm4932_vm1, %v6284_v1 }
 0x17a   : > { %4048 = vmatmul.mubr.msk.bf16.gmra.mrb[32].mxu0 %vm600_vm4, %v806_v7 }
 0x17b   : > { %4055 = vmatprep.mubr.msk.bf16.mxu0 %vm4932_vm1, %v6284_v1 }
 0x182   : > { %4056 = vmatmul.mubr.msk.bf16.vlgmr.msra.gmra.mrb[16].mxu0 %vm600_vm4, %v5190_v2  ;;  %v4882_v2 = vld [vmem:[%s6274_s4 + $0x58] sm:$0xff]  }
 0x183   : > { %4076 = vmatpush3.bf16.msra.mxu0 %v4879_v12  ;;  %4059 = vmatprep.mubr.msk.bf16.mxu0 %vm4932_vm1, %v6284_v1 }
 0x184   : > { %4077 = vmatprep.subr.bf16.mxu0 %v6284_v1 }
 0x187   : > { %4078 = vmatpush3.bf16.msra.mxu0 %v4880_v48 }
 0x188   : > { %4099 = vmatprep.subr.bf16.mxu0 %v6284_v1 }
 0x18a   : > { %4060 = vmatmul.mubr.msk.bf16.gmra.mrb[20].mxu0 %vm600_vm4, %v5211_v25  ;;  %v4883_v25 = vld [vmem:[%s6274_s4 + $0x60] sm:$0xff]  }
 0x18b   : > { %4063 = vmatprep.mubr.msk.bf16.mxu0 %vm4932_vm1, %v6284_v1 }
 0x192   : > { %4064 = vmatmul.mubr.msk.bf16.gmra.mrb[24].mxu0 %vm600_vm4, %v5214_v26  ;;  %v4884_v26 = vld [vmem:[%s6274_s4 + $0x68] sm:$0xff]  }
 0x193   : > { %4067 = vmatprep.mubr.msk.bf16.mxu0 %vm4932_vm1, %v6284_v1 }
 0x19a   : > { %4068 = vmatmul.mubr.msk.bf16.gmra.mrb[28].mxu0 %vm600_vm4, %v5235_v47  ;;  %v1771_v47 = vld [vmem:[%s5498_s13] sm:$0xff] }
 0x19b   : > { %4071 = vmatprep.mubr.msk.bf16.mxu0 %vm4932_vm1, %v6284_v1 }
 0x1a2   : > { %4072 = vmatmul.mubr.msk.bf16.gmra.mrb[32].mxu0 %vm600_vm4, %v5238_v39  ;;  %v1772_v39 = vld [vmem:[%s5498_s13 + $0x8] sm:$0xff] }
 0x1a3   : > { %4079 = vmatprep.mubr.msk.bf16.mxu0 %vm4932_vm1, %v6284_v1 }
 0x1aa   : > { %4080 = vmatmul.mubr.msk.bf16.vlgmr.msra.gmra.mrb[16].mxu0 %vm600_vm4, %v5230_v30  ;;  %v4885_v30 = vld [vmem:[%s6274_s4 + $0x70] sm:$0xff]  }
 0x1ab   : > { %4100 = vmatpush3.bf16.msra.mxu0 %v4881_v60  ;;  %4083 = vmatprep.mubr.msk.bf16.mxu0 %vm4932_vm1, %v6284_v1 }
 0x1ac   : > { %4101 = vmatprep.subr.bf16.mxu0 %v6284_v1 }
 0x1af   : > { %4102 = vmatpush3.bf16.msra.mxu0 %v4882_v2  ;;  %v4891_v2 = vld [vmem:[%s6275_s5 + $0x20] sm:$0xff]  }
 0x1b0   : > { %4123 = vmatprep.subr.bf16.mxu0 %v6284_v1 }
 0x1b2   : > { %4084 = vmatmul.mubr.msk.bf16.gmra.mrb[20].mxu0 %vm600_vm4, %v5255_v18  ;;  %v4508_v18 = vpack.c.bf16 %v1772_v39, %v1771_v47  ;;  %v4892_v39 = vld [vmem:[%s6275_s5 + $0x28] sm:$0xff]  }
 0x1b3   : > { %4087 = vmatprep.mubr.msk.bf16.mxu0 %vm4932_vm1, %v6284_v1 }
 0x1ba   : > { %4088 = vmatmul.mubr.msk.bf16.gmra.mrb[24].mxu0 %vm600_vm4, %v5260_v41  ;;  %v1366_v41 = vsel %vm1229_vm7, %v1363_v44, %v1365_v13 }
 0x1bb   : > { %4091 = vmatprep.mubr.msk.bf16.mxu0 %vm4932_vm1, %v6284_v1 }
 0x1c2   : > { %4092 = vmatmul.mubr.msk.bf16.gmra.mrb[28].mxu0 %vm600_vm4, %v5278_v50  ;;  %v1780_v50 = vld [vmem:[%s5498_s13 + $0x48] sm:$0xff] }
 0x1c3   : > { %4095 = vmatprep.mubr.msk.bf16.mxu0 %vm4932_vm1, %v6284_v1 }
 0x1ca   : > { %4096 = vmatmul.mubr.msk.bf16.gmra.mrb[32].mxu0 %vm600_vm4, %v5281_v32  ;;  %v4524_v32 = vpack.c.bf16 %v1780_v50, %v1779_v54 }
 0x1cb   : > { %4103 = vmatprep.mubr.msk.bf16.mxu0 %vm4932_vm1, %v6284_v1 }
 0x1d2   : > { %4104 = vmatmul.mubr.msk.bf16.vlgmr.msra.gmra.mrb[16].mxu0 %vm600_vm4, %v5250_v35  ;;  %v4886_v35 = vld [vmem:[%s6274_s4 + $0x78] sm:$0xff]  }
 0x1d3   : > { %4124 = vmatpush3.bf16.msra.mxu0 %v4883_v25  ;;  %4107 = vmatprep.mubr.msk.bf16.mxu0 %vm4932_vm1, %v6284_v1 }
 0x1d4   : > { %4125 = vmatprep.subr.bf16.mxu0 %v6284_v1 }
 0x1d7   : > { %4126 = vmatpush3.bf16.msra.mxu0 %v4884_v26 }
 0x1d8   : > { %4147 = vmatprep.subr.bf16.mxu0 %v6284_v1 }
 0x1da   : > { %4108 = vmatmul.mubr.msk.bf16.gmra.mrb[20].mxu0 %vm600_vm4, %v5265_v27  ;;  %v1775_v27 = vld [vmem:[%s5498_s13 + $0x20] sm:$0xff] }
 0x1db   : > { %4111 = vmatprep.mubr.msk.bf16.mxu0 %vm4932_vm1, %v6284_v1 }
 0x1e2   : > { %4112 = vmatmul.mubr.msk.bf16.gmra.mrb[24].mxu0 %vm600_vm4, %v5269_v28  ;;  %v4516_v28 = vpack.c.bf16 %v1776_v6, %v1775_v27 }
 0x1e3   : > { %4115 = vmatprep.mubr.msk.bf16.mxu0 %vm4932_vm1, %v6284_v1 }
 0x1ea   : > { %4116 = vmatmul.mubr.msk.bf16.gmra.mrb[28].mxu0 %vm600_vm4, %v5272_v31  ;;  %v1777_v31 = vld [vmem:[%s5498_s13 + $0x30] sm:$0xff] }
 0x1eb   : > { %4119 = vmatprep.mubr.msk.bf16.mxu0 %vm4932_vm1, %v6284_v1  ;;  %v4520_v44 = vpack.c.bf16 %v1778_v24, %v1777_v31  ;;  %v4893_v24 = vld [vmem:[%s6275_s5 + $0x30] sm:$0xff]  }
 0x1f2   : > { %4120 = vmatmul.mubr.msk.bf16.gmra.mrb[32].mxu0 %vm600_vm4, %v5284_v43  ;;  %v1757_v43 = vld [vmem:[%s6273_s3] sm:$0xff] }
 0x1f3   : > { %4127 = vmatprep.mubr.msk.bf16.mxu0 %vm4932_vm1, %v6284_v1 }
 0x1fa   : > { %4128 = vmatmul.mubr.msk.bf16.vlgmr.msra.gmra.mrb[16].mxu0 %vm600_vm4, %v5291_v56  ;;  %v1758_v56 = vld [vmem:[%s6273_s3 + $0x8] sm:$0xff] }
 0x1fb   : > { %4148 = vmatpush3.bf16.msra.mxu0 %v4885_v30  ;;  %4131 = vmatprep.mubr.msk.bf16.mxu0 %vm4932_vm1, %v6284_v1 }
 0x1fc   : > { %4149 = vmatprep.subr.bf16.mxu0 %v6284_v1 }
 0x1ff   : > { %4150 = vmatpush3.bf16.msra.mxu0 %v4886_v35 }
 0x200   : > { %4509 = vmatprep.subr.bf16.mxu0 %v4508_v18 }
 0x202   : > { %4132 = vmatmul.mubr.msk.bf16.gmra.mrb[20].mxu0 %vm600_vm4, %v5296_v15  ;;  %v1759_v15 = vld [vmem:[%s6273_s3 + $0x10] sm:$0xff] }
 0x203   : > { %4135 = vmatprep.mubr.msk.bf16.mxu0 %vm4932_vm1, %v6284_v1 }
 0x20a   : > { %4136 = vmatmul.mubr.msk.bf16.gmra.mrb[24].mxu0 %vm600_vm4, %v1366_v41 }
 0x20b   : > { %4139 = vmatprep.mubr.msk.bf16.mxu0 %vm4932_vm1, %v6284_v1 }
 0x212   : > { %4140 = vmatmul.mubr.msk.bf16.gmra.mrb[28].mxu0 %vm600_vm4, %v1368_v61 }
 0x213   : > { %4143 = vmatprep.mubr.msk.bf16.mxu0 %vm4932_vm1, %v6284_v1 }
 0x21a   : > { %4144 = vmatmul.mubr.msk.bf16.gmra.mrb[32].mxu0 %vm600_vm4, %v5315_v10  ;;  %v1767_v10 = vld [vmem:[%s6273_s3 + $0x50] sm:$0xff] }
 0x21b   : > { %4151 = vmatprep.mubr.msk.bf16.mxu0 %vm4932_vm1, %v6284_v1 }
 0x222   : > { %4152 = vmatmul.mubr.msk.bf16.vlgmr.msra.gmra.mrb[16].mxu0 %vm600_vm4, %v5328_v57 }
 0x223   : > { %4511 = vmatpush3.bf16.msra.mxu0 %v4508_v18  ;;  %4155 = vmatprep.mubr.msk.bf16.mxu0 %vm4932_vm1, %v6284_v1 }
 0x224   : > { %4513 = vmatprep.subr.bf16.mxu0 %v4512_v45 }
 0x227   : > { %4515 = vmatpush3.bf16.msra.mxu0 %v4512_v45 }
 0x228   : > { %4517 = vmatprep.subr.bf16.mxu0 %v4516_v28 }
 0x22a   : > { %4156 = vmatmul.mubr.msk.bf16.gmra.mrb[20].mxu0 %vm600_vm4, %v5332_v9 }
 0x22b   : > { %4159 = vmatprep.mubr.msk.bf16.mxu0 %vm4932_vm1, %v6284_v1  ;;  %4519 = vmatpush3.bf16.msra.mxu0 %v4516_v28 }
 0x22c   : > { %4521 = vmatprep.subr.bf16.mxu0 %v4520_v44 }
 0x22f   : > { %4523 = vmatpush3.bf16.msra.mxu0 %v4520_v44 }
 0x230   : > { %4525 = vmatprep.subr.bf16.mxu0 %v4524_v32 }
 0x232   : > { %4160 = vmatmul.mubr.msk.bf16.gmra.mrb[24].mxu0 %vm600_vm4, %v5336_v34 }
 0x233   : > { %4163 = vmatprep.mubr.msk.bf16.mxu0 %vm4932_vm1, %v6284_v1  ;;  %4527 = vmatpush3.bf16.msra.mxu0 %v4524_v32 }
 0x23a   : > { %4164 = vmatmul.mubr.msk.bf16.gmra.mrb[28].mxu0 %vm600_vm4, %v5343_v29 }
 0x23b   : > { %4167 = vmatprep.mubr.msk.bf16.mxu0 %vm4932_vm1, %v6284_v1 }
 0x242   : > { %4168 = vmatmul.mubr.msk.bf16.gmra.mrb[32].mxu0 %vm600_vm4, %v5346_v8 }
 0x243   : > { %4215 = vmatprep.mubr.msk.f32.mxu0 %vm351_vm0, %v1757_v43 }
 0x24a   : > { %4216 = vmatmul.mubr.msk.f32.vlgmr.msra.gmra.mrb[14].mxu0 %vm351_vm0, %v1758_v56 }
 0x24b   : > { %4218 = vmatprep.mubr.msk.f32.mxu0 %vm351_vm0, %v1759_v15 }
 0x24e   : > { %4219 = vmatmul.mubr.msk.f32.gmra.mrb[36].mxu0 %vm351_vm0, %v1760_v33 }
 0x24f   : > { %4221 = vmatprep.mubr.msk.f32.mxu0 %vm351_vm0, %v1761_v59 }
 0x252   : > { %4222 = vmatmul.mubr.msk.f32.gmra.mrb[38].mxu0 %vm351_vm0, %v1762_v55 }
 0x253   : > { %4224 = vmatprep.mubr.msk.f32.mxu0 %vm351_vm0, %v1763_v3 }
 0x256   : > { %4225 = vmatmul.mubr.msk.f32.gmra.mrb[40].mxu0 %vm351_vm0, %v1764_v16 }
 0x257   : > { %4227 = vmatprep.mubr.msk.f32.mxu0 %vm351_vm0, %v1765_v4 }
 0x25a   : > { %4228 = vmatmul.mubr.msk.f32.gmra.mrb[42].mxu0 %vm351_vm0, %v1766_v22 }
 0x25b   : > { %4230 = vmatprep.mubr.msk.f32.mxu0 %vm351_vm0, %v1767_v10 }
 0x25e   : > { %4231 = vmatmul.mubr.msk.f32.gmra.mrb[44].mxu0 %vm351_vm0, %v1768_v58 }
 0x25f   : > { %4233 = vmatprep.mubr.msk.f32.mxu0 %vm351_vm0, %v1769_v46 }
 0x262   : > { %4234 = vmatmul.mubr.msk.f32.gmra.mrb[46].mxu0 %vm351_vm0, %v1770_v51 }
 0x2f5   : > { %v5632_v17 = vpop.f32.mrb[16].mxu0 }
 0x2f6   : > { %v4153_v57 = vpop.f32.mrb[17].mxu0 }
 0x2f7   : > { %v5634_v37 = vpop.f32.mrb[18].mxu0 }
 0x2f8   : > { %v4154_v21 = vpop.f32.mrb[19].mxu0 }
 0x2fd   : > { %v5636_v62 = vpop.f32.mrb[20].mxu0 }
 0x2fe   : > { %v4157_v0 = vpop.f32.mrb[21].mxu0 }
 0x2ff   : > { %v5638_v9 = vpop.f32.mrb[22].mxu0 }
 0x300   : > { %v4158_v34 = vpop.f32.mrb[23].mxu0 }
 0x305   : > { %v5640_v63 = vpop.f32.mrb[24].mxu0 }
 0x306   : > { %v4161_v29 = vpop.f32.mrb[25].mxu0 }
 0x307   : > { %v5642_v8 = vpop.f32.mrb[26].mxu0 }
 0x308   : > { %v4162_v20 = vpop.f32.mrb[27].mxu0 }
 0x30d   : > { %v5644_v38 = vpop.f32.mrb[28].mxu0 }
 0x30e   : > { %v4165_v36 = vpop.f32.mrb[29].mxu0 }
 0x30f   : > { %v5646_v40 = vpop.f32.mrb[30].mxu0 }
 0x310   : > { %v4166_v49 = vpop.f32.mrb[31].mxu0 }
 0x315   : > { %v5648_v11 = vpop.f32.mrb[32].mxu0 }
 0x316   : > { %6286 = vst [vmem:[#allocation2_spill] sm:$0xff] %v5648_v11  ;;  %v4169_v53 = vpop.f32.mrb[33].mxu0 }
 0x317   : > { %v5650_v7 = vpop.f32.mrb[34].mxu0 }
 0x318   : > { %6287 = vst [vmem:[#allocation3_spill] sm:$0xff] %v5650_v7  ;;  %v4170_v12 = vpop.f32.mrb[35].mxu0 }
 0x31d   : > { %v4217_v48 = vpop.f32.mrb[14].mxu0 }
 0x31e   : > { %v1889_v60 = vpop.f32.mrb[15].mxu0 }
 0x31f   : > { %v1957_v25 = vpack.c.bf16 %v4217_v48, %v1889_v60 }
 0x321   : > { %v2105_v26 = vshll.u32 %v1957_v25, 16  ;;  %v4220_v30 = vpop.f32.mrb[36].mxu0  ;;  %4245 = vmatmul.mubr.msk.bf16.vlgmr.msra.gmra.mrb[0].mxu1 %vm1994_vm9, %v1957_v25  ;;  %v2103_v35 = vshrl.u32 %v1957_v25, 16  ;;  %v2279_v61 = vrot.slane %v1957_v25, 1 }
 0x322   : > { %4265 = vmatpush3.bf16.msra.mxu1 %v4891_v2  ;;  %v1899_v47 = vpop.f32.mrb[37].mxu0  ;;  %4248 = vmatprep.mubr.msk.bf16.mxu1 %vm4932_vm1, %v6284_v1 }
 0x323   : > { %v2107_v18 = vrot.slane %v2105_v26, 1  ;;  %v5661_v13 = vpack.c.bf16 %v4220_v30, %v1899_v47  ;;  %v5663_v41 = vpack.c.bf16 %v1899_v47, %v4217_v48  ;;  %4266 = vmatprep.subr.bf16.mxu1 %v6284_v1 }
 0x325   : > { %v2108_v5 = vor.u32 %v2107_v18, %v2103_v35  ;;  %v2433_v23 = vrot.slane %v5663_v41, 1  ;;  %v2576_v45 = vshrl.u32 %v5663_v41, 16  ;;  %v2579_v27 = vshll.u32 %v5663_v41, 16  ;;  %v4223_v6 = vpop.f32.mrb[38].mxu0 }
 0x326   : > { %v1909_v31 = vpop.f32.mrb[39].mxu0  ;;  %4267 = vmatpush3.bf16.msra.mxu1 %v4892_v39  ;;  %v6283_v44 = vshll.u32 %v5661_v13, 16  ;;  %v2113_v54 = vshrl.u32 %v5661_v13, 16  ;;  %v2280_v50 = vrot.slane %v5661_v13, 1 }
 0x327   : > { %v2578_v32 = vrot.slane %v2576_v45, 1  ;;  %v2581_v43 = vrot.slane %v2579_v27, 2  ;;  %v5676_v56 = vpack.c.bf16 %v4223_v6, %v1909_v31  ;;  %v5678_v15 = vpack.c.bf16 %v1909_v31, %v4220_v30  ;;  %4268 = vmatprep.subr.bf16.mxu1 %v6284_v1 }
 0x328   : > { %v2111_v33 = vrot.slane %v6283_v44, 1  ;;  %v5683_v59 = vrot.slane %v2113_v54, 2  ;;  %v5686_v55 = vsel %vm795_vm3, %v2279_v61, %v2280_v50 }
 0x329   : > { %v2582_v16 = vor.u32 %v2581_v43, %v2578_v32  ;;  %v2434_v4 = vrot.slane %v5678_v15, 1  ;;  %v2584_v22 = vshrl.u32 %v5678_v15, 16  ;;  %v2587_v10 = vshll.u32 %v5678_v15, 16  ;;  %v4226_v58 = vpop.f32.mrb[40].mxu0  ;;  %4249 = vmatmul.mubr.msk.bf16.gmra.mrb[4].mxu1 %vm1994_vm9, %v5661_v13 }
 0x32a   : > { %v1919_v51 = vpop.f32.mrb[41].mxu0  ;;  %4252 = vmatprep.mubr.msk.bf16.mxu1 %vm4932_vm1, %v6284_v1  ;;  %4269 = vmatpush3.bf16.msra.mxu1 %v4893_v24  ;;  %v5701_v52 = vsel %vm543_vm2, %v2108_v5, %v2111_v33  ;;  %v2115_v14 = vor.u32 %v2113_v54, %v2111_v33  ;;  %v2116_v19 = vshll.u32 %v5676_v56, 16  ;;  %v2120_v36 = vshrl.u32 %v5676_v56, 16 }
 0x32b   : > { %v2586_v57 = vrot.slane %v2584_v22, 1  ;;  %v2589_v21 = vrot.slane %v2587_v10, 2  ;;  %v5704_v0 = vpack.c.bf16 %v4226_v58, %v1919_v51  ;;  %v5706_v34 = vpack.c.bf16 %v1919_v51, %v4223_v6  ;;  %4270 = vmatprep.subr.bf16.mxu1 %v6284_v1 }
 0x32c   : > { %v2118_v29 = vrot.slane %v2116_v19, 1  ;;  %v5709_v20 = vrot.slane %v2116_v19, 3  ;;  %v2282_v49 = vrot.slane %v5676_v56, 1  ;;  %v5721_v47 = vrot.slane %v2120_v36, 2 }
 0x32d   : > { %v5713_v53 = vor.u32 %v2589_v21, %v2586_v57  ;;  %v2593_v12 = vshrl.u32 %v5706_v34, 16  ;;  %v2596_v48 = vshll.u32 %v5706_v34, 16  ;;  %v4229_v60 = vpop.f32.mrb[42].mxu0  ;;  %v6280_v2 = vshll.u32 %v5704_v0, 16 }
 0x32e   : > { %v1929_v25 = vpop.f32.mrb[43].mxu0  ;;  %4271 = vmatpush3.bf16.msra.mxu1 %v4894_v42  ;;  %v5719_v26 = vsel %vm543_vm2, %v2115_v14, %v2118_v29  ;;  %v2122_v30 = vor.u32 %v2120_v36, %v2118_v29  ;;  %v6281_v39 = vshrl.u32 %v5704_v0, 16  ;;  %v5732_v5 = vsel %vm795_vm3, %v2280_v50, %v2282_v49 }
 0x32f   : > { %v5724_v35 = vpack.c.bf16 %v4229_v60, %v1929_v25  ;;  %v5726_v18 = vpack.c.bf16 %v1929_v25, %v4226_v58  ;;  %4292 = vmatprep.subr.bf16.mxu1 %v6284_v1  ;;  %v2125_v61 = vrot.slane %v6280_v2, 1  ;;  %v2284_v45 = vrot.slane %v5704_v0, 1 }
 0x330   : > { %v5736_v27 = vsel %vm795_vm3, %v2433_v23, %v2434_v4  ;;  %v2436_v6 = vrot.slane %v5706_v34, 1  ;;  %v5741_v31 = vsel %vm1060_vm6, %v2582_v16, %v5713_v53 }
 0x331   : > { %v2602_v24 = vshrl.u32 %v5726_v18, 16  ;;  %v2605_v54 = vshll.u32 %v5726_v18, 16  ;;  %4253 = vmatmul.mubr.msk.bf16.gmra.mrb[8].mxu1 %vm1994_vm9, %v5676_v56  ;;  %v4232_v50 = vpop.f32.mrb[44].mxu0  ;;  %v5748_v32 = vsel %vm543_vm2, %v2122_v30, %v2125_v61  ;;  %v2129_v23 = vor.u32 %v6281_v39, %v2125_v61 }
 0x332   : > { %v5752_v43 = vpack.c.bf16 %v4232_v50, %v4232_v50  ;;  %v1939_v33 = vpop.f32.mrb[45].mxu0  ;;  %4256 = vmatprep.mubr.msk.bf16.mxu1 %vm4932_vm1, %v6284_v1  ;;  %v6279_v16 = vshll.u32 %v5724_v35, 16  ;;  %v6282_v22 = vshrl.u32 %v5724_v35, 16  ;;  %v5759_v10 = vsel %vm795_vm3, %v2282_v49, %v2284_v45 }
 0x333   : > { %v2093_v58 = vpack.c.bf16 %v1939_v33, %v1939_v33  ;;  %v5761_v51 = vpack.c.bf16 %v1939_v33, %v4229_v60  ;;  %v5763_v42 = vpack.c.bf16 %v4232_v50, %v1939_v33  ;;  %v2286_v14 = vrot.slane %v5724_v35, 1 }
 0x334   : > { %v2620_v19 = vshrl.u32 %v5752_v43, 16  ;;  %v2623_v57 = vshll.u32 %v5752_v43, 16  ;;  %v2132_v21 = vrot.slane %v6279_v16, 1  ;;  %v5771_v29 = vsel %vm795_vm3, %v2434_v4, %v2436_v6 }
 0x335   : > { %v2138_v36 = vshll.u32 %v2093_v58, 16  ;;  %v2288_v49 = vrot.slane %v2093_v58, 1  ;;  %v4235_v25 = vpop.f32.mrb[46].mxu0  ;;  %v5774_v60 = vsel %vm795_vm3, %v2284_v45, %v2286_v14  ;;  %v2438_v30 = vrot.slane %v5726_v18, 1 }
 0x336   : > { %v1949_v61 = vpop.f32.mrb[47].mxu0  ;;  %v5778_v50 = vsel %vm543_vm2, %v2129_v23, %v2132_v21  ;;  %v2136_v33 = vor.u32 %v6282_v22, %v2132_v21  ;;  %v2440_v16 = vrot.slane %v5761_v51, 1  ;;  %v2442_v4 = vrot.slane %v5752_v43, 1 }
 0x337   : > { %v2140_v2 = vrot.slane %v2138_v36, 1  ;;  %v5784_v39 = vpack.c.bf16 %v1949_v61, %v1949_v61  ;;  %v5787_v58 = vsel %vm795_vm3, %v2286_v14, %v2288_v49  ;;  %v5790_v45 = vsel %vm795_vm3, %v2436_v6, %v2438_v30 }
 0x338   : > { %v5793_v25 = vsel %vm795_vm3, %v2438_v30, %v2440_v16  ;;  %v5796_v23 = vsel %vm795_vm3, %v2440_v16, %v2442_v4  ;;  %v2595_v21 = vrot.slane %v2593_v12, 1  ;;  %v2598_v22 = vrot.slane %v2596_v48, 2 }
 0x339   : > { %4257 = vmatmul.mubr.msk.bf16.gmra.mrb[12].mxu1 %vm1994_vm9, %v5704_v0  ;;  %v2914_v36 = vrot.slane %v5784_v39, 2  ;;  %v3072_v61 = vshrl.u32 %v5784_v39, 16  ;;  %v3075_v14 = vshll.u32 %v5784_v39, 16  ;;  %v5807_v49 = vsel %vm543_vm2, %v2136_v33, %v2140_v2 }
 0x33a   : > { %4260 = vmatprep.mubr.msk.bf16.mxu1 %vm4932_vm1, %v6284_v1  ;;  %v2599_v16 = vor.u32 %v2598_v22, %v2595_v21  ;;  %v2604_v12 = vrot.slane %v2602_v24, 1  ;;  %v2607_v48 = vrot.slane %v2605_v54, 2  ;;  %v2611_v44 = vshrl.u32 %v5761_v51, 16 }
 0x33b   : > { %v5809_v30 = vrot.slane %v3072_v61, 2  ;;  %v5811_v4 = vrot.slane %v3075_v14, 3  ;;  %v2614_v3 = vshll.u32 %v5761_v51, 16  ;;  %v2622_v1 = vrot.slane %v2620_v19, 1 }
 0x33c   : > { %v5817_v6 = vsel %vm1060_vm6, %v5713_v53, %v2599_v16  ;;  %v2608_v28 = vor.u32 %v2607_v48, %v2604_v12  ;;  %v2625_v46 = vrot.slane %v2623_v57, 2  ;;  %v2613_v2 = vrot.slane %v2611_v44, 1 }
 0x33d   : > { %v2616_v33 = vrot.slane %v2614_v3, 2  ;;  %v6288_v24 = vrot.slane %v5678_v15, 2  ;;  %v6289_v54 = vrot.slane %v5663_v41, 2  ;;  %v2762_v21 = vrot.slane %v5706_v34, 2 }
 0x33e   : > { %v5828_v61 = vsel %vm1060_vm6, %v2599_v16, %v2608_v28  ;;  %v2626_v14 = vor.u32 %v2625_v46, %v2622_v1  ;;  %v2764_v53 = vrot.slane %v5726_v18, 2  ;;  %v2766_v19 = vrot.slane %v5761_v51, 2 }
 0x33f   : > { %v5824_v22 = vsel %vm1229_vm7, %v6289_v54, %v6288_v24  ;;  %v2617_v57 = vor.u32 %v2616_v33, %v2613_v2  ;;  %v6290_v44 = vmov %v6288_v24  ;;  %v2768_v41 = vrot.slane %v5752_v43, 2 }
 0x340   : > { %v5835_v3 = vsel %vm1229_vm7, %v6290_v44, %v2762_v21  ;;  %v2906_v12 = vrot.slane %v5676_v56, 2  ;;  %v5840_v34 = vsel %vm1229_vm7, %v2762_v21, %v2764_v53  ;;  %v5843_v16 = vsel %vm1229_vm7, %v2764_v53, %v2766_v19 }
 0x341   : > { %v2908_v1 = vrot.slane %v5704_v0, 2  ;;  %v2910_v46 = vrot.slane %v5724_v35, 2  ;;  %4261 = vmatmul.mubr.msk.bf16.gmra.mrb[16].mxu1 %vm1994_vm9, %v5724_v35  ;;  %v5850_v15 = vsel %vm1060_vm6, %v2608_v28, %v2617_v57  ;;  %v5853_v18 = vsel %vm1060_vm6, %v2617_v57, %v2626_v14 }
 0x342   : > { %v5856_v43 = vsel %vm1229_vm7, %v2766_v19, %v2768_v41  ;;  %v6291_v51 = vrot.slane %v5661_v13, 2  ;;  %v6292_v2 = vmov 0.0   ;;  %v2912_v24 = vrot.slane %v5763_v42, 2 }
 0x343   : > { %4272 = vmatprep.mubr.msk.bf16.mxu1 %vm4932_vm1, %v6292_v2  ;;  %v5866_v33 = vsel %vm1229_vm7, %v2906_v12, %v2908_v1  ;;  %v5869_v28 = vsel %vm1229_vm7, %v2908_v1, %v2910_v46  ;;  %v6293_v54 = vshll.u32 %v5661_v13, 16  ;;  %v3052_v14 = vor.u32 %v5709_v20, %v5721_v47 }
 0x344   : > { %v5861_v48 = vsel %vm1229_vm7, %v6291_v51, %v2906_v12  ;;  %v6294_v53 = vshrl.u32 %v5704_v0, 16  ;;  %v6295_v57 = vshll.u32 %v5704_v0, 16  ;;  %v6296_v41 = vshrl.u32 %v5724_v35, 16 }
 0x345   : > { %v3048_v21 = vrot.slane %v6293_v54, 3  ;;  %v5883_v1 = vsel %vm1229_vm7, %v2910_v46, %v2912_v24  ;;  %v5886_v51 = vsel %vm1229_vm7, %v2912_v24, %v2914_v36  ;;  %v6297_v7 = vshll.u32 %v5724_v35, 16  ;;  %v4895_v46 = vld [vmem:[%s6275_s5 + $0x40] sm:$0xff]  }
 0x346   : > { %v3054_v19 = vrot.slane %v6294_v53, 2  ;;  %v3055_v44 = vrot.slane %v6295_v57, 3  ;;  %v3058_v12 = vrot.slane %v6296_v41, 2  ;;  %v3063_v53 = vshrl.u32 %v5763_v42, 16 }
 0x347   : > { %v3049_v54 = vor.u32 %v3048_v21, %v5683_v59  ;;  %v3059_v20 = vrot.slane %v6297_v7, 3  ;;  %v3066_v11 = vshll.u32 %v5763_v42, 16  ;;  %v3078_v57 = vor.u32 %v5811_v4, %v5809_v30 }
 0x348   : > { %v3056_v47 = vor.u32 %v3055_v44, %v3054_v19  ;;  %v3211_v59 = vrot.slane %v5661_v13, 3  ;;  %v3212_v7 = vrot.slane %v5676_v56, 3  ;;  %v3065_v19 = vrot.slane %v3063_v53, 2 }
 0x349   : > { %v5899_v36 = vsel %vm1486_vm8, %v3049_v54, %v3052_v14  ;;  %v3060_v24 = vor.u32 %v3059_v20, %v3058_v12  ;;  %v3068_v44 = vrot.slane %v3066_v11, 3  ;;  %v3214_v41 = vrot.slane %v5704_v0, 3  ;;  %4273 = vmatmul.mubr.msk.bf16.vlgmr.msra.gmra.mrb[0].mxu1 %vm1994_vm9, %v5701_v52  ;;  %v4896_v11 = vld [vmem:[%s6275_s5 + $0x48] sm:$0xff]  }
 0x34a   : > { %v5904_v21 = vsel %vm1486_vm8, %v3052_v14, %v3056_v47  ;;  %v5911_v4 = vsel %vm1635_vm5, %v3211_v59, %v3212_v7  ;;  %v3216_v54 = vrot.slane %v5724_v35, 3  ;;  %v3218_v12 = vrot.slane %v5763_v42, 3  ;;  %4293 = vmatpush3.bf16.msra.mxu1 %v4895_v46  ;;  %4276 = vmatprep.mubr.msk.bf16.mxu1 %vm4932_vm1, %v6292_v2 }
 0x34b   : > { %v5908_v30 = vsel %vm1486_vm8, %v3056_v47, %v3060_v24  ;;  %v3069_v13 = vor.u32 %v3068_v44, %v3065_v19  ;;  %v5918_v56 = vsel %vm1635_vm5, %v3212_v7, %v3214_v41  ;;  %v6298_v52 = vrot.slane %v5784_v39, 3  ;;  %4294 = vmatprep.subr.bf16.mxu1 %v6292_v2  ;;  %v4897_v47 = vld [vmem:[%s6275_s5 + $0x50] sm:$0xff]   ;;  %v4898_v39 = vld [vmem:[%s6275_s5 + $0x58] sm:$0xff]  }
 0x34c   : > { %v5926_v0 = vsel %vm1635_vm5, %v3214_v41, %v3216_v54  ;;  %v5929_v35 = vsel %vm1635_vm5, %v3216_v54, %v3218_v12 }
 0x34d   : > { %v5934_v42 = vsel %vm1635_vm5, %v3218_v12, %v6298_v52  ;;  %v5938_v14 = vsel %vm1486_vm8, %v3060_v24, %v3069_v13  ;;  %v5941_v20 = vsel %vm1486_vm8, %v3069_v13, %v3078_v57 }
 0x34e   : > { %4295 = vmatpush3.bf16.msra.mxu1 %v4896_v11 }
 0x34f   : > { %4296 = vmatprep.subr.bf16.mxu1 %v6292_v2 }
 0x351   : > { %4277 = vmatmul.mubr.msk.bf16.gmra.mrb[4].mxu1 %vm1994_vm9, %v5719_v26  ;;  %v4899_v26 = vld [vmem:[%s6275_s5 + $0x60] sm:$0xff]  }
 0x352   : > { %4280 = vmatprep.mubr.msk.bf16.mxu1 %vm4932_vm1, %v6292_v2  ;;  %4297 = vmatpush3.bf16.msra.mxu1 %v4897_v47 }
 0x353   : > { %4298 = vmatprep.subr.bf16.mxu1 %v6292_v2 }
 0x356   : > { %4299 = vmatpush3.bf16.msra.mxu1 %v4898_v39 }
 0x357   : > { %4320 = vmatprep.subr.bf16.mxu1 %v6292_v2 }
 0x359   : > { %4281 = vmatmul.mubr.msk.bf16.gmra.mrb[8].mxu1 %vm1994_vm9, %v5748_v32  ;;  %v4900_v32 = vld [vmem:[%s6275_s5 + $0x68] sm:$0xff]  }
 0x35a   : > { %4284 = vmatprep.mubr.msk.bf16.mxu1 %vm4932_vm1, %v6292_v2 }
 0x361   : > { %4285 = vmatmul.mubr.msk.bf16.gmra.mrb[12].mxu1 %vm1994_vm9, %v5778_v50  ;;  %v4901_v50 = vld [vmem:[%s6275_s5 + $0x70] sm:$0xff]  }
 0x362   : > { %4288 = vmatprep.mubr.msk.bf16.mxu1 %vm4932_vm1, %v6292_v2 }
 0x369   : > { %4289 = vmatmul.mubr.msk.bf16.gmra.mrb[16].mxu1 %vm1994_vm9, %v5807_v49  ;;  %v4914_v49 = vld [vmem:[%s6275_s5 + $0xd8] sm:$0xff]  }
 0x36a   : > { %4300 = vmatprep.mubr.msk.bf16.mxu1 %vm4932_vm1, %v6292_v2 }
 0x371   : > { %4301 = vmatmul.mubr.msk.bf16.vlgmr.msra.gmra.mrb[0].mxu1 %vm1994_vm9, %v5686_v55  ;;  %v4902_v55 = vld [vmem:[%s6275_s5 + $0x78] sm:$0xff]  }
 0x372   : > { %4321 = vmatpush3.bf16.msra.mxu1 %v4899_v26  ;;  %4304 = vmatprep.mubr.msk.bf16.mxu1 %vm4932_vm1, %v6292_v2 }
 0x373   : > { %4322 = vmatprep.subr.bf16.mxu1 %v6292_v2 }
 0x376   : > { %4323 = vmatpush3.bf16.msra.mxu1 %v4900_v32 }
 0x377   : > { %4324 = vmatprep.subr.bf16.mxu1 %v6292_v2 }
 0x379   : > { %4305 = vmatmul.mubr.msk.bf16.gmra.mrb[4].mxu1 %vm1994_vm9, %v5732_v5  ;;  %v4903_v5 = vld [vmem:[%s6275_s5 + $0x80] sm:$0xff]  }
 0x37a   : > { %4308 = vmatprep.mubr.msk.bf16.mxu1 %vm4932_vm1, %v6292_v2  ;;  %4325 = vmatpush3.bf16.msra.mxu1 %v4901_v50 }
 0x37b   : > { %4326 = vmatprep.subr.bf16.mxu1 %v6292_v2 }
 0x37e   : > { %4327 = vmatpush3.bf16.msra.mxu1 %v4902_v55 }
 0x37f   : > { %4348 = vmatprep.subr.bf16.mxu1 %v6292_v2 }
 0x381   : > { %4309 = vmatmul.mubr.msk.bf16.gmra.mrb[8].mxu1 %vm1994_vm9, %v5759_v10  ;;  %v4904_v10 = vld [vmem:[%s6275_s5 + $0x88] sm:$0xff]  }
 0x382   : > { %4312 = vmatprep.mubr.msk.bf16.mxu1 %vm4932_vm1, %v6292_v2 }
 0x389   : > { %4313 = vmatmul.mubr.msk.bf16.gmra.mrb[12].mxu1 %vm1994_vm9, %v5774_v60  ;;  %v4905_v60 = vld [vmem:[%s6275_s5 + $0x90] sm:$0xff]  }
 0x38a   : > { %4316 = vmatprep.mubr.msk.bf16.mxu1 %vm4932_vm1, %v6292_v2 }
 0x391   : > { %4317 = vmatmul.mubr.msk.bf16.gmra.mrb[16].mxu1 %vm1994_vm9, %v5787_v58  ;;  %v4908_v58 = vld [vmem:[%s6275_s5 + $0xa8] sm:$0xff]  }
 0x392   : > { %4328 = vmatprep.mubr.msk.bf16.mxu1 %vm4932_vm1, %v6292_v2 }
 0x399   : > { %4329 = vmatmul.mubr.msk.bf16.vlgmr.msra.gmra.mrb[0].mxu1 %vm1994_vm9, %v5736_v27  ;;  %v4906_v27 = vld [vmem:[%s6275_s5 + $0x98] sm:$0xff]  }
 0x39a   : > { %4349 = vmatpush3.bf16.msra.mxu1 %v4903_v5  ;;  %4332 = vmatprep.mubr.msk.bf16.mxu1 %vm4932_vm1, %v6292_v2 }
 0x39b   : > { %4350 = vmatprep.subr.bf16.mxu1 %v6292_v2 }
 0x39e   : > { %4351 = vmatpush3.bf16.msra.mxu1 %v4904_v10 }
 0x39f   : > { %4352 = vmatprep.subr.bf16.mxu1 %v6292_v2 }
 0x3a1   : > { %4333 = vmatmul.mubr.msk.bf16.gmra.mrb[4].mxu1 %vm1994_vm9, %v5771_v29  ;;  %v4907_v29 = vld [vmem:[%s6275_s5 + $0xa0] sm:$0xff]  }
 0x3a2   : > { %4336 = vmatprep.mubr.msk.bf16.mxu1 %vm4932_vm1, %v6292_v2  ;;  %4353 = vmatpush3.bf16.msra.mxu1 %v4905_v60 }
 0x3a3   : > { %4354 = vmatprep.subr.bf16.mxu1 %v6292_v2 }
 0x3a6   : > { %4355 = vmatpush3.bf16.msra.mxu1 %v4906_v27 }
 0x3a7   : > { %4376 = vmatprep.subr.bf16.mxu1 %v6292_v2 }
 0x3a9   : > { %4337 = vmatmul.mubr.msk.bf16.gmra.mrb[8].mxu1 %vm1994_vm9, %v5790_v45  ;;  %v4909_v45 = vld [vmem:[%s6275_s5 + $0xb0] sm:$0xff]  }
 0x3aa   : > { %4340 = vmatprep.mubr.msk.bf16.mxu1 %vm4932_vm1, %v6292_v2 }
 0x3b1   : > { %4341 = vmatmul.mubr.msk.bf16.gmra.mrb[12].mxu1 %vm1994_vm9, %v5793_v25  ;;  %v4911_v25 = vld [vmem:[%s6275_s5 + $0xc0] sm:$0xff]  }
 0x3b2   : > { %4344 = vmatprep.mubr.msk.bf16.mxu1 %vm4932_vm1, %v6292_v2 }
 0x3b9   : > { %4345 = vmatmul.mubr.msk.bf16.gmra.mrb[16].mxu1 %vm1994_vm9, %v5796_v23  ;;  %v4912_v23 = vld [vmem:[%s6275_s5 + $0xc8] sm:$0xff]  }
 0x3ba   : > { %4356 = vmatprep.mubr.msk.bf16.mxu1 %vm4932_vm1, %v6292_v2 }
 0x3c1   : > { %4357 = vmatmul.mubr.msk.bf16.vlgmr.msra.gmra.mrb[0].mxu1 %vm1994_vm9, %v5741_v31  ;;  %v4910_v31 = vld [vmem:[%s6275_s5 + $0xb8] sm:$0xff]  }
 0x3c2   : > { %4377 = vmatpush3.bf16.msra.mxu1 %v4907_v29  ;;  %4360 = vmatprep.mubr.msk.bf16.mxu1 %vm4932_vm1, %v6292_v2 }
 0x3c3   : > { %4378 = vmatprep.subr.bf16.mxu1 %v6292_v2 }
 0x3c6   : > { %4379 = vmatpush3.bf16.msra.mxu1 %v4908_v58 }
 0x3c7   : > { %4380 = vmatprep.subr.bf16.mxu1 %v6292_v2 }
 0x3c9   : > { %4361 = vmatmul.mubr.msk.bf16.gmra.mrb[4].mxu1 %vm1994_vm9, %v5817_v6  ;;  %v4913_v6 = vld [vmem:[%s6275_s5 + $0xd0] sm:$0xff]  }
 0x3ca   : > { %4364 = vmatprep.mubr.msk.bf16.mxu1 %vm4932_vm1, %v6292_v2  ;;  %4381 = vmatpush3.bf16.msra.mxu1 %v4909_v45 }
 0x3cb   : > { %4382 = vmatprep.subr.bf16.mxu1 %v6292_v2 }
 0x3ce   : > { %4383 = vmatpush3.bf16.msra.mxu1 %v4910_v31 }
 0x3cf   : > { %4404 = vmatprep.subr.bf16.mxu1 %v6292_v2 }
 0x3d1   : > { %4365 = vmatmul.mubr.msk.bf16.gmra.mrb[8].mxu1 %vm1994_vm9, %v5828_v61  ;;  %v4916_v61 = vld [vmem:[%s6275_s5 + $0xe8] sm:$0xff]  }
 0x3d2   : > { %4368 = vmatprep.mubr.msk.bf16.mxu1 %vm4932_vm1, %v6292_v2 }
 0x3d9   : > { %4369 = vmatmul.mubr.msk.bf16.gmra.mrb[12].mxu1 %vm1994_vm9, %v5850_v15  ;;  %v4920_v15 = vld [vmem:[%s6275_s5 + $0x108] sm:$0xff]  }
 0x3da   : > { %4372 = vmatprep.mubr.msk.bf16.mxu1 %vm4932_vm1, %v6292_v2 }
 0x3e1   : > { %4373 = vmatmul.mubr.msk.bf16.gmra.mrb[16].mxu1 %vm1994_vm9, %v5853_v18  ;;  %v4921_v18 = vld [vmem:[%s6275_s5 + $0x110] sm:$0xff]  }
 0x3e2   : > { %4384 = vmatprep.mubr.msk.bf16.mxu1 %vm4932_vm1, %v6292_v2 }
 0x3e9   : > { %4385 = vmatmul.mubr.msk.bf16.vlgmr.msra.gmra.mrb[0].mxu1 %vm1994_vm9, %v5824_v22  ;;  %v4915_v22 = vld [vmem:[%s6275_s5 + $0xe0] sm:$0xff]  }
 0x3ea   : > { %4405 = vmatpush3.bf16.msra.mxu1 %v4911_v25  ;;  %4388 = vmatprep.mubr.msk.bf16.mxu1 %vm4932_vm1, %v6292_v2  ;;  %v6299_v25 = vld [vmem:[#allocation2_spill] sm:$0xff] }
 0x3eb   : > { %4406 = vmatprep.subr.bf16.mxu1 %v6292_v2 }
 0x3ee   : > { %4407 = vmatpush3.bf16.msra.mxu1 %v4912_v23 }
 0x3ef   : > { %4408 = vmatprep.subr.bf16.mxu1 %v6292_v2 }
 0x3f1   : > { %4389 = vmatmul.mubr.msk.bf16.gmra.mrb[4].mxu1 %vm1994_vm9, %v5835_v3  ;;  %v4917_v3 = vld [vmem:[%s6275_s5 + $0xf0] sm:$0xff]  }
 0x3f2   : > { %4392 = vmatprep.mubr.msk.bf16.mxu1 %vm4932_vm1, %v6292_v2  ;;  %4409 = vmatpush3.bf16.msra.mxu1 %v4913_v6 }
 0x3f3   : > { %4410 = vmatprep.subr.bf16.mxu1 %v6292_v2 }
 0x3f6   : > { %4411 = vmatpush3.bf16.msra.mxu1 %v4914_v49 }
 0x3f7   : > { %4432 = vmatprep.subr.bf16.mxu1 %v6292_v2 }
 0x3f9   : > { %4393 = vmatmul.mubr.msk.bf16.gmra.mrb[8].mxu1 %vm1994_vm9, %v5840_v34  ;;  %v4918_v34 = vld [vmem:[%s6275_s5 + $0xf8] sm:$0xff]  }
 0x3fa   : > { %4396 = vmatprep.mubr.msk.bf16.mxu1 %vm4932_vm1, %v6292_v2 }
 0x401   : > { %4397 = vmatmul.mubr.msk.bf16.gmra.mrb[12].mxu1 %vm1994_vm9, %v5843_v16  ;;  %v4919_v16 = vld [vmem:[%s6275_s5 + $0x100] sm:$0xff]  }
 0x402   : > { %4400 = vmatprep.mubr.msk.bf16.mxu1 %vm4932_vm1, %v6292_v2 }
 0x409   : > { %4401 = vmatmul.mubr.msk.bf16.gmra.mrb[16].mxu1 %vm1994_vm9, %v5856_v43  ;;  %v4922_v43 = vld [vmem:[%s6275_s5 + $0x118] sm:$0xff]  }
 0x40a   : > { %4412 = vmatprep.mubr.msk.bf16.mxu1 %vm4932_vm1, %v6292_v2 }
 0x411   : > { %4413 = vmatmul.mubr.msk.bf16.vlgmr.msra.gmra.mrb[0].mxu1 %vm1994_vm9, %v5861_v48 }
 0x412   : > { %4433 = vmatpush3.bf16.msra.mxu1 %v4915_v22  ;;  %4416 = vmatprep.mubr.msk.bf16.mxu1 %vm4932_vm1, %v6292_v2  ;;  %v6300_v22 = vld [vmem:[#allocation3_spill] sm:$0xff] }
 0x413   : > { %4434 = vmatprep.subr.bf16.mxu1 %v6292_v2 }
 0x416   : > { %4435 = vmatpush3.bf16.msra.mxu1 %v4916_v61 }
 0x417   : > { %4436 = vmatprep.subr.bf16.mxu1 %v6292_v2 }
 0x419   : > { %4417 = vmatmul.mubr.msk.bf16.gmra.mrb[4].mxu1 %vm1994_vm9, %v5866_v33  ;;  %v6204_v33 = vld [vmem:[%s6276_s6] ss:$0 sm:$0xff] }
 0x41a   : > { %4420 = vmatprep.mubr.msk.bf16.mxu1 %vm4932_vm1, %v6292_v2  ;;  %4437 = vmatpush3.bf16.msra.mxu1 %v4917_v3 }
 0x41b   : > { %4438 = vmatprep.subr.bf16.mxu1 %v6292_v2 }
 0x41e   : > { %4439 = vmatpush3.bf16.msra.mxu1 %v4918_v34 }
 0x41f   : > { %4460 = vmatprep.subr.bf16.mxu1 %v6292_v2 }
 0x421   : > { %4421 = vmatmul.mubr.msk.bf16.gmra.mrb[8].mxu1 %vm1994_vm9, %v5869_v28 }
 0x422   : > { %4424 = vmatprep.mubr.msk.bf16.mxu1 %vm4932_vm1, %v6292_v2 }
 0x429   : > { %4425 = vmatmul.mubr.msk.bf16.gmra.mrb[12].mxu1 %vm1994_vm9, %v5883_v1 }
 0x42a   : > { %4428 = vmatprep.mubr.msk.bf16.mxu1 %vm4932_vm1, %v6292_v2 }
 0x431   : > { %4429 = vmatmul.mubr.msk.bf16.gmra.mrb[16].mxu1 %vm1994_vm9, %v5886_v51  ;;  %v6210_v51 = vld [vmem:[%s6277_s7] ss:$0 sm:$0xff] }
 0x432   : > { %4440 = vmatprep.mubr.msk.bf16.mxu1 %vm4932_vm1, %v6292_v2 }
 0x439   : > { %4441 = vmatmul.mubr.msk.bf16.vlgmr.msra.gmra.mrb[0].mxu1 %vm1994_vm9, %v5899_v36 }
 0x43a   : > { %4461 = vmatpush3.bf16.msra.mxu1 %v4919_v16  ;;  %4444 = vmatprep.mubr.msk.bf16.mxu1 %vm4932_vm1, %v6292_v2 }
 0x43b   : > { %4462 = vmatprep.subr.bf16.mxu1 %v6292_v2 }
 0x43e   : > { %4463 = vmatpush3.bf16.msra.mxu1 %v4920_v15 }
 0x43f   : > { %4464 = vmatprep.subr.bf16.mxu1 %v6292_v2 }
 0x441   : > { %4445 = vmatmul.mubr.msk.bf16.gmra.mrb[4].mxu1 %vm1994_vm9, %v5904_v21 }
 0x442   : > { %4448 = vmatprep.mubr.msk.bf16.mxu1 %vm4932_vm1, %v6292_v2  ;;  %4465 = vmatpush3.bf16.msra.mxu1 %v4921_v18 }
 0x443   : > { %4466 = vmatprep.subr.bf16.mxu1 %v6292_v2 }
 0x446   : > { %4467 = vmatpush3.bf16.msra.mxu1 %v4922_v43 }
 0x449   : > { %4449 = vmatmul.mubr.msk.bf16.gmra.mrb[8].mxu1 %vm1994_vm9, %v5908_v30 }
 0x44a   : > { %4452 = vmatprep.mubr.msk.bf16.mxu1 %vm4932_vm1, %v6292_v2 }
 0x451   : > { %4453 = vmatmul.mubr.msk.bf16.gmra.mrb[12].mxu1 %vm1994_vm9, %v5938_v14 }
 0x452   : > { %4456 = vmatprep.mubr.msk.bf16.mxu1 %vm4932_vm1, %v6292_v2 }
 0x459   : > { %4457 = vmatmul.mubr.msk.bf16.gmra.mrb[16].mxu1 %vm1994_vm9, %v5941_v20 }
 0x45a   : > { %4468 = vmatprep.mubr.msk.bf16.mxu1 %vm4932_vm1, %v6292_v2 }
 0x461   : > { %4469 = vmatmul.mubr.msk.bf16.vlgmr.msra.gmra.mrb[0].mxu1 %vm1994_vm9, %v5911_v4 }
 0x462   : > { %4472 = vmatprep.mubr.msk.bf16.mxu1 %vm4932_vm1, %v6292_v2 }
 0x469   : > { %4473 = vmatmul.mubr.msk.bf16.gmra.mrb[4].mxu1 %vm1994_vm9, %v5918_v56 }
 0x46a   : > { %4476 = vmatprep.mubr.msk.bf16.mxu1 %vm4932_vm1, %v6292_v2 }
 0x471   : > { %4477 = vmatmul.mubr.msk.bf16.gmra.mrb[8].mxu1 %vm1994_vm9, %v5926_v0 }
 0x472   : > { %4480 = vmatprep.mubr.msk.bf16.mxu1 %vm4932_vm1, %v6292_v2 }
 0x479   : > { %4481 = vmatmul.mubr.msk.bf16.gmra.mrb[12].mxu1 %vm1994_vm9, %v5929_v35 }
 0x47a   : > { %4484 = vmatprep.mubr.msk.bf16.mxu1 %vm4932_vm1, %v6292_v2 }
 0x481   : > { %4485 = vmatmul.mubr.msk.bf16.gmra.mrb[16].mxu1 %vm1994_vm9, %v5934_v42 }
 0x534   : > { %v3295_v48 = vpop.f32.mrb[0].mxu1 }
 0x535   : > { %v4528_v28 = vadd.f32 %v3295_v48, %v5632_v17  ;;  %v4470_v1 = vpop.f32.mrb[1].mxu1 }
 0x536   : > { %v3298_v53 = vpop.f32.mrb[2].mxu1 }
 0x537   : > { %v3351_v2 = vmul.f32 %v4528_v28, %v6204_v33  ;;  %v4529_v57 = vadd.f32 %v3298_v53, %v5634_v37  ;;  %v4471_v46 = vpop.f32.mrb[3].mxu1 }
 0x539   : > { %v3368_v36 = vadd.f32 %v6210_v51, %v3351_v2  ;;  %v3352_v24 = vmul.f32 %v4529_v57, %v6204_v33 }
 0x53b   : > { %v3378_v17 = vmax.f32 %v3368_v36, 0.0  ;;  %v3369_v59 = vadd.f32 %v6210_v51, %v3352_v24 }
 0x53c   : > { %v3303_v7 = vpop.f32.mrb[4].mxu1 }
 0x53d   : > { %3389 = vst.msk [vmem:[%s6220_s24] sm:$0xff] %vm3388_vm10, %v3378_v17  ;;  %v3379_v37 = vmax.f32 %v3369_v59, 0.0  ;;  %v4530_v21 = vadd.f32 %v3303_v7, %v5636_v62  ;;  %v4474_v19 = vpop.f32.mrb[5].mxu1 }
 0x53e   : > { %v3306_v44 = vpop.f32.mrb[6].mxu1 }
 0x53f   : > { %3390 = vst.msk [vmem:[%s6220_s24 + $0x8] sm:$0xff] %vm3388_vm10, %v3379_v37  ;;  %v3353_v41 = vmul.f32 %v4530_v21, %v6204_v33  ;;  %v4531_v30 = vadd.f32 %v3306_v44, %v5638_v9  ;;  %v4475_v4 = vpop.f32.mrb[7].mxu1 }
 0x541   : > { %v3370_v54 = vadd.f32 %v6210_v51, %v3353_v41  ;;  %v3354_v12 = vmul.f32 %v4531_v30, %v6204_v33 }
 0x543   : > { %v3380_v13 = vmax.f32 %v3370_v54, 0.0  ;;  %v3371_v56 = vadd.f32 %v6210_v51, %v3354_v12 }
 0x544   : > { %v3311_v11 = vpop.f32.mrb[8].mxu1 }
 0x545   : > { %3391 = vst.msk [vmem:[%s6220_s24 + $0x10] sm:$0xff] %vm3388_vm10, %v3380_v13  ;;  %v3381_v62 = vmax.f32 %v3371_v56, 0.0  ;;  %v4532_v0 = vadd.f32 %v3311_v11, %v5640_v63  ;;  %v4478_v35 = vpop.f32.mrb[9].mxu1 }
 0x546   : > { %v3314_v52 = vpop.f32.mrb[10].mxu1 }
 0x547   : > { %3392 = vst.msk [vmem:[%s6220_s24 + $0x18] sm:$0xff] %vm3388_vm10, %v3381_v62  ;;  %v3355_v9 = vmul.f32 %v4532_v0, %v6204_v33  ;;  %v4533_v42 = vadd.f32 %v3314_v52, %v5642_v8  ;;  %v4479_v14 = vpop.f32.mrb[11].mxu1 }
 0x549   : > { %v3372_v20 = vadd.f32 %v6210_v51, %v3355_v9  ;;  %v3356_v47 = vmul.f32 %v4533_v42, %v6204_v33 }
 0x54b   : > { %v3382_v39 = vmax.f32 %v3372_v20, 0.0  ;;  %v3373_v26 = vadd.f32 %v6210_v51, %v3356_v47 }
 0x54c   : > { %v3319_v32 = vpop.f32.mrb[12].mxu1 }
 0x54d   : > { %3393 = vst.msk [vmem:[%s6220_s24 + $0x20] sm:$0xff] %vm3388_vm10, %v3382_v39  ;;  %v3383_v63 = vmax.f32 %v3373_v26, 0.0  ;;  %v4534_v50 = vadd.f32 %v3319_v32, %v5644_v38  ;;  %v4482_v55 = vpop.f32.mrb[13].mxu1 }
 0x54e   : > { %v3322_v5 = vpop.f32.mrb[14].mxu1 }
 0x54f   : > { %3394 = vst.msk [vmem:[%s6220_s24 + $0x28] sm:$0xff] %vm3388_vm10, %v3383_v63  ;;  %v3357_v8 = vmul.f32 %v4534_v50, %v6204_v33  ;;  %v4535_v10 = vadd.f32 %v3322_v5, %v5646_v40  ;;  %v4483_v60 = vpop.f32.mrb[15].mxu1 }
 0x551   : > { %v3374_v27 = vadd.f32 %v6210_v51, %v3357_v8  ;;  %v3358_v29 = vmul.f32 %v4535_v10, %v6204_v33 }
 0x553   : > { %v3384_v58 = vmax.f32 %v3374_v27, 0.0  ;;  %v3375_v45 = vadd.f32 %v6210_v51, %v3358_v29 }
 0x554   : > { %v3327_v31 = vpop.f32.mrb[16].mxu1 }
 0x555   : > { %3395 = vst.msk [vmem:[%s6220_s24 + $0x30] sm:$0xff] %vm3388_vm10, %v3384_v58  ;;  %v3385_v38 = vmax.f32 %v3375_v45, 0.0  ;;  %v4536_v23 = vadd.f32 %v3327_v31, %v6299_v25  ;;  %v4486_v6 = vpop.f32.mrb[17].mxu1 }
 0x556   : > { %v3330_v49 = vpop.f32.mrb[18].mxu1 }
 0x557   : > { %3396 = vst.msk [vmem:[%s6220_s24 + $0x38] sm:$0xff] %vm3388_vm10, %v3385_v38  ;;  %v3359_v40 = vmul.f32 %v4536_v23, %v6204_v33  ;;  %v4537_v61 = vadd.f32 %v3330_v49, %v6300_v22  ;;  %v4487_v3 = vpop.f32.mrb[19].mxu1 }
 0x559   : > { %v3376_v34 = vadd.f32 %v6210_v51, %v3359_v40  ;;  %v3360_v16 = vmul.f32 %v4537_v61, %v6204_v33 }
 0x55b   : > { %v3386_v15 = vmax.f32 %v3376_v34, 0.0  ;;  %v3377_v18 = vadd.f32 %v6210_v51, %v3360_v16 }
 0x55d   : > { %3397 = vst.msk [vmem:[%s6220_s24 + $0x40] sm:$0xff] %vm3388_vm10, %v3386_v15  ;;  %v3387_v43 = vmax.f32 %v3377_v18, 0.0 }
 0x55f   : > { %3398 = vst.msk [vmem:[%s6220_s24 + $0x48] sm:$0xff] %vm3388_vm10, %v3387_v43 }
 0x560 PF: > { %s18_s27 = sadd.s32 1, %s4929_s27  }
 0x561   : > { %p15_p4 = scmp.ge.s32.totalorder %s18_s27, 4  }
 0x563   :  { %17 = sbr.rel (!%p15_p4) target bundleno = 1 (0x1), region = 101 }

// kernel: ncd_forward.17
= control target key start
LH: loop header
LB: loop body
LE: loop exit
PB: predicated region body
PF: predicated region fallthrough
CT: control target
= control target key end

     0   :  { %s1802_s0 = inlined_call_operand.vmem [shape: f32[2,8,960], index: 0, kind: input, shape index: {}]   ;;  %s1803_s1 = inlined_call_operand.vmem [shape: f32[960,64], index: 1, kind: input, shape index: {}]   ;;  %s1804_s2 = inlined_call_operand.vmem [shape: f32[64,8], index: 2, kind: input, shape index: {}]   ;;  %s1805_s3 = inlined_call_operand.<no memory space> [shape: f32[1,1], index: 3, kind: input, shape index: {}]   ;;  %s1806_s4 = inlined_call_operand.hbm [shape: f32[2,64,64], index: 4, kind: output, shape index: {}]  }
   0x1   :  { %v9_v0 = vstv %s1805_s3 }
   0x2   :  { %10 = vst [vmem:[#allocation2] sm:$0x1] %v9_v0 }
   0x3   :  { %11 = vsyncpa [#allocation4], 0 }
   0x4   :  { %13 = vsyncpa [#allocation4 + $0x1], 0  ;;  %s1267_s17 = smov 0   ;;  %s1269_s18 = smov 0  }
   0x5   :  { %s1271_s19 = smov 0   ;;  %s1273_s20 = smov 0  }
   0x6 LB: > { %s1288_s3 = sadd.s32 4294967295, %s1232_s20   ;;  %s842_s21 = sadd.s32 4294967294, %s1232_s20   ;;  %s1232_s20 = sphi %s1273_s20, %s1812_s20   ;;  %s1228_s19 = sphi %s1271_s19, %s1811_s19   ;;  %s1224_s18 = sphi %s1269_s18, %s1810_s18   ;;  %s1220_s17 = sphi %s1267_s17, %s1809_s17  }
   0x7   : > { %s1292_s22 = sadd.s32 1, %s1232_s20   ;;  %s115_s23 = sadd.s32 1, %s1228_s19 }
   0x8   : > { %s112_s24 = ssub.s32 %s1232_s20, %s1292_s22  ;;  %p125_p0 = scmp.ne.s32.totalorder %s1228_s19, %s1224_s18 }
   0x9   : > { %p113_p1 = scmp.eq.s32.totalorder %s112_s24, 0  ;;  %p126_p2 = scmp.eq.s32.totalorder %s1288_s3, 1 }
   0xa   : > { %p131_p3 = scmp.ne.s32.totalorder %s1224_s18, %s1220_s17  ;;  %p132_p4 = scmp.eq.s32.totalorder %s842_s21, 1 }
   0xb   : > { %s1303_s25 = scalar_select %p113_p1, %s1228_s19, %s115_s23  }
   0xc   : > { %p1305_p5 = por %p126_p2, %p125_p0  ;;  %p1309_p6 = por %p132_p4, %p131_p3 }
   0xd   : > { %p845_p7 = scmp.ge.s32.totalorder %s1232_s20, 1  ;;  %p167_p8 = scmp.lt.s32.totalorder %s1232_s20, 3 }
   0xf   : > { %p168_p9 = pnand %p845_p7, %p167_p8 }
  0x10   : > { %v222_v1 = vld [vmem:[%s1803_s1 + $0x80] sm:$0xff] (!%p168_p9)  ;;  %v223_v2 = vld [vmem:[%s1803_s1 + $0x88] sm:$0xff] (!%p168_p9)  ;;  %v224_v12 = vld [vmem:[%s1803_s1 + $0x90] sm:$0xff] (!%p168_p9)  ;;  %p193_p10 = scmp.lt.s32.totalorder (!%p168_p9), %s1288_s3, 1  ;;  %vm326_vm0 = vcmask (!%p168_p9), 523264   ;;  %vm628_vm1 = vcmask (!%p168_p9), 64512  }
  0x11   : > { %171 = sbr.rel (%p168_p9) target bundleno = 559 (0x22f), region = 36  ;;  %v254_v3 = vld [vmem:[%s1803_s1 + $0x180] sm:$0xff] (!%p168_p9)  ;;  %v994_v4 = vpack.c.bf16 (!%p168_p9), %v223_v2, %v222_v1  ;;  %v255_v5 = vld [vmem:[%s1803_s1 + $0x188] sm:$0xff] (!%p168_p9)  ;;  %v225_v14 = vld [vmem:[%s1803_s1 + $0x98] sm:$0xff] (!%p168_p9)  ;;  %s190_s29 = sand.u32 (!%p168_p9), 1, %s1224_s18  }
  0x12   : > { %v206_v6 = vld [vmem:[%s1803_s1] sm:$0xff] (!%p168_p9)  ;;  %v207_v7 = vld [vmem:[%s1803_s1 + $0x8] sm:$0xff] (!%p168_p9)  ;;  %v1026_v8 = vpack.c.bf16 (!%p168_p9), %v255_v5, %v254_v3  ;;  %v256_v15 = vld [vmem:[%s1803_s1 + $0x190] sm:$0xff] (!%p168_p9)  ;;  %v998_v17 = vpack.c.bf16 (!%p168_p9), %v225_v14, %v224_v12  ;;  %s846_s30 = sshll.u32 (!%p168_p9), %s190_s29, 6  ;;  %s865_s6 = sshll.u32 (!%p168_p9), %s1288_s3, 10 }
  0x13   : > { %v996_v9 = vpack.c.bf16 (!%p168_p9), %v207_v7, %v206_v6  ;;  %v238_v10 = vld [vmem:[%s1803_s1 + $0x100] sm:$0xff] (!%p168_p9)  ;;  %v239_v11 = vld [vmem:[%s1803_s1 + $0x108] sm:$0xff] (!%p168_p9)  ;;  %995 = vmatprep.subr.bf16.mxu0 (!%p168_p9), %v994_v4  ;;  %v257_v16 = vld [vmem:[%s1803_s1 + $0x198] sm:$0xff] (!%p168_p9)  ;;  %s192_s5 = scalar_lea.vmem (!%p168_p9), [#allocation3], %s846_s30  ;;  %s1236_s9 = smov (!%p168_p9), [#allocation3]  }
  0x14   : > { %v1028_v13 = vpack.c.bf16 (!%p168_p9), %v239_v11, %v238_v10  ;;  %1027 = vmatprep.subr.bf16.mxu1 (!%p168_p9), %v1026_v8  ;;  %v1030_v18 = vpack.c.bf16 (!%p168_p9), %v257_v16, %v256_v15  ;;  %v208_v19 = vld [vmem:[%s1803_s1 + $0x10] sm:$0xff] (!%p168_p9)  ;;  %v209_v20 = vld [vmem:[%s1803_s1 + $0x18] sm:$0xff] (!%p168_p9)  ;;  %v226_v24 = vld [vmem:[%s1803_s1 + $0xa0] sm:$0xff] (!%p168_p9)  ;;  %s1174_s10 = sshll.u32 (!%p168_p9), %s1236_s9, 4  ;;  %s1175_s10 = int_to_ptr.vmem [resolvable:$false] %s1174_s10 }
  0x15   : > { %997 = vmatpush3.bf16.msra.mxu0 (!%p168_p9), %v996_v9  ;;  %v240_v21 = vld [vmem:[%s1803_s1 + $0x110] sm:$0xff] (!%p168_p9)  ;;  %v1000_v22 = vpack.c.bf16 (!%p168_p9), %v209_v20, %v208_v19  ;;  %v241_v23 = vld [vmem:[%s1803_s1 + $0x118] sm:$0xff] (!%p168_p9)  ;;  %v227_v25 = vld [vmem:[%s1803_s1 + $0xa8] sm:$0xff] (!%p168_p9)  ;;  %s1176_s11 = scalar_lea.vmem (!%p168_p9), %s1175_s10, 2048 }
  0x16   : > { %1029 = vmatpush3.bf16.msra.mxu1 (!%p168_p9), %v1028_v13  ;;  %999 = vmatprep.subr.bf16.mxu0 (!%p168_p9), %v998_v17  ;;  %v1032_v26 = vpack.c.bf16 (!%p168_p9), %v241_v23, %v240_v21  ;;  %v1002_v27 = vpack.c.bf16 (!%p168_p9), %v227_v25, %v226_v24  ;;  %v258_v28 = vld [vmem:[%s1803_s1 + $0x1a0] sm:$0xff] (!%p168_p9)  ;;  %v259_v29 = vld [vmem:[%s1803_s1 + $0x1a8] sm:$0xff] (!%p168_p9)  ;;  %v228_v36 = vld [vmem:[%s1803_s1 + $0xb0] sm:$0xff] (!%p168_p9) }
  0x17   : > { %1031 = vmatprep.subr.bf16.mxu1 (!%p168_p9), %v1030_v18  ;;  %v210_v30 = vld [vmem:[%s1803_s1 + $0x20] sm:$0xff] (!%p168_p9)  ;;  %v1034_v31 = vpack.c.bf16 (!%p168_p9), %v259_v29, %v258_v28  ;;  %v211_v32 = vld [vmem:[%s1803_s1 + $0x28] sm:$0xff] (!%p168_p9)  ;;  %v229_v37 = vld [vmem:[%s1803_s1 + $0xb8] sm:$0xff] (!%p168_p9) }
  0x18   : > { %v242_v33 = vld [vmem:[%s1803_s1 + $0x120] sm:$0xff]  ;;  %v243_v34 = vld [vmem:[%s1803_s1 + $0x128] sm:$0xff]  ;;  %v1004_v35 = vpack.c.bf16 %v211_v32, %v210_v30  ;;  %v260_v38 = vld [vmem:[%s1803_s1 + $0x1b0] sm:$0xff]  ;;  %v1006_v40 = vpack.c.bf16 %v229_v37, %v228_v36  ;;  %s1427_s28 = scalar_select %p193_p10, %s1288_s3, 1 }
  0x19   : > { %1001 = vmatpush3.bf16.msra.mxu0 %v1000_v22  ;;  %v1036_v39 = vpack.c.bf16 %v243_v34, %v242_v33  ;;  %v261_v41 = vld [vmem:[%s1803_s1 + $0x1b8] sm:$0xff]  ;;  %v212_v42 = vld [vmem:[%s1803_s1 + $0x30] sm:$0xff]  ;;  %v230_v47 = vld [vmem:[%s1803_s1 + $0xc0] sm:$0xff]  ;;  %s1761_s3 = scalar_lea.sflag [#allocation4], %s190_s29 }
  0x1a   : > { %1033 = vmatpush3.bf16.msra.mxu1 %v1032_v26  ;;  %1003 = vmatprep.subr.bf16.mxu0 %v1002_v27  ;;  %v213_v43 = vld [vmem:[%s1803_s1 + $0x38] sm:$0xff]  ;;  %v1038_v44 = vpack.c.bf16 %v261_v41, %v260_v38  ;;  %v244_v45 = vld [vmem:[%s1803_s1 + $0x130] sm:$0xff]  ;;  %v231_v48 = vld [vmem:[%s1803_s1 + $0xc8] sm:$0xff]  ;;  %s864_s24 = sshll.u32 %s1427_s28, 6 }
  0x1b   : > { %1035 = vmatprep.subr.bf16.mxu1 %v1034_v31  ;;  %v245_v46 = vld [vmem:[%s1803_s1 + $0x138] sm:$0xff]  ;;  %v262_v49 = vld [vmem:[%s1803_s1 + $0x1c0] sm:$0xff]  ;;  %v263_v50 = vld [vmem:[%s1803_s1 + $0x1c8] sm:$0xff]  ;;  %v1008_v51 = vpack.c.bf16 %v213_v43, %v212_v42  ;;  %v1010_v53 = vpack.c.bf16 %v231_v48, %v230_v47  ;;  %s1475_s16 = scalar_lea.vmem %s1802_s0, %s864_s24  ;;  %s1753_s24 = scalar_lea.hbm %s1806_s4, %s865_s6 }
  0x1c   : > { %v1040_v52 = vpack.c.bf16 %v245_v46, %v244_v45  ;;  %v214_v54 = vld [vmem:[%s1803_s1 + $0x40] sm:$0xff]  ;;  %v215_v55 = vld [vmem:[%s1803_s1 + $0x48] sm:$0xff]  ;;  %v1042_v57 = vpack.c.bf16 %v263_v50, %v262_v49  ;;  %v232_v59 = vld [vmem:[%s1803_s1 + $0xd0] sm:$0xff] }
  0x1d   : > { %1005 = vmatpush3.bf16.msra.mxu0 %v1004_v35  ;;  %v246_v56 = vld [vmem:[%s1803_s1 + $0x140] sm:$0xff]  ;;  %v247_v58 = vld [vmem:[%s1803_s1 + $0x148] sm:$0xff]  ;;  %v233_v60 = vld [vmem:[%s1803_s1 + $0xd8] sm:$0xff]  ;;  %v1012_v63 = vpack.c.bf16 %v215_v55, %v214_v54 }
  0x1e   : > { %1037 = vmatpush3.bf16.msra.mxu1 %v1036_v39  ;;  %1007 = vmatprep.subr.bf16.mxu0 %v1006_v40  ;;  %v264_v61 = vld [vmem:[%s1803_s1 + $0x1d0] sm:$0xff]  ;;  %v265_v62 = vld [vmem:[%s1803_s1 + $0x1d8] sm:$0xff]  ;;  %v1044_v0 = vpack.c.bf16 %v247_v58, %v246_v56  ;;  %v1014_v1 = vpack.c.bf16 %v233_v60, %v232_v59  ;;  %v234_v7 = vld [vmem:[%s1803_s1 + $0xe0] sm:$0xff] }
  0x1f   : > { %1039 = vmatprep.subr.bf16.mxu1 %v1038_v44  ;;  %v216_v2 = vld [vmem:[%s1803_s1 + $0x50] sm:$0xff]  ;;  %v217_v3 = vld [vmem:[%s1803_s1 + $0x58] sm:$0xff]  ;;  %v1046_v5 = vpack.c.bf16 %v265_v62, %v264_v61  ;;  %v235_v8 = vld [vmem:[%s1803_s1 + $0xe8] sm:$0xff] }
  0x20   : > { %v248_v4 = vld [vmem:[%s1803_s1 + $0x150] sm:$0xff]  ;;  %v249_v6 = vld [vmem:[%s1803_s1 + $0x158] sm:$0xff]  ;;  %v266_v9 = vld [vmem:[%s1803_s1 + $0x1e0] sm:$0xff]  ;;  %v1016_v11 = vpack.c.bf16 %v217_v3, %v216_v2  ;;  %v1018_v15 = vpack.c.bf16 %v235_v8, %v234_v7 }
  0x21   : > { %1009 = vmatpush3.bf16.msra.mxu0 %v1008_v51  ;;  %v267_v10 = vld [vmem:[%s1803_s1 + $0x1e8] sm:$0xff]  ;;  %v218_v12 = vld [vmem:[%s1803_s1 + $0x60] sm:$0xff]  ;;  %v1048_v14 = vpack.c.bf16 %v249_v6, %v248_v4  ;;  %v201_v18 = vld [vmem:[%s1475_s16 + $0x18] sm:$0xff] }
  0x22   : > { %1041 = vmatpush3.bf16.msra.mxu1 %v1040_v52  ;;  %1011 = vmatprep.subr.bf16.mxu0 %v1010_v53  ;;  %v219_v13 = vld [vmem:[%s1803_s1 + $0x68] sm:$0xff]  ;;  %v250_v16 = vld [vmem:[%s1803_s1 + $0x160] sm:$0xff]  ;;  %v1050_v19 = vpack.c.bf16 %v267_v10, %v266_v9  ;;  %v236_v21 = vld [vmem:[%s1803_s1 + $0xf0] sm:$0xff]  ;;  %v1234_v52 = vmov 0.0|0.0  }
  0x23   : > { %1043 = vmatprep.subr.bf16.mxu1 %v1042_v57  ;;  %v199_v17 = vld [vmem:[%s1475_s16 + $0x8] sm:$0xff]  ;;  %v237_v22 = vld [vmem:[%s1803_s1 + $0xf8] sm:$0xff]  ;;  %v268_v23 = vld [vmem:[%s1803_s1 + $0x1f0] sm:$0xff]  ;;  %464 = vmatprep.mubr.f32.mxu1 %v201_v18  ;;  %v1020_v25 = vpack.c.bf16 %v219_v13, %v218_v12 }
  0x24   : > { %v251_v20 = vld [vmem:[%s1803_s1 + $0x168] sm:$0xff]  ;;  %394 = vmatprep.mubr.f32.mxu0 %v199_v17  ;;  %v269_v24 = vld [vmem:[%s1803_s1 + $0x1f8] sm:$0xff]  ;;  %v1022_v27 = vpack.c.bf16 %v237_v22, %v236_v21  ;;  %v220_v28 = vld [vmem:[%s1803_s1 + $0x70] sm:$0xff] }
  0x25   : > { %1013 = vmatpush3.bf16.msra.mxu0 %v1012_v63  ;;  %v1052_v26 = vpack.c.bf16 %v251_v20, %v250_v16  ;;  %v221_v29 = vld [vmem:[%s1803_s1 + $0x78] sm:$0xff]  ;;  %v252_v30 = vld [vmem:[%s1803_s1 + $0x170] sm:$0xff]  ;;  %v1054_v31 = vpack.c.bf16 %v269_v24, %v268_v23  ;;  %v286_v33 = vld [vmem:[%s1803_s1 + $0x280] sm:$0xff] }
  0x26   : > { %1045 = vmatpush3.bf16.msra.mxu1 %v1044_v0  ;;  %1015 = vmatprep.subr.bf16.mxu0 %v1014_v1  ;;  %v253_v32 = vld [vmem:[%s1803_s1 + $0x178] sm:$0xff]  ;;  %v287_v34 = vld [vmem:[%s1803_s1 + $0x288] sm:$0xff]  ;;  %v1024_v35 = vpack.c.bf16 %v221_v29, %v220_v28  ;;  %v270_v38 = vld [vmem:[%s1803_s1 + $0x200] sm:$0xff] }
  0x27   : > { %1047 = vmatprep.subr.bf16.mxu1 %v1046_v5  ;;  %v1056_v36 = vpack.c.bf16 %v253_v32, %v252_v30  ;;  %v1058_v37 = vpack.c.bf16 %v287_v34, %v286_v33  ;;  %v271_v39 = vld [vmem:[%s1803_s1 + $0x208] sm:$0xff]  ;;  %v302_v40 = vld [vmem:[%s1803_s1 + $0x300] sm:$0xff]  ;;  %v288_v42 = vld [vmem:[%s1803_s1 + $0x290] sm:$0xff] }
  0x28   : > { %v303_v41 = vld [vmem:[%s1803_s1 + $0x308] sm:$0xff]  ;;  %v289_v43 = vld [vmem:[%s1803_s1 + $0x298] sm:$0xff]  ;;  %v198_v44 = vld [vmem:[%s1475_s16] sm:$0xff]  ;;  %v1060_v46 = vpack.c.bf16 %v271_v39, %v270_v38 }
  0x29   : > { %1017 = vmatpush3.bf16.msra.mxu0 %v1016_v11  ;;  %v200_v45 = vld [vmem:[%s1475_s16 + $0x10] sm:$0xff]  ;;  %v1091_v47 = vpack.c.bf16 %v303_v41, %v302_v40  ;;  %v1062_v48 = vpack.c.bf16 %v289_v43, %v288_v42  ;;  %v273_v50 = vld [vmem:[%s1803_s1 + $0x218] sm:$0xff]  ;;  %v290_v54 = vld [vmem:[%s1803_s1 + $0x2a0] sm:$0xff] }
  0x2a   : > { %1049 = vmatpush3.bf16.msra.mxu1 %v1048_v14  ;;  %1019 = vmatprep.subr.bf16.mxu0 %v1018_v15  ;;  %v272_v49 = vld [vmem:[%s1803_s1 + $0x210] sm:$0xff]  ;;  %v305_v53 = vld [vmem:[%s1803_s1 + $0x318] sm:$0xff]  ;;  %v291_v55 = vld [vmem:[%s1803_s1 + $0x2a8] sm:$0xff] }
  0x2b   : > { %1051 = vmatprep.subr.bf16.mxu1 %v1050_v19  ;;  %v304_v51 = vld [vmem:[%s1803_s1 + $0x310] sm:$0xff]  ;;  %v1064_v56 = vpack.c.bf16 %v273_v50, %v272_v49  ;;  %v274_v57 = vld [vmem:[%s1803_s1 + $0x220] sm:$0xff]  ;;  %v1066_v59 = vpack.c.bf16 %v291_v55, %v290_v54  ;;  %v275_v60 = vld [vmem:[%s1803_s1 + $0x228] sm:$0xff] }
  0x2c   : > { %v1094_v58 = vpack.c.bf16 %v305_v53, %v304_v51  ;;  %v306_v61 = vld [vmem:[%s1803_s1 + $0x320] sm:$0xff]  ;;  %v307_v62 = vld [vmem:[%s1803_s1 + $0x328] sm:$0xff]  ;;  %v292_v63 = vld [vmem:[%s1803_s1 + $0x2b0] sm:$0xff]  ;;  %v1068_v2 = vpack.c.bf16 %v275_v60, %v274_v57 }
  0x2d   : > { %1021 = vmatpush3.bf16.msra.mxu0 %v1020_v25  ;;  %v293_v0 = vld [vmem:[%s1803_s1 + $0x2b8] sm:$0xff]  ;;  %v203_v1 = vld [vmem:[%s1475_s16 + $0x28] sm:$0xff]  ;;  %v276_v3 = vld [vmem:[%s1803_s1 + $0x230] sm:$0xff]  ;;  %v1097_v4 = vpack.c.bf16 %v307_v62, %v306_v61 }
  0x2e   : > { %1053 = vmatpush3.bf16.msra.mxu1 %v1052_v26  ;;  %1023 = vmatprep.subr.bf16.mxu0 %v1022_v27  ;;  %v1070_v5 = vpack.c.bf16 %v293_v0, %v292_v63  ;;  %v277_v6 = vld [vmem:[%s1803_s1 + $0x238] sm:$0xff]  ;;  %v308_v7 = vld [vmem:[%s1803_s1 + $0x330] sm:$0xff]  ;;  %v294_v9 = vld [vmem:[%s1803_s1 + $0x2c0] sm:$0xff] }
  0x2f   : > { %1055 = vmatprep.subr.bf16.mxu1 %v1054_v31  ;;  %v309_v8 = vld [vmem:[%s1803_s1 + $0x338] sm:$0xff]  ;;  %v295_v10 = vld [vmem:[%s1803_s1 + $0x2c8] sm:$0xff]  ;;  %v1072_v12 = vpack.c.bf16 %v277_v6, %v276_v3  ;;  %v278_v15 = vld [vmem:[%s1803_s1 + $0x240] sm:$0xff] }
  0x30   : > { %v205_v11 = vld [vmem:[%s1475_s16 + $0x38] sm:$0xff]  ;;  %v1100_v13 = vpack.c.bf16 %v309_v8, %v308_v7  ;;  %v1074_v14 = vpack.c.bf16 %v295_v10, %v294_v9  ;;  %v279_v16 = vld [vmem:[%s1803_s1 + $0x248] sm:$0xff]  ;;  %v310_v17 = vld [vmem:[%s1803_s1 + $0x340] sm:$0xff] }
  0x31   : > { %1025 = vmatpush3.bf16.msra.mxu0 %v1024_v35  ;;  %v311_v18 = vld [vmem:[%s1803_s1 + $0x348] sm:$0xff]  ;;  %v296_v19 = vld [vmem:[%s1803_s1 + $0x2d0] sm:$0xff]  ;;  %v297_v20 = vld [vmem:[%s1803_s1 + $0x2d8] sm:$0xff]  ;;  %v1076_v21 = vpack.c.bf16 %v279_v16, %v278_v15 }
  0x32   : > { %1057 = vmatpush3.bf16.msra.mxu1 %v1056_v36  ;;  %1059 = vmatprep.subr.bf16.mxu0 %v1058_v37  ;;  %v1103_v22 = vpack.c.bf16 %v311_v18, %v310_v17  ;;  %v1078_v23 = vpack.c.bf16 %v297_v20, %v296_v19  ;;  %v280_v24 = vld [vmem:[%s1803_s1 + $0x250] sm:$0xff]  ;;  %v281_v25 = vld [vmem:[%s1803_s1 + $0x258] sm:$0xff]  ;;  %v298_v28 = vld [vmem:[%s1803_s1 + $0x2e0] sm:$0xff] }
  0x33   : > { %1090 = vmatprep.subr.bf16.mxu1 %v1234_v52  ;;  %v312_v26 = vld [vmem:[%s1803_s1 + $0x350] sm:$0xff]  ;;  %v313_v27 = vld [vmem:[%s1803_s1 + $0x358] sm:$0xff]  ;;  %v299_v29 = vld [vmem:[%s1803_s1 + $0x2e8] sm:$0xff]  ;;  %v1080_v30 = vpack.c.bf16 %v281_v25, %v280_v24 }
  0x34   : > { %395 = vmatmul.mubr.f32.vlgmr.msra.gmra.mrb[0].mxu0 %v198_v44  ;;  %v1106_v31 = vpack.c.bf16 %v313_v27, %v312_v26  ;;  %v1082_v32 = vpack.c.bf16 %v299_v29, %v298_v28  ;;  %v282_v33 = vld [vmem:[%s1803_s1 + $0x260] sm:$0xff]  ;;  %v283_v34 = vld [vmem:[%s1803_s1 + $0x268] sm:$0xff]  ;;  %v300_v37 = vld [vmem:[%s1803_s1 + $0x2f0] sm:$0xff] }
  0x35   : > { %465 = vmatmul.mubr.f32.vlgmr.msra.gmra.mrb[0].mxu1 %v200_v45  ;;  %1061 = vmatpush3.bf16.msra.mxu0 %v1060_v46  ;;  %v314_v35 = vld [vmem:[%s1803_s1 + $0x360] sm:$0xff]  ;;  %v315_v36 = vld [vmem:[%s1803_s1 + $0x368] sm:$0xff]  ;;  %v301_v38 = vld [vmem:[%s1803_s1 + $0x2f8] sm:$0xff]  ;;  %v1084_v39 = vpack.c.bf16 %v283_v34, %v282_v33 }
  0x36   : > { %1092 = vmatpush1.bf16.msra.mxu1 %v1091_v47  ;;  %1063 = vmatprep.subr.bf16.mxu0 %v1062_v48  ;;  %v1109_v40 = vpack.c.bf16 %v315_v36, %v314_v35  ;;  %v1086_v41 = vpack.c.bf16 %v301_v38, %v300_v37  ;;  %v284_v42 = vld [vmem:[%s1803_s1 + $0x270] sm:$0xff]  ;;  %v285_v43 = vld [vmem:[%s1803_s1 + $0x278] sm:$0xff]  ;;  %v318_v48 = vld [vmem:[%s1803_s1 + $0x380] sm:$0xff] }
  0x37   : > { %1093 = vmatprep.subr.bf16.mxu1 %v1234_v52  ;;  %534 = vmatprep.mubr.f32.mxu0 %v203_v1  ;;  %v316_v44 = vld [vmem:[%s1803_s1 + $0x370] sm:$0xff]  ;;  %v317_v45 = vld [vmem:[%s1803_s1 + $0x378] sm:$0xff]  ;;  %v1088_v46 = vpack.c.bf16 %v285_v43, %v284_v42  ;;  %v319_v49 = vld [vmem:[%s1803_s1 + $0x388] sm:$0xff]  ;;  %v1235_v1 = vmov 0  }
  0x38   : > { %849 = vmatprep.mubr.msk.f32.mxu1 %vm326_vm0, %v205_v11  ;;  %v1112_v47 = vpack.c.bf16 %v317_v45, %v316_v44  ;;  %v202_v50 = vld [vmem:[%s1475_s16 + $0x20] sm:$0xff]  ;;  %v1115_v51 = vpack.c.bf16 %v319_v49, %v318_v48  ;;  %v320_v53 = vld [vmem:[%s1803_s1 + $0x390] sm:$0xff]  ;;  %v321_v54 = vld [vmem:[%s1803_s1 + $0x398] sm:$0xff]  ;;  %1169 = vset.pattern.permute.xlu0 %v1235_v1 }
  0x39   : > { %1065 = vmatpush3.bf16.msra.mxu0 %v1064_v56  ;;  %v1118_v55 = vpack.c.bf16 %v321_v54, %v320_v53  ;;  %v322_v56 = vld [vmem:[%s1803_s1 + $0x3a0] sm:$0xff]  ;;  %v323_v57 = vld [vmem:[%s1803_s1 + $0x3a8] sm:$0xff]  ;;  %v325_v60 = vld [vmem:[%s1803_s1 + $0x3b8] sm:$0xff] }
  0x3a   : > { %1095 = vmatpush1.bf16.msra.mxu1 %v1094_v58  ;;  %1067 = vmatprep.subr.bf16.mxu0 %v1066_v59  ;;  %v1121_v58 = vpack.c.bf16 %v323_v57, %v322_v56  ;;  %v324_v59 = vld [vmem:[%s1803_s1 + $0x3b0] sm:$0xff]  ;;  %v610_v63 = vld [vmem:[%s1804_s2] sm:$0xff]  ;;  %v611_v15 = vld [vmem:[%s1804_s2 + $0x8] sm:$0xff] }
  0x3b   : > { %1096 = vmatprep.subr.bf16.mxu1 %v1234_v52  ;;  %v1124_v61 = vpack.c.bf16 %v325_v60, %v324_v59  ;;  %v204_v62 = vld [vmem:[%s1475_s16 + $0x30] sm:$0xff]  ;;  %v850_v0 = vld [vmem:[#allocation2] ss:$0 sm:$0xff]  ;;  %v613_v17 = vld [vmem:[%s1804_s2 + $0x18] sm:$0xff]  ;;  %s780_s16 = sshll.u32 %s192_s5, 4  ;;  %s1755_s16 = int_to_ptr.vmem [resolvable:$true] %s780_s16 }
  0x3c   : > { %625 = vperm.xlu0 %1169, %v850_v0   ;;  %v612_v16 = vld [vmem:[%s1804_s2 + $0x10] sm:$0xff]  ;;  %v614_v18 = vld [vmem:[%s1804_s2 + $0x20] sm:$0xff]  ;;  %v615_v19 = vld [vmem:[%s1804_s2 + $0x28] sm:$0xff]  ;;  %s1170_s28 = scalar_lea.vmem %s1755_s16, 1024  ;;  %p1177_p0 = scmp.lt.s32.totalorder %s1755_s16, %s1175_s10 }
  0x3d   : > { %1069 = vmatpush3.bf16.msra.mxu0 %v1068_v2  ;;  %v616_v20 = vld [vmem:[%s1804_s2 + $0x30] sm:$0xff]  ;;  %p1171_p11 = scmp.ne.s32.totalorder %s1755_s16, %s1170_s28  ;;  %p1178_p1 = scmp.lt.s32.totalorder %s1176_s11, %s1170_s28 }
  0x3e   : > { %1098 = vmatpush1.bf16.msra.mxu1 %v1097_v4  ;;  %1071 = vmatprep.subr.bf16.mxu0 %v1070_v5 }
  0x3f   : > { %1099 = vmatprep.subr.bf16.mxu1 %v1234_v52  ;;  %p1172_p12 = pnand %p1171_p11, %p1305_p5  ;;  %p1179_p2 = por %p1178_p1, %p1177_p0 }
  0x41   : > { %1073 = vmatpush3.bf16.msra.mxu0 %v1072_v12  ;;  %p1173_p13 = pneg %p1172_p12 }
  0x42   : > { %1101 = vmatpush1.bf16.msra.mxu1 %v1100_v13  ;;  %1075 = vmatprep.subr.bf16.mxu0 %v1074_v14 }
  0x43   : > { %1102 = vmatprep.subr.bf16.mxu1 %v1234_v52  ;;  %p1180_p3 = pnand %p1179_p2, %p1173_p13 }
  0x45   : > { %1077 = vmatpush3.bf16.msra.mxu0 %v1076_v21  ;;  %v617_v21 = vld [vmem:[%s1804_s2 + $0x38] sm:$0xff] }
  0x46   : > { %1104 = vmatpush1.bf16.msra.mxu1 %v1103_v22  ;;  %1079 = vmatprep.subr.bf16.mxu0 %v1078_v23 }
  0x47   : > { %1105 = vmatprep.subr.bf16.mxu1 %v1234_v52 }
  0x49   : > { %1081 = vmatpush3.bf16.msra.mxu0 %v1080_v30 }
  0x4a   : > { %1107 = vmatpush1.bf16.msra.mxu1 %v1106_v31  ;;  %1083 = vmatprep.subr.bf16.mxu0 %v1082_v32 }
  0x4b   : > { %1108 = vmatprep.subr.bf16.mxu1 %v1234_v52 }
  0x4d   : > { %1085 = vmatpush3.bf16.msra.mxu0 %v1084_v39 }
  0x4e   : > { %1110 = vmatpush1.bf16.msra.mxu1 %v1109_v40  ;;  %1087 = vmatprep.subr.bf16.mxu0 %v1086_v41 }
  0x4f   : > { %1111 = vmatprep.subr.bf16.mxu1 %v1234_v52 }
  0x51   : > { %1089 = vmatpush3.bf16.msra.mxu0 %v1088_v46 }
  0x52   : > { %1113 = vmatpush1.bf16.msra.mxu1 %v1112_v47 }
  0x53   : > { %1114 = vmatprep.subr.bf16.mxu1 %v1234_v52 }
  0x54   : > { %535 = vmatmul.mubr.f32.vlgmr.msra.gmra.mrb[2].mxu0 %v202_v50 }
  0x55   : > { %982 = vmatprep.mubr.msk.f32.mxu0 %vm628_vm1, %v610_v63 }
  0x56   : > { %1116 = vmatpush1.bf16.msra.mxu1 %v1115_v51 }
  0x57   : > { %1117 = vmatprep.subr.bf16.mxu1 %v1234_v52 }
  0x5a   : > { %1119 = vmatpush1.bf16.msra.mxu1 %v1118_v55 }
  0x5b   : > { %1120 = vmatprep.subr.bf16.mxu1 %v1234_v52 }
  0x5e   : > { %1122 = vmatpush1.bf16.msra.mxu1 %v1121_v58 }
  0x5f   : > { %1123 = vmatprep.subr.bf16.mxu1 %v1234_v52 }
  0x62   : > { %1125 = vmatpush1.bf16.msra.mxu1 %v1124_v61 }
  0x65   : > { %605 = vmatmul.mubr.f32.vlgmr.msra.gmra.mrb[2].mxu1 %v204_v62 }
  0xbb   : > { %v626_v22 = vpop.permute.xlu0 %625 }
 0x107   : > { %v898_v2 = vpop.f32.mrb[0].mxu0 }
 0x108   : > { %v933_v3 = vpop.f32.mrb[0].mxu1  ;;  %v899_v4 = vpop.f32.mrb[1].mxu0 }
 0x109   : > { %v900_v5 = vadd.f32 %v899_v4, %v898_v2  ;;  %v934_v6 = vpop.f32.mrb[1].mxu1 }
 0x10a   : > { %v935_v52 = vadd.f32 %v934_v6, %v933_v3 }
 0x10c   : > { %v467_v7 = vadd.f32 %v935_v52, %v900_v5 }
 0x127   : > { %v968_v8 = vpop.f32.mrb[2].mxu0 }
 0x128   : > { %v969_v9 = vpop.f32.mrb[3].mxu0 }
 0x129   : > { %v970_v10 = vadd.f32 %v969_v9, %v968_v8 }
 0x12b   : > { %v537_v11 = vadd.f32 %v970_v10, %v467_v7 }
 0x138   : > { %v606_v12 = vpop.f32.mrb[2].mxu1 }
 0x139   : > { %v607_v13 = vadd.f32 %v606_v12, %v537_v11  ;;  %v608_v14 = vpop.f32.mrb[3].mxu1 }
 0x13b   : > { %980 = vmatprep.subr.mxu0 %v607_v13 }
 0x13c   : > { %981 = vmatpush3.msra.mxu0 %v607_v13 }
 0x13d   : > { %983 = vmatmul.mubr.msk.f32.vlgmr.msra.gmra.mrb[4].mxu0 %vm628_vm1, %v611_v15 }
 0x13e   : > { %985 = vmatprep.mubr.msk.f32.mxu0 %vm628_vm1, %v612_v16 }
 0x141   : > { %986 = vmatmul.mubr.msk.f32.gmra.mrb[6].mxu0 %vm628_vm1, %v613_v17 }
 0x142   : > { %988 = vmatprep.mubr.msk.f32.mxu0 %vm628_vm1, %v614_v18 }
 0x145   : > { %989 = vmatmul.mubr.msk.f32.gmra.mrb[8].mxu0 %vm628_vm1, %v615_v19 }
 0x146   : > { %991 = vmatprep.mubr.msk.f32.mxu0 %vm628_vm1, %v616_v20 }
 0x149   : > { %992 = vmatmul.mubr.msk.f32.gmra.mrb[10].mxu0 %vm628_vm1, %v617_v21 }
 0x210   : > { %v984_v23 = vpop.f32.mrb[4].mxu0 }
 0x211   : > { %v725_v24 = vadd.f32 %v984_v23, %v626_v22  ;;  %v719_v25 = vpop.f32.mrb[5].mxu0 }
 0x212   : > { %v720_v26 = vadd.f32 %v719_v25, %v626_v22 }
 0x213   : > { %759 = vst.msk [vmem:[%s192_s5 + $0x8] sm:$0xff] %vm326_vm0, %v725_v24 }
 0x214   : > { %758 = vst.msk [vmem:[%s192_s5] sm:$0xff] %vm326_vm0, %v720_v26  ;;  %v987_v27 = vpop.f32.mrb[6].mxu0 }
 0x215   : > { %v735_v28 = vadd.f32 %v987_v27, %v626_v22  ;;  %v729_v29 = vpop.f32.mrb[7].mxu0 }
 0x216   : > { %v730_v30 = vadd.f32 %v729_v29, %v626_v22 }
 0x217   : > { %761 = vst.msk [vmem:[%s192_s5 + $0x18] sm:$0xff] %vm326_vm0, %v735_v28 }
 0x218   : > { %760 = vst.msk [vmem:[%s192_s5 + $0x10] sm:$0xff] %vm326_vm0, %v730_v30  ;;  %v990_v31 = vpop.f32.mrb[8].mxu0 }
 0x219   : > { %v745_v32 = vadd.f32 %v990_v31, %v626_v22  ;;  %v739_v33 = vpop.f32.mrb[9].mxu0 }
 0x21a   : > { %v740_v34 = vadd.f32 %v739_v33, %v626_v22 }
 0x21b   : > { %763 = vst.msk [vmem:[%s192_s5 + $0x28] sm:$0xff] %vm326_vm0, %v745_v32 }
 0x21c   : > { %762 = vst.msk [vmem:[%s192_s5 + $0x20] sm:$0xff] %vm326_vm0, %v740_v34  ;;  %v993_v35 = vpop.f32.mrb[10].mxu0 }
 0x21d   : > { %v755_v36 = vadd.f32 %v993_v35, %v626_v22  ;;  %v749_v37 = vpop.f32.mrb[11].mxu0 }
 0x21e   : > { %v750_v38 = vadd.f32 %v749_v37, %v626_v22 }
 0x21f   : > { %765 = vst.msk [vmem:[%s192_s5 + $0x38] sm:$0xff] %vm326_vm0, %v755_v36 }
 0x220   : > { %764 = vst.msk [vmem:[%s192_s5 + $0x30] sm:$0xff] %vm326_vm0, %v750_v38 }
 0x221   : > { %1183 = shalt.err (!%p1180_p3)
}
 0x222   : > { %s1184_s12 = scalar_lea.hbm %s1753_s24, 1024  ;;  %s1188_s15 = scalar_lea.hbm %s1806_s4, 2048 }
 0x223   : > { %p1185_p4 = scmp.ne.s32.totalorder %s1753_s24, %s1184_s12  ;;  %p1189_p9 = scmp.lt.u32.totalorder %s1753_s24, %s1806_s4 }
 0x224   : > { %p1190_p10 = scmp.lt.u32.totalorder %s1188_s15, %s1184_s12  ;;  %p1192_p12 = scmp.lt.u32.totalorder %s1184_s12, %s1753_s24 }
 0x225   : > { %p1186_p7 = pnand %p1185_p4, %p1305_p5 }
 0x226   : > { %p1191_p11 = por %p1190_p10, %p1189_p9 }
 0x227   : > { %p1187_p8 = pneg %p1186_p7 }
 0x228   : > { %p1193_p13 = por %p1192_p12, %p1191_p11 }
 0x22a   : > { %p1194_p0 = pnand %p1193_p13, %p1187_p8 }
 0x22c   : > { %1197 = shalt.err (!%p1194_p0)
}
 0x22d   : > { %s1237_s29 = smov 128   ;;  %s1238_s30 = smov 8  }
 0x22e   : > { %1126 = dma.vmem_to_hbm [thread:$0]  (%p1305_p5), %s1755_s16, 1024, %s1753_s24, %s1761_s3, %s1237_s29, %s1237_s29, %s1238_s30  }
 0x22f PF: > { %p1132_p1 = scmp.ge.s32.totalorder %s1232_s20, 2  ;;  %s795_s5 = sand.u32 1, %s1220_s17  }
 0x230   : > { %s796_s6 = scalar_lea.sflag [#allocation4], %s795_s5 }
 0x231   : > { %p1129_p2 = pnand %p1132_p1, %p1309_p6 }
 0x233   : > { %1215 = dma.done.wait (!%p1129_p2), %s796_s6, 1024  }
 0x234   : > { %1217 = vsyncadd (!%p1129_p2), %s796_s6, 4294966272  ;;  %p16_p3 = scmp.ge.s32.totalorder %s1292_s22, 4   ;;  %s1809_s17 = smov %s1224_s18 }
 0x235   : > { %s1810_s18 = smov %s1228_s19  ;;  %s1811_s19 = smov %s1303_s25 }
 0x236   : > { %s1812_s20 = smov %s1292_s22  ;;  %18 = sbr.rel (!%p16_p3) target bundleno = 6 (0x6), region = 71 }
 0x23d   :  { %801 = vsyncpa [#allocation4], 1 }
 0x23e   :  { %803 = vsyncpa [#allocation4 + $0x1], 1 }

</bundles_post_ra>
